<compile_context>
chip_gen: v7x
topology: tpu7x:2x2x1
jax: 0.10.0
libtpu: 0.0.40
codegen_flags: <defaults>
</compile_context>

<pallas_src>
import jax
import jax.numpy as jnp
from jax import lax
from jax.experimental import pallas as pl
from jax.experimental.pallas import tpu as pltpu


def _round_up(x, m):
    return ((x + m - 1) // m) * m


def _block_b_kernel(x_ref, w1_ref, b1_ref, w2_ref, b2_ref, o_ref, patch_ref):
    # x_ref    : (NB, H+2, W+2, Cp)      zero-padded NHWC batch block (bf16)
    # w1_ref   : (9*Cp, Cmid_p)          conv1 weights in im2col layout (bf16)
    # b1_ref   : (1, Cmid_p)             f32
    # w2_ref   : (Cmid_p, Cout_p)        bf16
    # b2_ref   : (1, Cout_p)             f32
    # o_ref    : (NB*H*W, Cout_p)        lane-dense flat output
    # patch_ref: VMEM (NB*H*W, 9*Cp)     bf16 im2col scratch
    NB, Hp, Wp, Cp = x_ref.shape
    H, W = Hp - 2, Wp - 2
    M = NB * H * W

    # --- im2col: built once, all lane offsets are multiples of 128 ----------
    for dy in range(3):
        for dx in range(3):
            t = dy * 3 + dx
            tap = x_ref[:, dy:dy + H, dx:dx + W, :].reshape(M, Cp)
            patch_ref[:, t * Cp:(t + 1) * Cp] = tap

    # --- conv1 (3x3) as a single fat-K matmul, bf16 in / f32 accumulate -----
    mid = jnp.dot(patch_ref[...], w1_ref[...],
                  preferred_element_type=jnp.float32)
    mid = mid + b1_ref[...]                                    # f32 bias add

    # --- conv2 (1x1) fused as a second matmul --------------------------------
    out = jnp.dot(mid.astype(jnp.bfloat16), w2_ref[...],
                  preferred_element_type=jnp.float32) + b2_ref[...]

    o_ref[...] = out.astype(o_ref.dtype)                       # single store


def block_b_forward(x_nchw, w1, b1, w2, b2, *, batch_block=None):
    """x_nchw: (N, Cin, H, W); w1: (Cmid, Cin, 3, 3); w2: (Cout, Cmid, 1, 1)."""
    N, Cin, H, W = x_nchw.shape
    Cmid = w1.shape[0]
    Cout = w2.shape[0]

    nb = N if batch_block is None else batch_block
    assert N % nb == 0

    LANE = 128
    Cp = _round_up(Cin, LANE)
    Cmid_p = _round_up(Cmid, LANE)
    Cout_p = _round_up(Cout, LANE)

    # NCHW -> NHWC, spatial zero pad of 1 (conv1's padding), lane pad, bf16.
    x_nhwc = jnp.transpose(x_nchw, (0, 2, 3, 1))
    x_pad = jnp.pad(
        x_nhwc, ((0, 0), (1, 1), (1, 1), (0, Cp - Cin))).astype(jnp.bfloat16)

    # conv1 weights (Cmid, Cin, 3, 3) -> im2col layout (9*Cp, Cmid_p), bf16.
    w1_hwio = jnp.transpose(w1, (2, 3, 1, 0))                  # (3,3,Cin,Cmid)
    w1_hwio = jnp.pad(
        w1_hwio, ((0, 0), (0, 0), (0, Cp - Cin), (0, Cmid_p - Cmid)))
    w1_2d = w1_hwio.reshape(9 * Cp, Cmid_p).astype(jnp.bfloat16)
    b1_2d = jnp.pad(b1, (0, Cmid_p - Cmid)).reshape(1, Cmid_p).astype(jnp.float32)

    # conv2 weights (Cout, Cmid, 1, 1) -> (Cmid_p, Cout_p), bf16.
    w2_io = jnp.transpose(w2[:, :, 0, 0], (1, 0))              # (Cmid, Cout)
    w2_io = jnp.pad(
        w2_io, ((0, Cmid_p - Cmid), (0, Cout_p - Cout))).astype(jnp.bfloat16)
    b2_2d = jnp.pad(b2, (0, Cout_p - Cout)).reshape(1, Cout_p).astype(jnp.float32)

    m_blk = nb * H * W

    out_flat = pl.pallas_call(
        _block_b_kernel,
        out_shape=jax.ShapeDtypeStruct((N * H * W, Cout_p), x_nchw.dtype),
        grid_spec=pltpu.PrefetchScalarGridSpec(
            num_scalar_prefetch=0,
            grid=(N // nb,),
            in_specs=[
                pl.BlockSpec((nb, H + 2, W + 2, Cp), lambda n: (n, 0, 0, 0)),
                pl.BlockSpec((9 * Cp, Cmid_p), lambda n: (0, 0)),
                pl.BlockSpec((1, Cmid_p), lambda n: (0, 0)),
                pl.BlockSpec((Cmid_p, Cout_p), lambda n: (0, 0)),
                pl.BlockSpec((1, Cout_p), lambda n: (0, 0)),
            ],
            out_specs=pl.BlockSpec((m_blk, Cout_p), lambda n: (n, 0)),
            scratch_shapes=[pltpu.VMEM((m_blk, 9 * Cp), jnp.bfloat16)],
        ),
        compiler_params=pltpu.CompilerParams(
            dimension_semantics=("parallel",),
            vmem_limit_bytes=32 * 1024 * 1024,
        ),
    )(x_pad, w1_2d, b1_2d, w2_io, b2_2d)

    # (N*H*W, Cout_p) -> NHWC -> slice channel pad -> NCHW (PyTorch layout).
    out_nhwc = out_flat.reshape(N, H, W, Cout_p)[..., :Cout]
    return jnp.transpose(out_nhwc, (0, 3, 1, 2))


def _reference_forward(x_nchw, w1, b1, w2, b2):
    y = lax.conv_general_dilated(
        x_nchw, w1, window_strides=(1, 1), padding=((1, 1), (1, 1)),
        dimension_numbers=("NCHW", "OIHW", "NCHW"))
    y = y + b1.reshape(1, -1, 1, 1)
    z = lax.conv_general_dilated(
        y, w2, window_strides=(1, 1), padding=((0, 0), (0, 0)),
        dimension_numbers=("NCHW", "OIHW", "NCHW"))
    return z + b2.reshape(1, -1, 1, 1)


if __name__ == "__main__":
    # Small shapes: batch=2, in_channels=4, spatial=16x16, out_channels=8.
    N, Cin, H, W = 2, 4, 16, 16
    Cout = 8
    Cmid = Cin * 2

    key = jax.random.PRNGKey(0)
    kx, k1, kb1, k2, kb2 = jax.random.split(key, 5)

    x = jax.random.normal(kx, (N, Cin, H, W), dtype=jnp.float32)
    w1 = jax.random.normal(k1, (Cmid, Cin, 3, 3), dtype=jnp.float32) * 0.1
    b1 = jax.random.normal(kb1, (Cmid,), dtype=jnp.float32) * 0.1
    w2 = jax.random.normal(k2, (Cout, Cmid, 1, 1), dtype=jnp.float32) * 0.1
    b2 = jax.random.normal(kb2, (Cout,), dtype=jnp.float32) * 0.1

    fwd = jax.jit(block_b_forward)
    out = fwd(x, w1, b1, w2, b2)
    out = jax.block_until_ready(out)

    ref = _reference_forward(x, w1, b1, w2, b2)
    assert out.shape == (N, Cout, H, W), out.shape
    # bf16 MXU inputs with f32 accumulation -> compare against the pure-f32
    # reference with a bf16-appropriate tolerance.
    max_err = float(jnp.max(jnp.abs(out - ref)))
    assert jnp.allclose(out, ref, atol=3e-2, rtol=3e-2), max_err

    print("KERNEL_OK")
</pallas_src>

<mosaic_0001>
module attributes {stable_mosaic.version = 11 : i64} {
  func.func @_block_b_kernel(%arg0: i32, %arg1: memref<2x18x18x128xbf16, #tpu.memory_space<vmem>>, %arg2: memref<1152x128xbf16, #tpu.memory_space<vmem>>, %arg3: memref<1x128xf32, #tpu.memory_space<vmem>>, %arg4: memref<128x128xbf16, #tpu.memory_space<vmem>>, %arg5: memref<1x128xf32, #tpu.memory_space<vmem>>, %arg6: memref<512x128xf32, #tpu.memory_space<vmem>>, %arg7: memref<512x1152xbf16, #tpu.memory_space<vmem>>) attributes {dimension_semantics = [#tpu.dimension_semantics<parallel>], iteration_bounds = array<i64: 1>, scalar_prefetch = 0 : i64, scratch_operands = 1 : i64, tpu.core_type = #tpu.core_type<tc>, window_params = [{transform_indices = @transform_0, window_bounds = array<i64: 2, 18, 18, 128>}, {pipeline_mode = #tpu.pipeline_mode<synchronous>, transform_indices = @transform_1, window_bounds = array<i64: 1152, 128>}, {pipeline_mode = #tpu.pipeline_mode<synchronous>, transform_indices = @transform_2, window_bounds = array<i64: 1, 128>}, {pipeline_mode = #tpu.pipeline_mode<synchronous>, transform_indices = @transform_3, window_bounds = array<i64: 128, 128>}, {pipeline_mode = #tpu.pipeline_mode<synchronous>, transform_indices = @transform_4, window_bounds = array<i64: 1, 128>}, {transform_indices = @transform_5, window_bounds = array<i64: 512, 128>}]} {
    %c0 = arith.constant 0 : index
    %c0_0 = arith.constant 0 : index
    %c0_1 = arith.constant 0 : index
    %c0_2 = arith.constant 0 : index
    %0 = vector.load %arg1[%c0, %c0_0, %c0_1, %c0_2] : memref<2x18x18x128xbf16, #tpu.memory_space<vmem>>, vector<2x16x16x128xbf16>
    %1 = vector.shape_cast %0 : vector<2x16x16x128xbf16> to vector<512x128xbf16>
    %c0_3 = arith.constant 0 : index
    %c0_4 = arith.constant 0 : index
    %2 = vector.load %arg7[%c0_3, %c0_4] : memref<512x1152xbf16, #tpu.memory_space<vmem>>, vector<512x128xbf16>
    tpu.vector_store %arg7[%c0_3, %c0_4], %1 {strides = array<i32>} : memref<512x1152xbf16, #tpu.memory_space<vmem>>, vector<512x128xbf16>,
    %c0_5 = arith.constant 0 : index
    %c0_6 = arith.constant 0 : index
    %c1 = arith.constant 1 : index
    %c0_7 = arith.constant 0 : index
    %3 = vector.load %arg1[%c0_5, %c0_6, %c1, %c0_7] : memref<2x18x18x128xbf16, #tpu.memory_space<vmem>>, vector<2x16x16x128xbf16>
    %4 = vector.shape_cast %3 : vector<2x16x16x128xbf16> to vector<512x128xbf16>
    %c0_8 = arith.constant 0 : index
    %c128 = arith.constant 128 : index
    %5 = vector.load %arg7[%c0_8, %c128] : memref<512x1152xbf16, #tpu.memory_space<vmem>>, vector<512x128xbf16>
    tpu.vector_store %arg7[%c0_8, %c128], %4 {strides = array<i32>} : memref<512x1152xbf16, #tpu.memory_space<vmem>>, vector<512x128xbf16>,
    %c0_9 = arith.constant 0 : index
    %c0_10 = arith.constant 0 : index
    %c2 = arith.constant 2 : index
    %c0_11 = arith.constant 0 : index
    %6 = vector.load %arg1[%c0_9, %c0_10, %c2, %c0_11] : memref<2x18x18x128xbf16, #tpu.memory_space<vmem>>, vector<2x16x16x128xbf16>
    %7 = vector.shape_cast %6 : vector<2x16x16x128xbf16> to vector<512x128xbf16>
    %c0_12 = arith.constant 0 : index
    %c256 = arith.constant 256 : index
    %8 = vector.load %arg7[%c0_12, %c256] : memref<512x1152xbf16, #tpu.memory_space<vmem>>, vector<512x128xbf16>
    tpu.vector_store %arg7[%c0_12, %c256], %7 {strides = array<i32>} : memref<512x1152xbf16, #tpu.memory_space<vmem>>, vector<512x128xbf16>,
    %c0_13 = arith.constant 0 : index
    %c1_14 = arith.constant 1 : index
    %c0_15 = arith.constant 0 : index
    %c0_16 = arith.constant 0 : index
    %9 = vector.load %arg1[%c0_13, %c1_14, %c0_15, %c0_16] : memref<2x18x18x128xbf16, #tpu.memory_space<vmem>>, vector<2x16x16x128xbf16>
    %10 = vector.shape_cast %9 : vector<2x16x16x128xbf16> to vector<512x128xbf16>
    %c0_17 = arith.constant 0 : index
    %c384 = arith.constant 384 : index
    %11 = vector.load %arg7[%c0_17, %c384] : memref<512x1152xbf16, #tpu.memory_space<vmem>>, vector<512x128xbf16>
    tpu.vector_store %arg7[%c0_17, %c384], %10 {strides = array<i32>} : memref<512x1152xbf16, #tpu.memory_space<vmem>>, vector<512x128xbf16>,
    %c0_18 = arith.constant 0 : index
    %c1_19 = arith.constant 1 : index
    %c1_20 = arith.constant 1 : index
    %c0_21 = arith.constant 0 : index
    %12 = vector.load %arg1[%c0_18, %c1_19, %c1_20, %c0_21] : memref<2x18x18x128xbf16, #tpu.memory_space<vmem>>, vector<2x16x16x128xbf16>
    %13 = vector.shape_cast %12 : vector<2x16x16x128xbf16> to vector<512x128xbf16>
    %c0_22 = arith.constant 0 : index
    %c512 = arith.constant 512 : index
    %14 = vector.load %arg7[%c0_22, %c512] : memref<512x1152xbf16, #tpu.memory_space<vmem>>, vector<512x128xbf16>
    tpu.vector_store %arg7[%c0_22, %c512], %13 {strides = array<i32>} : memref<512x1152xbf16, #tpu.memory_space<vmem>>, vector<512x128xbf16>,
    %c0_23 = arith.constant 0 : index
    %c1_24 = arith.constant 1 : index
    %c2_25 = arith.constant 2 : index
    %c0_26 = arith.constant 0 : index
    %15 = vector.load %arg1[%c0_23, %c1_24, %c2_25, %c0_26] : memref<2x18x18x128xbf16, #tpu.memory_space<vmem>>, vector<2x16x16x128xbf16>
    %16 = vector.shape_cast %15 : vector<2x16x16x128xbf16> to vector<512x128xbf16>
    %c0_27 = arith.constant 0 : index
    %c640 = arith.constant 640 : index
    %17 = vector.load %arg7[%c0_27, %c640] : memref<512x1152xbf16, #tpu.memory_space<vmem>>, vector<512x128xbf16>
    tpu.vector_store %arg7[%c0_27, %c640], %16 {strides = array<i32>} : memref<512x1152xbf16, #tpu.memory_space<vmem>>, vector<512x128xbf16>,
    %c0_28 = arith.constant 0 : index
    %c2_29 = arith.constant 2 : index
    %c0_30 = arith.constant 0 : index
    %c0_31 = arith.constant 0 : index
    %18 = vector.load %arg1[%c0_28, %c2_29, %c0_30, %c0_31] : memref<2x18x18x128xbf16, #tpu.memory_space<vmem>>, vector<2x16x16x128xbf16>
    %19 = vector.shape_cast %18 : vector<2x16x16x128xbf16> to vector<512x128xbf16>
    %c0_32 = arith.constant 0 : index
    %c768 = arith.constant 768 : index
    %20 = vector.load %arg7[%c0_32, %c768] : memref<512x1152xbf16, #tpu.memory_space<vmem>>, vector<512x128xbf16>
    tpu.vector_store %arg7[%c0_32, %c768], %19 {strides = array<i32>} : memref<512x1152xbf16, #tpu.memory_space<vmem>>, vector<512x128xbf16>,
    %c0_33 = arith.constant 0 : index
    %c2_34 = arith.constant 2 : index
    %c1_35 = arith.constant 1 : index
    %c0_36 = arith.constant 0 : index
    %21 = vector.load %arg1[%c0_33, %c2_34, %c1_35, %c0_36] : memref<2x18x18x128xbf16, #tpu.memory_space<vmem>>, vector<2x16x16x128xbf16>
    %22 = vector.shape_cast %21 : vector<2x16x16x128xbf16> to vector<512x128xbf16>
    %c0_37 = arith.constant 0 : index
    %c896 = arith.constant 896 : index
    %23 = vector.load %arg7[%c0_37, %c896] : memref<512x1152xbf16, #tpu.memory_space<vmem>>, vector<512x128xbf16>
    tpu.vector_store %arg7[%c0_37, %c896], %22 {strides = array<i32>} : memref<512x1152xbf16, #tpu.memory_space<vmem>>, vector<512x128xbf16>,
    %c0_38 = arith.constant 0 : index
    %c2_39 = arith.constant 2 : index
    %c2_40 = arith.constant 2 : index
    %c0_41 = arith.constant 0 : index
    %24 = vector.load %arg1[%c0_38, %c2_39, %c2_40, %c0_41] : memref<2x18x18x128xbf16, #tpu.memory_space<vmem>>, vector<2x16x16x128xbf16>
    %25 = vector.shape_cast %24 : vector<2x16x16x128xbf16> to vector<512x128xbf16>
    %c0_42 = arith.constant 0 : index
    %c1024 = arith.constant 1024 : index
    %26 = vector.load %arg7[%c0_42, %c1024] : memref<512x1152xbf16, #tpu.memory_space<vmem>>, vector<512x128xbf16>
    tpu.vector_store %arg7[%c0_42, %c1024], %25 {strides = array<i32>} : memref<512x1152xbf16, #tpu.memory_space<vmem>>, vector<512x128xbf16>,
    %c0_43 = arith.constant 0 : index
    %c0_44 = arith.constant 0 : index
    %27 = vector.load %arg7[%c0_43, %c0_44] : memref<512x1152xbf16, #tpu.memory_space<vmem>>, vector<512x1152xbf16>
    %c0_45 = arith.constant 0 : index
    %c0_46 = arith.constant 0 : index
    %28 = vector.load %arg2[%c0_45, %c0_46] : memref<1152x128xbf16, #tpu.memory_space<vmem>>, vector<1152x128xbf16>
    %cst = arith.constant dense<0.000000e+00> : vector<512x128xf32>
    %29 = tpu.matmul %27, %28, %cst {dimension_numbers = #tpu.dot_dimension_numbers<[1], [0], [0], [1], [0, 0, 1, 1], [], []>} : vector<512x1152xbf16>, vector<1152x128xbf16>, vector<512x128xf32> -> vector<512x128xf32>
    %c0_47 = arith.constant 0 : index
    %c0_48 = arith.constant 0 : index
    %30 = vector.load %arg3[%c0_47, %c0_48] : memref<1x128xf32, #tpu.memory_space<vmem>>, vector<1x128xf32>
    %31 = vector.broadcast %30 : vector<1x128xf32> to vector<512x128xf32>
    %32 = arith.addf %29, %31 : vector<512x128xf32>
    %33 = arith.truncf %32 : vector<512x128xf32> to vector<512x128xbf16>
    %c0_49 = arith.constant 0 : index
    %c0_50 = arith.constant 0 : index
    %34 = vector.load %arg4[%c0_49, %c0_50] : memref<128x128xbf16, #tpu.memory_space<vmem>>, vector<128x128xbf16>
    %cst_51 = arith.constant dense<0.000000e+00> : vector<512x128xf32>
    %35 = tpu.matmul %33, %34, %cst_51 {dimension_numbers = #tpu.dot_dimension_numbers<[1], [0], [0], [1], [0, 0, 1, 1], [], []>} : vector<512x128xbf16>, vector<128x128xbf16>, vector<512x128xf32> -> vector<512x128xf32>
    %c0_52 = arith.constant 0 : index
    %c0_53 = arith.constant 0 : index
    %36 = vector.load %arg5[%c0_52, %c0_53] : memref<1x128xf32, #tpu.memory_space<vmem>>, vector<1x128xf32>
    %37 = vector.broadcast %36 : vector<1x128xf32> to vector<512x128xf32>
    %38 = arith.addf %35, %37 : vector<512x128xf32>
    %c0_54 = arith.constant 0 : index
    %c0_55 = arith.constant 0 : index
    %39 = vector.load %arg6[%c0_54, %c0_55] : memref<512x128xf32, #tpu.memory_space<vmem>>, vector<512x128xf32>
    tpu.vector_store %arg6[%c0_54, %c0_55], %38 {strides = array<i32>} : memref<512x128xf32, #tpu.memory_space<vmem>>, vector<512x128xf32>,
    return
  }
  func.func @transform_0(%arg0: i32) -> (i32, i32, i32, i32) {
    %c0_i32 = arith.constant 0 : i32
    %c0_i32_0 = arith.constant 0 : i32
    %c0_i32_1 = arith.constant 0 : i32
    %c0_i32_2 = arith.constant 0 : i32
    return %arg0, %c0_i32, %c0_i32_0, %c0_i32_1 : i32, i32, i32, i32
  }
  func.func @transform_1(%arg0: i32) -> (i32, i32) {
    %c0_i32 = arith.constant 0 : i32
    %c0_i32_0 = arith.constant 0 : i32
    %c0_i32_1 = arith.constant 0 : i32
    return %c0_i32, %c0_i32_0 : i32, i32
  }
  func.func @transform_2(%arg0: i32) -> (i32, i32) {
    %c0_i32 = arith.constant 0 : i32
    %c0_i32_0 = arith.constant 0 : i32
    %c0_i32_1 = arith.constant 0 : i32
    return %c0_i32, %c0_i32_0 : i32, i32
  }
  func.func @transform_3(%arg0: i32) -> (i32, i32) {
    %c0_i32 = arith.constant 0 : i32
    %c0_i32_0 = arith.constant 0 : i32
    %c0_i32_1 = arith.constant 0 : i32
    return %c0_i32, %c0_i32_0 : i32, i32
  }
  func.func @transform_4(%arg0: i32) -> (i32, i32) {
    %c0_i32 = arith.constant 0 : i32
    %c0_i32_0 = arith.constant 0 : i32
    %c0_i32_1 = arith.constant 0 : i32
    return %c0_i32, %c0_i32_0 : i32, i32
  }
  func.func @transform_5(%arg0: i32) -> (i32, i32) {
    %c0_i32 = arith.constant 0 : i32
    %c0_i32_0 = arith.constant 0 : i32
    return %arg0, %c0_i32 : i32, i32
  }
}

</mosaic_0001>

<bundles_post_ra>
// kernel: block_b_forward.1
= control target key start
LH: loop header
LB: loop body
LE: loop exit
PB: predicated region body
PF: predicated region fallthrough
CT: control target
= control target key end

     0   :  { %v10281_v0 = vmov 0   ;;  %vm405_vm0 = vsmask.f32 3328  ;;  %vm406_vm1 = vsmask.f32 7440  ;;  %vm1528_vm3 = vcmask 1042432   ;;  %s14834_s1 = inlined_call_operand.vmem [shape: bf16[1152,128], index: 1, kind: input, shape index: {}]   ;;  %s14835_s0 = inlined_call_operand.vmem [shape: bf16[2,18,18,128], index: 0, kind: input, shape index: {}]   ;;  %s14836_s3 = inlined_call_operand.vmem [shape: bf16[128,128], index: 3, kind: input, shape index: {}]   ;;  %s14837_s2 = inlined_call_operand.vmem [shape: f32[1,128], index: 2, kind: input, shape index: {}]   ;;  %s14838_s4 = inlined_call_operand.vmem [shape: f32[1,128], index: 4, kind: input, shape index: {}]   ;;  %s14839_s5 = inlined_call_operand.vmem [shape: f32[512,128], index: 5, kind: output, shape index: {}]  }
   0x1   :  { %6564 = vmatprep.subr.bf16.mxu1 %v10281_v0  ;;  %6853 = vmatprep.subr.bf16.mxu0 %v10281_v0  ;;  %v10104_v1 = vld [vmem:[%s14834_s1] sm:$0xff]   ;;  %v10106_v3 = vld [vmem:[%s14834_s1 + $0x8] sm:$0xff]   ;;  %v10108_v5 = vld [vmem:[%s14834_s1 + $0x10] sm:$0xff]   ;;  %vm1529_vm4 = vcmask 1046532  }
   0x2   :  { %v10320_v2 = vld [vmem:[%s14834_s1 + $0x80] sm:$0xff]   ;;  %6565 = vmatpush1.bf16.msra.mxu1 %v10104_v1  ;;  %v10330_v4 = vld [vmem:[%s14834_s1 + $0x88] sm:$0xff]   ;;  %v10341_v6 = vld [vmem:[%s14834_s1 + $0x90] sm:$0xff]  }
   0x3   :  { %6854 = vmatpush1.bf16.msra.mxu0 %v10320_v2  ;;  %6566 = vmatprep.subr.bf16.mxu1 %v10281_v0  ;;  %v10110_v7 = vld [vmem:[%s14834_s1 + $0x18] sm:$0xff]   ;;  %v10112_v9 = vld [vmem:[%s14834_s1 + $0x20] sm:$0xff]   ;;  %v10114_v11 = vld [vmem:[%s14834_s1 + $0x28] sm:$0xff]  }
   0x4   :  { %6855 = vmatprep.subr.bf16.mxu0 %v10281_v0  ;;  %v10352_v8 = vld [vmem:[%s14834_s1 + $0x98] sm:$0xff]   ;;  %v10363_v10 = vld [vmem:[%s14834_s1 + $0xa0] sm:$0xff]   ;;  %v10374_v12 = vld [vmem:[%s14834_s1 + $0xa8] sm:$0xff]  }
   0x5   :  { %v10116_v13 = vld [vmem:[%s14834_s1 + $0x30] sm:$0xff]   ;;  %v10118_v15 = vld [vmem:[%s14834_s1 + $0x38] sm:$0xff]   ;;  %v10120_v17 = vld [vmem:[%s14834_s1 + $0x40] sm:$0xff]  }
   0x6   :  { %6567 = vmatpush1.bf16.msra.mxu1 %v10106_v3  ;;  %v10385_v14 = vld [vmem:[%s14834_s1 + $0xb0] sm:$0xff]   ;;  %v10396_v16 = vld [vmem:[%s14834_s1 + $0xb8] sm:$0xff]   ;;  %v10407_v18 = vld [vmem:[%s14834_s1 + $0xc0] sm:$0xff]  }
   0x7   :  { %6856 = vmatpush1.bf16.msra.mxu0 %v10330_v4  ;;  %6568 = vmatprep.subr.bf16.mxu1 %v10281_v0  ;;  %v10122_v19 = vld [vmem:[%s14834_s1 + $0x48] sm:$0xff]   ;;  %v309_v20 = vld [vmem:[%s14835_s0] sm:$0xf]  ;;  %v310_v21 = vld [vmem:[%s14835_s0 + $0x4] sm:$0xf] }
   0x8   :  { %6857 = vmatprep.subr.bf16.mxu0 %v10281_v0  ;;  %v311_v22 = vld [vmem:[%s14835_s0 + $0x8] sm:$0x1]  ;;  %v409_v24 = vshrl.u32 %v309_v20, 16  ;;  %v412_v25 = vshll.u32 %v309_v20, 16  ;;  %v418_v26 = vshll.u32 %v310_v21, 16  ;;  %v422_v27 = vshrl.u32 %v310_v21, 16  ;;  %vm10438_vm2 = vmor %vm405_vm0, %vm406_vm1 }
   0x9   :  { %v10425_v23 = vld [vmem:[%s14834_s1 + $0xc8] sm:$0xff]   ;;  %v428_v28 = vshll.u32 %v311_v22, 16  ;;  %v10124_v34 = vld [vmem:[%s14834_s1 + $0x50] sm:$0xff]   ;;  %v10126_v48 = vld [vmem:[%s14834_s1 + $0x58] sm:$0xff]  }
   0xa   :  { %6569 = vmatpush1.bf16.msra.mxu1 %v10108_v5  ;;  %v10136_v29 = vld [vmem:[%s14835_s0 + $0xc] sm:$0xff]   ;;  %v411_v30 = vrot.slane %v409_v24, 4  ;;  %v414_v31 = vrot.slane %v412_v25, 5  ;;  %v420_v32 = vrot.slane %v418_v26, 5  ;;  %v424_v33 = vrot.slane %v422_v27, 4  ;;  %v10466_v51 = vld [vmem:[%s14834_s1 + $0xd8] sm:$0xff]   ;;  %vm10531_vm5 = vmor %vm1528_vm3, %vm1529_vm4 }
   0xb   :  { %6858 = vmatpush1.bf16.msra.mxu0 %v10341_v6  ;;  %6570 = vmatprep.subr.bf16.mxu1 %v10281_v0  ;;  %v430_v37 = vrot.slane %v428_v28, 5  ;;  %v312_v39 = vld [vmem:[%s14835_s0 + $0xc] sm:$0xf]  ;;  %v10450_v40 = vld [vmem:[%s14834_s1 + $0xd0] sm:$0xff]   ;;  %v1337_v53 = vld [vmem:[%s14835_s0 + $0x4] sm:$0xf] }
   0xc   :  { %6859 = vmatprep.subr.bf16.mxu0 %v10281_v0  ;;  %6885 = vmatprep.mubr.bf16.mxu0 %v10136_v29  ;;  %v415_v35 = vor.u32 %v414_v31, %v411_v30  ;;  %v425_v36 = vor.u32 %v424_v33, %v420_v32  ;;  %v313_v43 = vld [vmem:[%s14835_s0 + $0x10] sm:$0xf]  ;;  %v433_v44 = vshrl.u32 %v312_v39, 16  ;;  %v436_v45 = vshll.u32 %v312_v39, 16  ;;  %v314_v54 = vld [vmem:[%s14835_s0 + $0x14] sm:$0x1] }
   0xd   :  { %v442_v46 = vshll.u32 %v313_v43, 16  ;;  %v446_v47 = vshrl.u32 %v313_v43, 16  ;;  %v10128_v57 = vld [vmem:[%s14834_s1 + $0x60] sm:$0xff]   ;;  %v1338_v62 = vld [vmem:[%s14835_s0 + $0x8] sm:$0x1]  ;;  %v1533_v63 = vrot.slane %v1337_v53, 5 }
   0xe   :  { %6571 = vmatpush1.bf16.msra.mxu1 %v10110_v7  ;;  %v416_v41 = vrot.slane %v415_v35, 4  ;;  %v426_v42 = vrot.slane %v425_v36, 4  ;;  %v435_v55 = vrot.slane %v433_v44, 4  ;;  %v438_v56 = vrot.slane %v436_v45, 5  ;;  %v1336_v58 = vld [vmem:[%s14835_s0] sm:$0xe] }
   0xf   :  { %6860 = vmatpush1.bf16.msra.mxu0 %v10352_v8  ;;  %6572 = vmatprep.subr.bf16.mxu1 %v10281_v0  ;;  %v10483_v59 = vrot.slane %v442_v46, 5  ;;  %v448_v60 = vrot.slane %v446_v47, 4  ;;  %v10488_v61 = vld [vmem:[%s14834_s1 + $0xe0] sm:$0xff]   ;;  %v452_v1 = vshll.u32 %v314_v54, 16  ;;  %v315_v3 = vld [vmem:[%s14835_s0 + $0x18] sm:$0xf] }
  0x10   :  { %6861 = vmatprep.subr.bf16.mxu0 %v10281_v0  ;;  %v421_v49 = vsel %vm10438_vm2, %v416_v41, %v420_v32  ;;  %v431_v50 = vsel %vm10438_vm2, %v426_v42, %v430_v37  ;;  %v316_v5 = vld [vmem:[%s14835_s0 + $0x1c] sm:$0xf]  ;;  %v8533_v7 = vrot.slane %v1336_v58, 9  ;;  %v460_v20 = vshll.u32 %v315_v3, 16  ;;  %v10519_v24 = vld [vmem:[%s14834_s1 + $0xe8] sm:$0xff]   ;;  %v10132_v37 = vld [vmem:[%s14834_s1 + $0x70] sm:$0xff]  }
  0x11   :  { %v8501_v52 = vcombine.low %v421_v49, %v431_v50  ;;  %v466_v21 = vshll.u32 %v316_v5, 16  ;;  %v470_v22 = vshrl.u32 %v316_v5, 16  ;;  %v317_v25 = vld [vmem:[%s14835_s0 + $0x20] sm:$0x1]  ;;  %v1535_v26 = vrot.slane %v1533_v63, 4  ;;  %v10555_v44 = vld [vmem:[%s14834_s1 + $0xf0] sm:$0xff]  }
  0x12   :  { %6573 = vmatpush1.bf16.msra.mxu1 %v10112_v9  ;;  %v439_v9 = vor.u32 %v438_v56, %v435_v55  ;;  %v1536_v27 = vrot.slane %v1338_v62, 5  ;;  %v10524_v28 = vrot.slane %v452_v1, 5  ;;  %v10538_v31 = vld [vmem:[%s14835_s0 + $0x14] sm:$0x1]  ;;  %v462_v33 = vrot.slane %v460_v20, 5 }
  0x13   :  { %6862 = vmatpush1.bf16.msra.mxu0 %v10363_v10  ;;  %6574 = vmatprep.subr.bf16.mxu1 %v10281_v0  ;;  %v472_v35 = vrot.slane %v470_v22, 4  ;;  %v10545_v36 = vld [vmem:[%s14835_s0 + $0x1c] sm:$0xf]  ;;  %v476_v43 = vshll.u32 %v317_v25, 16  ;;  %v318_v45 = vld [vmem:[%s14835_s0 + $0x24] sm:$0xf]  ;;  %v10565_v47 = vsel %vm10531_vm5, %v8533_v7, %v1533_v63 }
  0x14   :  { %6863 = vmatprep.subr.bf16.mxu0 %v10281_v0  ;;  %6596 = vmatprep.mubr.bf16.mxu1 %v8501_v52  ;;  %v440_v39 = vrot.slane %v439_v9, 4  ;;  %v319_v46 = vld [vmem:[%s14835_s0 + $0x28] sm:$0xf]  ;;  %v10575_v49 = vld [vmem:[%s14835_s0 + $0x20] sm:$0x1]  ;;  %v1547_v50 = vrot.slane %v10545_v36, 5  ;;  %v1537_v58 = vsel %vm10531_vm5, %v1535_v26, %v1536_v27 }
  0x15   :  { %v481_v52 = vshrl.u32 %v318_v45, 16  ;;  %v320_v55 = vld [vmem:[%s14835_s0 + $0x2c] sm:$0x1]  ;;  %v484_v56 = vshll.u32 %v318_v45, 16  ;;  %v1543_v63 = vrot.slane %v10538_v31, 5  ;;  %v494_v7 = vshrl.u32 %v319_v46, 16 }
  0x16   :  { %6575 = vmatpush1.bf16.msra.mxu1 %v10114_v11  ;;  %v10504_v11 = vld [vmem:[%s14835_s0 + $0xc] sm:$0xe]  ;;  %v10134_v9 = vld [vmem:[%s14834_s1 + $0x78] sm:$0xff]   ;;  %v500_v20 = vshll.u32 %v320_v55, 16  ;;  %v10619_v26 = vrot.slane %v1547_v50, 4  ;;  %v8565_v45 = vcombine.low %v10565_v47, %v1537_v58 }
  0x17   :  { %6864 = vmatpush1.bf16.msra.mxu0 %v10374_v12  ;;  %6576 = vmatprep.subr.bf16.mxu1 %v10281_v0  ;;  %v8534_v29 = vrot.slane %v10504_v11, 9  ;;  %v486_v5 = vrot.slane %v484_v56, 5  ;;  %v321_v31 = vld [vmem:[%s14835_s0 + $0x30] sm:$0xf]  ;;  %v323_v55 = vld [vmem:[%s14835_s0 + $0x38] sm:$0x1] }
  0x18   :  { %6865 = vmatprep.subr.bf16.mxu0 %v10281_v0  ;;  %v10757_v36 = vld [vmem:[%s14835_s0 + $0x40] sm:$0xf]  ;;  %v9155_v30 = vld [vmem:[%s14835_s0 + $0x168] sm:$0xf] }
  0x1a   :  { %6577 = vmatpush1.bf16.msra.mxu1 %v10116_v13  ;;  %v10509_v13 = vld [vmem:[%s14835_s0 + $0x10] sm:$0xf] }
  0x1b   :  { %6866 = vmatpush1.bf16.msra.mxu0 %v10385_v14  ;;  %6578 = vmatprep.subr.bf16.mxu1 %v10281_v0  ;;  %v1540_v42 = vrot.slane %v10509_v13, 5 }
  0x1c   :  { %6867 = vmatprep.subr.bf16.mxu0 %v10281_v0 }
  0x1d   :  { %v1542_v62 = vrot.slane %v1540_v42, 4 }
  0x1e   :  { %6579 = vmatpush1.bf16.msra.mxu1 %v10118_v15  ;;  %v457_v15 = vshrl.u32 %v315_v3, 16  ;;  %v483_v3 = vrot.slane %v481_v52, 4  ;;  %v10649_v52 = vrot.slane %v500_v20, 5 }
  0x1f   :  { %6868 = vmatpush1.bf16.msra.mxu0 %v10396_v16  ;;  %6580 = vmatprep.subr.bf16.mxu1 %v10281_v0  ;;  %v1544_v13 = vsel %vm10531_vm5, %v1542_v62, %v1543_v63  ;;  %v325_v62 = vld [vmem:[%s14835_s0 + $0x40] sm:$0xf] }
  0x20   :  { %6869 = vmatprep.subr.bf16.mxu0 %v10281_v0  ;;  %v459_v32 = vrot.slane %v457_v15, 4  ;;  %v10604_v15 = vrot.slane %v476_v43, 5  ;;  %v505_v43 = vshrl.u32 %v321_v31, 16 }
  0x22   :  { %6581 = vmatpush1.bf16.msra.mxu1 %v10120_v17  ;;  %v10130_v17 = vld [vmem:[%s14834_s1 + $0x68] sm:$0xff]   ;;  %v463_v53 = vor.u32 %v462_v33, %v459_v32  ;;  %v10138_v32 = vld [vmem:[%s14834_s1 + $0x100] sm:$0xff]   ;;  %v10139_v33 = vld [vmem:[%s14835_s0 + $0x18] sm:$0xff]  }
  0x23   :  { %6870 = vmatpush1.bf16.msra.mxu0 %v10407_v18  ;;  %6582 = vmatprep.subr.bf16.mxu1 %v10281_v0 }
  0x24   :  { %6871 = vmatprep.subr.bf16.mxu0 %v10281_v0  ;;  %v10613_v22 = vrot.slane %v463_v53, 4  ;;  %v322_v53 = vld [vmem:[%s14835_s0 + $0x34] sm:$0xf] }
  0x25   :  { %v518_v20 = vshrl.u32 %v322_v53, 16 }
  0x26   :  { %6583 = vmatpush1.bf16.msra.mxu1 %v10122_v19  ;;  %v449_v19 = vor.u32 %v448_v60, %v10483_v59  ;;  %v445_v60 = vsel %vm10438_vm2, %v440_v39, %v10483_v59  ;;  %v10602_v59 = vld [vmem:[%s14834_s1 + $0xf8] sm:$0xff]   ;;  %v10641_v39 = vld [vmem:[%s14835_s0 + $0x28] sm:$0xf] }
  0x27   :  { %6872 = vmatpush1.bf16.msra.mxu0 %v10425_v23  ;;  %6584 = vmatprep.subr.bf16.mxu1 %v10281_v0  ;;  %v14840_v56 = vrot.slane %v10641_v39, 5 }
  0x28   :  { %6873 = vmatprep.subr.bf16.mxu0 %v10281_v0  ;;  %v450_v41 = vrot.slane %v449_v19, 4  ;;  %v1550_v19 = vrot.slane %v10575_v49, 5 }
  0x2a   :  { %6585 = vmatpush1.bf16.msra.mxu1 %v10124_v34  ;;  %v10540_v34 = vrot.slane %v466_v21, 5  ;;  %v455_v1 = vsel %vm10438_vm2, %v450_v41, %v10524_v28  ;;  %v10137_v21 = vld [vmem:[%s14835_s0] sm:$0xff]   ;;  %v10646_v41 = vld [vmem:[%s14835_s0 + $0x2c] sm:$0x1] }
  0x2b   :  { %6874 = vmatpush1.bf16.msra.mxu0 %v10450_v40  ;;  %6586 = vmatprep.subr.bf16.mxu1 %v10281_v0  ;;  %v10627_v28 = vld [vmem:[%s14835_s0 + $0x24] sm:$0xe] }
  0x2c   :  { %6875 = vmatprep.subr.bf16.mxu0 %v10281_v0  ;;  %v473_v54 = vor.u32 %v472_v35, %v10540_v34  ;;  %v487_v35 = vor.u32 %v486_v5, %v483_v3  ;;  %v469_v11 = vsel %vm10438_vm2, %v10613_v22, %v10540_v34  ;;  %v10707_v34 = vrot.slane %v14840_v56, 4  ;;  %v326_v22 = vld [vmem:[%s14835_s0 + $0x44] sm:$0x1] }
  0x2e   :  { %6587 = vmatpush1.bf16.msra.mxu1 %v10126_v48  ;;  %v10570_v48 = vld [vmem:[%s14835_s0 + $0x18] sm:$0xe]  ;;  %v10615_v25 = vrot.slane %v473_v54, 4  ;;  %v508_v54 = vshll.u32 %v321_v31, 16  ;;  %v10678_v31 = vld [vmem:[%s14835_s0 + $0x30] sm:$0xe] }
  0x2f   :  { %6876 = vmatpush1.bf16.msra.mxu0 %v10466_v51  ;;  %6588 = vmatprep.subr.bf16.mxu1 %v10281_v0  ;;  %v8537_v5 = vrot.slane %v10678_v31, 9 }
  0x30   :  { %6877 = vmatprep.subr.bf16.mxu0 %v10281_v0  ;;  %v510_v58 = vrot.slane %v508_v54, 5 }
  0x32   :  { %6589 = vmatpush1.bf16.msra.mxu1 %v10128_v57  ;;  %v490_v57 = vshll.u32 %v319_v46, 16  ;;  %v8502_v46 = vcombine.low %v445_v60, %v455_v1  ;;  %v10141_v60 = vld [vmem:[%s14834_s1 + $0x108] sm:$0xff]   ;;  %v10665_v1 = vrot.slane %v487_v35, 4 }
  0x33   :  { %6878 = vmatpush1.bf16.msra.mxu0 %v10488_v61  ;;  %6590 = vmatprep.subr.bf16.mxu1 %v10281_v0  ;;  %v10140_v35 = vld [vmem:[%s14835_s0 + $0xc] sm:$0xff]  }
  0x34   :  { %6879 = vmatprep.subr.bf16.mxu0 %v10281_v0  ;;  %v10621_v27 = vrot.slane %v490_v57, 5  ;;  %v507_v57 = vrot.slane %v505_v43, 4 }
  0x36   :  { %6591 = vmatpush1.bf16.msra.mxu1 %v10130_v17  ;;  %v8535_v17 = vrot.slane %v10570_v48, 9  ;;  %v511_v63 = vor.u32 %v510_v58, %v507_v57  ;;  %v520_v58 = vrot.slane %v518_v20, 4  ;;  %v10147_v20 = vld [vmem:[%s14834_s1 + $0x118] sm:$0xff]   ;;  %v493_v48 = vsel %vm10438_vm2, %v10665_v1, %v10621_v27  ;;  %v328_v1 = vld [vmem:[%s14835_s0 + $0x4c] sm:$0xf] }
  0x37   :  { %6880 = vmatpush1.bf16.msra.mxu0 %v10519_v24  ;;  %6592 = vmatprep.subr.bf16.mxu1 %v10281_v0 }
  0x38   :  { %6881 = vmatprep.subr.bf16.mxu0 %v10281_v0 }
  0x3a   :  { %6593 = vmatpush1.bf16.msra.mxu1 %v10132_v37  ;;  %v496_v37 = vrot.slane %v494_v7, 4  ;;  %v514_v7 = vshll.u32 %v322_v53, 16  ;;  %v542_v53 = vshrl.u32 %v325_v62, 16 }
  0x3b   :  { %6882 = vmatpush1.bf16.msra.mxu0 %v10555_v44  ;;  %6594 = vmatprep.subr.bf16.mxu1 %v10281_v0 }
  0x3c   :  { %6883 = vmatprep.subr.bf16.mxu0 %v10281_v0  ;;  %v497_v3 = vor.u32 %v496_v37, %v10621_v27  ;;  %v10144_v37 = vld [vmem:[%s14834_s1 + $0x110] sm:$0xff]   ;;  %v10725_v57 = vrot.slane %v514_v7, 5  ;;  %v1551_v7 = vsel %vm10531_vm5, %v10619_v26, %v1550_v19  ;;  %v327_v19 = vld [vmem:[%s14835_s0 + $0x48] sm:$0xf]  ;;  %v10143_v26 = vld [vmem:[%s14835_s0 + $0x18] sm:$0xff]  }
  0x3e   :  { %6595 = vmatpush1.bf16.msra.mxu1 %v10134_v9  ;;  %v1541_v9 = vsel %vm10531_vm5, %v8534_v29, %v1540_v42  ;;  %v479_v29 = vsel %vm10438_vm2, %v10615_v25, %v10604_v15  ;;  %v10696_v42 = vld [vmem:[%s14835_s0 + $0x34] sm:$0xf]  ;;  %v10712_v15 = vld [vmem:[%s14835_s0 + $0x38] sm:$0x1]  ;;  %v498_v43 = vrot.slane %v497_v3, 4  ;;  %v10731_v3 = vrot.slane %v511_v63, 4 }
  0x3f   :  { %6884 = vmatpush1.bf16.msra.mxu0 %v10602_v59  ;;  %9687 = vmatprep.subr.bf16.mxu1 %v10281_v0  ;;  %v8566_v54 = vcombine.low %v1541_v9, %v1544_v13  ;;  %v548_v9 = vshll.u32 %v326_v22, 16  ;;  %v1568_v13 = vrot.slane %v10757_v36, 5 }
  0x40   :  { %7142 = vmatprep.subr.bf16.mxu0 %v10281_v0  ;;  %v503_v49 = vsel %vm10438_vm2, %v498_v43, %v10649_v52  ;;  %v10782_v52 = vld [vmem:[%s14835_s0 + $0x44] sm:$0x1] }
  0x41   :  { %6597 = vmatmul.mubr.bf16.vlgmr.msra.gmra.mrb[0].mxu1 %v10137_v21  ;;  %v524_v21 = vshll.u32 %v323_v55, 16  ;;  %v8503_v55 = vcombine.low %v469_v11, %v479_v29  ;;  %v553_v11 = vshrl.u32 %v327_v19, 16  ;;  %v556_v29 = vshll.u32 %v327_v19, 16  ;;  %v10834_v19 = vld [vmem:[%s14835_s0 + $0x48] sm:$0xe] }
  0x42   :  { %6886 = vmatmul.mubr.bf16.vlgmr.msra.gmra.mrb[0].mxu0 %v8565_v45  ;;  %6604 = vmatprep.mubr.bf16.mxu1 %v8502_v46  ;;  %v538_v46 = vshll.u32 %v325_v62, 16  ;;  %v1564_v62 = vrot.slane %v10712_v15, 5  ;;  %v8504_v63 = vcombine.low %v493_v48, %v503_v49  ;;  %v10800_v43 = vrot.slane %v548_v9, 5  ;;  %v334_v15 = vld [vmem:[%s14835_s0 + $0x64] sm:$0xf] }
  0x43   :  { %7143 = vmatpush1.bf16.msra.mxu0 %v10138_v32  ;;  %6893 = vmatprep.mubr.bf16.mxu0 %v10139_v33  ;;  %v324_v32 = vld [vmem:[%s14835_s0 + $0x3c] sm:$0xf]  ;;  %v10142_v33 = vld [vmem:[%s14835_s0 + $0x24] sm:$0xff]   ;;  %v14845_v48 = vrot.slane %v10641_v39, 5  ;;  %v14846_v49 = vrot.slane %v10627_v28, 9  ;;  %v517_v28 = vsel %vm10438_vm2, %v10731_v3, %v10725_v57 }
  0x44   :  { %7144 = vmatprep.subr.bf16.mxu0 %v10281_v0  ;;  %v529_v25 = vshrl.u32 %v324_v32, 16  ;;  %9703 = vmatpush1.bf16.msra.mxu1 %v10320_v2  ;;  %v532_v45 = vshll.u32 %v324_v32, 16  ;;  %v10727_v2 = vrot.slane %v524_v21, 5  ;;  %v1561_v32 = vrot.slane %v10696_v42, 5 }
  0x45   :  { %9688 = vmatprep.subr.bf16.mxu1 %v10281_v0  ;;  %v10750_v21 = vrot.slane %v538_v46, 5  ;;  %v10150_v46 = vld [vmem:[%s14834_s1 + $0x120] sm:$0xff]  }
  0x46   :  { %v531_v47 = vrot.slane %v529_v25, 4  ;;  %v534_v56 = vrot.slane %v532_v45, 5  ;;  %v10795_v22 = vrot.slane %v1561_v32, 4  ;;  %v566_v25 = vshrl.u32 %v328_v1, 16 }
  0x47   :  { %7145 = vmatpush1.bf16.msra.mxu0 %v10141_v60  ;;  %v1548_v60 = vsel %vm10531_vm5, %v8535_v17, %v1547_v50  ;;  %v521_v50 = vor.u32 %v520_v58, %v10725_v57  ;;  %v10771_v17 = vld [vmem:[%s14835_s0 + $0x3c] sm:$0xe]  ;;  %v10146_v57 = vld [vmem:[%s14835_s0 + $0x24] sm:$0xff]  }
  0x48   :  { %7146 = vmatprep.subr.bf16.mxu0 %v10281_v0  ;;  %9704 = vmatpush1.bf16.msra.mxu1 %v10330_v4  ;;  %v10752_v4 = vrot.slane %v542_v53, 4  ;;  %v535_v27 = vor.u32 %v534_v56, %v531_v47  ;;  %v562_v47 = vshll.u32 %v328_v1, 16  ;;  %v8567_v56 = vcombine.low %v1548_v60, %v1551_v7 }
  0x49   :  { %6605 = vmatmul.mubr.bf16.gmra.mrb[4].mxu1 %v10140_v35  ;;  %9689 = vmatprep.subr.bf16.mxu1 %v10281_v0  ;;  %v329_v35 = vld [vmem:[%s14835_s0 + $0x50] sm:$0x1]  ;;  %v8538_v45 = vrot.slane %v10771_v17, 9  ;;  %v555_v53 = vrot.slane %v553_v11, 4  ;;  %v568_v58 = vrot.slane %v566_v25, 4  ;;  %v10816_v60 = vrot.slane %v1568_v13, 4 }
  0x4a   :  { %6894 = vmatmul.mubr.bf16.gmra.mrb[4].mxu0 %v8566_v54  ;;  %6612 = vmatprep.mubr.bf16.mxu1 %v8503_v55  ;;  %v558_v54 = vrot.slane %v556_v29, 5  ;;  %v10809_v55 = vrot.slane %v562_v47, 5  ;;  %v10812_v9 = vrot.slane %v535_v27, 4  ;;  %v1571_v7 = vrot.slane %v10782_v52, 5  ;;  %v332_v11 = vld [vmem:[%s14835_s0 + $0x5c] sm:$0x1] }
  0x4b   :  { %6901 = vmatprep.mubr.bf16.mxu0 %v10142_v33  ;;  %7147 = vmatpush1.bf16.msra.mxu0 %v10144_v37  ;;  %v522_v33 = vrot.slane %v521_v50, 4  ;;  %v545_v37 = vor.u32 %v10752_v4, %v10750_v21  ;;  %v10822_v4 = vld [vmem:[%s14835_s0 + $0x4c] sm:$0xf]  ;;  %v1555_v50 = vsel %vm10531_vm5, %v14846_v49, %v14845_v48  ;;  %v14847_v27 = vrot.slane %v10646_v41, 5  ;;  %v330_v41 = vld [vmem:[%s14835_s0 + $0x54] sm:$0xf] }
  0x4c   :  { %7148 = vmatprep.subr.bf16.mxu0 %v10281_v0  ;;  %9705 = vmatpush1.bf16.msra.mxu1 %v10341_v6  ;;  %v10145_v6 = vld [vmem:[%s14835_s0 + $0x30] sm:$0xff]   ;;  %v559_v3 = vor.u32 %v558_v54, %v555_v53  ;;  %v569_v1 = vor.u32 %v568_v58, %v10809_v55  ;;  %v577_v29 = vshrl.u32 %v330_v41, 16  ;;  %v541_v31 = vsel %vm10438_vm2, %v10812_v9, %v10750_v21  ;;  %v10936_v21 = vld [vmem:[%s14835_s0 + $0x5c] sm:$0x1]  ;;  %v10996_v17 = vld [vmem:[%s14835_s0 + $0x68] sm:$0x1] }
  0x4d   :  { %9690 = vmatprep.subr.bf16.mxu1 %v10281_v0  ;;  %v527_v39 = vsel %vm10438_vm2, %v522_v33, %v10727_v2  ;;  %v10153_v2 = vld [vmem:[%s14834_s1 + $0x128] sm:$0xff]   ;;  %v546_v47 = vrot.slane %v545_v37, 4  ;;  %v596_v37 = vshll.u32 %v332_v11, 16 }
  0x4e   :  { %v579_v54 = vrot.slane %v577_v29, 4  ;;  %v10881_v49 = vrot.slane %v559_v3, 4  ;;  %v610_v3 = vshll.u32 %v334_v15, 16  ;;  %v10165_v52 = vld [vmem:[%s14834_s1 + $0x148] sm:$0xff]  }
  0x4f   :  { %7149 = vmatpush1.bf16.msra.mxu0 %v10147_v20  ;;  %v572_v20 = vshll.u32 %v329_v35, 16  ;;  %v1575_v35 = vrot.slane %v10822_v4, 5  ;;  %v551_v42 = vsel %vm10438_vm2, %v546_v47, %v10800_v43  ;;  %v10159_v43 = vld [vmem:[%s14834_s1 + $0x138] sm:$0xff]   ;;  %v335_v47 = vld [vmem:[%s14835_s0 + $0x68] sm:$0x1] }
  0x50   :  { %7150 = vmatprep.subr.bf16.mxu0 %v10281_v0  ;;  %9706 = vmatpush1.bf16.msra.mxu1 %v10352_v8  ;;  %v1558_v8 = vsel %vm10531_vm5, %v10707_v34, %v14847_v27  ;;  %v331_v34 = vld [vmem:[%s14835_s0 + $0x58] sm:$0xf]  ;;  %v10156_v27 = vld [vmem:[%s14834_s1 + $0x130] sm:$0xff]   ;;  %v8506_v29 = vcombine.low %v541_v31, %v551_v42  ;;  %v10976_v31 = vld [vmem:[%s14835_s0 + $0x60] sm:$0xe]  ;;  %v1569_v42 = vsel %vm10531_vm5, %v8538_v45, %v1568_v13 }
  0x51   :  { %6613 = vmatmul.mubr.bf16.gmra.mrb[8].mxu1 %v10143_v26  ;;  %9691 = vmatprep.subr.bf16.mxu1 %v10281_v0  ;;  %v10852_v26 = vld [vmem:[%s14835_s0 + $0x50] sm:$0x1]  ;;  %v586_v25 = vshll.u32 %v331_v34, 16  ;;  %v8568_v33 = vcombine.low %v1555_v50, %v1558_v8  ;;  %v590_v48 = vshrl.u32 %v331_v34, 16  ;;  %v10887_v50 = vrot.slane %v1575_v35, 4 }
  0x52   :  { %6902 = vmatmul.mubr.bf16.gmra.mrb[8].mxu0 %v8567_v56  ;;  %6620 = vmatprep.mubr.bf16.mxu1 %v8504_v63  ;;  %v10872_v56 = vrot.slane %v572_v20, 5  ;;  %v580_v63 = vshll.u32 %v330_v41, 16  ;;  %v1578_v53 = vrot.slane %v10852_v26, 5  ;;  %v10148_v20 = vld [vmem:[%s14835_s0 + $0x3c] sm:$0xff]   ;;  %v10909_v41 = vld [vmem:[%s14835_s0 + $0x58] sm:$0xf] }
  0x53   :  { %6909 = vmatprep.mubr.bf16.mxu0 %v10145_v6  ;;  %7151 = vmatpush1.bf16.msra.mxu0 %v10150_v46  ;;  %v8505_v6 = vcombine.low %v517_v28, %v527_v39  ;;  %v8539_v46 = vrot.slane %v10834_v19, 9  ;;  %v10892_v8 = vrot.slane %v586_v25, 5  ;;  %v1562_v28 = vsel %vm10531_vm5, %v8537_v5, %v1561_v32  ;;  %v10904_v39 = vld [vmem:[%s14835_s0 + $0x54] sm:$0xe]  ;;  %v338_v45 = vld [vmem:[%s14835_s0 + $0x74] sm:$0x1] }
  0x54   :  { %7152 = vmatprep.subr.bf16.mxu0 %v10281_v0  ;;  %9707 = vmatpush1.bf16.msra.mxu1 %v10363_v10  ;;  %v582_v58 = vrot.slane %v580_v63, 5  ;;  %v10883_v10 = vrot.slane %v569_v1, 4  ;;  %v1565_v5 = vsel %vm10531_vm5, %v10795_v22, %v1564_v62  ;;  %v592_v62 = vrot.slane %v590_v48, 4  ;;  %v10149_v34 = vld [vmem:[%s14835_s0 + $0x30] sm:$0xff]   ;;  %v10151_v63 = vld [vmem:[%s14835_s0 + $0x48] sm:$0xff]  }
  0x55   :  { %9692 = vmatprep.subr.bf16.mxu1 %v10281_v0  ;;  %v10931_v22 = vrot.slane %v596_v37, 5  ;;  %v614_v1 = vshrl.u32 %v334_v15, 16  ;;  %v8569_v11 = vcombine.low %v1562_v28, %v1565_v5  ;;  %v8540_v25 = vrot.slane %v10904_v39, 9  ;;  %v337_v15 = vld [vmem:[%s14835_s0 + $0x70] sm:$0xf] }
  0x56   :  { %v583_v32 = vor.u32 %v582_v58, %v579_v54  ;;  %v10954_v54 = vrot.slane %v610_v3, 5  ;;  %v593_v48 = vor.u32 %v592_v62, %v10892_v8  ;;  %v1585_v37 = vrot.slane %v10936_v21, 5  ;;  %v11073_v4 = vld [vmem:[%s14835_s0 + $0x74] sm:$0x1] }
  0x57   :  { %7153 = vmatpush1.bf16.msra.mxu0 %v10153_v2  ;;  %v620_v5 = vshll.u32 %v335_v47, 16  ;;  %v1572_v3 = vsel %vm10531_vm5, %v10816_v60, %v1571_v7  ;;  %v8541_v47 = vrot.slane %v10976_v31, 9  ;;  %v1599_v26 = vrot.slane %v11073_v4, 5 }
  0x58   :  { %7154 = vmatprep.subr.bf16.mxu0 %v10281_v0  ;;  %9708 = vmatpush1.bf16.msra.mxu1 %v10374_v12  ;;  %v333_v12 = vld [vmem:[%s14835_s0 + $0x60] sm:$0xf]  ;;  %v10957_v58 = vrot.slane %v583_v32, 4 }
  0x59   :  { %6621 = vmatmul.mubr.bf16.gmra.mrb[12].mxu1 %v10146_v57  ;;  %9693 = vmatprep.subr.bf16.mxu1 %v10281_v0  ;;  %v601_v9 = vshrl.u32 %v333_v12, 16  ;;  %v1582_v57 = vrot.slane %v10909_v41, 5  ;;  %v604_v2 = vshll.u32 %v333_v12, 16  ;;  %v336_v12 = vld [vmem:[%s14835_s0 + $0x6c] sm:$0xf] }
  0x5a   :  { %6910 = vmatmul.mubr.bf16.gmra.mrb[12].mxu0 %v8568_v33  ;;  %6628 = vmatprep.mubr.bf16.mxu1 %v8505_v6  ;;  %v625_v62 = vshrl.u32 %v336_v12, 16  ;;  %v11146_v41 = vld [vmem:[%s14835_s0 + $0x80] sm:$0x1] }
  0x5b   :  { %6917 = vmatprep.mubr.bf16.mxu0 %v10148_v20  ;;  %7155 = vmatpush1.bf16.msra.mxu0 %v10156_v27  ;;  %v603_v33 = vrot.slane %v601_v9, 4  ;;  %v606_v6 = vrot.slane %v604_v2, 5  ;;  %v616_v20 = vrot.slane %v614_v1, 4  ;;  %v10162_v27 = vld [vmem:[%s14834_s1 + $0x140] sm:$0xff]   ;;  %v10971_v28 = vrot.slane %v1582_v57, 4 }
  0x5c   :  { %7156 = vmatprep.subr.bf16.mxu0 %v10281_v0  ;;  %9709 = vmatpush1.bf16.msra.mxu1 %v10385_v14  ;;  %v10964_v14 = vld [vmem:[%s14835_s0 + $0x64] sm:$0xf]  ;;  %v634_v9 = vshll.u32 %v337_v15, 16  ;;  %v10152_v2 = vld [vmem:[%s14835_s0 + $0x3c] sm:$0xff]   ;;  %v565_v1 = vsel %vm10438_vm2, %v10881_v49, %v10809_v55  ;;  %v627_v60 = vrot.slane %v625_v62, 4  ;;  %v10154_v55 = vld [vmem:[%s14835_s0 + $0x54] sm:$0xff]  }
  0x5d   :  { %9694 = vmatprep.subr.bf16.mxu1 %v10281_v0  ;;  %v607_v32 = vor.u32 %v606_v6, %v603_v33  ;;  %v617_v36 = vor.u32 %v616_v20, %v10954_v54  ;;  %v1589_v13 = vrot.slane %v10964_v14, 5  ;;  %v1592_v33 = vrot.slane %v10996_v17, 5  ;;  %v11044_v6 = vld [vmem:[%s14835_s0 + $0x70] sm:$0xf] }
  0x5e   :  { %v11047_v20 = vrot.slane %v634_v9, 5  ;;  %v1596_v19 = vrot.slane %v11044_v6, 5  ;;  %v1579_v9 = vsel %vm10531_vm5, %v10887_v50, %v1578_v53  ;;  %v10155_v50 = vld [vmem:[%s14835_s0 + $0x48] sm:$0xff]   ;;  %v1606_v21 = vrot.slane %v11146_v41, 5  ;;  %v345_v14 = vld [vmem:[%s14835_s0 + $0x90] sm:$0xf] }
  0x5f   :  { %7157 = vmatpush1.bf16.msra.mxu0 %v10159_v43  ;;  %v628_v43 = vshll.u32 %v336_v12, 16  ;;  %v11034_v49 = vrot.slane %v617_v36, 4  ;;  %v11060_v12 = vsel %vm10531_vm5, %v8539_v46, %v1575_v35  ;;  %v347_v6 = vld [vmem:[%s14835_s0 + $0x98] sm:$0x1] }
  0x60   :  { %7158 = vmatprep.subr.bf16.mxu0 %v10281_v0  ;;  %9710 = vmatpush1.bf16.msra.mxu1 %v10396_v16  ;;  %v11003_v16 = vrot.slane %v593_v48, 4 }
  0x61   :  { %6629 = vmatmul.mubr.bf16.gmra.mrb[16].mxu1 %v10149_v34  ;;  %9695 = vmatprep.subr.bf16.mxu1 %v10281_v0  ;;  %v638_v34 = vshrl.u32 %v337_v15, 16  ;;  %v630_v7 = vrot.slane %v628_v43, 5  ;;  %v340_v15 = vld [vmem:[%s14835_s0 + $0x7c] sm:$0xf] }
  0x62   :  { %6918 = vmatmul.mubr.bf16.gmra.mrb[16].mxu0 %v8569_v11  ;;  %6636 = vmatprep.mubr.bf16.mxu1 %v8506_v29  ;;  %v575_v11 = vsel %vm10438_vm2, %v10883_v10, %v10872_v56  ;;  %v11021_v29 = vrot.slane %v620_v5, 5  ;;  %v11032_v56 = vrot.slane %v607_v32, 4  ;;  %v11038_v10 = vrot.slane %v1589_v13, 4  ;;  %v11052_v5 = vld [vmem:[%s14835_s0 + $0x6c] sm:$0xe] }
  0x63   :  { %6925 = vmatprep.mubr.bf16.mxu0 %v10151_v63  ;;  %7159 = vmatpush1.bf16.msra.mxu0 %v10162_v27  ;;  %v644_v63 = vshll.u32 %v338_v45, 16  ;;  %v8507_v48 = vcombine.low %v565_v1, %v575_v11  ;;  %v640_v27 = vrot.slane %v638_v34, 4  ;;  %v631_v32 = vor.u32 %v630_v7, %v627_v60  ;;  %v11112_v11 = vld [vmem:[%s14835_s0 + $0x7c] sm:$0xf]  ;;  %v11121_v7 = vld [vmem:[%s14835_s0 + $0x78] sm:$0xe] }
  0x64   :  { %7160 = vmatprep.subr.bf16.mxu0 %v10281_v0  ;;  %9711 = vmatpush1.bf16.msra.mxu1 %v10407_v18  ;;  %v8570_v18 = vcombine.low %v1569_v42, %v1572_v3  ;;  %v339_v42 = vld [vmem:[%s14835_s0 + $0x78] sm:$0xf]  ;;  %v8542_v46 = vrot.slane %v11052_v5, 9  ;;  %v658_v62 = vshll.u32 %v340_v15, 16  ;;  %v662_v43 = vshrl.u32 %v340_v15, 16 }
  0x65   :  { %9696 = vmatprep.subr.bf16.mxu1 %v10281_v0  ;;  %v11068_v36 = vrot.slane %v644_v63, 5  ;;  %v649_v35 = vshrl.u32 %v339_v42, 16  ;;  %v652_v45 = vshll.u32 %v339_v42, 16  ;;  %v599_v34 = vsel %vm10438_vm2, %v11003_v16, %v10931_v22  ;;  %v10168_v63 = vld [vmem:[%s14834_s1 + $0x150] sm:$0xff]  }
  0x66   :  { %v11097_v53 = vrot.slane %v658_v62, 5  ;;  %v11107_v22 = vrot.slane %v1596_v19, 4  ;;  %v664_v16 = vrot.slane %v662_v43, 4  ;;  %v1603_v39 = vrot.slane %v11112_v11, 5 }
  0x67   :  { %7161 = vmatpush1.bf16.msra.mxu0 %v10165_v52  ;;  %v651_v3 = vrot.slane %v649_v35, 4  ;;  %v654_v1 = vrot.slane %v652_v45, 5  ;;  %v10157_v52 = vld [vmem:[%s14835_s0 + $0x60] sm:$0xff]   ;;  %v1586_v62 = vsel %vm10531_vm5, %v10971_v28, %v1585_v37  ;;  %v613_v43 = vsel %vm10438_vm2, %v11032_v56, %v10954_v54  ;;  %v10171_v54 = vld [vmem:[%s14834_s1 + $0x158] sm:$0xff]  }
  0x68   :  { %7162 = vmatprep.subr.bf16.mxu0 %v10281_v0  ;;  %9712 = vmatpush1.bf16.msra.mxu1 %v10425_v23  ;;  %v589_v23 = vsel %vm10438_vm2, %v10957_v58, %v10892_v8  ;;  %v11102_v8 = vrot.slane %v631_v32, 4  ;;  %v641_v58 = vor.u32 %v640_v27, %v11047_v20  ;;  %v343_v27 = vld [vmem:[%s14835_s0 + $0x88] sm:$0xf]  ;;  %v10158_v56 = vld [vmem:[%s14835_s0 + $0x54] sm:$0xff]   ;;  %v697_v5 = vshrl.u32 %v345_v14, 16 }
  0x69   :  { %6637 = vmatmul.mubr.bf16.gmra.mrb[20].mxu1 %v10152_v2  ;;  %9697 = vmatprep.subr.bf16.mxu1 %v10281_v0  ;;  %v341_v2 = vld [vmem:[%s14835_s0 + $0x80] sm:$0x1]  ;;  %v655_v42 = vor.u32 %v654_v1, %v651_v3  ;;  %v682_v35 = vshll.u32 %v343_v27, 16  ;;  %v686_v45 = vshrl.u32 %v343_v27, 16 }
  0x6a   :  { %6926 = vmatmul.mubr.bf16.gmra.mrb[20].mxu0 %v8570_v18  ;;  %6644 = vmatprep.mubr.bf16.mxu1 %v8507_v48  ;;  %v668_v60 = vshll.u32 %v341_v2, 16  ;;  %v8508_v18 = vcombine.low %v589_v23, %v599_v34  ;;  %v342_v48 = vld [vmem:[%s14835_s0 + $0x84] sm:$0xf]  ;;  %v11152_v15 = vrot.slane %v641_v58, 4  ;;  %v8543_v23 = vrot.slane %v11121_v7, 9 }
  0x6b   :  { %6933 = vmatprep.mubr.bf16.mxu0 %v10154_v55  ;;  %v8571_v55 = vcombine.low %v11060_v12, %v1579_v9  ;;  %v665_v12 = vor.u32 %v664_v16, %v11097_v53  ;;  %7163 = vmatpush1.bf16.msra.mxu0 %v10168_v63  ;;  %v676_v32 = vshll.u32 %v342_v48, 16  ;;  %v11180_v34 = vrot.slane %v655_v42, 4  ;;  %v10160_v16 = vld [vmem:[%s14835_s0 + $0x6c] sm:$0xff]  }
  0x6c   :  { %9713 = vmatpush1.bf16.msra.mxu1 %v10450_v40  ;;  %v11134_v40 = vsel %vm10531_vm5, %v8540_v25, %v1582_v57  ;;  %v344_v57 = vld [vmem:[%s14835_s0 + $0x8c] sm:$0x1]  ;;  %v673_v25 = vshrl.u32 %v342_v48, 16  ;;  %7164 = vmatprep.subr.bf16.mxu0 %v10281_v0  ;;  %v11165_v9 = vrot.slane %v668_v60, 5  ;;  %v11188_v3 = vrot.slane %v682_v35, 5 }
  0x6d   :  { %9698 = vmatprep.subr.bf16.mxu1 %v10281_v0  ;;  %v678_v28 = vrot.slane %v676_v32, 5  ;;  %v11182_v2 = vrot.slane %v665_v12, 4  ;;  %v688_v1 = vrot.slane %v686_v45, 4  ;;  %v8572_v58 = vcombine.low %v11134_v40, %v1586_v62  ;;  %v11218_v60 = vld [vmem:[%s14835_s0 + $0x84] sm:$0xe] }
  0x6e   :  { %v675_v37 = vrot.slane %v673_v25, 4  ;;  %v637_v17 = vsel %vm10438_vm2, %v11102_v8, %v11047_v20  ;;  %v700_v8 = vshll.u32 %v345_v14, 16  ;;  %v647_v40 = vsel %vm10438_vm2, %v11152_v15, %v11068_v36  ;;  %v11275_v36 = vld [vmem:[%s14835_s0 + $0x90] sm:$0xe]  ;;  %v11289_v45 = vld [vmem:[%s14835_s0 + $0x94] sm:$0xf] }
  0x6f   :  { %7165 = vmatpush1.bf16.msra.mxu0 %v10171_v54  ;;  %v689_v63 = vor.u32 %v688_v1, %v11188_v3  ;;  %v699_v4 = vrot.slane %v697_v5, 4  ;;  %v11294_v62 = vld [vmem:[%s14835_s0 + $0x98] sm:$0x1]  ;;  %v8510_v54 = vcombine.low %v637_v17, %v647_v40  ;;  %v671_v1 = vsel %vm10438_vm2, %v11182_v2, %v11165_v9  ;;  %v350_v2 = vld [vmem:[%s14835_s0 + $0xa4] sm:$0x1] }
  0x70   :  { %9714 = vmatpush1.bf16.msra.mxu1 %v10466_v51  ;;  %v623_v51 = vsel %vm10438_vm2, %v11034_v49, %v11021_v29  ;;  %v11186_v29 = vrot.slane %v1603_v39, 4  ;;  %v692_v49 = vshll.u32 %v344_v57, 16  ;;  %7166 = vmatprep.subr.bf16.mxu0 %v10281_v0  ;;  %v702_v27 = vrot.slane %v700_v8, 5  ;;  %v10161_v57 = vld [vmem:[%s14835_s0 + $0x60] sm:$0xff]   ;;  %v10164_v8 = vld [vmem:[%s14835_s0 + $0x6c] sm:$0xff]  }
  0x71   :  { %6645 = vmatmul.mubr.bf16.gmra.mrb[24].mxu1 %v10155_v50  ;;  %9699 = vmatprep.subr.bf16.mxu1 %v10281_v0  ;;  %v11193_v50 = vld [vmem:[%s14835_s0 + $0x88] sm:$0xf]  ;;  %v8509_v31 = vcombine.low %v613_v43, %v623_v51  ;;  %v11298_v51 = vrot.slane %v689_v63, 4  ;;  %v1617_v9 = vrot.slane %v11289_v45, 5  ;;  %v1377_v5 = vld [vmem:[%s14835_s0 + $0xa4] sm:$0x1] }
  0x72   :  { %6934 = vmatmul.mubr.bf16.gmra.mrb[24].mxu0 %v8571_v55  ;;  %6652 = vmatprep.mubr.bf16.mxu1 %v8508_v18  ;;  %v1610_v20 = vrot.slane %v11193_v50, 5  ;;  %v716_v18 = vshll.u32 %v347_v6, 16  ;;  %v11262_v48 = vrot.slane %v692_v49, 5  ;;  %v703_v35 = vor.u32 %v702_v27, %v699_v4 }
  0x73   :  { %6941 = vmatprep.mubr.bf16.mxu0 %v10157_v52  ;;  %v11206_v52 = vsel %vm10531_vm5, %v8541_v47, %v1589_v13  ;;  %v11235_v13 = vsel %vm10531_vm5, %v8542_v46, %v1596_v19  ;;  %v679_v47 = vor.u32 %v678_v28, %v675_v37  ;;  %v11254_v46 = vsel %vm10531_vm5, %v11107_v22, %v1599_v26  ;;  %v10174_v26 = vld [vmem:[%s14834_s1 + $0x160] sm:$0xff]  }
  0x74   :  { %9715 = vmatpush1.bf16.msra.mxu1 %v10488_v61  ;;  %v11213_v61 = vsel %vm10531_vm5, %v11038_v10, %v1592_v33  ;;  %v11240_v10 = vld [vmem:[%s14835_s0 + $0x8c] sm:$0x1]  ;;  %v346_v33 = vld [vmem:[%s14835_s0 + $0x94] sm:$0xf]  ;;  %v1612_v32 = vrot.slane %v1610_v20, 4  ;;  %7167 = vmatpush1.bf16.msra.mxu0 %v10174_v26  ;;  %v8574_v43 = vcombine.low %v11235_v13, %v11254_v46  ;;  %v11301_v28 = vrot.slane %v716_v18, 5 }
  0x75   :  { %9700 = vmatprep.subr.bf16.mxu1 %v10281_v0  ;;  %v706_v19 = vshll.u32 %v346_v33, 16  ;;  %v710_v55 = vshrl.u32 %v346_v33, 16  ;;  %v1613_v22 = vrot.slane %v11240_v10, 5  ;;  %v8573_v25 = vcombine.low %v11206_v52, %v11213_v61  ;;  %7168 = vmatprep.subr.bf16.mxu0 %v10281_v0  ;;  %v10177_v52 = vld [vmem:[%s14834_s1 + $0x168] sm:$0xff]   ;;  %v10180_v18 = vld [vmem:[%s14834_s1 + $0x170] sm:$0xff]  }
  0x76   :  { %v11282_v15 = vrot.slane %v679_v47, 4  ;;  %v661_v49 = vsel %vm10438_vm2, %v11180_v34, %v11097_v53  ;;  %v11327_v53 = vrot.slane %v703_v35, 4  ;;  %v1620_v34 = vrot.slane %v11294_v62, 5 }
  0x77   :  { %v11270_v42 = vrot.slane %v706_v19, 5  ;;  %v712_v12 = vrot.slane %v710_v55, 4  ;;  %v11340_v47 = vsel %vm10531_vm5, %v8543_v23, %v1603_v39  ;;  %v11347_v10 = vsel %vm10531_vm5, %v11186_v29, %v1606_v21  ;;  %v1375_v23 = vld [vmem:[%s14835_s0 + $0x9c] sm:$0xe] }
  0x78   :  { %9716 = vmatpush1.bf16.msra.mxu1 %v10519_v24  ;;  %v8544_v24 = vrot.slane %v11218_v60, 9  ;;  %7169 = vmatpush1.bf16.msra.mxu0 %v10177_v52  ;;  %v740_v6 = vshll.u32 %v350_v2, 16  ;;  %v8511_v11 = vcombine.low %v661_v49, %v671_v1  ;;  %v11368_v21 = vsel %vm10531_vm5, %v1612_v32, %v1613_v22  ;;  %v352_v22 = vld [vmem:[%s14835_s0 + $0xac] sm:$0xf]  ;;  %v1378_v52 = vld [vmem:[%s14835_s0 + $0xa8] sm:$0xe] }
  0x79   :  { %6653 = vmatmul.mubr.bf16.gmra.mrb[28].mxu1 %v10158_v56  ;;  %9701 = vmatprep.subr.bf16.mxu1 %v10281_v0  ;;  %v713_v37 = vor.u32 %v712_v12, %v11270_v42  ;;  %v10163_v56 = vld [vmem:[%s14835_s0 + $0x78] sm:$0xff]   ;;  %v1619_v29 = vrot.slane %v1617_v9, 4  ;;  %v8546_v63 = vrot.slane %v1375_v23, 9  ;;  %v695_v40 = vsel %vm10438_vm2, %v11298_v51, %v11262_v48  ;;  %v10166_v48 = vld [vmem:[%s14835_s0 + $0x84] sm:$0xff]  }
  0x7a   :  { %6942 = vmatmul.mubr.bf16.gmra.mrb[28].mxu0 %v8572_v58  ;;  %6660 = vmatprep.mubr.bf16.mxu1 %v8509_v31  ;;  %v8545_v58 = vrot.slane %v11275_v36, 9  ;;  %v11355_v7 = vsel %vm10531_vm5, %v8544_v24, %v1610_v20  ;;  %v1376_v20 = vld [vmem:[%s14835_s0 + $0xa0] sm:$0xf]  ;;  %v11379_v19 = vrot.slane %v740_v6, 5  ;;  %v709_v4 = vsel %vm10438_vm2, %v11327_v53, %v11270_v42  ;;  %v351_v24 = vld [vmem:[%s14835_s0 + $0xa8] sm:$0xf] }
  0x7b   :  { %6949 = vmatprep.mubr.bf16.mxu0 %v10160_v16  ;;  %v349_v16 = vld [vmem:[%s14835_s0 + $0xa0] sm:$0xf]  ;;  %v714_v60 = vrot.slane %v713_v37, 4  ;;  %7170 = vmatprep.subr.bf16.mxu0 %v10281_v0  ;;  %v1624_v55 = vrot.slane %v1376_v20, 5  ;;  %v748_v35 = vshll.u32 %v351_v24, 16  ;;  %v754_v45 = vshll.u32 %v352_v22, 16 }
  0x7c   :  { %9717 = vmatpush1.bf16.msra.mxu1 %v10555_v44  ;;  %v348_v44 = vld [vmem:[%s14835_s0 + $0x9c] sm:$0xf]  ;;  %v730_v31 = vshll.u32 %v349_v16, 16  ;;  %v734_v17 = vshrl.u32 %v349_v16, 16  ;;  %7171 = vmatpush1.bf16.msra.mxu0 %v10180_v18  ;;  %v758_v51 = vshrl.u32 %v352_v22, 16  ;;  %v8575_v37 = vcombine.low %v11340_v47, %v11347_v10 }
  0x7d   :  { %9702 = vmatprep.subr.bf16.mxu1 %v10281_v0  ;;  %v721_v61 = vshrl.u32 %v348_v44, 16  ;;  %v724_v14 = vshll.u32 %v348_v44, 16  ;;  %v719_v27 = vsel %vm10438_vm2, %v714_v60, %v11301_v28  ;;  %v1626_v42 = vrot.slane %v1624_v55, 4  ;;  %7172 = vmatprep.subr.bf16.mxu0 %v10281_v0  ;;  %v355_v10 = vld [vmem:[%s14835_s0 + $0xb8] sm:$0xf] }
  0x7e   :  { %v11357_v39 = vrot.slane %v730_v31, 5  ;;  %v736_v50 = vrot.slane %v734_v17, 4  ;;  %v8576_v28 = vcombine.low %v11355_v7, %v11368_v21  ;;  %v11419_v1 = vsel %vm10531_vm5, %v8545_v58, %v1617_v9  ;;  %v1379_v58 = vld [vmem:[%s14835_s0 + $0xac] sm:$0xf]  ;;  %v1380_v9 = vld [vmem:[%s14835_s0 + $0xb0] sm:$0x1] }
  0x7f   :  { %v723_v33 = vrot.slane %v721_v61, 4  ;;  %v726_v41 = vrot.slane %v724_v14, 5  ;;  %v750_v44 = vrot.slane %v748_v35, 5  ;;  %v11421_v16 = vrot.slane %v754_v45, 5  ;;  %v10167_v31 = vld [vmem:[%s14835_s0 + $0x78] sm:$0xff]  }
  0x80   :  { %9718 = vmatpush1.bf16.msra.mxu1 %v10602_v59  ;;  %v685_v59 = vsel %vm10438_vm2, %v11282_v15, %v11188_v3  ;;  %v737_v26 = vor.u32 %v736_v50, %v11357_v39  ;;  %v745_v15 = vshrl.u32 %v351_v24, 16  ;;  %v11426_v53 = vcombine.low %v709_v4, %v719_v27  ;;  %v10183_v23 = vld [vmem:[%s14834_s1 + $0x178] sm:$0xff]   ;;  %v1381_v27 = vld [vmem:[%s14835_s0 + $0xb4] sm:$0xe]  ;;  %v360_v7 = vld [vmem:[%s14835_s0 + $0xe4] sm:$0xf] }
  0x81   :  { %6661 = vmatmul.mubr.bf16.gmra.mrb[32].mxu1 %v10161_v57  ;;  %v727_v3 = vor.u32 %v726_v41, %v723_v33  ;;  %v1627_v57 = vrot.slane %v1377_v5, 5  ;;  %v8512_v49 = vcombine.low %v685_v59, %v695_v40  ;;  %v11432_v2 = vsel %vm10531_vm5, %v1619_v29, %v1620_v34  ;;  %v356_v41 = vld [vmem:[%s14835_s0 + $0xbc] sm:$0x1]  ;;  %v10169_v59 = vld [vmem:[%s14835_s0 + $0x90] sm:$0xff]   ;;  %7173 = vmatpush1.bf16.msra.mxu0 %v10183_v23 }
  0x82   :  { %6950 = vmatmul.mubr.bf16.gmra.mrb[32].mxu0 %v8573_v25  ;;  %6668 = vmatprep.mubr.bf16.mxu1 %v8510_v54  ;;  %v353_v25 = vld [vmem:[%s14835_s0 + $0xb0] sm:$0x1]  ;;  %v738_v32 = vrot.slane %v737_v26, 4  ;;  %v747_v54 = vrot.slane %v745_v15, 4  ;;  %v760_v36 = vrot.slane %v758_v51, 4  ;;  %v8547_v60 = vrot.slane %v1378_v52, 9 }
  0x83   :  { %6957 = vmatprep.mubr.bf16.mxu0 %v10163_v56  ;;  %v11405_v12 = vrot.slane %v727_v3, 4  ;;  %v764_v56 = vshll.u32 %v353_v25, 16  ;;  %v1631_v34 = vrot.slane %v1379_v58, 5  ;;  %v1634_v14 = vrot.slane %v1380_v9, 5  ;;  %7431 = vmatprep.subr.bf16.mxu0 %v10281_v0  ;;  %v359_v52 = vld [vmem:[%s14835_s0 + $0xe0] sm:$0x1] }
  0x84   :  { %v751_v62 = vor.u32 %v750_v44, %v747_v54  ;;  %v11454_v47 = vsel %vm10531_vm5, %v8546_v63, %v1624_v55  ;;  %v11458_v13 = vsel %vm10531_vm5, %v1626_v42, %v1627_v57  ;;  %v761_v46 = vor.u32 %v760_v36, %v11421_v16  ;;  %v1383_v42 = vld [vmem:[%s14835_s0 + $0xbc] sm:$0x1]  ;;  %v357_v54 = vld [vmem:[%s14835_s0 + $0xd8] sm:$0xf] }
  0x85   :  { %v11434_v61 = vrot.slane %v764_v56, 5  ;;  %v733_v17 = vsel %vm10438_vm2, %v11405_v12, %v11357_v39  ;;  %v743_v33 = vsel %vm10438_vm2, %v738_v32, %v11379_v19  ;;  %v778_v20 = vshll.u32 %v355_v10, 16  ;;  %v1382_v12 = vld [vmem:[%s14835_s0 + $0xb8] sm:$0xf]  ;;  %v358_v56 = vld [vmem:[%s14835_s0 + $0xdc] sm:$0xf] }
  0x86   :  { %v752_v6 = vrot.slane %v751_v62, 4  ;;  %v762_v29 = vrot.slane %v761_v46, 4  ;;  %v782_v5 = vshrl.u32 %v355_v10, 16  ;;  %v8578_v3 = vcombine.low %v11454_v47, %v11458_v13  ;;  %v8822_v46 = vld [vmem:[%s14835_s0 + $0x10] sm:$0xf]  ;;  %v10179_v13 = vld [vmem:[%s14835_s0 + $0xa8] sm:$0xff]  }
  0x87   :  { %v788_v63 = vshll.u32 %v356_v41, 16  ;;  %v11485_v55 = vsel %vm10531_vm5, %v8547_v60, %v1631_v34  ;;  %v780_v4 = vrot.slane %v778_v20, 5  ;;  %v11495_v26 = vcombine.low %v733_v17, %v743_v33  ;;  %v8821_v60 = vld [vmem:[%s14835_s0 + $0xc] sm:$0xe]  ;;  %v10172_v41 = vld [vmem:[%s14835_s0 + $0x9c] sm:$0xff]  }
  0x88   :  { %v757_v24 = vsel %vm10438_vm2, %v752_v6, %v11421_v16  ;;  %v784_v22 = vrot.slane %v782_v5, 4  ;;  %v8548_v25 = vrot.slane %v1381_v27, 9  ;;  %v1638_v15 = vrot.slane %v1382_v12, 5  ;;  %v8700_v47 = vld [vmem:[%s14835_s0 + $0x28] sm:$0xf] }
  0x89   :  { %6669 = vmatmul.mubr.bf16.gmra.mrb[36].mxu1 %v10164_v8  ;;  %v8577_v8 = vcombine.low %v11419_v1, %v11432_v2  ;;  %v1641_v32 = vrot.slane %v1383_v42, 5  ;;  %v767_v35 = vsel %vm10438_vm2, %v762_v29, %v11434_v61  ;;  %v793_v36 = vshrl.u32 %v357_v54, 16 }
  0x8a   :  { %6958 = vmatmul.mubr.bf16.gmra.mrb[36].mxu0 %v8574_v43  ;;  %6676 = vmatprep.mubr.bf16.mxu1 %v8511_v11  ;;  %v354_v43 = vld [vmem:[%s14835_s0 + $0xb4] sm:$0xf]  ;;  %v1633_v11 = vrot.slane %v1631_v34, 4  ;;  %v785_v51 = vor.u32 %v784_v22, %v780_v4  ;;  %v11522_v44 = vsel %vm10531_vm5, %v8548_v25, %v1638_v15  ;;  %v1640_v16 = vrot.slane %v1638_v15, 4 }
  0x8b   :  { %6965 = vmatprep.mubr.bf16.mxu0 %v10166_v48  ;;  %v769_v39 = vshrl.u32 %v354_v43, 16  ;;  %v772_v50 = vshll.u32 %v354_v43, 16  ;;  %v790_v48 = vrot.slane %v788_v63, 5  ;;  %v796_v58 = vshll.u32 %v357_v54, 16  ;;  %v8823_v43 = vld [vmem:[%s14835_s0 + $0x14] sm:$0x1] }
  0x8c   :  { %v11489_v18 = vsel %vm10531_vm5, %v1633_v11, %v1634_v14  ;;  %v786_v61 = vrot.slane %v785_v51, 4  ;;  %v802_v9 = vshll.u32 %v358_v56, 16  ;;  %v806_v62 = vshrl.u32 %v358_v56, 16  ;;  %v10173_v15 = vld [vmem:[%s14835_s0 + $0x90] sm:$0xff]  }
  0x8d   :  { %v771_v19 = vrot.slane %v769_v39, 4  ;;  %v774_v40 = vrot.slane %v772_v50, 5  ;;  %v8579_v45 = vcombine.low %v11485_v55, %v11489_v18  ;;  %v11534_v14 = vsel %vm10531_vm5, %v1640_v16, %v1641_v32  ;;  %v8693_v50 = vld [vmem:[%s14835_s0 + $0xc] sm:$0xf]  ;;  %v8832_v55 = vld [vmem:[%s14835_s0 + $0x38] sm:$0x1] }
  0x8e   :  { %v812_v17 = vshll.u32 %v359_v52, 16  ;;  %v11542_v10 = vcombine.low %v757_v24, %v767_v35  ;;  %v791_v33 = vsel %vm10438_vm2, %v786_v61, %v790_v48  ;;  %v798_v6 = vrot.slane %v796_v58, 5  ;;  %v10175_v16 = vld [vmem:[%s14835_s0 + $0xa8] sm:$0xff]  }
  0x8f   :  { %v775_v57 = vor.u32 %v774_v40, %v771_v19  ;;  %v804_v11 = vrot.slane %v802_v9, 5  ;;  %v8580_v39 = vcombine.low %v11522_v44, %v11534_v14  ;;  %v808_v23 = vrot.slane %v806_v62, 4  ;;  %v8694_v40 = vld [vmem:[%s14835_s0 + $0x10] sm:$0xf]  ;;  %v8824_v9 = vld [vmem:[%s14835_s0 + $0x18] sm:$0xe] }
  0x90   :  { %v8917_v29 = vrot.slane %v8821_v60, 9  ;;  %v3422_v19 = vrot.slane %v8822_v46, 5  ;;  %v3425_v63 = vrot.slane %v8823_v43, 5  ;;  %v2301_v24 = vshrl.u32 %v8693_v50, 16  ;;  %v8825_v62 = vld [vmem:[%s14835_s0 + $0x1c] sm:$0xf] }
  0x91   :  { %6677 = vmatmul.mubr.bf16.gmra.mrb[40].mxu1 %v10167_v31  ;;  %v795_v31 = vrot.slane %v793_v36, 4  ;;  %v809_v27 = vor.u32 %v808_v23, %v804_v11  ;;  %v2304_v22 = vshll.u32 %v8693_v50, 16  ;;  %v2310_v48 = vshll.u32 %v8694_v40, 16  ;;  %v8826_v46 = vld [vmem:[%s14835_s0 + $0x20] sm:$0x1]  ;;  %v10184_v44 = vld [vmem:[%s14835_s0 + $0xd8] sm:$0xff]  }
  0x92   :  { %6966 = vmatmul.mubr.bf16.gmra.mrb[40].mxu0 %v8575_v37  ;;  %6684 = vmatprep.mubr.bf16.mxu1 %v8512_v49  ;;  %v10170_v37 = vld [vmem:[%s14835_s0 + $0x84] sm:$0xff]   ;;  %v776_v49 = vrot.slane %v775_v57, 4  ;;  %v11568_v42 = vsel %vm10531_vm5, %v8917_v29, %v3422_v19  ;;  %v3424_v57 = vrot.slane %v3422_v19, 4  ;;  %v2314_v25 = vshrl.u32 %v8694_v40, 16  ;;  %v8696_v50 = vld [vmem:[%s14835_s0 + $0x18] sm:$0xf] }
  0x93   :  { %6973 = vmatprep.mubr.bf16.mxu0 %v10169_v59  ;;  %v814_v59 = vrot.slane %v812_v17, 5  ;;  %v799_v5 = vor.u32 %v798_v6, %v795_v31  ;;  %v810_v32 = vrot.slane %v809_v27, 4  ;;  %v2303_v35 = vrot.slane %v2301_v24, 4 }
  0x94   :  { %v781_v34 = vsel %vm10438_vm2, %v776_v49, %v780_v4  ;;  %v8695_v4 = vld [vmem:[%s14835_s0 + $0x14] sm:$0x1]  ;;  %v2306_v51 = vrot.slane %v2304_v22, 5  ;;  %v2312_v54 = vrot.slane %v2310_v48, 5  ;;  %v362_v49 = vld [vmem:[%s14835_s0 + $0xec] sm:$0x1] }
  0x95   :  { %v11554_v20 = vcombine.low %v781_v34, %v791_v33  ;;  %v800_v12 = vrot.slane %v799_v5, 4  ;;  %v2320_v56 = vshll.u32 %v8695_v4, 16  ;;  %v815_v52 = vsel %vm10438_vm2, %v810_v32, %v814_v59  ;;  %v8697_v4 = vld [vmem:[%s14835_s0 + $0x1c] sm:$0xf] }
  0x96   :  { %v2307_v61 = vor.u32 %v2306_v51, %v2303_v35  ;;  %v817_v58 = vshrl.u32 %v360_v7, 16  ;;  %v820_v17 = vshll.u32 %v360_v7, 16  ;;  %v836_v59 = vshll.u32 %v362_v49, 16  ;;  %v364_v51 = vld [vmem:[%s14835_s0 + $0xf4] sm:$0xf] }
  0x97   :  { %v805_v21 = vsel %vm10438_vm2, %v800_v12, %v804_v11  ;;  %v2322_v31 = vrot.slane %v2320_v56, 5  ;;  %v8918_v29 = vrot.slane %v8824_v9, 9  ;;  %v3429_v40 = vrot.slane %v8825_v62, 5  ;;  %v8698_v12 = vld [vmem:[%s14835_s0 + $0x20] sm:$0x1]  ;;  %v10178_v9 = vld [vmem:[%s14835_s0 + $0xb4] sm:$0xff]  }
  0x98   :  { %v11601_v60 = vcombine.low %v805_v21, %v815_v52  ;;  %v2308_v43 = vrot.slane %v2307_v61, 4  ;;  %v819_v33 = vrot.slane %v817_v58, 4  ;;  %v822_v23 = vrot.slane %v820_v17, 5  ;;  %v8827_v58 = vld [vmem:[%s14835_s0 + $0x24] sm:$0xe] }
  0x99   :  { %6685 = vmatmul.mubr.bf16.gmra.mrb[44].mxu1 %v10170_v37  ;;  %v361_v37 = vld [vmem:[%s14835_s0 + $0xe8] sm:$0xf]  ;;  %v838_v22 = vrot.slane %v836_v59, 5  ;;  %v3432_v48 = vrot.slane %v8826_v46, 5  ;;  %v11627_v1 = vsel %vm10531_vm5, %v8918_v29, %v3429_v40  ;;  %v3431_v2 = vrot.slane %v3429_v40, 4 }
  0x9a   :  { %6974 = vmatmul.mubr.bf16.gmra.mrb[44].mxu0 %v8576_v28  ;;  %6692 = vmatprep.mubr.bf16.mxu1 %v11426_v53  ;;  %v11580_v28 = vsel %vm10531_vm5, %v3424_v57, %v3425_v63  ;;  %v2316_v53 = vrot.slane %v2314_v25, 4  ;;  %v826_v6 = vshll.u32 %v361_v37, 16  ;;  %v830_v11 = vshrl.u32 %v361_v37, 16  ;;  %v365_v37 = vld [vmem:[%s14835_s0 + $0xf8] sm:$0x1] }
  0x9b   :  { %6981 = vmatprep.mubr.bf16.mxu0 %v10172_v41  ;;  %v8949_v36 = vcombine.low %v11568_v42, %v11580_v28  ;;  %v2313_v5 = vsel %vm10438_vm2, %v2308_v43, %v2312_v54  ;;  %v823_v24 = vor.u32 %v822_v23, %v819_v33  ;;  %v2328_v32 = vshll.u32 %v8696_v50, 16  ;;  %v8833_v28 = vld [vmem:[%s14835_s0 + $0x3c] sm:$0xe] }
  0x9c   :  { %v2317_v34 = vor.u32 %v2316_v53, %v2312_v54  ;;  %v828_v19 = vrot.slane %v826_v6, 5  ;;  %v832_v63 = vrot.slane %v830_v11, 4  ;;  %v2334_v35 = vshll.u32 %v8697_v4, 16  ;;  %v10176_v54 = vld [vmem:[%s14835_s0 + $0x9c] sm:$0xff]   ;;  %v8828_v11 = vld [vmem:[%s14835_s0 + $0x28] sm:$0xf] }
  0x9d   :  { %v11640_v21 = vsel %vm10531_vm5, %v3431_v2, %v3432_v48  ;;  %v2338_v53 = vshrl.u32 %v8697_v4, 16  ;;  %v2344_v56 = vshll.u32 %v8698_v12, 16  ;;  %v2330_v61 = vrot.slane %v2328_v32, 5 }
  0x9e   :  { %v2318_v41 = vrot.slane %v2317_v34, 4  ;;  %v833_v25 = vor.u32 %v832_v63, %v828_v19  ;;  %v2336_v34 = vrot.slane %v2334_v35, 5  ;;  %v850_v59 = vshll.u32 %v364_v51, 16  ;;  %v10181_v35 = vld [vmem:[%s14835_s0 + $0xc0] sm:$0xff]  }
  0x9f   :  { %v2346_v17 = vrot.slane %v2344_v56, 5  ;;  %v854_v29 = vshrl.u32 %v364_v51, 16  ;;  %v8919_v4 = vrot.slane %v8827_v58, 9  ;;  %v3436_v2 = vrot.slane %v8828_v11, 5  ;;  %v366_v56 = vld [vmem:[%s14835_s0 + $0xfc] sm:$0xf] }
  0xa0   :  { %v2323_v27 = vsel %vm10438_vm2, %v2318_v41, %v2322_v31  ;;  %v834_v7 = vrot.slane %v833_v25, 4  ;;  %v2340_v31 = vrot.slane %v2338_v53, 4  ;;  %v8829_v41 = vld [vmem:[%s14835_s0 + $0x2c] sm:$0x1]  ;;  %v368_v11 = vld [vmem:[%s14835_s0 + $0x104] sm:$0x1] }
  0xa1   :  { %6693 = vmatmul.mubr.bf16.gmra.mrb[48].mxu1 %v10173_v15  ;;  %v11623_v57 = vcombine.low %v2313_v5, %v2323_v27  ;;  %v2325_v15 = vshrl.u32 %v8696_v50, 16  ;;  %v860_v50 = vshll.u32 %v365_v37, 16  ;;  %v8699_v5 = vld [vmem:[%s14835_s0 + $0x24] sm:$0xf]  ;;  %v3438_v53 = vrot.slane %v3436_v2, 4 }
  0xa2   :  { %6982 = vmatmul.mubr.bf16.gmra.mrb[48].mxu0 %v8577_v8  ;;  %6700 = vmatprep.mubr.bf16.mxu1 %v11495_v26  ;;  %v363_v8 = vld [vmem:[%s14835_s0 + $0xf0] sm:$0xf]  ;;  %v824_v26 = vrot.slane %v823_v24, 4  ;;  %v839_v62 = vsel %vm10438_vm2, %v834_v7, %v838_v22  ;;  %v2341_v23 = vor.u32 %v2340_v31, %v2336_v34  ;;  %v852_v24 = vrot.slane %v850_v59, 5  ;;  %v367_v31 = vld [vmem:[%s14835_s0 + $0x100] sm:$0xf] }
  0xa3   :  { %6989 = vmatprep.mubr.bf16.mxu0 %v10175_v16  ;;  %v8950_v16 = vcombine.low %v11627_v1, %v11640_v21  ;;  %v2327_v52 = vrot.slane %v2325_v15, 4  ;;  %v841_v33 = vshrl.u32 %v363_v8, 16  ;;  %v844_v6 = vshll.u32 %v363_v8, 16 }
  0xa4   :  { %v829_v49 = vsel %vm10438_vm2, %v824_v26, %v828_v19  ;;  %v2342_v27 = vrot.slane %v2341_v23, 4  ;;  %v856_v22 = vrot.slane %v854_v29, 4  ;;  %v862_v48 = vrot.slane %v860_v50, 5  ;;  %v8701_v26 = vld [vmem:[%s14835_s0 + $0x2c] sm:$0x1] }
  0xa5   :  { %v11657_v46 = vcombine.low %v829_v49, %v839_v62  ;;  %v2331_v43 = vor.u32 %v2330_v61, %v2327_v52  ;;  %v843_v63 = vrot.slane %v841_v33, 4  ;;  %v846_v40 = vrot.slane %v844_v6, 5 }
  0xa6   :  { %v3439_v8 = vrot.slane %v8829_v41, 5  ;;  %v2349_v15 = vshrl.u32 %v8699_v5, 16  ;;  %v2352_v32 = vshll.u32 %v8699_v5, 16  ;;  %v11692_v7 = vsel %vm10531_vm5, %v8919_v4, %v3436_v2  ;;  %v8830_v41 = vld [vmem:[%s14835_s0 + $0x30] sm:$0xe] }
  0xa7   :  { %v2332_v19 = vrot.slane %v2331_v43, 4  ;;  %v847_v25 = vor.u32 %v846_v40, %v843_v63  ;;  %v2358_v61 = vshll.u32 %v8700_v47, 16  ;;  %v2362_v62 = vshrl.u32 %v8700_v47, 16  ;;  %v8831_v5 = vld [vmem:[%s14835_s0 + $0x34] sm:$0xf] }
  0xa8   :  { %v2351_v49 = vrot.slane %v2349_v15, 4  ;;  %v2354_v52 = vrot.slane %v2352_v32, 5  ;;  %v865_v50 = vshrl.u32 %v366_v56, 16  ;;  %v868_v63 = vshll.u32 %v366_v56, 16  ;;  %v8704_v32 = vld [vmem:[%s14835_s0 + $0x38] sm:$0x1] }
  0xa9   :  { %6701 = vmatmul.mubr.bf16.gmra.mrb[52].mxu1 %v10176_v54  ;;  %v2337_v12 = vsel %vm10438_vm2, %v2332_v19, %v2336_v34  ;;  %v848_v54 = vrot.slane %v847_v25, 4  ;;  %v2368_v34 = vshll.u32 %v8701_v26, 16  ;;  %v2360_v6 = vrot.slane %v2358_v61, 5 }
  0xaa   :  { %6990 = vmatmul.mubr.bf16.gmra.mrb[52].mxu0 %v8578_v3  ;;  %6708 = vmatprep.mubr.bf16.mxu1 %v11542_v10  ;;  %v2347_v3 = vsel %vm10438_vm2, %v2342_v27, %v2346_v17  ;;  %v857_v10 = vor.u32 %v856_v22, %v852_v24  ;;  %v2355_v33 = vor.u32 %v2354_v52, %v2351_v49  ;;  %v2364_v59 = vrot.slane %v2362_v62, 4  ;;  %v10182_v22 = vld [vmem:[%s14835_s0 + $0xb4] sm:$0xff]   ;;  %v369_v52 = vld [vmem:[%s14835_s0 + $0x108] sm:$0xf] }
  0xab   :  { %6997 = vmatprep.mubr.bf16.mxu0 %v10178_v9  ;;  %v11688_v51 = vcombine.low %v2337_v12, %v2347_v3  ;;  %v853_v58 = vsel %vm10438_vm2, %v848_v54, %v852_v24  ;;  %v11701_v9 = vsel %vm10531_vm5, %v3438_v53, %v3439_v8  ;;  %v2370_v29 = vrot.slane %v2368_v34, 5  ;;  %v8702_v24 = vld [vmem:[%s14835_s0 + $0x30] sm:$0xf]  ;;  %v8703_v8 = vld [vmem:[%s14835_s0 + $0x34] sm:$0xf] }
  0xac   :  { %v858_v37 = vrot.slane %v857_v10, 4  ;;  %v8951_v43 = vcombine.low %v11692_v7, %v11701_v9  ;;  %v2356_v19 = vrot.slane %v2355_v33, 4  ;;  %v874_v40 = vshll.u32 %v367_v31, 16  ;;  %v8710_v7 = vld [vmem:[%s14835_s0 + $0x50] sm:$0x1] }
  0xad   :  { %v878_v4 = vshrl.u32 %v367_v31, 16  ;;  %v2365_v18 = vor.u32 %v2364_v59, %v2360_v6  ;;  %v8920_v27 = vrot.slane %v8830_v41, 9  ;;  %v870_v12 = vrot.slane %v868_v63, 5  ;;  %v370_v31 = vld [vmem:[%s14835_s0 + $0x10c] sm:$0xf] }
  0xae   :  { %v863_v17 = vsel %vm10438_vm2, %v858_v37, %v862_v48  ;;  %v2361_v48 = vsel %vm10438_vm2, %v2356_v19, %v2360_v6  ;;  %v876_v25 = vrot.slane %v874_v40, 5  ;;  %v3443_v3 = vrot.slane %v8831_v5, 5  ;;  %v371_v41 = vld [vmem:[%s14835_s0 + $0x110] sm:$0x1] }
  0xaf   :  { %v11720_v23 = vcombine.low %v853_v58, %v863_v17  ;;  %v880_v2 = vrot.slane %v878_v4, 4  ;;  %v2366_v47 = vrot.slane %v2365_v18, 4  ;;  %v3446_v10 = vrot.slane %v8832_v55, 5  ;;  %v8835_v55 = vld [vmem:[%s14835_s0 + $0x44] sm:$0x1] }
  0xb0   :  { %v2376_v54 = vshll.u32 %v8702_v24, 16  ;;  %v11746_v56 = vsel %vm10531_vm5, %v8920_v27, %v3443_v3  ;;  %v3445_v37 = vrot.slane %v3443_v3, 4  ;;  %v2382_v49 = vshll.u32 %v8703_v8, 16 }
  0xb1   :  { %6709 = vmatmul.mubr.bf16.gmra.mrb[56].mxu1 %v10179_v13  ;;  %v881_v15 = vor.u32 %v880_v2, %v876_v25  ;;  %v2371_v53 = vsel %vm10438_vm2, %v2366_v47, %v2370_v29  ;;  %v2392_v59 = vshll.u32 %v8704_v32, 16  ;;  %v889_v42 = vshrl.u32 %v369_v52, 16 }
  0xb2   :  { %6998 = vmatmul.mubr.bf16.gmra.mrb[56].mxu0 %v8579_v45  ;;  %6716 = vmatprep.mubr.bf16.mxu1 %v11554_v20  ;;  %v867_v45 = vrot.slane %v865_v50, 4  ;;  %v884_v20 = vshll.u32 %v368_v11, 16  ;;  %v11751_v61 = vcombine.low %v2361_v48, %v2371_v53  ;;  %v11762_v17 = vsel %vm10531_vm5, %v3445_v37, %v3446_v10  ;;  %v8706_v10 = vld [vmem:[%s14835_s0 + $0x40] sm:$0xf] }
  0xb3   :  { %7005 = vmatprep.mubr.bf16.mxu0 %v10181_v35  ;;  %v2373_v35 = vshrl.u32 %v8702_v24, 16  ;;  %v882_v62 = vrot.slane %v881_v15, 4  ;;  %v2378_v33 = vrot.slane %v2376_v54, 5  ;;  %v2384_v6 = vrot.slane %v2382_v49, 5  ;;  %v8705_v24 = vld [vmem:[%s14835_s0 + $0x3c] sm:$0xf] }
  0xb4   :  { %v886_v13 = vrot.slane %v884_v20, 5  ;;  %v871_v26 = vor.u32 %v870_v12, %v867_v45  ;;  %v2386_v11 = vshrl.u32 %v8703_v8, 16  ;;  %v2394_v19 = vrot.slane %v2392_v59, 5  ;;  %v8707_v49 = vld [vmem:[%s14835_s0 + $0x44] sm:$0x1]  ;;  %v10191_v59 = vld [vmem:[%s14834_s1 + $0x190] sm:$0xff]  }
  0xb5   :  { %v2375_v34 = vrot.slane %v2373_v35, 4  ;;  %v892_v63 = vshll.u32 %v369_v52, 16  ;;  %v898_v40 = vshll.u32 %v370_v31, 16  ;;  %v902_v4 = vshrl.u32 %v370_v31, 16  ;;  %v372_v31 = vld [vmem:[%s14835_s0 + $0x114] sm:$0xf] }
  0xb6   :  { %v872_v58 = vrot.slane %v871_v26, 4  ;;  %v2388_v5 = vrot.slane %v2386_v11, 4  ;;  %v891_v20 = vrot.slane %v889_v42, 4  ;;  %v908_v27 = vshll.u32 %v371_v41, 16  ;;  %v373_v11 = vld [vmem:[%s14835_s0 + $0x118] sm:$0xf] }
  0xb7   :  { %v2379_v50 = vor.u32 %v2378_v33, %v2375_v34  ;;  %v894_v48 = vrot.slane %v892_v63, 5  ;;  %v900_v12 = vrot.slane %v898_v40, 5  ;;  %v8921_v2 = vrot.slane %v8833_v28, 9  ;;  %v10186_v33 = vld [vmem:[%s14835_s0 + $0xe4] sm:$0xff]   ;;  %v8837_v63 = vld [vmem:[%s14835_s0 + $0x4c] sm:$0xf] }
  0xb8   :  { %v877_v14 = vsel %vm10438_vm2, %v872_v58, %v876_v25  ;;  %v2389_v45 = vor.u32 %v2388_v5, %v2384_v6  ;;  %v904_v25 = vrot.slane %v902_v4, 4  ;;  %v3453_v32 = vrot.slane %v8835_v55, 5  ;;  %v8836_v5 = vld [vmem:[%s14835_s0 + $0x48] sm:$0xe]  ;;  %v8838_v40 = vld [vmem:[%s14835_s0 + $0x50] sm:$0x1] }
  0xb9   :  { %6717 = vmatmul.mubr.bf16.gmra.mrb[60].mxu1 %v10182_v22  ;;  %v2380_v18 = vrot.slane %v2379_v50, 4  ;;  %v10185_v22 = vld [vmem:[%s14834_s1 + $0x180] sm:$0xff]   ;;  %v895_v26 = vor.u32 %v894_v48, %v891_v20  ;;  %v2397_v35 = vshrl.u32 %v8705_v24, 16  ;;  %v2400_v52 = vshll.u32 %v8705_v24, 16  ;;  %v374_v50 = vld [vmem:[%s14835_s0 + $0x11c] sm:$0x1] }
  0xba   :  { %7006 = vmatmul.mubr.bf16.gmra.mrb[60].mxu0 %v8580_v39  ;;  %6724 = vmatprep.mubr.bf16.mxu1 %v11601_v60  ;;  %v887_v39 = vsel %vm10438_vm2, %v882_v62, %v886_v13  ;;  %v8952_v60 = vcombine.low %v11746_v56, %v11762_v17  ;;  %v2390_v47 = vrot.slane %v2389_v45, 4  ;;  %v910_v13 = vrot.slane %v908_v27, 5  ;;  %v8708_v4 = vld [vmem:[%s14835_s0 + $0x48] sm:$0xf]  ;;  %v8709_v27 = vld [vmem:[%s14835_s0 + $0x4c] sm:$0xf] }
  0xbb   :  { %7174 = vmatprep.mubr.bf16.mxu0 %v8949_v36  ;;  %v11779_v29 = vcombine.low %v877_v14, %v887_v39  ;;  %v8834_v36 = vld [vmem:[%s14835_s0 + $0x40] sm:$0xf]  ;;  %v2385_v8 = vsel %vm10438_vm2, %v2380_v18, %v2384_v6  ;;  %v905_v15 = vor.u32 %v904_v25, %v900_v12  ;;  %v896_v58 = vrot.slane %v895_v26, 4  ;;  %v8712_v17 = vld [vmem:[%s14835_s0 + $0x58] sm:$0xf] }
  0xbc   :  { %v3450_v3 = vrot.slane %v8834_v36, 5  ;;  %v2395_v54 = vsel %vm10438_vm2, %v2390_v47, %v2394_v19  ;;  %v2399_v34 = vrot.slane %v2397_v35, 4  ;;  %v2402_v21 = vrot.slane %v2400_v52, 5 }
  0xbd   :  { %v906_v62 = vrot.slane %v905_v15, 4  ;;  %v2410_v6 = vshrl.u32 %v8706_v10, 16  ;;  %v901_v41 = vsel %vm10438_vm2, %v896_v58, %v900_v12  ;;  %v2416_v39 = vshll.u32 %v8707_v49, 16  ;;  %v10187_v15 = vld [vmem:[%s14835_s0 + $0xf0] sm:$0xff]  }
  0xbe   :  { %v11807_v53 = vsel %vm10531_vm5, %v8921_v2, %v3450_v3  ;;  %v3452_v37 = vrot.slane %v3450_v3, 4  ;;  %v2403_v28 = vor.u32 %v2402_v21, %v2399_v34  ;;  %v913_v18 = vshrl.u32 %v372_v31, 16  ;;  %v375_v34 = vld [vmem:[%s14835_s0 + $0x120] sm:$0xf] }
  0xbf   :  { %v2412_v19 = vrot.slane %v2410_v6, 4  ;;  %v2418_v55 = vrot.slane %v2416_v39, 5  ;;  %v916_v45 = vshll.u32 %v372_v31, 16  ;;  %v922_v20 = vshll.u32 %v373_v11, 16  ;;  %v10197_v31 = vld [vmem:[%s14834_s1 + $0x1a0] sm:$0xff]  }
  0xc0   :  { %v11829_v1 = vsel %vm10531_vm5, %v3452_v37, %v3453_v32  ;;  %v2404_v24 = vrot.slane %v2403_v28, 4  ;;  %v926_v48 = vshrl.u32 %v373_v11, 16  ;;  %v932_v12 = vshll.u32 %v374_v50, 16  ;;  %v376_v11 = vld [vmem:[%s14835_s0 + $0x124] sm:$0xf] }
  0xc1   :  { %6725 = vmatmul.mubr.bf16.gmra.mrb[64].mxu1 %v10184_v44  ;;  %v911_v44 = vsel %vm10438_vm2, %v906_v62, %v910_v13  ;;  %v8953_v14 = vcombine.low %v11807_v53, %v11829_v1  ;;  %v915_v25 = vrot.slane %v913_v18, 4  ;;  %v918_v2 = vrot.slane %v916_v45, 5  ;;  %v377_v50 = vld [vmem:[%s14835_s0 + $0x128] sm:$0x1] }
  0xc2   :  { %7175 = vmatmul.mubr.bf16.vlgmr.msra.gmra.mrb[0].mxu0 %v11623_v57  ;;  %6732 = vmatprep.mubr.bf16.mxu1 %v11657_v46  ;;  %v10188_v57 = vld [vmem:[%s14834_s1 + $0x188] sm:$0xff]   ;;  %v11818_v46 = vcombine.low %v2385_v8, %v2395_v54  ;;  %v11849_v42 = vcombine.low %v901_v41, %v911_v44  ;;  %v924_v8 = vrot.slane %v922_v20, 5  ;;  %v8922_v47 = vrot.slane %v8836_v5, 9  ;;  %v8839_v5 = vld [vmem:[%s14835_s0 + $0x54] sm:$0xe] }
  0xc3   :  { %7432 = vmatpush1.bf16.msra.mxu0 %v10185_v22  ;;  %7182 = vmatprep.mubr.bf16.mxu0 %v8950_v16  ;;  %v2406_v16 = vshll.u32 %v8706_v10, 16  ;;  %v928_v10 = vrot.slane %v926_v48, 4  ;;  %v934_v26 = vrot.slane %v932_v12, 5  ;;  %v919_v32 = vor.u32 %v918_v2, %v915_v25 }
  0xc4   :  { %7433 = vmatprep.subr.bf16.mxu0 %v10281_v0  ;;  %v3457_v35 = vrot.slane %v8837_v63, 5  ;;  %v2421_v54 = vshrl.u32 %v8708_v4, 16  ;;  %v2424_v9 = vshll.u32 %v8708_v4, 16  ;;  %v2434_v39 = vshrl.u32 %v8709_v27, 16  ;;  %v8841_v4 = vld [vmem:[%s14835_s0 + $0x5c] sm:$0x1] }
  0xc5   :  { %v2408_v36 = vrot.slane %v2406_v16, 5  ;;  %v929_v49 = vor.u32 %v928_v10, %v924_v8  ;;  %v937_v63 = vshrl.u32 %v375_v34, 16  ;;  %v940_v20 = vshll.u32 %v375_v34, 16 }
  0xc6   :  { %v11887_v58 = vsel %vm10531_vm5, %v8922_v47, %v3457_v35  ;;  %v3459_v62 = vrot.slane %v3457_v35, 4  ;;  %v2423_v21 = vrot.slane %v2421_v54, 4  ;;  %v2426_v16 = vrot.slane %v2424_v9, 5  ;;  %v8711_v47 = vld [vmem:[%s14835_s0 + $0x54] sm:$0xf] }
  0xc7   :  { %7434 = vmatpush1.bf16.msra.mxu0 %v10188_v57  ;;  %v2413_v22 = vor.u32 %v2412_v19, %v2408_v36  ;;  %v2409_v13 = vsel %vm10438_vm2, %v2404_v24, %v2408_v36  ;;  %v920_v57 = vrot.slane %v919_v32, 4  ;;  %v2436_v18 = vrot.slane %v2434_v39, 4 }
  0xc8   :  { %7435 = vmatprep.subr.bf16.mxu0 %v10281_v0  ;;  %v2427_v19 = vor.u32 %v2426_v16, %v2423_v21  ;;  %v939_v24 = vrot.slane %v937_v63, 4  ;;  %v950_v48 = vshrl.u32 %v376_v11, 16  ;;  %v942_v25 = vrot.slane %v940_v20, 5  ;;  %v379_v16 = vld [vmem:[%s14835_s0 + $0x130] sm:$0xf] }
  0xc9   :  { %6733 = vmatmul.mubr.bf16.gmra.mrb[68].mxu1 %v10186_v33  ;;  %v2414_v3 = vrot.slane %v2413_v22, 4  ;;  %v930_v33 = vrot.slane %v929_v49, 4  ;;  %v925_v41 = vsel %vm10438_vm2, %v920_v57, %v924_v8  ;;  %v946_v22 = vshll.u32 %v376_v11, 16  ;;  %v378_v57 = vld [vmem:[%s14835_s0 + $0x12c] sm:$0xf] }
  0xca   :  { %7183 = vmatmul.mubr.bf16.gmra.mrb[4].mxu0 %v11688_v51  ;;  %6740 = vmatprep.mubr.bf16.mxu1 %v11720_v23  ;;  %v3460_v51 = vrot.slane %v8838_v40, 5  ;;  %v10194_v23 = vld [vmem:[%s14834_s1 + $0x198] sm:$0xff]   ;;  %v956_v2 = vshll.u32 %v377_v50, 16  ;;  %v8923_v8 = vrot.slane %v8839_v5, 9  ;;  %v3467_v32 = vrot.slane %v8841_v4, 5 }
  0xcb   :  { %7190 = vmatprep.mubr.bf16.mxu0 %v8951_v43  ;;  %7436 = vmatpush1.bf16.msra.mxu0 %v10191_v59  ;;  %v2419_v37 = vsel %vm10438_vm2, %v2414_v3, %v2418_v55  ;;  %v2430_v43 = vshll.u32 %v8709_v27, 16  ;;  %v2440_v59 = vshll.u32 %v8710_v7, 16  ;;  %v935_v28 = vsel %vm10438_vm2, %v930_v33, %v934_v26  ;;  %v8840_v40 = vld [vmem:[%s14835_s0 + $0x58] sm:$0xf]  ;;  %v8842_v50 = vld [vmem:[%s14835_s0 + $0x60] sm:$0xe] }
  0xcc   :  { %7437 = vmatprep.subr.bf16.mxu0 %v10281_v0  ;;  %v11883_v52 = vcombine.low %v2409_v13, %v2419_v37  ;;  %v11902_v44 = vsel %vm10531_vm5, %v3459_v62, %v3460_v51  ;;  %v11921_v55 = vcombine.low %v925_v41, %v935_v28  ;;  %v2428_v27 = vrot.slane %v2427_v19, 4  ;;  %v10203_v62 = vld [vmem:[%s14834_s1 + $0x1b0] sm:$0xff]   ;;  %v8843_v20 = vld [vmem:[%s14835_s0 + $0x64] sm:$0xf] }
  0xcd   :  { %v2432_v6 = vrot.slane %v2430_v43, 5  ;;  %v8954_v36 = vcombine.low %v11887_v58, %v11902_v44  ;;  %v2442_v45 = vrot.slane %v2440_v59, 5  ;;  %v948_v13 = vrot.slane %v946_v22, 5  ;;  %v8714_v22 = vld [vmem:[%s14835_s0 + $0x60] sm:$0xf] }
  0xce   :  { %v952_v3 = vrot.slane %v950_v48, 4  ;;  %v3464_v56 = vrot.slane %v8840_v40, 5  ;;  %v943_v26 = vor.u32 %v942_v25, %v939_v24  ;;  %v2445_v37 = vshrl.u32 %v8711_v47, 16  ;;  %v10206_v40 = vld [vmem:[%s14834_s1 + $0x1b8] sm:$0xff]   ;;  %v8715_v48 = vld [vmem:[%s14835_s0 + $0x64] sm:$0xf] }
  0xcf   :  { %7438 = vmatpush1.bf16.msra.mxu0 %v10194_v23  ;;  %v2437_v12 = vor.u32 %v2436_v18, %v2432_v6  ;;  %v8713_v23 = vld [vmem:[%s14835_s0 + $0x5c] sm:$0x1]  ;;  %v2448_v9 = vshll.u32 %v8711_v47, 16  ;;  %v2454_v43 = vshll.u32 %v8712_v17, 16  ;;  %v2458_v28 = vshrl.u32 %v8712_v17, 16 }
  0xd0   :  { %7439 = vmatprep.subr.bf16.mxu0 %v10281_v0  ;;  %v953_v35 = vor.u32 %v952_v3, %v948_v13  ;;  %v11945_v51 = vsel %vm10531_vm5, %v8923_v8, %v3464_v56  ;;  %v3466_v54 = vrot.slane %v3464_v56, 4  ;;  %v944_v7 = vrot.slane %v943_v26, 4 }
  0xd1   :  { %6741 = vmatmul.mubr.bf16.gmra.mrb[72].mxu1 %v10187_v15  ;;  %v2438_v10 = vrot.slane %v2437_v12, 4  ;;  %v958_v15 = vrot.slane %v956_v2, 5  ;;  %v2447_v21 = vrot.slane %v2445_v37, 4  ;;  %v2450_v39 = vrot.slane %v2448_v9, 5 }
  0xd2   :  { %7191 = vmatmul.mubr.bf16.gmra.mrb[8].mxu0 %v11751_v61  ;;  %6748 = vmatprep.mubr.bf16.mxu1 %v11779_v29  ;;  %v10200_v61 = vld [vmem:[%s14834_s1 + $0x1a8] sm:$0xff]   ;;  %v2433_v29 = vsel %vm10438_vm2, %v2428_v27, %v2432_v6  ;;  %v11962_v33 = vsel %vm10531_vm5, %v3466_v54, %v3467_v32  ;;  %v380_v6 = vld [vmem:[%s14835_s0 + $0x134] sm:$0x1]  ;;  %v949_v11 = vsel %vm10438_vm2, %v944_v7, %v948_v13  ;;  %v2456_v59 = vrot.slane %v2454_v43, 5 }
  0xd3   :  { %7198 = vmatprep.mubr.bf16.mxu0 %v8952_v60  ;;  %7440 = vmatpush1.bf16.msra.mxu0 %v10197_v31  ;;  %v10189_v60 = vld [vmem:[%s14835_s0 + $0xfc] sm:$0xff]   ;;  %v2443_v49 = vsel %vm10438_vm2, %v2438_v10, %v2442_v45  ;;  %v954_v31 = vrot.slane %v953_v35, 4  ;;  %v8955_v41 = vcombine.low %v11945_v51, %v11962_v33  ;;  %v2464_v19 = vshll.u32 %v8713_v23, 16  ;;  %v8844_v27 = vld [vmem:[%s14835_s0 + $0x68] sm:$0x1] }
  0xd4   :  { %7441 = vmatprep.subr.bf16.mxu0 %v10281_v0  ;;  %v11958_v34 = vcombine.low %v2433_v29, %v2443_v49  ;;  %v961_v63 = vshrl.u32 %v378_v57, 16  ;;  %v964_v18 = vshll.u32 %v378_v57, 16  ;;  %v970_v45 = vshll.u32 %v379_v16, 16  ;;  %v10209_v10 = vld [vmem:[%s14834_s1 + $0x1c0] sm:$0xff]   ;;  %v8716_v23 = vld [vmem:[%s14835_s0 + $0x68] sm:$0x1] }
  0xd5   :  { %v959_v5 = vsel %vm10438_vm2, %v954_v31, %v958_v15  ;;  %v2460_v53 = vrot.slane %v2458_v28, 4  ;;  %v2466_v1 = vrot.slane %v2464_v19, 5  ;;  %v974_v24 = vshrl.u32 %v379_v16, 16  ;;  %v381_v31 = vld [vmem:[%s14835_s0 + $0x138] sm:$0xf] }
  0xd6   :  { %v11991_v4 = vcombine.low %v949_v11, %v959_v5  ;;  %v966_v25 = vrot.slane %v964_v18, 5  ;;  %v972_v2 = vrot.slane %v970_v45, 5  ;;  %v980_v8 = vshll.u32 %v380_v6, 16  ;;  %v382_v6 = vld [vmem:[%s14835_s0 + $0x13c] sm:$0xf]  ;;  %v10212_v11 = vld [vmem:[%s14834_s1 + $0x1c8] sm:$0xff]  }
  0xd7   :  { %7442 = vmatpush1.bf16.msra.mxu0 %v10200_v61  ;;  %v2461_v47 = vor.u32 %v2460_v53, %v2456_v59  ;;  %v976_v61 = vrot.slane %v974_v24, 4  ;;  %v8924_v29 = vrot.slane %v8842_v50, 9  ;;  %v3471_v13 = vrot.slane %v8843_v20, 5  ;;  %v10192_v50 = vld [vmem:[%s14835_s0 + $0x114] sm:$0xff]   ;;  %v8845_v45 = vld [vmem:[%s14835_s0 + $0x6c] sm:$0xe] }
  0xd8   :  { %7443 = vmatprep.subr.bf16.mxu0 %v10281_v0  ;;  %v982_v17 = vrot.slane %v980_v8, 5  ;;  %v2469_v37 = vshrl.u32 %v8714_v22, 16  ;;  %v2472_v49 = vshll.u32 %v8714_v22, 16  ;;  %v2478_v7 = vshll.u32 %v8715_v48, 16  ;;  %v8846_v20 = vld [vmem:[%s14835_s0 + $0x70] sm:$0xf] }
  0xd9   :  { %6749 = vmatmul.mubr.bf16.gmra.mrb[76].mxu1 %v10189_v60  ;;  %v3474_v60 = vrot.slane %v8844_v27, 5  ;;  %v2462_v26 = vrot.slane %v2461_v47, 4  ;;  %v977_v15 = vor.u32 %v976_v61, %v972_v2  ;;  %v12013_v32 = vsel %vm10531_vm5, %v8924_v29, %v3471_v13  ;;  %v8847_v24 = vld [vmem:[%s14835_s0 + $0x74] sm:$0x1] }
  0xda   :  { %7199 = vmatmul.mubr.bf16.gmra.mrb[12].mxu0 %v11818_v46  ;;  %6756 = vmatprep.mubr.bf16.mxu1 %v11849_v42  ;;  %v10190_v46 = vld [vmem:[%s14835_s0 + $0x108] sm:$0xff]   ;;  %v2451_v42 = vor.u32 %v2450_v39, %v2447_v21  ;;  %v3473_v35 = vrot.slane %v3471_v13, 4  ;;  %v2471_v16 = vrot.slane %v2469_v37, 4  ;;  %v2474_v44 = vrot.slane %v2472_v49, 5  ;;  %v8718_v13 = vld [vmem:[%s14835_s0 + $0x70] sm:$0xf] }
  0xdb   :  { %7206 = vmatprep.mubr.bf16.mxu0 %v8953_v14  ;;  %7444 = vmatpush1.bf16.msra.mxu0 %v10203_v62  ;;  %v963_v14 = vrot.slane %v961_v63, 4  ;;  %v2467_v9 = vsel %vm10438_vm2, %v2462_v26, %v2466_v1  ;;  %v978_v43 = vrot.slane %v977_v15, 4  ;;  %v2482_v62 = vshrl.u32 %v8715_v48, 16  ;;  %v8719_v26 = vld [vmem:[%s14835_s0 + $0x74] sm:$0x1] }
  0xdc   :  { %7445 = vmatprep.subr.bf16.mxu0 %v10281_v0  ;;  %v2452_v12 = vrot.slane %v2451_v42, 4  ;;  %v12025_v57 = vsel %vm10531_vm5, %v3473_v35, %v3474_v60  ;;  %v2488_v28 = vshll.u32 %v8716_v23, 16  ;;  %v985_v19 = vshrl.u32 %v381_v31, 16  ;;  %v384_v23 = vld [vmem:[%s14835_s0 + $0x144] sm:$0xf] }
  0xdd   :  { %v967_v56 = vor.u32 %v966_v25, %v963_v14  ;;  %v8956_v21 = vcombine.low %v12013_v32, %v12025_v57  ;;  %v983_v58 = vsel %vm10438_vm2, %v978_v43, %v982_v17  ;;  %v2484_v39 = vrot.slane %v2482_v62, 4  ;;  %v385_v49 = vld [vmem:[%s14835_s0 + $0x148] sm:$0xf] }
  0xde   :  { %v2457_v3 = vsel %vm10438_vm2, %v2452_v12, %v2456_v59  ;;  %v383_v59 = vld [vmem:[%s14835_s0 + $0x140] sm:$0x1]  ;;  %v988_v63 = vshll.u32 %v381_v31, 16  ;;  %v994_v42 = vshll.u32 %v382_v6, 16  ;;  %v998_v18 = vshrl.u32 %v382_v6, 16 }
  0xdf   :  { %7446 = vmatpush1.bf16.msra.mxu0 %v10206_v40  ;;  %v968_v54 = vrot.slane %v967_v56, 4  ;;  %v2475_v40 = vor.u32 %v2474_v44, %v2471_v16  ;;  %v2490_v27 = vrot.slane %v2488_v28, 5  ;;  %v987_v53 = vrot.slane %v985_v19, 4  ;;  %v386_v31 = vld [vmem:[%s14835_s0 + $0x14c] sm:$0x1] }
  0xe0   :  { %7447 = vmatprep.subr.bf16.mxu0 %v10281_v0  ;;  %v990_v1 = vrot.slane %v988_v63, 5  ;;  %v1004_v14 = vshll.u32 %v383_v59, 16  ;;  %v996_v12 = vrot.slane %v994_v42, 5  ;;  %v1000_v25 = vrot.slane %v998_v18, 4 }
  0xe1   :  { %6757 = vmatmul.mubr.bf16.gmra.mrb[80].mxu1 %v10190_v46  ;;  %v2476_v22 = vrot.slane %v2475_v40, 4  ;;  %v8925_v61 = vrot.slane %v8845_v45, 9  ;;  %v3478_v29 = vrot.slane %v8846_v20, 5  ;;  %v2506_v43 = vshrl.u32 %v8718_v13, 16 }
  0xe2   :  { %7207 = vmatmul.mubr.bf16.gmra.mrb[16].mxu0 %v11883_v52  ;;  %6764 = vmatprep.mubr.bf16.mxu1 %v11921_v55  ;;  %v12033_v52 = vcombine.low %v2457_v3, %v2467_v9  ;;  %v973_v55 = vsel %vm10438_vm2, %v968_v54, %v972_v2  ;;  %v8717_v2 = vld [vmem:[%s14835_s0 + $0x6c] sm:$0xf]  ;;  %v991_v8 = vor.u32 %v990_v1, %v987_v53  ;;  %v1006_v47 = vrot.slane %v1004_v14, 5  ;;  %v10215_v3 = vld [vmem:[%s14834_s1 + $0x1d0] sm:$0xff]  }
  0xe3   :  { %7214 = vmatprep.mubr.bf16.mxu0 %v8954_v36  ;;  %7448 = vmatpush1.bf16.msra.mxu0 %v10209_v10  ;;  %v2480_v36 = vrot.slane %v2478_v7, 5  ;;  %v12054_v5 = vcombine.low %v973_v55, %v983_v58  ;;  %v1001_v60 = vor.u32 %v1000_v25, %v996_v12  ;;  %v3481_v10 = vrot.slane %v8847_v24, 5  ;;  %v8848_v58 = vld [vmem:[%s14835_s0 + $0x78] sm:$0xe] }
  0xe4   :  { %7449 = vmatprep.subr.bf16.mxu0 %v10281_v0  ;;  %v992_v15 = vrot.slane %v991_v8, 4  ;;  %v12094_v35 = vsel %vm10531_vm5, %v8925_v61, %v3478_v29  ;;  %v3480_v54 = vrot.slane %v3478_v29, 4  ;;  %v2493_v51 = vshrl.u32 %v8717_v2, 16  ;;  %v10195_v61 = vld [vmem:[%s14835_s0 + $0x12c] sm:$0xff]  }
  0xe5   :  { %v2485_v46 = vor.u32 %v2484_v39, %v2480_v36  ;;  %v2481_v56 = vsel %vm10438_vm2, %v2476_v22, %v2480_v36  ;;  %v1002_v37 = vrot.slane %v1001_v60, 4  ;;  %v2496_v33 = vshll.u32 %v8717_v2, 16  ;;  %v8721_v2 = vld [vmem:[%s14835_s0 + $0x7c] sm:$0xf] }
  0xe6   :  { %v997_v7 = vsel %vm10438_vm2, %v992_v15, %v996_v12  ;;  %v12107_v9 = vsel %vm10531_vm5, %v3480_v54, %v3481_v10  ;;  %v2512_v62 = vshll.u32 %v8719_v26, 16  ;;  %v2495_v6 = vrot.slane %v2493_v51, 4  ;;  %v387_v10 = vld [vmem:[%s14835_s0 + $0x150] sm:$0xf] }
  0xe7   :  { %7450 = vmatpush1.bf16.msra.mxu0 %v10212_v11  ;;  %v2486_v48 = vrot.slane %v2485_v46, 4  ;;  %v1007_v55 = vsel %vm10438_vm2, %v1002_v37, %v1006_v47  ;;  %v8957_v16 = vcombine.low %v12094_v35, %v12107_v9  ;;  %v2498_v11 = vrot.slane %v2496_v33, 5  ;;  %v8850_v46 = vld [vmem:[%s14835_s0 + $0x80] sm:$0x1]  ;;  %v8723_v9 = vld [vmem:[%s14835_s0 + $0x84] sm:$0xf] }
  0xe8   :  { %7451 = vmatprep.subr.bf16.mxu0 %v10281_v0  ;;  %v8525_v44 = vcombine.low %v997_v7, %v1007_v55  ;;  %v2508_v39 = vrot.slane %v2506_v43, 4  ;;  %v2514_v59 = vrot.slane %v2512_v62, 5  ;;  %v1009_v19 = vshrl.u32 %v384_v23, 16  ;;  %v8851_v55 = vld [vmem:[%s14835_s0 + $0x84] sm:$0xe] }
  0xe9   :  { %6765 = vmatmul.mubr.bf16.gmra.mrb[84].mxu1 %v10192_v50  ;;  %v2491_v17 = vsel %vm10438_vm2, %v2486_v48, %v2490_v27  ;;  %v8849_v50 = vld [vmem:[%s14835_s0 + $0x7c] sm:$0xf]  ;;  %v2499_v28 = vor.u32 %v2498_v11, %v2495_v6  ;;  %v1012_v63 = vshll.u32 %v384_v23, 16  ;;  %v1018_v40 = vshll.u32 %v385_v49, 16  ;;  %v8720_v27 = vld [vmem:[%s14835_s0 + $0x78] sm:$0xf] }
  0xea   :  { %7215 = vmatmul.mubr.bf16.gmra.mrb[20].mxu0 %v11958_v34  ;;  %6772 = vmatprep.mubr.bf16.mxu1 %v11991_v4  ;;  %v10193_v34 = vld [vmem:[%s14835_s0 + $0x120] sm:$0xff]   ;;  %v12090_v4 = vcombine.low %v2481_v56, %v2491_v17  ;;  %v1022_v18 = vshrl.u32 %v385_v49, 16  ;;  %v1028_v45 = vshll.u32 %v386_v31, 16  ;;  %v8926_v20 = vrot.slane %v8848_v58, 9  ;;  %v389_v49 = vld [vmem:[%s14835_s0 + $0x158] sm:$0x1] }
  0xeb   :  { %7222 = vmatprep.mubr.bf16.mxu0 %v8955_v41  ;;  %7452 = vmatpush1.bf16.msra.mxu0 %v10215_v3  ;;  %v2502_v41 = vshll.u32 %v8718_v13, 16  ;;  %v2500_v53 = vrot.slane %v2499_v28, 4  ;;  %v1011_v1 = vrot.slane %v1009_v19, 4  ;;  %v1014_v14 = vrot.slane %v1012_v63, 5  ;;  %v8722_v13 = vld [vmem:[%s14835_s0 + $0x80] sm:$0x1] }
  0xec   :  { %7453 = vmatprep.subr.bf16.mxu0 %v10281_v0  ;;  %v1020_v24 = vrot.slane %v1018_v40, 5  ;;  %v1024_v48 = vrot.slane %v1022_v18, 4  ;;  %v1030_v12 = vrot.slane %v1028_v45, 5  ;;  %v3485_v25 = vrot.slane %v8849_v50, 5  ;;  %v10218_v6 = vld [vmem:[%s14834_s1 + $0x1d8] sm:$0xff]  }
  0xed   :  { %v2504_v36 = vrot.slane %v2502_v41, 5  ;;  %v3488_v8 = vrot.slane %v8850_v46, 5  ;;  %v2517_v47 = vshrl.u32 %v8720_v27, 16  ;;  %v2520_v60 = vshll.u32 %v8720_v27, 16  ;;  %v388_v41 = vld [vmem:[%s14835_s0 + $0x154] sm:$0xf] }
  0xee   :  { %v1025_v57 = vor.u32 %v1024_v48, %v1020_v24  ;;  %v3487_v29 = vrot.slane %v3485_v25, 4  ;;  %v2526_v15 = vshll.u32 %v8721_v2, 16  ;;  %v2530_v54 = vshrl.u32 %v8721_v2, 16  ;;  %v8853_v50 = vld [vmem:[%s14835_s0 + $0x8c] sm:$0x1] }
  0xef   :  { %v2509_v42 = vor.u32 %v2508_v39, %v2504_v36  ;;  %v2519_v17 = vrot.slane %v2517_v47, 4  ;;  %v2522_v51 = vrot.slane %v2520_v60, 5  ;;  %v2536_v33 = vshll.u32 %v8722_v13, 16  ;;  %7454 = vmatpush1.bf16.msra.mxu0 %v10218_v6 }
  0xf0   :  { %v1026_v26 = vrot.slane %v1025_v57, 4  ;;  %v2528_v43 = vrot.slane %v2526_v15, 5  ;;  %v2532_v62 = vrot.slane %v2530_v54, 4  ;;  %v1033_v31 = vshrl.u32 %v387_v10, 16  ;;  %7455 = vmatprep.subr.bf16.mxu0 %v10281_v0  ;;  %v392_v15 = vld [vmem:[%s14835_s0 + $0x164] sm:$0x1] }
  0xf1   :  { %6773 = vmatmul.mubr.bf16.gmra.mrb[88].mxu1 %v10193_v34  ;;  %v2510_v22 = vrot.slane %v2509_v42, 4  ;;  %v12157_v34 = vsel %vm10531_vm5, %v3487_v29, %v3488_v8  ;;  %v2523_v58 = vor.u32 %v2522_v51, %v2519_v17  ;;  %v1036_v39 = vshll.u32 %v387_v10, 16  ;;  %v8854_v54 = vld [vmem:[%s14835_s0 + $0x90] sm:$0xe] }
  0xf2   :  { %7223 = vmatmul.mubr.bf16.gmra.mrb[24].mxu0 %v12033_v52  ;;  %6780 = vmatprep.mubr.bf16.mxu1 %v12054_v5  ;;  %v2505_v52 = vsel %vm10438_vm2, %v2500_v53, %v2504_v36  ;;  %v1015_v5 = vor.u32 %v1014_v14, %v1011_v1  ;;  %v1031_v7 = vsel %vm10438_vm2, %v1026_v26, %v1030_v12  ;;  %v2538_v36 = vrot.slane %v2536_v33, 5 }
  0xf3   :  { %7230 = vmatprep.mubr.bf16.mxu0 %v8956_v21  ;;  %v2515_v32 = vsel %vm10438_vm2, %v2510_v22, %v2514_v59  ;;  %v12145_v21 = vsel %vm10531_vm5, %v8926_v20, %v3485_v25  ;;  %v8852_v59 = vld [vmem:[%s14835_s0 + $0x88] sm:$0xf]  ;;  %v1035_v28 = vrot.slane %v1033_v31, 4  ;;  %v1042_v19 = vshll.u32 %v388_v41, 16  ;;  %v8725_v22 = vld [vmem:[%s14835_s0 + $0x8c] sm:$0x1] }
  0xf4   :  { %v12150_v3 = vcombine.low %v2505_v52, %v2515_v32  ;;  %v1016_v56 = vrot.slane %v1015_v5, 4  ;;  %v8958_v37 = vcombine.low %v12145_v21, %v12157_v34  ;;  %v1046_v63 = vshrl.u32 %v388_v41, 16  ;;  %v8855_v41 = vld [vmem:[%s14835_s0 + $0x94] sm:$0xf]  ;;  %v8856_v31 = vld [vmem:[%s14835_s0 + $0x98] sm:$0x1] }
  0xf5   :  { %v2524_v40 = vrot.slane %v2523_v58, 4  ;;  %v1038_v46 = vrot.slane %v1036_v39, 5  ;;  %v1052_v42 = vshll.u32 %v389_v49, 16  ;;  %v8927_v18 = vrot.slane %v8851_v55, 9  ;;  %v10198_v21 = vld [vmem:[%s14835_s0 + $0x144] sm:$0xff]  }
  0xf6   :  { %v1021_v23 = vsel %vm10438_vm2, %v1016_v56, %v1020_v24  ;;  %v1044_v20 = vrot.slane %v1042_v19, 5  ;;  %v1048_v27 = vrot.slane %v1046_v63, 4  ;;  %v3492_v35 = vrot.slane %v8852_v59, 5  ;;  %v8724_v24 = vld [vmem:[%s14835_s0 + $0x88] sm:$0xf] }
  0xf7   :  { %v8526_v11 = vcombine.low %v1021_v23, %v1031_v7  ;;  %v1039_v53 = vor.u32 %v1038_v46, %v1035_v28  ;;  %v1054_v1 = vrot.slane %v1052_v42, 5  ;;  %v3495_v14 = vrot.slane %v8853_v50, 5  ;;  %v391_v56 = vld [vmem:[%s14835_s0 + $0x160] sm:$0xf]  ;;  %v8726_v59 = vld [vmem:[%s14835_s0 + $0x90] sm:$0xf] }
  0xf8   :  { %v1049_v12 = vor.u32 %v1048_v27, %v1044_v20  ;;  %v12206_v25 = vsel %vm10531_vm5, %v8927_v18, %v3492_v35  ;;  %v3494_v2 = vrot.slane %v3492_v35, 4  ;;  %v2541_v8 = vshrl.u32 %v8723_v9, 16  ;;  %v8727_v42 = vld [vmem:[%s14835_s0 + $0x94] sm:$0xf]  ;;  %v8728_v27 = vld [vmem:[%s14835_s0 + $0x98] sm:$0x1] }
  0xf9   :  { %6781 = vmatmul.mubr.bf16.gmra.mrb[92].mxu1 %v10195_v61  ;;  %v1040_v5 = vrot.slane %v1039_v53, 4  ;;  %v2544_v47 = vshll.u32 %v8723_v9, 16  ;;  %v390_v61 = vld [vmem:[%s14835_s0 + $0x15c] sm:$0xf]  ;;  %v2550_v29 = vshll.u32 %v8724_v24, 16  ;;  %v2554_v13 = vshrl.u32 %v8724_v24, 16 }
  0xfa   :  { %7231 = vmatmul.mubr.bf16.gmra.mrb[28].mxu0 %v12090_v4  ;;  %6788 = vmatprep.mubr.bf16.mxu1 %v8525_v44  ;;  %v10196_v4 = vld [vmem:[%s14835_s0 + $0x138] sm:$0xff]   ;;  %v2533_v44 = vor.u32 %v2532_v62, %v2528_v43  ;;  %v1050_v32 = vrot.slane %v1049_v12, 4  ;;  %v3496_v57 = vsel %vm10531_vm5, %v3494_v2, %v3495_v14  ;;  %v2543_v10 = vrot.slane %v2541_v8, 4  ;;  %v393_v14 = vld [vmem:[%s14835_s0 + $0x168] sm:$0xf] }
  0xfb   :  { %7238 = vmatprep.mubr.bf16.mxu0 %v8957_v16  ;;  %v2529_v16 = vsel %vm10438_vm2, %v2524_v40, %v2528_v43  ;;  %v1045_v17 = vsel %vm10438_vm2, %v1040_v5, %v1044_v20  ;;  %v8959_v60 = vcombine.low %v12206_v25, %v3496_v57  ;;  %v2546_v26 = vrot.slane %v2544_v47, 5  ;;  %v394_v24 = vld [vmem:[%s14835_s0 + $0x16c] sm:$0xf]  ;;  %v8857_v5 = vld [vmem:[%s14835_s0 + $0x9c] sm:$0xe] }
  0xfc   :  { %v2534_v45 = vrot.slane %v2533_v44, 4  ;;  %v2552_v23 = vrot.slane %v2550_v29, 5  ;;  %v2556_v51 = vrot.slane %v2554_v13, 4  ;;  %v2560_v33 = vshll.u32 %v8725_v22, 16  ;;  %v10199_v22 = vld [vmem:[%s14835_s0 + $0x150] sm:$0xff]  }
  0xfd   :  { %v2547_v7 = vor.u32 %v2546_v26, %v2543_v10  ;;  %v1057_v43 = vshrl.u32 %v390_v61, 16  ;;  %v1060_v62 = vshll.u32 %v390_v61, 16  ;;  %v1066_v55 = vshll.u32 %v391_v56, 16 }
  0xfe   :  { %v2539_v48 = vsel %vm10438_vm2, %v2534_v45, %v2538_v36  ;;  %v2557_v34 = vor.u32 %v2556_v51, %v2552_v23  ;;  %v1070_v6 = vshrl.u32 %v391_v56, 16  ;;  %v1076_v39 = vshll.u32 %v392_v15, 16 }
  0xff   :  { %v8798_v52 = vcombine.low %v2529_v16, %v2539_v48  ;;  %v1059_v58 = vrot.slane %v1057_v43, 4  ;;  %v1062_v36 = vrot.slane %v1060_v62, 5  ;;  %v8928_v28 = vrot.slane %v8854_v54, 9 }
 0x100   :  { %v2558_v50 = vrot.slane %v2557_v34, 4  ;;  %v1072_v44 = vrot.slane %v1070_v6, 4  ;;  %v1078_v40 = vrot.slane %v1076_v39, 5  ;;  %v3499_v46 = vrot.slane %v8855_v41, 5 }
 0x101   :  { %6789 = vmatmul.mubr.bf16.gmra.mrb[96].mxu1 %v10196_v4  ;;  %v1068_v4 = vrot.slane %v1066_v55, 5  ;;  %v1063_v63 = vor.u32 %v1062_v36, %v1059_v58  ;;  %v3502_v20 = vrot.slane %v8856_v31, 5  ;;  %v2565_v35 = vshrl.u32 %v8726_v59, 16 }
 0x102   :  { %7239 = vmatmul.mubr.bf16.gmra.mrb[32].mxu0 %v12150_v3  ;;  %6796 = vmatprep.mubr.bf16.mxu1 %v8526_v11  ;;  %v1055_v3 = vsel %vm10438_vm2, %v1050_v32, %v1054_v1  ;;  %v2548_v11 = vrot.slane %v2547_v7, 4  ;;  %v3500_v53 = vsel %vm10531_vm5, %v8928_v28, %v3499_v46  ;;  %v3501_v1 = vrot.slane %v3499_v46, 4 }
 0x103   :  { %7246 = vmatprep.mubr.bf16.mxu0 %v8958_v37  ;;  %v8527_v49 = vcombine.low %v1045_v17, %v1055_v3  ;;  %v2562_v37 = vrot.slane %v2560_v33, 5  ;;  %v1073_v45 = vor.u32 %v1072_v44, %v1068_v4  ;;  %v1064_v16 = vrot.slane %v1063_v63, 4  ;;  %v8858_v17 = vld [vmem:[%s14835_s0 + $0xa0] sm:$0xf]  ;;  %v8729_v3 = vld [vmem:[%s14835_s0 + $0x9c] sm:$0xf] }
 0x104   :  { %v2553_v19 = vsel %vm10438_vm2, %v2548_v11, %v2552_v23  ;;  %v2567_v12 = vrot.slane %v2565_v35, 4  ;;  %v2568_v25 = vshll.u32 %v8726_v59, 16  ;;  %v2574_v2 = vshll.u32 %v8727_v42, 16  ;;  %v10221_v23 = vld [vmem:[%s14834_s1 + $0x1e0] sm:$0xff]  }
 0x105   :  { %v2563_v18 = vsel %vm10438_vm2, %v2558_v50, %v2562_v37  ;;  %v1074_v48 = vrot.slane %v1073_v45, 4  ;;  %v1069_v8 = vsel %vm10438_vm2, %v1064_v16, %v1068_v4  ;;  %v3503_v47 = vsel %vm10531_vm5, %v3501_v1, %v3502_v20  ;;  %7456 = vmatpush1.bf16.msra.mxu0 %v10221_v23  ;;  %v8730_v4 = vld [vmem:[%s14835_s0 + $0xa0] sm:$0xf]  ;;  %v8731_v44 = vld [vmem:[%s14835_s0 + $0xa4] sm:$0x1] }
 0x106   :  { %v8799_v9 = vcombine.low %v2553_v19, %v2563_v18  ;;  %v2578_v61 = vshrl.u32 %v8727_v42, 16  ;;  %v2584_v32 = vshll.u32 %v8728_v27, 16  ;;  %v8960_v29 = vcombine.low %v3500_v53, %v3503_v47  ;;  %7457 = vmatprep.subr.bf16.mxu0 %v10281_v0  ;;  %v396_v42 = vld [vmem:[%s14835_s0 + $0x174] sm:$0xf]  ;;  %v397_v18 = vld [vmem:[%s14835_s0 + $0x178] sm:$0xf] }
 0x107   :  { %v1079_v57 = vsel %vm10438_vm2, %v1074_v48, %v1078_v40  ;;  %v2570_v13 = vrot.slane %v2568_v25, 5  ;;  %v2576_v56 = vrot.slane %v2574_v2, 5  ;;  %v1081_v54 = vshrl.u32 %v393_v14, 16  ;;  %v10201_v45 = vld [vmem:[%s14835_s0 + $0x15c] sm:$0xff]   ;;  %v8860_v2 = vld [vmem:[%s14835_s0 + $0xa8] sm:$0xe] }
 0x108   :  { %v8528_v10 = vcombine.low %v1069_v8, %v1079_v57  ;;  %v2580_v26 = vrot.slane %v2578_v61, 4  ;;  %v2586_v15 = vrot.slane %v2584_v32, 5  ;;  %v1084_v33 = vshll.u32 %v393_v14, 16  ;;  %v398_v25 = vld [vmem:[%s14835_s0 + $0x17c] sm:$0x1] }
 0x109   :  { %6797 = vmatmul.mubr.bf16.gmra.mrb[100].mxu1 %v10198_v21  ;;  %v2571_v51 = vor.u32 %v2570_v13, %v2567_v12  ;;  %v1090_v41 = vshll.u32 %v394_v24, 16  ;;  %v1083_v43 = vrot.slane %v1081_v54, 4  ;;  %v8929_v31 = vrot.slane %v8857_v5, 9  ;;  %v8861_v61 = vld [vmem:[%s14835_s0 + $0xac] sm:$0xf] }
 0x10a   :  { %7247 = vmatmul.mubr.bf16.gmra.mrb[36].mxu0 %v8798_v52  ;;  %6804 = vmatprep.mubr.bf16.mxu1 %v8527_v49  ;;  %v395_v52 = vld [vmem:[%s14835_s0 + $0x170] sm:$0x1]  ;;  %v1094_v49 = vshrl.u32 %v394_v24, 16  ;;  %v2581_v7 = vor.u32 %v2580_v26, %v2576_v56  ;;  %v1086_v34 = vrot.slane %v1084_v33, 5  ;;  %v3506_v58 = vrot.slane %v8858_v17, 5 }
 0x10b   :  { %7254 = vmatprep.mubr.bf16.mxu0 %v8959_v60  ;;  %v8859_v60 = vld [vmem:[%s14835_s0 + $0xa4] sm:$0x1]  ;;  %v1100_v62 = vshll.u32 %v395_v52, 16  ;;  %v2572_v21 = vrot.slane %v2571_v51, 4  ;;  %v1092_v37 = vrot.slane %v1090_v41, 5  ;;  %v2589_v28 = vshrl.u32 %v8729_v3, 16 }
 0x10c   :  { %v1096_v55 = vrot.slane %v1094_v49, 4  ;;  %v2582_v6 = vrot.slane %v2581_v7, 4  ;;  %v3509_v36 = vrot.slane %v8859_v60, 5  ;;  %v1087_v59 = vor.u32 %v1086_v34, %v1083_v43  ;;  %v8862_v32 = vld [vmem:[%s14835_s0 + $0xb0] sm:$0x1] }
 0x10d   :  { %v1102_v11 = vrot.slane %v1100_v62, 5  ;;  %v2577_v39 = vsel %vm10438_vm2, %v2572_v21, %v2576_v56  ;;  %v3507_v63 = vsel %vm10531_vm5, %v8929_v31, %v3506_v58  ;;  %v3508_v40 = vrot.slane %v3506_v58, 4  ;;  %v8733_v41 = vld [vmem:[%s14835_s0 + $0xac] sm:$0xf] }
 0x10e   :  { %v1097_v50 = vor.u32 %v1096_v55, %v1092_v37  ;;  %v2587_v19 = vsel %vm10438_vm2, %v2582_v6, %v2586_v15  ;;  %v2592_v46 = vshll.u32 %v8729_v3, 16  ;;  %v1088_v27 = vrot.slane %v1087_v59, 4  ;;  %v8732_v15 = vld [vmem:[%s14835_s0 + $0xa8] sm:$0xf] }
 0x10f   :  { %v8800_v20 = vcombine.low %v2577_v39, %v2587_v19  ;;  %v3510_v16 = vsel %vm10531_vm5, %v3508_v40, %v3509_v36  ;;  %v2598_v1 = vshll.u32 %v8730_v4, 16  ;;  %v2602_v14 = vshrl.u32 %v8730_v4, 16  ;;  %v10224_v31 = vld [vmem:[%s14834_s1 + $0x1e8] sm:$0xff]   ;;  %v8734_v39 = vld [vmem:[%s14835_s0 + $0xb0] sm:$0x1] }
 0x110   :  { %v1098_v35 = vrot.slane %v1097_v50, 4  ;;  %v2594_v53 = vrot.slane %v2592_v46, 5  ;;  %v1093_v24 = vsel %vm10438_vm2, %v1088_v27, %v1092_v37  ;;  %v8961_v48 = vcombine.low %v3507_v63, %v3510_v16  ;;  %v10202_v21 = vld [vmem:[%s14835_s0 + $0x168] sm:$0xff]   ;;  %7458 = vmatpush1.bf16.msra.mxu0 %v10224_v31  ;;  %v399_v63 = vld [vmem:[%s14835_s0 + $0x180] sm:$0xf] }
 0x111   :  { %6805 = vmatmul.mubr.bf16.gmra.mrb[104].mxu1 %v10199_v22  ;;  %v2608_v12 = vshll.u32 %v8731_v44, 16  ;;  %v2600_v8 = vrot.slane %v2598_v1, 5  ;;  %v2604_v47 = vrot.slane %v2602_v14, 4  ;;  %v1108_v13 = vshll.u32 %v396_v42, 16  ;;  %v400_v40 = vld [vmem:[%s14835_s0 + $0x184] sm:$0xf]  ;;  %7459 = vmatprep.subr.bf16.mxu0 %v10281_v0 }
 0x112   :  { %7255 = vmatmul.mubr.bf16.gmra.mrb[40].mxu0 %v8799_v9  ;;  %6812 = vmatprep.mubr.bf16.mxu1 %v8528_v10  ;;  %v2591_v9 = vrot.slane %v2589_v28, 4  ;;  %v1103_v22 = vsel %vm10438_vm2, %v1098_v35, %v1102_v11  ;;  %v1114_v56 = vshll.u32 %v397_v18, 16  ;;  %v1118_v10 = vshrl.u32 %v397_v18, 16  ;;  %v8863_v27 = vld [vmem:[%s14835_s0 + $0xb4] sm:$0xe] }
 0x113   :  { %7262 = vmatprep.mubr.bf16.mxu0 %v8960_v29  ;;  %v8529_v52 = vcombine.low %v1093_v24, %v1103_v22  ;;  %v2610_v57 = vrot.slane %v2608_v12, 5  ;;  %v1105_v29 = vshrl.u32 %v396_v42, 16  ;;  %v2605_v60 = vor.u32 %v2604_v47, %v2600_v8 }
 0x114   :  { %v2595_v5 = vor.u32 %v2594_v53, %v2591_v9  ;;  %v1124_v26 = vshll.u32 %v398_v25, 16  ;;  %v12331_v54 = vpop.f32.mrb[0].mxu1  ;;  %v1110_v23 = vrot.slane %v1108_v13, 5  ;;  %v1116_v51 = vrot.slane %v1114_v56, 5  ;;  %v10204_v13 = vld [vmem:[%s14835_s0 + $0x174] sm:$0xff]  }
 0x115   :  { %v1107_v3 = vrot.slane %v1105_v29, 4  ;;  %v8930_v33 = vrot.slane %v8860_v2, 9  ;;  %v2606_v7 = vrot.slane %v2605_v60, 4  ;;  %v1120_v43 = vrot.slane %v1118_v10, 4  ;;  %v6600_v11 = vpop.f32.mrb[1].mxu1 }
 0x116   :  { %v2596_v17 = vrot.slane %v2595_v5, 4  ;;  %v1126_v62 = vrot.slane %v1124_v26, 5  ;;  %v3513_v37 = vrot.slane %v8861_v61, 5  ;;  %v3516_v55 = vrot.slane %v8862_v32, 5  ;;  %v8864_v5 = vld [vmem:[%s14835_s0 + $0xb8] sm:$0xf] }
 0x117   :  { %v1111_v34 = vor.u32 %v1110_v23, %v1107_v3  ;;  %v2613_v6 = vshrl.u32 %v8732_v15, 16  ;;  %v2611_v58 = vsel %vm10438_vm2, %v2606_v7, %v2610_v57  ;;  %v1121_v36 = vor.u32 %v1120_v43, %v1116_v51  ;;  %v8865_v29 = vld [vmem:[%s14835_s0 + $0xbc] sm:$0x1]  ;;  %v8735_v26 = vld [vmem:[%s14835_s0 + $0xb4] sm:$0xf] }
 0x118   :  { %v2601_v49 = vsel %vm10438_vm2, %v2596_v17, %v2600_v8  ;;  %v2616_v59 = vshll.u32 %v8732_v15, 16  ;;  %v2622_v50 = vshll.u32 %v8733_v41, 16  ;;  %v3514_v28 = vsel %vm10531_vm5, %v8930_v33, %v3513_v37  ;;  %v8736_v33 = vld [vmem:[%s14835_s0 + $0xb8] sm:$0xf] }
 0x119   :  { %6813 = vmatmul.mubr.bf16.gmra.mrb[108].mxu1 %v10201_v45  ;;  %v8801_v4 = vcombine.low %v2601_v49, %v2611_v58  ;;  %v1112_v44 = vrot.slane %v1111_v34, 4  ;;  %v3515_v19 = vrot.slane %v3513_v37, 4  ;;  %v1122_v46 = vrot.slane %v1121_v36, 4 }
 0x11a   :  { %7263 = vmatmul.mubr.bf16.gmra.mrb[44].mxu0 %v8800_v20  ;;  %6820 = vmatprep.mubr.bf16.mxu1 %v8529_v52  ;;  %v2615_v42 = vrot.slane %v2613_v6, 4  ;;  %v2618_v18 = vrot.slane %v2616_v59, 5  ;;  %v2624_v45 = vrot.slane %v2622_v50, 5  ;;  %v401_v20 = vld [vmem:[%s14835_s0 + $0x188] sm:$0x1]  ;;  %v2626_v16 = vshrl.u32 %v8733_v41, 16 }
 0x11b   :  { %7270 = vmatprep.mubr.bf16.mxu0 %v8961_v48  ;;  %v1117_v35 = vsel %vm10438_vm2, %v1112_v44, %v1116_v51  ;;  %v3517_v9 = vsel %vm10531_vm5, %v3515_v19, %v3516_v55  ;;  %v2632_v53 = vshll.u32 %v8734_v39, 16  ;;  %v1127_v1 = vsel %vm10438_vm2, %v1122_v46, %v1126_v62  ;;  %v12370_v48 = vpop.f32.mrb[2].mxu1  ;;  %v8737_v55 = vld [vmem:[%s14835_s0 + $0xbc] sm:$0x1]  ;;  %v402_v59 = vld [vmem:[%s14835_s0 + $0x18c] sm:$0xf] }
 0x11c   :  { %v8962_v14 = vcombine.low %v3514_v28, %v3517_v9  ;;  %v2619_v24 = vor.u32 %v2618_v18, %v2615_v42  ;;  %v1129_v22 = vshrl.u32 %v399_v63, 16  ;;  %v8530_v12 = vcombine.low %v1117_v35, %v1127_v1  ;;  %v6603_v8 = vpop.f32.mrb[3].mxu1  ;;  %v10205_v42 = vld [vmem:[%s14835_s0 + $0x180] sm:$0xff]   ;;  %v404_v9 = vld [vmem:[%s14835_s0 + $0x194] sm:$0x1] }
 0x11d   :  { %v2628_v25 = vrot.slane %v2626_v16, 4  ;;  %v2634_v2 = vrot.slane %v2632_v53, 5  ;;  %v1132_v52 = vshll.u32 %v399_v63, 16  ;;  %v1138_v32 = vshll.u32 %v400_v40, 16  ;;  %v12389_v41 = vpop.f32.mrb[4].mxu1 }
 0x11e   :  { %v2620_v47 = vrot.slane %v2619_v24, 4  ;;  %v1131_v61 = vrot.slane %v1129_v22, 4  ;;  %v1142_v57 = vshrl.u32 %v400_v40, 16  ;;  %v1148_v60 = vshll.u32 %v401_v20, 16  ;;  %v6608_v31 = vpop.f32.mrb[5].mxu1 }
 0x11f   :  { %v2629_v56 = vor.u32 %v2628_v25, %v2624_v45  ;;  %v1134_v17 = vrot.slane %v1132_v52, 5  ;;  %v8931_v10 = vrot.slane %v8863_v27, 9  ;;  %v1140_v3 = vrot.slane %v1138_v32, 5  ;;  %v12401_v50 = vpop.f32.mrb[6].mxu1  ;;  %v403_v63 = vld [vmem:[%s14835_s0 + $0x190] sm:$0xf] }
 0x120   :  { %v2625_v15 = vsel %vm10438_vm2, %v2620_v47, %v2624_v45  ;;  %v1144_v23 = vrot.slane %v1142_v57, 4  ;;  %v3520_v51 = vrot.slane %v8864_v5, 5  ;;  %v1150_v43 = vrot.slane %v1148_v60, 5  ;;  %v6611_v53 = vpop.f32.mrb[7].mxu1  ;;  %v8867_v25 = vld [vmem:[%s14835_s0 + $0xc4] sm:$0xf] }
 0x121   :  { %6821 = vmatmul.mubr.bf16.gmra.mrb[112].mxu1 %v10202_v21  ;;  %v2630_v49 = vrot.slane %v2629_v56, 4  ;;  %v1135_v7 = vor.u32 %v1134_v17, %v1131_v61  ;;  %v3523_v62 = vrot.slane %v8865_v29, 5  ;;  %v2637_v6 = vshrl.u32 %v8735_v26, 16  ;;  %v8868_v47 = vld [vmem:[%s14835_s0 + $0xc8] sm:$0x1] }
 0x122   :  { %7271 = vmatmul.mubr.bf16.gmra.mrb[48].mxu0 %v8801_v4  ;;  %6828 = vmatprep.mubr.bf16.mxu1 %v8530_v12  ;;  %v1145_v21 = vor.u32 %v1144_v23, %v1140_v3  ;;  %v3521_v34 = vsel %vm10531_vm5, %v8931_v10, %v3520_v51  ;;  %v3522_v37 = vrot.slane %v3520_v51, 4  ;;  %v2640_v36 = vshll.u32 %v8735_v26, 16  ;;  %v8866_v12 = vld [vmem:[%s14835_s0 + $0xc0] sm:$0xe]  ;;  %v8739_v26 = vld [vmem:[%s14835_s0 + $0xc4] sm:$0xf] }
 0x123   :  { %7278 = vmatprep.mubr.bf16.mxu0 %v8962_v14  ;;  %v2635_v11 = vsel %vm10438_vm2, %v2630_v49, %v2634_v2  ;;  %v1136_v58 = vrot.slane %v1135_v7, 4  ;;  %v2646_v39 = vshll.u32 %v8736_v33, 16  ;;  %v2639_v19 = vrot.slane %v2637_v6, 4  ;;  %v8869_v31 = vld [vmem:[%s14835_s0 + $0xe4] sm:$0xe] }
 0x124   :  { %v8802_v4 = vcombine.low %v2625_v15, %v2635_v11  ;;  %v1146_v44 = vrot.slane %v1145_v21, 4  ;;  %v3524_v28 = vsel %vm10531_vm5, %v3522_v37, %v3523_v62  ;;  %v2642_v18 = vrot.slane %v2640_v36, 5  ;;  %v8740_v62 = vld [vmem:[%s14835_s0 + $0xc8] sm:$0x1] }
 0x125   :  { %v1141_v40 = vsel %vm10438_vm2, %v1136_v58, %v1140_v3  ;;  %v8963_v46 = vcombine.low %v3521_v34, %v3524_v28  ;;  %v2648_v45 = vrot.slane %v2646_v39, 5  ;;  %v2650_v27 = vshrl.u32 %v8736_v33, 16  ;;  %v8870_v21 = vld [vmem:[%s14835_s0 + $0xe8] sm:$0xf]  ;;  %v10207_v39 = vld [vmem:[%s14835_s0 + $0x18c] sm:$0xff]  }
 0x126   :  { %v1151_v20 = vsel %vm10438_vm2, %v1146_v44, %v1150_v43  ;;  %v2656_v35 = vshll.u32 %v8737_v55, 16  ;;  %v1153_v16 = vshrl.u32 %v402_v59, 16  ;;  %v2643_v14 = vor.u32 %v2642_v18, %v2639_v19  ;;  %v12467_v18 = vpop.f32.mrb[8].mxu1 }
 0x127   :  { %v8531_v1 = vcombine.low %v1141_v40, %v1151_v20  ;;  %v1156_v24 = vshll.u32 %v402_v59, 16  ;;  %v1162_v22 = vshll.u32 %v403_v63, 16  ;;  %v2652_v2 = vrot.slane %v2650_v27, 4  ;;  %v10208_v40 = vld [vmem:[%s14835_s0 + $0xe4] sm:$0xff]  }
 0x128   :  { %v2658_v52 = vrot.slane %v2656_v35, 5  ;;  %v1155_v5 = vrot.slane %v1153_v16, 4  ;;  %v1166_v8 = vshrl.u32 %v403_v63, 16  ;;  %v2644_v61 = vrot.slane %v2643_v14, 4  ;;  %v10227_v16 = vld [vmem:[%s14834_s1 + $0x1f0] sm:$0xff]  }
 0x129   :  { %6829 = vmatmul.mubr.bf16.gmra.mrb[116].mxu1 %v10204_v13  ;;  %v1158_v32 = vrot.slane %v1156_v24, 5  ;;  %v1164_v57 = vrot.slane %v1162_v22, 5  ;;  %v1172_v29 = vshll.u32 %v404_v9, 16  ;;  %v8738_v13 = vld [vmem:[%s14835_s0 + $0xc0] sm:$0xf]  ;;  %v2653_v56 = vor.u32 %v2652_v2, %v2648_v45  ;;  %7460 = vmatpush1.bf16.msra.mxu0 %v10227_v16  ;;  %v10229_v16 = vld [vmem:[%s14834_s1 + $0x208] sm:$0xff]  }
 0x12a   :  { %7279 = vmatmul.mubr.bf16.gmra.mrb[52].mxu0 %v8802_v4  ;;  %6836 = vmatprep.mubr.bf16.mxu1 %v8531_v1  ;;  %v1168_v17 = vrot.slane %v1166_v8, 4  ;;  %v8932_v60 = vrot.slane %v8866_v12, 9  ;;  %v3527_v10 = vrot.slane %v8867_v25, 5  ;;  %v2649_v15 = vsel %vm10438_vm2, %v2644_v61, %v2648_v45  ;;  %v8871_v4 = vld [vmem:[%s14835_s0 + $0xec] sm:$0x1]  ;;  %v12483_v12 = vld [vmem:[%s14834_s1 + $0x200] sm:$0xff]  }
 0x12b   :  { %7286 = vmatprep.mubr.bf16.mxu0 %v8963_v46  ;;  %v1159_v3 = vor.u32 %v1158_v32, %v1155_v5  ;;  %v1174_v23 = vrot.slane %v1172_v29, 5  ;;  %v3530_v51 = vrot.slane %v8868_v47, 5  ;;  %v2654_v33 = vrot.slane %v2653_v56, 4  ;;  %v1384_v46 = vld [vmem:[%s14835_s0 + $0xd8] sm:$0xe]  ;;  %9527 = vmatprep.subr.bf16.mxu1 %v12483_v12  ;;  %v6616_v56 = vpop.f32.mrb[9].mxu1 }
 0x12c   :  { %v1169_v49 = vor.u32 %v1168_v17, %v1164_v57  ;;  %v3528_v7 = vsel %vm10531_vm5, %v8932_v60, %v3527_v10  ;;  %v3529_v43 = vrot.slane %v3527_v10, 4  ;;  %v2661_v37 = vshrl.u32 %v8738_v13, 16  ;;  %v1386_v9 = vld [vmem:[%s14835_s0 + $0xe0] sm:$0x1]  ;;  %v8741_v22 = vld [vmem:[%s14835_s0 + $0xe4] sm:$0xf]  ;;  %7461 = vmatprep.subr.bf16.mxu0 %v10281_v0 }
 0x12d   :  { %v1160_v34 = vrot.slane %v1159_v3, 4  ;;  %v2664_v55 = vshll.u32 %v8738_v13, 16  ;;  %v2670_v6 = vshll.u32 %v8739_v26, 16  ;;  %v2659_v11 = vsel %vm10438_vm2, %v2654_v33, %v2658_v52  ;;  %v8742_v8 = vld [vmem:[%s14835_s0 + $0xe8] sm:$0xf] }
 0x12e   :  { %v1170_v58 = vrot.slane %v1169_v49, 4  ;;  %v3531_v36 = vsel %vm10531_vm5, %v3529_v43, %v3530_v51  ;;  %v2674_v59 = vshrl.u32 %v8739_v26, 16  ;;  %v8803_v44 = vcombine.low %v2649_v15, %v2659_v11  ;;  %v8743_v29 = vld [vmem:[%s14835_s0 + $0xec] sm:$0x1]  ;;  %v8872_v13 = vld [vmem:[%s14835_s0 + $0xf0] sm:$0xe] }
 0x12f   :  { %v1165_v28 = vsel %vm10438_vm2, %v1160_v34, %v1164_v57  ;;  %v8964_v19 = vcombine.low %v3528_v7, %v3531_v36  ;;  %v2663_v63 = vrot.slane %v2661_v37, 4  ;;  %v2666_v20 = vrot.slane %v2664_v55, 5  ;;  %v8873_v15 = vld [vmem:[%s14835_s0 + $0xf4] sm:$0xf]  ;;  %v8874_v0 = vld [vmem:[%s14835_s0 + $0xf8] sm:$0x1] }
 0x130   :  { %v1175_v45 = vsel %vm10438_vm2, %v1170_v58, %v1174_v23  ;;  %v2672_v27 = vrot.slane %v2670_v6, 5  ;;  %v2676_v35 = vrot.slane %v2674_v59, 4  ;;  %v2680_v1 = vshll.u32 %v8740_v62, 16  ;;  %v1388_v11 = vld [vmem:[%s14835_s0 + $0xe8] sm:$0xf] }
 0x131   :  { %6837 = vmatmul.mubr.bf16.gmra.mrb[120].mxu1 %v10205_v42  ;;  %v1385_v42 = vld [vmem:[%s14835_s0 + $0xdc] sm:$0xf]  ;;  %v8532_v53 = vcombine.low %v1165_v28, %v1175_v45  ;;  %v8933_v14 = vrot.slane %v8869_v31, 9  ;;  %v3534_v24 = vrot.slane %v8870_v21, 5  ;;  %v2667_v25 = vor.u32 %v2666_v20, %v2663_v63  ;;  %v1387_v31 = vld [vmem:[%s14835_s0 + $0xe4] sm:$0xe] }
 0x132   :  { %7287 = vmatmul.mubr.bf16.gmra.mrb[56].mxu0 %v8803_v44  ;;  %v2677_v2 = vor.u32 %v2676_v35, %v2672_v27  ;;  %v3537_v52 = vrot.slane %v8871_v4, 5  ;;  %v8549_v5 = vrot.slane %v1384_v46, 9  ;;  %v2682_v47 = vrot.slane %v2680_v1, 5  ;;  %v12515_v21 = vpop.f32.mrb[10].mxu1  ;;  %v1389_v58 = vld [vmem:[%s14835_s0 + $0xec] sm:$0x1] }
 0x133   :  { %7294 = vmatprep.mubr.bf16.mxu0 %v8964_v19  ;;  %6844 = vmatprep.mubr.bf16.mxu1 %v8532_v53  ;;  %v3535_v61 = vsel %vm10531_vm5, %v8933_v14, %v3534_v24  ;;  %v3536_v32 = vrot.slane %v3534_v24, 4  ;;  %v1645_v57 = vrot.slane %v1385_v42, 5  ;;  %v2668_v17 = vrot.slane %v2667_v25, 4  ;;  %v8744_v44 = vld [vmem:[%s14835_s0 + $0xf0] sm:$0xf]  ;;  %v6619_v28 = vpop.f32.mrb[11].mxu1 }
 0x134   :  { %v2678_v60 = vrot.slane %v2677_v2, 4  ;;  %v1648_v10 = vrot.slane %v1386_v9, 5  ;;  %v2685_v26 = vshrl.u32 %v8741_v22, 16  ;;  %v2688_v33 = vshll.u32 %v8741_v22, 16  ;;  %v8745_v45 = vld [vmem:[%s14835_s0 + $0xf4] sm:$0xf] }
 0x135   :  { %v3538_v3 = vsel %vm10531_vm5, %v3536_v32, %v3537_v52  ;;  %v1646_v23 = vsel %vm10531_vm5, %v8549_v5, %v1645_v57  ;;  %v1647_v51 = vrot.slane %v1645_v57, 4  ;;  %v2673_v49 = vsel %vm10438_vm2, %v2668_v17, %v2672_v27  ;;  %v8746_v22 = vld [vmem:[%s14835_s0 + $0xf8] sm:$0x1]  ;;  %v8875_v25 = vld [vmem:[%s14835_s0 + $0xfc] sm:$0xe] }
 0x136   :  { %v2683_v7 = vsel %vm10438_vm2, %v2678_v60, %v2682_v47  ;;  %v8965_v43 = vcombine.low %v3535_v61, %v3538_v3  ;;  %v2687_v62 = vrot.slane %v2685_v26, 4  ;;  %v2690_v55 = vrot.slane %v2688_v33, 5  ;;  %v8876_v2 = vld [vmem:[%s14835_s0 + $0x100] sm:$0xf]  ;;  %v8877_v61 = vld [vmem:[%s14835_s0 + $0x104] sm:$0x1] }
 0x137   :  { %v8804_v34 = vcombine.low %v2673_v49, %v2683_v7  ;;  %v1649_v37 = vsel %vm10531_vm5, %v1647_v51, %v1648_v10  ;;  %v2694_v6 = vshll.u32 %v8742_v8, 16  ;;  %v2704_v59 = vshll.u32 %v8743_v29, 16  ;;  %v1390_v26 = vld [vmem:[%s14835_s0 + $0xf0] sm:$0xe]  ;;  %v10211_v33 = vld [vmem:[%s14835_s0 + $0xfc] sm:$0xff]   ;;  %v12569_v49 = vpop.f32.mrb[12].mxu1 }
 0x138   :  { %v8581_v36 = vcombine.low %v1646_v23, %v1649_v37  ;;  %v8934_v4 = vrot.slane %v8872_v13, 9  ;;  %v2691_v19 = vor.u32 %v2690_v55, %v2687_v62  ;;  %v3541_v46 = vrot.slane %v8873_v15, 5  ;;  %v8749_v28 = vld [vmem:[%s14835_s0 + $0x104] sm:$0x1] }
 0x139   :  { %6845 = vmatmul.mubr.bf16.gmra.mrb[124].mxu1 %v10207_v39  ;;  %v2698_v39 = vshrl.u32 %v8742_v8, 16  ;;  %v2696_v63 = vrot.slane %v2694_v6, 5  ;;  %v3544_v42 = vrot.slane %v8874_v0, 5  ;;  %v2706_v27 = vrot.slane %v2704_v59, 5 }
 0x13a   :  { %7013 = vmatprep.mubr.bf16.mxu1 %v10208_v40  ;;  %7295 = vmatmul.mubr.bf16.gmra.mrb[60].mxu0 %v8804_v34  ;;  %v10210_v40 = vld [vmem:[%s14835_s0 + $0xf0] sm:$0xff]   ;;  %v8550_v35 = vrot.slane %v1387_v31, 9  ;;  %v1652_v9 = vrot.slane %v1388_v11, 5  ;;  %v2692_v53 = vrot.slane %v2691_v19, 4  ;;  %v3542_v1 = vsel %vm10531_vm5, %v8934_v4, %v3541_v46  ;;  %v1392_v31 = vld [vmem:[%s14835_s0 + $0xf8] sm:$0x1] }
 0x13b   :  { %7302 = vmatprep.mubr.bf16.mxu0 %v8965_v43  ;;  %v2700_v20 = vrot.slane %v2698_v39, 4  ;;  %v3543_v14 = vrot.slane %v3541_v46, 4  ;;  %v1655_v24 = vrot.slane %v1389_v58, 5  ;;  %v2709_v47 = vshrl.u32 %v8744_v44, 16  ;;  %v10231_v34 = vld [vmem:[%s14834_s1 + $0x210] sm:$0xff]  }
 0x13c   :  { %v1653_v5 = vsel %vm10531_vm5, %v8550_v35, %v1652_v9  ;;  %v1654_v8 = vrot.slane %v1652_v9, 4  ;;  %v2697_v32 = vsel %vm10438_vm2, %v2692_v53, %v2696_v63  ;;  %v2712_v29 = vshll.u32 %v8744_v44, 16  ;;  %v8747_v58 = vld [vmem:[%s14835_s0 + $0xfc] sm:$0xf]  ;;  %v8878_v19 = vld [vmem:[%s14835_s0 + $0x108] sm:$0xe] }
 0x13d   :  { %v2701_v52 = vor.u32 %v2700_v20, %v2696_v63  ;;  %v3545_v57 = vsel %vm10531_vm5, %v3543_v14, %v3544_v42  ;;  %v2718_v13 = vshll.u32 %v8745_v45, 16  ;;  %v2711_v10 = vrot.slane %v2709_v47, 4  ;;  %v6624_v63 = vpop.f32.mrb[13].mxu1  ;;  %v8879_v20 = vld [vmem:[%s14835_s0 + $0x10c] sm:$0xf] }
 0x13e   :  { %v8966_v17 = vcombine.low %v3542_v1, %v3545_v57  ;;  %v1656_v60 = vsel %vm10531_vm5, %v1654_v8, %v1655_v24  ;;  %v2714_v3 = vrot.slane %v2712_v29, 5  ;;  %v2722_v51 = vshrl.u32 %v8745_v45, 16  ;;  %v8880_v1 = vld [vmem:[%s14835_s0 + $0x110] sm:$0x1] }
 0x13f   :  { %v2702_v56 = vrot.slane %v2701_v52, 4  ;;  %v8582_v15 = vcombine.low %v1653_v5, %v1656_v60  ;;  %v2720_v23 = vrot.slane %v2718_v13, 5  ;;  %v2728_v43 = vshll.u32 %v8746_v22, 16  ;;  %v1393_v52 = vld [vmem:[%s14835_s0 + $0xfc] sm:$0xe] }
 0x140   :  { %v8935_v62 = vrot.slane %v8875_v25, 9  ;;  %v3548_v0 = vrot.slane %v8876_v2, 5  ;;  %v2715_v55 = vor.u32 %v2714_v3, %v2711_v10  ;;  %v2724_v6 = vrot.slane %v2722_v51, 4  ;;  %v10232_v5 = vld [vmem:[%s14834_s1 + $0x218] sm:$0xff]   ;;  %v1394_v60 = vld [vmem:[%s14835_s0 + $0x100] sm:$0xf] }
 0x141   :  { %7014 = vmatmul.mubr.bf16.vlgmr.msra.gmra.mrb[64].mxu1 %v8581_v36  ;;  %v2707_v7 = vsel %vm10438_vm2, %v2702_v56, %v2706_v27  ;;  %v3551_v11 = vrot.slane %v8877_v61, 5  ;;  %v8748_v36 = vld [vmem:[%s14835_s0 + $0x100] sm:$0xf]  ;;  %v2730_v39 = vrot.slane %v2728_v43, 5  ;;  %v8551_v44 = vrot.slane %v1390_v26, 9  ;;  %v12598_v27 = vpop.f32.mrb[14].mxu1 }
 0x142   :  { %7021 = vmatprep.mubr.bf16.mxu1 %v10210_v40  ;;  %9528 = vmatpush3.bf16.msra.mxu1 %v12483_v12  ;;  %v1391_v12 = vld [vmem:[%s14835_s0 + $0xf4] sm:$0xf]  ;;  %v8805_v37 = vcombine.low %v2697_v32, %v2707_v7  ;;  %v12587_v59 = vsel %vm10531_vm5, %v8935_v62, %v3548_v0  ;;  %v3550_v4 = vrot.slane %v3548_v0, 4  ;;  %v2716_v40 = vrot.slane %v2715_v55, 4  ;;  %v6627_v14 = vpop.f32.mrb[15].mxu1  ;;  %v10213_v56 = vld [vmem:[%s14835_s0 + $0x108] sm:$0xff]  }
 0x143   :  { %9529 = vmatprep.subr.bf16.mxu1 %v10229_v16  ;;  %v2725_v46 = vor.u32 %v2724_v6, %v2720_v23  ;;  %v1659_v42 = vrot.slane %v1391_v12, 5  ;;  %v1662_v45 = vrot.slane %v1392_v31, 5  ;;  %v2733_v9 = vshrl.u32 %v8747_v58, 16  ;;  %v8750_v51 = vld [vmem:[%s14835_s0 + $0x108] sm:$0xf]  ;;  %v10234_v31 = vld [vmem:[%s14834_s1 + $0x1f8] sm:$0xff]  }
 0x144   :  { %7303 = vmatmul.mubr.bf16.gmra.mrb[64].mxu0 %v8805_v37  ;;  %v3552_v35 = vsel %vm10531_vm5, %v3550_v4, %v3551_v11  ;;  %v2742_v53 = vshll.u32 %v8748_v36, 16  ;;  %v2721_v24 = vsel %vm10438_vm2, %v2716_v40, %v2720_v23  ;;  %v2746_v29 = vshrl.u32 %v8748_v36, 16  ;;  %v1395_v23 = vld [vmem:[%s14835_s0 + $0x104] sm:$0x1]  ;;  %v8751_v0 = vld [vmem:[%s14835_s0 + $0x10c] sm:$0xf] }
 0x145   :  { %7310 = vmatprep.mubr.bf16.mxu0 %v8966_v17  ;;  %v2726_v22 = vrot.slane %v2725_v46, 4  ;;  %v8967_v25 = vcombine.low %v12587_v59, %v3552_v35  ;;  %v1660_v2 = vsel %vm10531_vm5, %v8551_v44, %v1659_v42  ;;  %v1661_v8 = vrot.slane %v1659_v42, 4  ;;  %v8752_v11 = vld [vmem:[%s14835_s0 + $0x110] sm:$0x1]  ;;  %v8881_v44 = vld [vmem:[%s14835_s0 + $0x114] sm:$0xe]  ;;  %7462 = vmatpush1.bf16.msra.mxu0 %v10234_v31 }
 0x146   :  { %9530 = vmatpush3.bf16.msra.mxu1 %v10229_v16  ;;  %v2736_v16 = vshll.u32 %v8747_v58, 16  ;;  %v2735_v47 = vrot.slane %v2733_v9, 4  ;;  %v12616_v32 = vrot.slane %v2742_v53, 5  ;;  %v2752_v13 = vshll.u32 %v8749_v28, 16  ;;  %v10235_v58 = vld [vmem:[%s14834_s1 + $0x220] sm:$0xff]  }
 0x147   :  { %9531 = vmatprep.subr.bf16.mxu1 %v10231_v34  ;;  %v2731_v57 = vsel %vm10438_vm2, %v2726_v22, %v2730_v39  ;;  %v8936_v17 = vrot.slane %v8878_v19, 9  ;;  %v1663_v26 = vsel %vm10531_vm5, %v1661_v8, %v1662_v45  ;;  %v3555_v3 = vrot.slane %v8879_v20, 5  ;;  %v8882_v42 = vld [vmem:[%s14835_s0 + $0x118] sm:$0xf]  ;;  %v8883_v45 = vld [vmem:[%s14835_s0 + $0x11c] sm:$0x1] }
 0x148   :  { %v2738_v61 = vrot.slane %v2736_v16, 5  ;;  %v8806_v10 = vcombine.low %v2721_v24, %v2731_v57  ;;  %v8583_v12 = vcombine.low %v1660_v2, %v1663_v26  ;;  %v2748_v7 = vrot.slane %v2746_v29, 4  ;;  %v1396_v20 = vld [vmem:[%s14835_s0 + $0x108] sm:$0xe]  ;;  %v1398_v14 = vld [vmem:[%s14835_s0 + $0x110] sm:$0x1] }
 0x149   :  { %7022 = vmatmul.mubr.bf16.gmra.mrb[68].mxu1 %v8582_v15  ;;  %v2754_v43 = vrot.slane %v2752_v13, 5  ;;  %v3558_v62 = vrot.slane %v8880_v1, 5  ;;  %v12644_v37 = vsel %vm10531_vm5, %v8936_v17, %v3555_v3  ;;  %v3557_v55 = vrot.slane %v3555_v3, 4  ;;  %v1397_v1 = vld [vmem:[%s14835_s0 + $0x10c] sm:$0xf] }
 0x14a   :  { %7029 = vmatprep.mubr.bf16.mxu1 %v10211_v33  ;;  %9532 = vmatpush3.bf16.msra.mxu1 %v10231_v34  ;;  %v2739_v15 = vor.u32 %v2738_v61, %v2735_v47  ;;  %v12634_v33 = vpop.f32.mrb[16].mxu1  ;;  %v8552_v6 = vrot.slane %v1393_v52, 9  ;;  %v2749_v36 = vor.u32 %v2748_v7, %v12616_v32  ;;  %v1666_v39 = vrot.slane %v1394_v60, 5  ;;  %v8753_v13 = vld [vmem:[%s14835_s0 + $0x114] sm:$0xf] }
 0x14b   :  { %9533 = vmatprep.subr.bf16.mxu1 %v10232_v5  ;;  %v1669_v59 = vrot.slane %v1395_v23, 5  ;;  %v2757_v4 = vshrl.u32 %v8750_v51, 16  ;;  %v6632_v28 = vpop.f32.mrb[17].mxu1  ;;  %v3559_v63 = vsel %vm10531_vm5, %v3557_v55, %v3558_v62  ;;  %v2760_v40 = vshll.u32 %v8750_v51, 16  ;;  %v10214_v60 = vld [vmem:[%s14835_s0 + $0x114] sm:$0xff]  }
 0x14c   :  { %v2740_v34 = vrot.slane %v2739_v15, 4  ;;  %7311 = vmatmul.mubr.bf16.gmra.mrb[68].mxu0 %v8806_v10  ;;  %v2766_v46 = vshll.u32 %v8751_v0, 16  ;;  %v2750_v35 = vrot.slane %v2749_v36, 4  ;;  %v8968_v9 = vcombine.low %v12644_v37, %v3559_v63  ;;  %v8754_v7 = vld [vmem:[%s14835_s0 + $0x118] sm:$0xf] }
 0x14d   :  { %7318 = vmatprep.mubr.bf16.mxu0 %v8967_v25  ;;  %v1667_v16 = vsel %vm10531_vm5, %v8552_v6, %v1666_v39  ;;  %v1668_v53 = vrot.slane %v1666_v39, 4  ;;  %v2759_v24 = vrot.slane %v2757_v4, 4  ;;  %v2762_v22 = vrot.slane %v2760_v40, 5  ;;  %v8755_v31 = vld [vmem:[%s14835_s0 + $0x11c] sm:$0x1]  ;;  %v10236_v6 = vld [vmem:[%s14834_s1 + $0x228] sm:$0xff]  }
 0x14e   :  { %9534 = vmatpush3.bf16.msra.mxu1 %v10232_v5  ;;  %v2745_v19 = vsel %vm10438_vm2, %v2740_v34, %v12616_v32  ;;  %v2768_v25 = vrot.slane %v2766_v46, 5  ;;  %v2770_v2 = vshrl.u32 %v8751_v0, 16  ;;  %v2755_v52 = vsel %vm10438_vm2, %v2750_v35, %v2754_v43  ;;  %v8884_v55 = vld [vmem:[%s14835_s0 + $0x120] sm:$0xe]  ;;  %v8886_v4 = vld [vmem:[%s14835_s0 + $0x128] sm:$0x1] }
 0x14f   :  { %9535 = vmatprep.subr.bf16.mxu1 %v10235_v58  ;;  %v1670_v5 = vsel %vm10531_vm5, %v1668_v53, %v1669_v59  ;;  %v2776_v8 = vshll.u32 %v8752_v11, 16  ;;  %v8937_v47 = vrot.slane %v8881_v44, 9  ;;  %v8807_v61 = vcombine.low %v2745_v19, %v2755_v52  ;;  %v8885_v59 = vld [vmem:[%s14835_s0 + $0x124] sm:$0xf]  ;;  %v1399_v40 = vld [vmem:[%s14835_s0 + $0x114] sm:$0xe] }
 0x150   :  { %v8584_v32 = vcombine.low %v1667_v16, %v1670_v5  ;;  %v2763_v57 = vor.u32 %v2762_v22, %v2759_v24  ;;  %v2772_v29 = vrot.slane %v2770_v2, 4  ;;  %v3562_v10 = vrot.slane %v8882_v42, 5  ;;  %v1400_v35 = vld [vmem:[%s14835_s0 + $0x118] sm:$0xf]  ;;  %v10216_v24 = vld [vmem:[%s14835_s0 + $0x120] sm:$0xff]   ;;  %v10238_v22 = vld [vmem:[%s14834_s1 + $0x230] sm:$0xff]  }
 0x151   :  { %7030 = vmatmul.mubr.bf16.gmra.mrb[72].mxu1 %v8583_v12  ;;  %v2778_v17 = vrot.slane %v2776_v8, 5  ;;  %v3565_v26 = vrot.slane %v8883_v45, 5  ;;  %v8553_v15 = vrot.slane %v1396_v20, 9  ;;  %v1673_v51 = vrot.slane %v1397_v1, 5  ;;  %v1401_v8 = vld [vmem:[%s14835_s0 + $0x11c] sm:$0x1] }
 0x152   :  { %7037 = vmatprep.mubr.bf16.mxu1 %v10213_v56  ;;  %9536 = vmatpush3.bf16.msra.mxu1 %v10235_v58  ;;  %v12686_v56 = vpop.f32.mrb[18].mxu1  ;;  %v2764_v3 = vrot.slane %v2763_v57, 4  ;;  %v2773_v23 = vor.u32 %v2772_v29, %v2768_v25  ;;  %v1676_v12 = vrot.slane %v1398_v14, 5  ;;  %v3563_v62 = vsel %vm10531_vm5, %v8937_v47, %v3562_v10  ;;  %v8756_v29 = vld [vmem:[%s14835_s0 + $0x120] sm:$0xf] }
 0x153   :  { %v6635_v43 = vpop.f32.mrb[19].mxu1  ;;  %v3564_v0 = vrot.slane %v3562_v10, 4  ;;  %v2781_v34 = vshrl.u32 %v8753_v13, 16  ;;  %v2784_v37 = vshll.u32 %v8753_v13, 16  ;;  %v1674_v36 = vsel %vm10531_vm5, %v8553_v15, %v1673_v51  ;;  %9537 = vmatprep.subr.bf16.mxu1 %v10236_v6  ;;  %v8758_v15 = vld [vmem:[%s14835_s0 + $0x128] sm:$0x1] }
 0x154   :  { %7319 = vmatmul.mubr.bf16.gmra.mrb[72].mxu0 %v8807_v61  ;;  %v2769_v11 = vsel %vm10438_vm2, %v2764_v3, %v2768_v25  ;;  %v2774_v58 = vrot.slane %v2773_v23, 4  ;;  %v1675_v39 = vrot.slane %v1673_v51, 4  ;;  %v2790_v63 = vshll.u32 %v8754_v7, 16  ;;  %v8888_v43 = vld [vmem:[%s14835_s0 + $0x130] sm:$0xf] }
 0x155   :  { %7326 = vmatprep.mubr.bf16.mxu0 %v8968_v9  ;;  %v3566_v44 = vsel %vm10531_vm5, %v3564_v0, %v3565_v26  ;;  %v2783_v28 = vrot.slane %v2781_v34, 4  ;;  %v2786_v19 = vrot.slane %v2784_v37, 5  ;;  %v2794_v20 = vshrl.u32 %v8754_v7, 16  ;;  %v12727_v9 = vpop.f32.mrb[20].mxu1  ;;  %v8757_v26 = vld [vmem:[%s14835_s0 + $0x124] sm:$0xf] }
 0x156   :  { %v2779_v46 = vsel %vm10438_vm2, %v2774_v58, %v2778_v17  ;;  %v8969_v42 = vcombine.low %v3563_v62, %v3566_v44  ;;  %v1677_v45 = vsel %vm10531_vm5, %v1675_v39, %v1676_v12  ;;  %9538 = vmatpush3.bf16.msra.mxu1 %v10236_v6  ;;  %v2792_v14 = vrot.slane %v2790_v63, 5  ;;  %v8887_v7 = vld [vmem:[%s14835_s0 + $0x12c] sm:$0xe]  ;;  %v8889_v62 = vld [vmem:[%s14835_s0 + $0x134] sm:$0x1] }
 0x157   :  { %v8808_v16 = vcombine.low %v2769_v11, %v2779_v46  ;;  %v8585_v53 = vcombine.low %v1674_v36, %v1677_v45  ;;  %v2787_v1 = vor.u32 %v2786_v19, %v2783_v28  ;;  %v2796_v25 = vrot.slane %v2794_v20, 4  ;;  %9539 = vmatprep.subr.bf16.mxu1 %v10238_v22  ;;  %v1403_v6 = vld [vmem:[%s14835_s0 + $0x124] sm:$0xf]  ;;  %v6640_v11 = vpop.f32.mrb[21].mxu1  ;;  %v10217_v20 = vld [vmem:[%s14835_s0 + $0x12c] sm:$0xff]  }
 0x158   :  { %v2800_v2 = vshll.u32 %v8755_v31, 16  ;;  %v8938_v52 = vrot.slane %v8884_v55, 9  ;;  %v3569_v5 = vrot.slane %v8885_v59, 5  ;;  %v3572_v61 = vrot.slane %v8886_v4, 5  ;;  %v1402_v55 = vld [vmem:[%s14835_s0 + $0x120] sm:$0xe] }
 0x159   :  { %7038 = vmatmul.mubr.bf16.gmra.mrb[76].mxu1 %v8584_v32  ;;  %v2788_v47 = vrot.slane %v2787_v1, 4  ;;  %v8554_v32 = vrot.slane %v1399_v40, 9  ;;  %v1680_v57 = vrot.slane %v1400_v35, 5  ;;  %v2797_v13 = vor.u32 %v2796_v25, %v2792_v14  ;;  %v1404_v4 = vld [vmem:[%s14835_s0 + $0x128] sm:$0x1]  ;;  %v12783_v35 = vpop.f32.mrb[22].mxu1 }
 0x15a   :  { %7045 = vmatprep.mubr.bf16.mxu1 %v10214_v60  ;;  %v2802_v17 = vrot.slane %v2800_v2, 5  ;;  %v12743_v60 = vsel %vm10531_vm5, %v8938_v52, %v3569_v5  ;;  %v3571_v10 = vrot.slane %v3569_v5, 4  ;;  %9540 = vmatpush3.bf16.msra.mxu1 %v10238_v22  ;;  %v1683_v12 = vrot.slane %v1401_v8, 5  ;;  %v6643_v22 = vpop.f32.mrb[23].mxu1  ;;  %v8760_v8 = vld [vmem:[%s14835_s0 + $0x130] sm:$0xf] }
 0x15b   :  { %v2793_v3 = vsel %vm10438_vm2, %v2788_v47, %v2792_v14  ;;  %v1681_v23 = vsel %vm10531_vm5, %v8554_v32, %v1680_v57  ;;  %v1682_v51 = vrot.slane %v1680_v57, 4  ;;  %v2798_v0 = vrot.slane %v2797_v13, 4  ;;  %v10239_v47 = vld [vmem:[%s14834_s1 + $0x238] sm:$0xff]   ;;  %v8761_v13 = vld [vmem:[%s14835_s0 + $0x134] sm:$0x1] }
 0x15c   :  { %7327 = vmatmul.mubr.bf16.gmra.mrb[76].mxu0 %v8808_v16  ;;  %v3573_v31 = vsel %vm10531_vm5, %v3571_v10, %v3572_v61  ;;  %v2805_v34 = vshrl.u32 %v8756_v29, 16  ;;  %v2808_v37 = vshll.u32 %v8756_v29, 16  ;;  %v2814_v39 = vshll.u32 %v8757_v26, 16  ;;  %9541 = vmatprep.subr.bf16.mxu1 %v10239_v47 }
 0x15d   :  { %7334 = vmatprep.mubr.bf16.mxu0 %v8969_v42  ;;  %v8970_v58 = vcombine.low %v12743_v60, %v3573_v31  ;;  %v1684_v36 = vsel %vm10531_vm5, %v1682_v51, %v1683_v12  ;;  %v2818_v59 = vshrl.u32 %v8757_v26, 16  ;;  %v2803_v44 = vsel %vm10438_vm2, %v2798_v0, %v2802_v17 }
 0x15e   :  { %v8586_v28 = vcombine.low %v1681_v23, %v1684_v36  ;;  %v2807_v19 = vrot.slane %v2805_v34, 4  ;;  %v2810_v63 = vrot.slane %v2808_v37, 5  ;;  %v8809_v40 = vcombine.low %v2793_v3, %v2803_v44  ;;  %v12806_v3 = vpop.f32.mrb[24].mxu1  ;;  %9542 = vmatpush3.bf16.msra.mxu1 %v10239_v47 }
 0x15f   :  { %v2816_v46 = vrot.slane %v2814_v39, 5  ;;  %v2820_v42 = vrot.slane %v2818_v59, 4  ;;  %v2824_v45 = vshll.u32 %v8758_v15, 16  ;;  %v3576_v1 = vrot.slane %v8888_v43, 5  ;;  %v8890_v15 = vld [vmem:[%s14835_s0 + $0x138] sm:$0xe] }
 0x160   :  { %v2811_v16 = vor.u32 %v2810_v63, %v2807_v19  ;;  %v3579_v14 = vrot.slane %v8889_v62, 5  ;;  %v8555_v52 = vrot.slane %v1402_v55, 9  ;;  %v1687_v5 = vrot.slane %v1403_v6, 5  ;;  %v8891_v43 = vld [vmem:[%s14835_s0 + $0x13c] sm:$0xf]  ;;  %v6648_v11 = vpop.f32.mrb[25].mxu1 }
 0x161   :  { %7046 = vmatmul.mubr.bf16.gmra.mrb[80].mxu1 %v8585_v53  ;;  %v8939_v53 = vrot.slane %v8887_v7, 9  ;;  %v2821_v25 = vor.u32 %v2820_v42, %v2816_v46  ;;  %v2826_v2 = vrot.slane %v2824_v45, 5  ;;  %v3578_v57 = vrot.slane %v3576_v1, 4  ;;  %v8892_v62 = vld [vmem:[%s14835_s0 + $0x140] sm:$0x1]  ;;  %v10219_v19 = vld [vmem:[%s14835_s0 + $0x138] sm:$0xff]  }
 0x162   :  { %7053 = vmatprep.mubr.bf16.mxu1 %v10216_v24  ;;  %v8759_v24 = vld [vmem:[%s14835_s0 + $0x12c] sm:$0xf]  ;;  %v2812_v61 = vrot.slane %v2811_v16, 4  ;;  %v1690_v29 = vrot.slane %v1404_v4, 5  ;;  %v1688_v60 = vsel %vm10531_vm5, %v8555_v52, %v1687_v5  ;;  %v1689_v10 = vrot.slane %v1687_v5, 4 }
 0x163   :  { %v12796_v32 = vsel %vm10531_vm5, %v8939_v53, %v3576_v1  ;;  %v2822_v17 = vrot.slane %v2821_v25, 4  ;;  %v2829_v26 = vshrl.u32 %v8759_v24, 16  ;;  %v3580_v51 = vsel %vm10531_vm5, %v3578_v57, %v3579_v14  ;;  %v1405_v55 = vld [vmem:[%s14835_s0 + $0x12c] sm:$0xe]  ;;  %v1406_v6 = vld [vmem:[%s14835_s0 + $0x130] sm:$0xf] }
 0x164   :  { %7335 = vmatmul.mubr.bf16.gmra.mrb[80].mxu0 %v8809_v40  ;;  %v2817_v23 = vsel %vm10438_vm2, %v2812_v61, %v2816_v46  ;;  %v2832_v12 = vshll.u32 %v8759_v24, 16  ;;  %v2838_v7 = vshll.u32 %v8760_v8, 16  ;;  %v8971_v31 = vcombine.low %v12796_v32, %v3580_v51  ;;  %v1407_v4 = vld [vmem:[%s14835_s0 + $0x134] sm:$0x1]  ;;  %v8762_v16 = vld [vmem:[%s14835_s0 + $0x138] sm:$0xf] }
 0x165   :  { %7342 = vmatprep.mubr.bf16.mxu0 %v8970_v58  ;;  %v2827_v0 = vsel %vm10438_vm2, %v2822_v17, %v2826_v2  ;;  %v1691_v34 = vsel %vm10531_vm5, %v1689_v10, %v1690_v29  ;;  %v2831_v37 = vrot.slane %v2829_v26, 4  ;;  %v2842_v44 = vshrl.u32 %v8760_v8, 16  ;;  %v12838_v53 = vpop.f32.mrb[26].mxu1  ;;  %v8763_v25 = vld [vmem:[%s14835_s0 + $0x13c] sm:$0xf] }
 0x166   :  { %v8810_v58 = vcombine.low %v2817_v23, %v2827_v0  ;;  %v8587_v36 = vcombine.low %v1688_v60, %v1691_v34  ;;  %v2834_v39 = vrot.slane %v2832_v12, 5  ;;  %v2840_v59 = vrot.slane %v2838_v7, 5  ;;  %v6651_v2 = vpop.f32.mrb[27].mxu1  ;;  %v8764_v61 = vld [vmem:[%s14835_s0 + $0x140] sm:$0x1] }
 0x167   :  { %v8940_v63 = vrot.slane %v8890_v15, 9  ;;  %v3583_v40 = vrot.slane %v8891_v43, 5  ;;  %v3586_v42 = vrot.slane %v8892_v62, 5  ;;  %v8556_v45 = vrot.slane %v1405_v55, 9  ;;  %v8893_v17 = vld [vmem:[%s14835_s0 + $0x144] sm:$0xe] }
 0x168   :  { %v2835_v46 = vor.u32 %v2834_v39, %v2831_v37  ;;  %v2844_v1 = vrot.slane %v2842_v44, 4  ;;  %v1697_v47 = vrot.slane %v1407_v4, 5  ;;  %v2853_v29 = vshrl.u32 %v8762_v16, 16  ;;  %v8894_v60 = vld [vmem:[%s14835_s0 + $0x148] sm:$0xf]  ;;  %v12873_v7 = vpop.f32.mrb[28].mxu1 }
 0x169   :  { %7054 = vmatmul.mubr.bf16.gmra.mrb[84].mxu1 %v8586_v28  ;;  %v2848_v28 = vshll.u32 %v8761_v13, 16  ;;  %v12842_v24 = vsel %vm10531_vm5, %v8940_v63, %v3583_v40  ;;  %v3585_v22 = vrot.slane %v3583_v40, 4  ;;  %v2856_v13 = vshll.u32 %v8762_v16, 16  ;;  %v8895_v51 = vld [vmem:[%s14835_s0 + $0x14c] sm:$0x1]  ;;  %v6656_v37 = vpop.f32.mrb[29].mxu1 }
 0x16a   :  { %7061 = vmatprep.mubr.bf16.mxu1 %v10217_v20  ;;  %v1694_v20 = vrot.slane %v1406_v6, 5  ;;  %v2836_v52 = vrot.slane %v2835_v46, 4  ;;  %v2845_v32 = vor.u32 %v2844_v1, %v2840_v59  ;;  %v2862_v23 = vshll.u32 %v8763_v25, 16  ;;  %v1408_v12 = vld [vmem:[%s14835_s0 + $0x138] sm:$0xe]  ;;  %v10220_v4 = vld [vmem:[%s14835_s0 + $0x144] sm:$0xff]  }
 0x16b   :  { %v2850_v14 = vrot.slane %v2848_v28, 5  ;;  %v3587_v57 = vsel %vm10531_vm5, %v3585_v22, %v3586_v42  ;;  %v2855_v0 = vrot.slane %v2853_v29, 4  ;;  %v1409_v34 = vld [vmem:[%s14835_s0 + $0x13c] sm:$0xf]  ;;  %v2866_v6 = vshrl.u32 %v8763_v25, 16  ;;  %v12896_v16 = vpop.f32.mrb[30].mxu1 }
 0x16c   :  { %v12849_v5 = vsel %vm10531_vm5, %v8556_v45, %v1694_v20  ;;  %v1696_v8 = vrot.slane %v1694_v20, 4  ;;  %7343 = vmatmul.mubr.bf16.gmra.mrb[84].mxu0 %v8810_v58  ;;  %v2841_v10 = vsel %vm10438_vm2, %v2836_v52, %v2840_v59  ;;  %v8972_v26 = vcombine.low %v12842_v24, %v3587_v57  ;;  %v8766_v45 = vld [vmem:[%s14835_s0 + $0x148] sm:$0xf]  ;;  %v8767_v20 = vld [vmem:[%s14835_s0 + $0x14c] sm:$0x1]  ;;  %v6659_v2 = vpop.f32.mrb[31].mxu1 }
 0x16d   :  { %7350 = vmatprep.mubr.bf16.mxu0 %v8971_v31  ;;  %v2846_v43 = vrot.slane %v2845_v32, 4  ;;  %v2858_v31 = vrot.slane %v2856_v13, 5  ;;  %v2864_v55 = vrot.slane %v2862_v23, 5  ;;  %v2872_v11 = vshll.u32 %v8764_v61, 16  ;;  %v8896_v25 = vld [vmem:[%s14835_s0 + $0x150] sm:$0xe] }
 0x16e   :  { %v1698_v15 = vsel %vm10531_vm5, %v1696_v8, %v1697_v47  ;;  %v8941_v58 = vrot.slane %v8893_v17, 9  ;;  %v3590_v44 = vrot.slane %v8894_v60, 5  ;;  %v3593_v28 = vrot.slane %v8895_v51, 5  ;;  %v8897_v13 = vld [vmem:[%s14835_s0 + $0x154] sm:$0xf]  ;;  %v12917_v60 = vpop.f32.mrb[32].mxu1 }
 0x16f   :  { %v8588_v62 = vcombine.low %v12849_v5, %v1698_v15  ;;  %v2851_v39 = vsel %vm10438_vm2, %v2846_v43, %v2850_v14  ;;  %v2859_v59 = vor.u32 %v2858_v31, %v2855_v0  ;;  %v2868_v40 = vrot.slane %v2866_v6, 4  ;;  %v8898_v17 = vld [vmem:[%s14835_s0 + $0x158] sm:$0x1]  ;;  %v6664_v43 = vpop.f32.mrb[33].mxu1 }
 0x170   :  { %v8811_v63 = vcombine.low %v2841_v10, %v2851_v39  ;;  %v2874_v46 = vrot.slane %v2872_v11, 5  ;;  %v8557_v42 = vrot.slane %v1408_v12, 9  ;;  %v12900_v14 = vsel %vm10531_vm5, %v8941_v58, %v3590_v44  ;;  %v1411_v12 = vld [vmem:[%s14835_s0 + $0x144] sm:$0xe]  ;;  %v8768_v39 = vld [vmem:[%s14835_s0 + $0x150] sm:$0xf] }
 0x171   :  { %7062 = vmatmul.mubr.bf16.gmra.mrb[88].mxu1 %v8587_v36  ;;  %v1410_v36 = vld [vmem:[%s14835_s0 + $0x140] sm:$0x1]  ;;  %v2860_v1 = vrot.slane %v2859_v59, 4  ;;  %v3592_v24 = vrot.slane %v3590_v44, 4  ;;  %v1701_v22 = vrot.slane %v1409_v34, 5  ;;  %v2869_v52 = vor.u32 %v2868_v40, %v2864_v55 }
 0x172   :  { %7069 = vmatprep.mubr.bf16.mxu1 %v10219_v19  ;;  %v8765_v19 = vld [vmem:[%s14835_s0 + $0x144] sm:$0xf]  ;;  %v1704_v5 = vrot.slane %v1410_v36, 5  ;;  %v2886_v31 = vshll.u32 %v8766_v45, 16  ;;  %v2890_v34 = vshrl.u32 %v8766_v45, 16  ;;  %v2896_v37 = vshll.u32 %v8767_v20, 16 }
 0x173   :  { %v2877_v8 = vshrl.u32 %v8765_v19, 16  ;;  %v2880_v47 = vshll.u32 %v8765_v19, 16  ;;  %v2865_v61 = vsel %vm10438_vm2, %v2860_v1, %v2864_v55  ;;  %v3594_v32 = vsel %vm10531_vm5, %v3592_v24, %v3593_v28  ;;  %v1413_v36 = vld [vmem:[%s14835_s0 + $0x14c] sm:$0x1]  ;;  %v8769_v20 = vld [vmem:[%s14835_s0 + $0x154] sm:$0xf] }
 0x174   :  { %7351 = vmatmul.mubr.bf16.gmra.mrb[88].mxu0 %v8811_v63  ;;  %v1702_v57 = vsel %vm10531_vm5, %v8557_v42, %v1701_v22  ;;  %v1703_v29 = vrot.slane %v1701_v22, 4  ;;  %v2870_v10 = vrot.slane %v2869_v52, 4  ;;  %v8973_v15 = vcombine.low %v12900_v14, %v3594_v32  ;;  %v10222_v63 = vld [vmem:[%s14835_s0 + $0x150] sm:$0xff]   ;;  %v8770_v22 = vld [vmem:[%s14835_s0 + $0x158] sm:$0x1] }
 0x175   :  { %7358 = vmatprep.mubr.bf16.mxu0 %v8972_v26  ;;  %v2879_v23 = vrot.slane %v2877_v8, 4  ;;  %v2882_v51 = vrot.slane %v2880_v47, 5  ;;  %v1412_v26 = vld [vmem:[%s14835_s0 + $0x148] sm:$0xf]  ;;  %v8942_v58 = vrot.slane %v8896_v25, 9  ;;  %v2888_v44 = vrot.slane %v2886_v31, 5 }
 0x176   :  { %v1705_v0 = vsel %vm10531_vm5, %v1703_v29, %v1704_v5  ;;  %v2875_v55 = vsel %vm10438_vm2, %v2870_v10, %v2874_v46  ;;  %v2892_v28 = vrot.slane %v2890_v34, 4  ;;  %v2898_v19 = vrot.slane %v2896_v37, 5 }
 0x177   :  { %v8589_v6 = vcombine.low %v1702_v57, %v1705_v0  ;;  %v2883_v11 = vor.u32 %v2882_v51, %v2879_v23  ;;  %v3597_v46 = vrot.slane %v8897_v13, 5  ;;  %v3600_v42 = vrot.slane %v8898_v17, 5  ;;  %v8900_v17 = vld [vmem:[%s14835_s0 + $0x160] sm:$0xf]  ;;  %v8901_v0 = vld [vmem:[%s14835_s0 + $0x164] sm:$0x1] }
 0x178   :  { %v8558_v45 = vrot.slane %v1411_v12, 9  ;;  %v2893_v1 = vor.u32 %v2892_v28, %v2888_v44  ;;  %v1708_v14 = vrot.slane %v1412_v26, 5  ;;  %v1711_v24 = vrot.slane %v1413_v36, 5  ;;  %v1414_v26 = vld [vmem:[%s14835_s0 + $0x150] sm:$0xe] }
 0x179   :  { %7070 = vmatmul.mubr.bf16.gmra.mrb[92].mxu1 %v8588_v62  ;;  %v12928_v62 = vpop.f32.mrb[34].mxu1  ;;  %v2884_v40 = vrot.slane %v2883_v11, 4  ;;  %v2901_v25 = vshrl.u32 %v8768_v39, 16  ;;  %v3598_v5 = vsel %vm10531_vm5, %v8942_v58, %v3597_v46  ;;  %v3599_v8 = vrot.slane %v3597_v46, 4 }
 0x17a   :  { %7077 = vmatprep.mubr.bf16.mxu1 %v10220_v4  ;;  %v6667_v59 = vpop.f32.mrb[35].mxu1  ;;  %v8812_v4 = vcombine.low %v2865_v61, %v2875_v55  ;;  %v2904_v47 = vshll.u32 %v8768_v39, 16  ;;  %v8899_v61 = vld [vmem:[%s14835_s0 + $0x15c] sm:$0xe]  ;;  %v2894_v32 = vrot.slane %v2893_v1, 4  ;;  %v1709_v57 = vsel %vm10531_vm5, %v8558_v45, %v1708_v14 }
 0x17b   :  { %v12947_v2 = vpop.f32.mrb[36].mxu1  ;;  %v2889_v52 = vsel %vm10438_vm2, %v2884_v40, %v2888_v44  ;;  %v1710_v29 = vrot.slane %v1708_v14, 4  ;;  %v2903_v13 = vrot.slane %v2901_v25, 4  ;;  %v3601_v23 = vsel %vm10531_vm5, %v3599_v8, %v3600_v42  ;;  %v1415_v55 = vld [vmem:[%s14835_s0 + $0x154] sm:$0xf] }
 0x17c   :  { %7359 = vmatmul.mubr.bf16.gmra.mrb[92].mxu0 %v8812_v4  ;;  %v6672_v10 = vpop.f32.mrb[37].mxu1  ;;  %v2906_v51 = vrot.slane %v2904_v47, 5  ;;  %v2910_v12 = vshll.u32 %v8769_v20, 16  ;;  %v2914_v43 = vshrl.u32 %v8769_v20, 16  ;;  %v2899_v34 = vsel %vm10438_vm2, %v2894_v32, %v2898_v19  ;;  %v1416_v59 = vld [vmem:[%s14835_s0 + $0x158] sm:$0x1] }
 0x17d   :  { %7366 = vmatprep.mubr.bf16.mxu0 %v8973_v15  ;;  %v12966_v31 = vpop.f32.mrb[38].mxu1  ;;  %v1712_v15 = vsel %vm10531_vm5, %v1710_v29, %v1711_v24  ;;  %v2920_v37 = vshll.u32 %v8770_v22, 16  ;;  %v8813_v11 = vcombine.low %v2889_v52, %v2899_v34  ;;  %v8974_v58 = vcombine.low %v3598_v5, %v3601_v23  ;;  %v8772_v20 = vld [vmem:[%s14835_s0 + $0x160] sm:$0xf]  ;;  %v8773_v52 = vld [vmem:[%s14835_s0 + $0x164] sm:$0x1] }
 0x17e   :  { %v2907_v36 = vor.u32 %v2906_v51, %v2903_v13  ;;  %v2912_v39 = vrot.slane %v2910_v12, 5  ;;  %v8590_v4 = vcombine.low %v1709_v57, %v1712_v15  ;;  %v2916_v44 = vrot.slane %v2914_v43, 4  ;;  %v10223_v24 = vld [vmem:[%s14835_s0 + $0x15c] sm:$0xff]   ;;  %v8902_v32 = vld [vmem:[%s14835_s0 + $0x168] sm:$0xe] }
 0x17f   :  { %v8943_v28 = vrot.slane %v8899_v61, 9  ;;  %v3604_v19 = vrot.slane %v8900_v17, 5  ;;  %v3607_v46 = vrot.slane %v8901_v0, 5  ;;  %v8559_v42 = vrot.slane %v1414_v26, 9  ;;  %v8903_v57 = vld [vmem:[%s14835_s0 + $0x16c] sm:$0xf] }
 0x180   :  { %v2908_v40 = vrot.slane %v2907_v36, 4  ;;  %v1715_v45 = vrot.slane %v1415_v55, 5  ;;  %v2917_v1 = vor.u32 %v2916_v44, %v2912_v39  ;;  %v2922_v14 = vrot.slane %v2920_v37, 5  ;;  %v8904_v23 = vld [vmem:[%s14835_s0 + $0x170] sm:$0x1]  ;;  %v10225_v44 = vld [vmem:[%s14835_s0 + $0x168] sm:$0xff]  }
 0x181   :  { %7078 = vmatmul.mubr.bf16.gmra.mrb[96].mxu1 %v8589_v6  ;;  %v6675_v6 = vpop.f32.mrb[39].mxu1  ;;  %v3606_v22 = vrot.slane %v3604_v19, 4  ;;  %v1718_v25 = vrot.slane %v1416_v59, 5  ;;  %v3605_v5 = vsel %vm10531_vm5, %v8943_v28, %v3604_v19  ;;  %v2934_v10 = vshll.u32 %v8772_v20, 16  ;;  %v1417_v51 = vld [vmem:[%s14835_s0 + $0x15c] sm:$0xe] }
 0x182   :  { %7085 = vmatprep.mubr.bf16.mxu1 %v10222_v63  ;;  %v8771_v63 = vld [vmem:[%s14835_s0 + $0x15c] sm:$0xf]  ;;  %v1716_v8 = vsel %vm10531_vm5, %v8559_v42, %v1715_v45  ;;  %v1717_v47 = vrot.slane %v1715_v45, 4  ;;  %v2918_v29 = vrot.slane %v2917_v1, 4  ;;  %v13011_v12 = vpop.f32.mrb[40].mxu1  ;;  %v2913_v43 = vsel %vm10438_vm2, %v2908_v40, %v2912_v39 }
 0x183   :  { %v2925_v61 = vshrl.u32 %v8771_v63, 16  ;;  %v3608_v13 = vsel %vm10531_vm5, %v3606_v22, %v3607_v46  ;;  %v2928_v17 = vshll.u32 %v8771_v63, 16  ;;  %v2938_v15 = vshrl.u32 %v8772_v20, 16  ;;  %v1419_v63 = vld [vmem:[%s14835_s0 + $0x164] sm:$0x1] }
 0x184   :  { %7367 = vmatmul.mubr.bf16.gmra.mrb[96].mxu0 %v8813_v11  ;;  %v1719_v0 = vsel %vm10531_vm5, %v1717_v47, %v1718_v25  ;;  %v2923_v37 = vsel %vm10438_vm2, %v2918_v29, %v2922_v14  ;;  %v2936_v55 = vrot.slane %v2934_v10, 5  ;;  %v8975_v6 = vcombine.low %v3605_v5, %v3608_v13  ;;  %v8774_v40 = vld [vmem:[%s14835_s0 + $0x168] sm:$0xf]  ;;  %v8775_v1 = vld [vmem:[%s14835_s0 + $0x16c] sm:$0xf]  ;;  %v6680_v14 = vpop.f32.mrb[41].mxu1 }
 0x185   :  { %7374 = vmatprep.mubr.bf16.mxu0 %v8974_v58  ;;  %v2927_v34 = vrot.slane %v2925_v61, 4  ;;  %v2930_v26 = vrot.slane %v2928_v17, 5  ;;  %v8591_v11 = vcombine.low %v1716_v8, %v1719_v0  ;;  %v2940_v36 = vrot.slane %v2938_v15, 4  ;;  %v1418_v58 = vld [vmem:[%s14835_s0 + $0x160] sm:$0xf]  ;;  %v13037_v5 = vpop.f32.mrb[42].mxu1 }
 0x186   :  { %v2944_v59 = vshll.u32 %v8773_v52, 16  ;;  %v8814_v39 = vcombine.low %v2913_v43, %v2923_v37  ;;  %v8944_v28 = vrot.slane %v8902_v32, 9  ;;  %v3611_v19 = vrot.slane %v8903_v57, 5  ;;  %v8776_v52 = vld [vmem:[%s14835_s0 + $0x170] sm:$0x1]  ;;  %v6683_v43 = vpop.f32.mrb[43].mxu1 }
 0x187   :  { %v2941_v46 = vor.u32 %v2940_v36, %v2936_v55  ;;  %v3614_v45 = vrot.slane %v8904_v23, 5  ;;  %v8560_v20 = vrot.slane %v1417_v51, 9  ;;  %v1722_v25 = vrot.slane %v1418_v58, 5  ;;  %v8905_v57 = vld [vmem:[%s14835_s0 + $0x174] sm:$0xe] }
 0x188   :  { %v2946_v42 = vrot.slane %v2944_v59, 5  ;;  %v3613_v22 = vrot.slane %v3611_v19, 4  ;;  %v1725_v47 = vrot.slane %v1419_v63, 5  ;;  %v2949_v61 = vshrl.u32 %v8774_v40, 16  ;;  %v8906_v23 = vld [vmem:[%s14835_s0 + $0x178] sm:$0xf] }
 0x189   :  { %7086 = vmatmul.mubr.bf16.gmra.mrb[100].mxu1 %v8590_v4  ;;  %v2931_v4 = vor.u32 %v2930_v26, %v2927_v34  ;;  %v2942_v8 = vrot.slane %v2941_v46, 4  ;;  %v2952_v32 = vshll.u32 %v8774_v40, 16  ;;  %v3612_v13 = vsel %vm10531_vm5, %v8944_v28, %v3611_v19  ;;  %v8907_v51 = vld [vmem:[%s14835_s0 + $0x17c] sm:$0x1]  ;;  %v1420_v26 = vld [vmem:[%s14835_s0 + $0x168] sm:$0xe] }
 0x18a   :  { %7093 = vmatprep.mubr.bf16.mxu1 %v10223_v24  ;;  %v3615_v17 = vsel %vm10531_vm5, %v3613_v22, %v3614_v45  ;;  %v1724_v10 = vrot.slane %v1722_v25, 4  ;;  %v1723_v34 = vsel %vm10531_vm5, %v8560_v20, %v1722_v25  ;;  %v2951_v15 = vrot.slane %v2949_v61, 4  ;;  %v13072_v45 = vpop.f32.mrb[44].mxu1 }
 0x18b   :  { %v2932_v24 = vrot.slane %v2931_v4, 4  ;;  %v2947_v0 = vsel %vm10438_vm2, %v2942_v8, %v2946_v42  ;;  %v2954_v37 = vrot.slane %v2952_v32, 5  ;;  %v2958_v36 = vshll.u32 %v8775_v1, 16  ;;  %v8777_v42 = vld [vmem:[%s14835_s0 + $0x174] sm:$0xf]  ;;  %v6688_v61 = vpop.f32.mrb[45].mxu1 }
 0x18c   :  { %7375 = vmatmul.mubr.bf16.gmra.mrb[100].mxu0 %v8814_v39  ;;  %v2962_v59 = vshrl.u32 %v8775_v1, 16  ;;  %v8976_v39 = vcombine.low %v3612_v13, %v3615_v17  ;;  %v2968_v28 = vshll.u32 %v8776_v52, 16  ;;  %v8945_v46 = vrot.slane %v8905_v57, 9  ;;  %v10226_v1 = vld [vmem:[%s14835_s0 + $0x174] sm:$0xff]   ;;  %v8779_v13 = vld [vmem:[%s14835_s0 + $0x17c] sm:$0x1] }
 0x18d   :  { %v2937_v29 = vsel %vm10438_vm2, %v2932_v24, %v2936_v55  ;;  %7382 = vmatprep.mubr.bf16.mxu0 %v8975_v6  ;;  %v1421_v55 = vld [vmem:[%s14835_s0 + $0x16c] sm:$0xf]  ;;  %v1422_v6 = vld [vmem:[%s14835_s0 + $0x170] sm:$0x1]  ;;  %v2955_v4 = vor.u32 %v2954_v37, %v2951_v15  ;;  %v2960_v63 = vrot.slane %v2958_v36, 5  ;;  %v3618_v14 = vrot.slane %v8906_v23, 5 }
 0x18e   :  { %v8815_v58 = vcombine.low %v2937_v29, %v2947_v0  ;;  %v2964_v40 = vrot.slane %v2962_v59, 4  ;;  %v2970_v20 = vrot.slane %v2968_v28, 5  ;;  %v3621_v24 = vrot.slane %v8907_v51, 5  ;;  %v8908_v0 = vld [vmem:[%s14835_s0 + $0x180] sm:$0xe]  ;;  %v13098_v37 = vpop.f32.mrb[46].mxu1 }
 0x18f   :  { %v8561_v25 = vrot.slane %v1420_v26, 9  ;;  %v1729_v52 = vrot.slane %v1421_v55, 5  ;;  %v1732_v8 = vrot.slane %v1422_v6, 5  ;;  %v3619_v57 = vsel %vm10531_vm5, %v8945_v46, %v3618_v14  ;;  %v8910_v15 = vld [vmem:[%s14835_s0 + $0x188] sm:$0x1]  ;;  %v6691_v59 = vpop.f32.mrb[47].mxu1 }
 0x190   :  { %v2965_v22 = vor.u32 %v2964_v40, %v2960_v63  ;;  %v3620_v29 = vrot.slane %v3618_v14, 4  ;;  %v2973_v17 = vshrl.u32 %v8777_v42, 16  ;;  %v2976_v43 = vshll.u32 %v8777_v42, 16  ;;  %v1423_v36 = vld [vmem:[%s14835_s0 + $0x174] sm:$0xe] }
 0x191   :  { %7094 = vmatmul.mubr.bf16.gmra.mrb[104].mxu1 %v8591_v11  ;;  %v1726_v11 = vsel %vm10531_vm5, %v1724_v10, %v1725_v47  ;;  %v8778_v47 = vld [vmem:[%s14835_s0 + $0x178] sm:$0xf]  ;;  %v1730_v23 = vsel %vm10531_vm5, %v8561_v25, %v1729_v52  ;;  %v1731_v51 = vrot.slane %v1729_v52, 4  ;;  %v8780_v42 = vld [vmem:[%s14835_s0 + $0x180] sm:$0xf]  ;;  %v2992_v14 = vshll.u32 %v8779_v13, 16 }
 0x192   :  { %7101 = vmatprep.mubr.bf16.mxu1 %v10225_v44  ;;  %v8592_v19 = vcombine.low %v1723_v34, %v1726_v11  ;;  %v2956_v44 = vrot.slane %v2955_v4, 4  ;;  %v2966_v10 = vrot.slane %v2965_v22, 4  ;;  %v8909_v34 = vld [vmem:[%s14835_s0 + $0x184] sm:$0xf]  ;;  %v3622_v26 = vsel %vm10531_vm5, %v3620_v29, %v3621_v24  ;;  %v1424_v28 = vld [vmem:[%s14835_s0 + $0x178] sm:$0xf] }
 0x193   :  { %v2975_v55 = vrot.slane %v2973_v17, 4  ;;  %v2982_v6 = vshll.u32 %v8778_v47, 16  ;;  %v2986_v11 = vshrl.u32 %v8778_v47, 16  ;;  %v1733_v4 = vsel %vm10531_vm5, %v1731_v51, %v1732_v8  ;;  %v10230_v24 = vld [vmem:[%s14835_s0 + $0x180] sm:$0xff]   ;;  %v13124_v25 = vpop.f32.mrb[48].mxu1 }
 0x194   :  { %v2961_v32 = vsel %vm10438_vm2, %v2956_v44, %v2960_v63  ;;  %7383 = vmatmul.mubr.bf16.gmra.mrb[104].mxu0 %v8815_v58  ;;  %v2971_v58 = vsel %vm10438_vm2, %v2966_v10, %v2970_v20  ;;  %v8977_v63 = vcombine.low %v3619_v57, %v3622_v26  ;;  %v8593_v20 = vcombine.low %v1730_v23, %v1733_v4  ;;  %v8781_v22 = vld [vmem:[%s14835_s0 + $0x184] sm:$0xf]  ;;  %v6696_v57 = vpop.f32.mrb[49].mxu1  ;;  %v8782_v26 = vld [vmem:[%s14835_s0 + $0x188] sm:$0x1] }
 0x195   :  { %7390 = vmatprep.mubr.bf16.mxu0 %v8976_v39  ;;  %v2978_v39 = vrot.slane %v2976_v43, 5  ;;  %v2984_v40 = vrot.slane %v2982_v6, 5  ;;  %v2988_v46 = vrot.slane %v2986_v11, 4  ;;  %v8816_v44 = vcombine.low %v2961_v32, %v2971_v58  ;;  %v8911_v11 = vld [vmem:[%s14835_s0 + $0x18c] sm:$0xe] }
 0x196   :  { %v8946_v8 = vrot.slane %v8908_v0, 9  ;;  %v3625_v47 = vrot.slane %v8909_v34, 5  ;;  %v3628_v61 = vrot.slane %v8910_v15, 5  ;;  %v2994_v32 = vrot.slane %v2992_v14, 5 }
 0x197   :  { %v2989_v52 = vor.u32 %v2988_v46, %v2984_v40  ;;  %v8562_v17 = vrot.slane %v1423_v36, 9  ;;  %v1736_v10 = vrot.slane %v1424_v28, 5  ;;  %v2997_v6 = vshrl.u32 %v8780_v42, 16  ;;  %v8913_v28 = vld [vmem:[%s14835_s0 + $0x194] sm:$0x1] }
 0x198   :  { %v3626_v23 = vsel %vm10531_vm5, %v8946_v8, %v3625_v47  ;;  %v3627_v51 = vrot.slane %v3625_v47, 4  ;;  %v3000_v58 = vshll.u32 %v8780_v42, 16  ;;  %v3006_v4 = vshll.u32 %v8781_v22, 16  ;;  %v1427_v46 = vld [vmem:[%s14835_s0 + $0x184] sm:$0xf] }
 0x199   :  { %7102 = vmatmul.mubr.bf16.gmra.mrb[108].mxu1 %v8592_v19  ;;  %v1425_v19 = vld [vmem:[%s14835_s0 + $0x17c] sm:$0x1]  ;;  %v2990_v13 = vrot.slane %v2989_v52, 4  ;;  %v1737_v34 = vsel %vm10531_vm5, %v8562_v17, %v1736_v10  ;;  %v1738_v15 = vrot.slane %v1736_v10, 4  ;;  %v3010_v14 = vshrl.u32 %v8781_v22, 16 }
 0x19a   :  { %7109 = vmatprep.mubr.bf16.mxu1 %v10226_v1  ;;  %v2979_v1 = vor.u32 %v2978_v39, %v2975_v55  ;;  %v1739_v43 = vrot.slane %v1425_v19, 5  ;;  %v13131_v55 = vpop.f32.mrb[50].mxu1  ;;  %v3629_v59 = vsel %vm10531_vm5, %v3627_v51, %v3628_v61  ;;  %v8912_v39 = vld [vmem:[%s14835_s0 + $0x190] sm:$0xf]  ;;  %v3016_v47 = vshll.u32 %v8782_v26, 16 }
 0x19b   :  { %v2995_v36 = vsel %vm10438_vm2, %v2990_v13, %v2994_v32  ;;  %v6699_v42 = vpop.f32.mrb[51].mxu1  ;;  %v8978_v52 = vcombine.low %v3626_v23, %v3629_v59  ;;  %v10233_v61 = vld [vmem:[%s14835_s0 + $0x18c] sm:$0xff]   ;;  %v8947_v57 = vrot.slane %v8911_v11, 9  ;;  %v3012_v17 = vrot.slane %v3010_v14, 4  ;;  %v8785_v11 = vld [vmem:[%s14835_s0 + $0x194] sm:$0x1] }
 0x19c   :  { %v2980_v29 = vrot.slane %v2979_v1, 4  ;;  %7391 = vmatmul.mubr.bf16.gmra.mrb[108].mxu0 %v8816_v44  ;;  %v1740_v19 = vsel %vm10531_vm5, %v1738_v15, %v1739_v43  ;;  %v3008_v1 = vrot.slane %v3006_v4, 5  ;;  %v3632_v10 = vrot.slane %v8912_v39, 5  ;;  %v8784_v13 = vld [vmem:[%s14835_s0 + $0x190] sm:$0xf]  ;;  %v13170_v23 = vpop.f32.mrb[52].mxu1 }
 0x19d   :  { %7398 = vmatprep.mubr.bf16.mxu0 %v8977_v63  ;;  %v2999_v63 = vrot.slane %v2997_v6, 4  ;;  %v8594_v8 = vcombine.low %v1737_v34, %v1740_v19  ;;  %v3635_v22 = vrot.slane %v8913_v28, 5  ;;  %v3018_v51 = vrot.slane %v3016_v47, 5  ;;  %v6704_v39 = vpop.f32.mrb[53].mxu1  ;;  %v8915_v42 = vld [vmem:[%s14835_s0 + $0x19c] sm:$0xf] }
 0x19e   :  { %v2985_v0 = vsel %vm10438_vm2, %v2980_v29, %v2984_v40  ;;  %v1426_v40 = vld [vmem:[%s14835_s0 + $0x180] sm:$0xe]  ;;  %v8783_v29 = vld [vmem:[%s14835_s0 + $0x18c] sm:$0xf]  ;;  %v1743_v26 = vrot.slane %v1427_v46, 5  ;;  %v3013_v15 = vor.u32 %v3012_v17, %v3008_v1  ;;  %v3634_v6 = vrot.slane %v3632_v10, 4 }
 0x19f   :  { %v8817_v44 = vcombine.low %v2985_v0, %v2995_v36  ;;  %v8563_v43 = vrot.slane %v1426_v40, 9  ;;  %v3633_v36 = vsel %vm10531_vm5, %v8947_v57, %v3632_v10  ;;  %v3024_v4 = vshll.u32 %v8783_v29, 16  ;;  %v8914_v46 = vld [vmem:[%s14835_s0 + $0x198] sm:$0xe]  ;;  %v1430_v10 = vld [vmem:[%s14835_s0 + $0x190] sm:$0xf] }
 0x1a0   :  { %v1745_v59 = vrot.slane %v1743_v26, 4  ;;  %v3014_v19 = vrot.slane %v3013_v15, 4  ;;  %v3030_v40 = vshll.u32 %v8784_v13, 16  ;;  %v3034_v47 = vshrl.u32 %v8784_v13, 16 }
 0x1a1   :  { %7110 = vmatmul.mubr.bf16.gmra.mrb[112].mxu1 %v8593_v20  ;;  %v3002_v20 = vrot.slane %v3000_v58, 5  ;;  %v3021_v58 = vshrl.u32 %v8783_v29, 16  ;;  %v3026_v14 = vrot.slane %v3024_v4, 5  ;;  %v3040_v17 = vshll.u32 %v8785_v11, 16  ;;  %v10237_v11 = vld [vmem:[%s14835_s0 + $0x198] sm:$0xff]  }
 0x1a2   :  { %7117 = vmatprep.mubr.bf16.mxu1 %v10230_v24  ;;  %v1428_v24 = vld [vmem:[%s14835_s0 + $0x188] sm:$0x1]  ;;  %v3036_v13 = vrot.slane %v3034_v47, 4 }
 0x1a3   :  { %v3003_v32 = vor.u32 %v3002_v20, %v2999_v63  ;;  %v1746_v0 = vrot.slane %v1428_v24, 5  ;;  %v3636_v63 = vsel %vm10531_vm5, %v3634_v6, %v3635_v22  ;;  %v8916_v24 = vld [vmem:[%s14835_s0 + $0x1a0] sm:$0x1]  ;;  %v1431_v22 = vld [vmem:[%s14835_s0 + $0x194] sm:$0x1]  ;;  %v3042_v4 = vrot.slane %v3040_v17, 5 }
 0x1a4   :  { %7399 = vmatmul.mubr.bf16.gmra.mrb[112].mxu0 %v8817_v44  ;;  %v1744_v44 = vsel %vm10531_vm5, %v8563_v43, %v1743_v26  ;;  %v8979_v29 = vcombine.low %v3633_v36, %v3636_v63  ;;  %v13205_v43 = vpop.f32.mrb[54].mxu1  ;;  %v8948_v26 = vrot.slane %v8914_v46, 9  ;;  %v3642_v36 = vrot.slane %v8916_v24, 5  ;;  %v8788_v46 = vld [vmem:[%s14835_s0 + $0x1a0] sm:$0x1] }
 0x1a5   :  { %v3004_v34 = vrot.slane %v3003_v32, 4  ;;  %7406 = vmatprep.mubr.bf16.mxu0 %v8978_v52  ;;  %v1747_v20 = vsel %vm10531_vm5, %v1745_v59, %v1746_v0  ;;  %v3019_v52 = vsel %vm10438_vm2, %v3014_v19, %v3018_v51  ;;  %14848 = vst [vmem:[#allocation3_spill] sm:$0xff] %v13205_v43  ;;  %v3639_v0 = vrot.slane %v8915_v42, 5  ;;  %v6707_v15 = vpop.f32.mrb[55].mxu1  ;;  %v8787_v19 = vld [vmem:[%s14835_s0 + $0x19c] sm:$0xf] }
 0x1a6   :  { %v8595_v51 = vcombine.low %v1744_v44, %v1747_v20  ;;  %v9205_v15 = vld [vmem:[%s14835_s0 + $0x18] sm:$0xe] }
 0x1a7   :  { %v3009_v28 = vsel %vm10438_vm2, %v3004_v34, %v3008_v1  ;;  %v3023_v1 = vrot.slane %v3021_v58, 4  ;;  %v8786_v34 = vld [vmem:[%s14835_s0 + $0x198] sm:$0xf]  ;;  %v3641_v39 = vrot.slane %v3639_v0, 4  ;;  %v3640_v63 = vsel %vm10531_vm5, %v8948_v26, %v3639_v0 }
 0x1a8   :  { %v8818_v57 = vcombine.low %v3009_v28, %v3019_v52  ;;  %v1750_v28 = vrot.slane %v1430_v10, 5  ;;  %v3045_v42 = vshrl.u32 %v8786_v34, 16  ;;  %v3048_v44 = vshll.u32 %v8786_v34, 16  ;;  %v9077_v52 = vld [vmem:[%s14835_s0 + $0x18] sm:$0xf] }
 0x1a9   :  { %7118 = vmatmul.mubr.bf16.gmra.mrb[116].mxu1 %v8594_v8  ;;  %v3032_v8 = vrot.slane %v3030_v40, 5  ;;  %v3027_v32 = vor.u32 %v3026_v14, %v3023_v1  ;;  %v1753_v40 = vrot.slane %v1431_v22, 5  ;;  %v3643_v14 = vsel %vm10531_vm5, %v3641_v39, %v3642_v36 }
 0x1aa   :  { %7125 = vmatprep.mubr.bf16.mxu1 %v10233_v61  ;;  %v1429_v61 = vld [vmem:[%s14835_s0 + $0x18c] sm:$0xe]  ;;  %v1752_v24 = vrot.slane %v1750_v28, 4  ;;  %v3058_v10 = vshrl.u32 %v8787_v19, 16  ;;  %v3064_v22 = vshll.u32 %v8788_v46, 16 }
 0x1ab   :  { %v3028_v6 = vrot.slane %v3027_v32, 4  ;;  %v8564_v59 = vrot.slane %v1429_v61, 9  ;;  %v3037_v58 = vor.u32 %v3036_v13, %v3032_v8  ;;  %v3047_v61 = vrot.slane %v3045_v42, 4  ;;  %v13230_v32 = vpop.f32.mrb[56].mxu1  ;;  %v9079_v13 = vld [vmem:[%s14835_s0 + $0x20] sm:$0x1] }
 0x1ac   :  { %7407 = vmatmul.mubr.bf16.gmra.mrb[116].mxu0 %v8818_v57  ;;  %v3050_v57 = vrot.slane %v3048_v44, 5  ;;  %14849 = vst [vmem:[#allocation4_spill] sm:$0xff] %v13230_v32  ;;  %v1754_v17 = vsel %vm10531_vm5, %v1752_v24, %v1753_v40  ;;  %v9207_v46 = vld [vmem:[%s14835_s0 + $0x20] sm:$0x1] }
 0x1ad   :  { %7414 = vmatprep.mubr.bf16.mxu0 %v8979_v29  ;;  %v3033_v20 = vsel %vm10438_vm2, %v3028_v6, %v3032_v8  ;;  %v3038_v1 = vrot.slane %v3037_v58, 4  ;;  %v1751_v47 = vsel %vm10531_vm5, %v8564_v59, %v1750_v28  ;;  %v3054_v29 = vshll.u32 %v8787_v19, 16  ;;  %v6712_v6 = vpop.f32.mrb[57].mxu1 }
 0x1ae   :  { %v3051_v0 = vor.u32 %v3050_v57, %v3047_v61  ;;  %v8596_v36 = vcombine.low %v1751_v47, %v1754_v17  ;;  %v3060_v59 = vrot.slane %v3058_v10, 4  ;;  %v3066_v58 = vrot.slane %v3064_v22, 5  ;;  %v9210_v22 = vld [vmem:[%s14835_s0 + $0x2c] sm:$0x1] }
 0x1af   :  { %v3043_v8 = vsel %vm10438_vm2, %v3038_v1, %v3042_v4  ;;  %v3056_v34 = vrot.slane %v3054_v29, 5  ;;  %v9206_v4 = vld [vmem:[%s14835_s0 + $0x1c] sm:$0xf]  ;;  %v4190_v28 = vshrl.u32 %v9077_v52, 16  ;;  %v4193_v19 = vshll.u32 %v9077_v52, 16 }
 0x1b0   :  { %v8819_v26 = vcombine.low %v3033_v20, %v3043_v8  ;;  %v3052_v39 = vrot.slane %v3051_v0, 4  ;;  %v4209_v20 = vshll.u32 %v9079_v13, 16  ;;  %v9301_v1 = vrot.slane %v9205_v15, 9  ;;  %v9209_v52 = vld [vmem:[%s14835_s0 + $0x28] sm:$0xf] }
 0x1b1   :  { %7126 = vmatmul.mubr.bf16.gmra.mrb[120].mxu1 %v8595_v51  ;;  %v9078_v51 = vld [vmem:[%s14835_s0 + $0x1c] sm:$0xf]  ;;  %v3061_v42 = vor.u32 %v3060_v59, %v3056_v34  ;;  %v4192_v24 = vrot.slane %v4190_v28, 4  ;;  %v4195_v47 = vrot.slane %v4193_v19, 5  ;;  %v5311_v10 = vrot.slane %v9206_v4, 5 }
 0x1b2   :  { %7133 = vmatprep.mubr.bf16.mxu1 %v10237_v11  ;;  %v8980_v11 = vcombine.low %v3640_v63, %v3643_v14  ;;  %v4199_v40 = vshll.u32 %v9078_v51, 16  ;;  %v4203_v44 = vshrl.u32 %v9078_v51, 16  ;;  %v9208_v63 = vld [vmem:[%s14835_s0 + $0x24] sm:$0xe]  ;;  %v13254_v14 = vpop.f32.mrb[58].mxu1  ;;  %v3057_v29 = vsel %vm10438_vm2, %v3052_v39, %v3056_v34 }
 0x1b3   :  { %14850 = vst [vmem:[#allocation5_spill] sm:$0xff] %v13254_v14  ;;  %v6715_v57 = vpop.f32.mrb[59].mxu1  ;;  %v3062_v8 = vrot.slane %v3061_v42, 4  ;;  %v4196_v51 = vor.u32 %v4195_v47, %v4192_v24  ;;  %v4211_v13 = vrot.slane %v4209_v20, 5  ;;  %v9302_v0 = vrot.slane %v9208_v63, 9 }
 0x1b4   :  { %7415 = vmatmul.mubr.bf16.gmra.mrb[120].mxu0 %v8819_v26  ;;  %v4201_v61 = vrot.slane %v4199_v40, 5  ;;  %v4205_v17 = vrot.slane %v4203_v44, 4  ;;  %v5314_v26 = vrot.slane %v9207_v46, 5  ;;  %v9080_v15 = vld [vmem:[%s14835_s0 + $0x24] sm:$0xf]  ;;  %v5312_v34 = vsel %vm10531_vm5, %v9301_v1, %v5311_v10  ;;  %v13274_v40 = vpop.f32.mrb[60].mxu1 }
 0x1b5   :  { %7422 = vmatprep.mubr.bf16.mxu0 %v8980_v11  ;;  %v3067_v6 = vsel %vm10438_vm2, %v3062_v8, %v3066_v58  ;;  %v9081_v59 = vld [vmem:[%s14835_s0 + $0x28] sm:$0xf]  ;;  %v4197_v39 = vrot.slane %v4196_v51, 4  ;;  %v5318_v28 = vrot.slane %v9209_v52, 5  ;;  %v5321_v19 = vrot.slane %v9210_v22, 5  ;;  %14851 = vst [vmem:[#allocation6_spill] sm:$0xff] %v13274_v40 }
 0x1b6   :  { %v4206_v11 = vor.u32 %v4205_v17, %v4201_v61  ;;  %v8820_v4 = vcombine.low %v3057_v29, %v3067_v6  ;;  %v9082_v58 = vld [vmem:[%s14835_s0 + $0x2c] sm:$0x1]  ;;  %v4214_v44 = vshrl.u32 %v9080_v15, 16  ;;  %v9083_v47 = vld [vmem:[%s14835_s0 + $0x30] sm:$0xf]  ;;  %v6720_v57 = vpop.f32.mrb[61].mxu1 }
 0x1b7   :  { %v4202_v20 = vsel %vm10438_vm2, %v4197_v39, %v4201_v61  ;;  %v5319_v63 = vsel %vm10531_vm5, %v9302_v0, %v5318_v28  ;;  %v5320_v24 = vrot.slane %v5318_v28, 4  ;;  %v9084_v52 = vld [vmem:[%s14835_s0 + $0x34] sm:$0xf]  ;;  %v4217_v17 = vshll.u32 %v9080_v15, 16  ;;  %v9085_v6 = vld [vmem:[%s14835_s0 + $0x38] sm:$0x1] }
 0x1b8   :  { %v4207_v46 = vrot.slane %v4206_v11, 4  ;;  %v4216_v8 = vrot.slane %v4214_v44, 4  ;;  %v4223_v61 = vshll.u32 %v9081_v59, 16  ;;  %v4233_v0 = vshll.u32 %v9082_v58, 16  ;;  %v9211_v15 = vld [vmem:[%s14835_s0 + $0x30] sm:$0xe] }
 0x1b9   :  { %7134 = vmatmul.mubr.bf16.gmra.mrb[124].mxu1 %v8596_v36  ;;  %v5313_v36 = vrot.slane %v5311_v10, 4  ;;  %v13293_v10 = vpop.f32.mrb[62].mxu1  ;;  %v5322_v51 = vsel %vm10531_vm5, %v5320_v24, %v5321_v19  ;;  %v9213_v28 = vld [vmem:[%s14835_s0 + $0x38] sm:$0x1]  ;;  %v4247_v58 = vshll.u32 %v9084_v52, 16  ;;  %v4251_v44 = vshrl.u32 %v9084_v52, 16 }
 0x1ba   :  { %v4212_v29 = vsel %vm10438_vm2, %v4207_v46, %v4211_v13  ;;  %14852 = vst [vmem:[#allocation7_spill] sm:$0xff] %v13293_v10  ;;  %v9334_v11 = vcombine.low %v5319_v63, %v5322_v51  ;;  %v4225_v13 = vrot.slane %v4223_v61, 5  ;;  %v4235_v39 = vrot.slane %v4233_v0, 5  ;;  %v6723_v19 = vpop.f32.mrb[63].mxu1 }
 0x1bb   :  { %v5315_v42 = vsel %vm10531_vm5, %v5313_v36, %v5314_v26  ;;  %v9173_v22 = vcombine.low %v4202_v20, %v4212_v29  ;;  %v4227_v26 = vshrl.u32 %v9081_v59, 16  ;;  %v9212_v36 = vld [vmem:[%s14835_s0 + $0x34] sm:$0xf]  ;;  %v4238_v59 = vshrl.u32 %v9083_v47, 16  ;;  %v9214_v20 = vld [vmem:[%s14835_s0 + $0x3c] sm:$0xe] }
 0x1bc   :  { %v9333_v1 = vcombine.low %v5312_v34, %v5315_v42  ;;  %7423 = vmatmul.mubr.bf16.gmra.mrb[124].mxu0 %v8820_v4  ;;  %v4219_v34 = vrot.slane %v4217_v17, 5  ;;  %v4241_v42 = vshll.u32 %v9083_v47, 16  ;;  %v4257_v57 = vshll.u32 %v9085_v6, 16  ;;  %v9215_v17 = vld [vmem:[%s14835_s0 + $0x40] sm:$0xf] }
 0x1bd   :  { %7463 = vmatprep.mubr.bf16.mxu0 %v9173_v22  ;;  %v4229_v4 = vrot.slane %v4227_v26, 4  ;;  %v4240_v24 = vrot.slane %v4238_v59, 4  ;;  %v9303_v29 = vrot.slane %v9211_v15, 9  ;;  %v4249_v61 = vrot.slane %v4247_v58, 5  ;;  %v9216_v22 = vld [vmem:[%s14835_s0 + $0x44] sm:$0x1] }
 0x1be   :  { %9543 = vmatprep.mubr.bf16.mxu1 %v9333_v1  ;;  %v4220_v46 = vor.u32 %v4219_v34, %v4216_v8  ;;  %v10240_v1 = vld [vmem:[%s14835_s0 + $0x18] sm:$0xff]   ;;  %v4243_v47 = vrot.slane %v4241_v42, 5  ;;  %v4253_v52 = vrot.slane %v4251_v44, 4  ;;  %v5325_v26 = vrot.slane %v9212_v36, 5 }
 0x1bf   :  { %v4230_v63 = vor.u32 %v4229_v4, %v4225_v13  ;;  %v5328_v0 = vrot.slane %v9213_v28, 5  ;;  %v9086_v6 = vld [vmem:[%s14835_s0 + $0x3c] sm:$0xf]  ;;  %v4259_v4 = vrot.slane %v4257_v57, 5  ;;  %v9304_v36 = vrot.slane %v9214_v20, 9 }
 0x1c0   :  { %v4221_v8 = vrot.slane %v4220_v46, 4  ;;  %v4244_v34 = vor.u32 %v4243_v47, %v4240_v24  ;;  %v4254_v15 = vor.u32 %v4253_v52, %v4249_v61  ;;  %v5326_v19 = vsel %vm10531_vm5, %v9303_v29, %v5325_v26  ;;  %v9087_v28 = vld [vmem:[%s14835_s0 + $0x40] sm:$0xf] }
 0x1c1   :  { %9544 = vmatmul.mubr.bf16.vlgmr.msra.gmra.mrb[128].mxu1 %v9334_v11  ;;  %v4231_v51 = vrot.slane %v4230_v63, 4  ;;  %v5327_v46 = vrot.slane %v5325_v26, 4  ;;  %v5335_v63 = vrot.slane %v9216_v22, 5  ;;  %v4262_v24 = vshrl.u32 %v9086_v6, 16 }
 0x1c2   :  { %v4226_v11 = vsel %vm10438_vm2, %v4221_v8, %v4225_v13  ;;  %v4245_v58 = vrot.slane %v4244_v34, 4  ;;  %v4255_v44 = vrot.slane %v4254_v15, 4  ;;  %v5332_v13 = vrot.slane %v9215_v17, 5  ;;  %v9089_v17 = vld [vmem:[%s14835_s0 + $0x48] sm:$0xf] }
 0x1c3   :  { %v4236_v59 = vsel %vm10438_vm2, %v4231_v51, %v4235_v39  ;;  %v5329_v39 = vsel %vm10531_vm5, %v5327_v46, %v5328_v0  ;;  %v10241_v8 = vld [vmem:[%s14835_s0 + $0x24] sm:$0xff]   ;;  %v4264_v22 = vrot.slane %v4262_v24, 4  ;;  %v4265_v51 = vshll.u32 %v9086_v6, 16  ;;  %v9091_v15 = vld [vmem:[%s14835_s0 + $0x50] sm:$0x1] }
 0x1c4   :  { %7464 = vmatmul.mubr.bf16.vlgmr.msra.gmra.mrb[0].mxu0 %v10240_v1  ;;  %v9174_v42 = vcombine.low %v4226_v11, %v4236_v59  ;;  %v9088_v1 = vld [vmem:[%s14835_s0 + $0x44] sm:$0x1]  ;;  %v4250_v20 = vsel %vm10438_vm2, %v4245_v58, %v4249_v61  ;;  %v4260_v57 = vsel %vm10438_vm2, %v4255_v44, %v4259_v4  ;;  %v9335_v29 = vcombine.low %v5326_v19, %v5329_v39  ;;  %v9090_v61 = vld [vmem:[%s14835_s0 + $0x4c] sm:$0xf]  ;;  %v9217_v6 = vld [vmem:[%s14835_s0 + $0x48] sm:$0xe] }
 0x1c5   :  { %v5333_v47 = vsel %vm10531_vm5, %v9304_v36, %v5332_v13  ;;  %v5334_v52 = vrot.slane %v5332_v13, 4  ;;  %v9175_v26 = vcombine.low %v4250_v20, %v4260_v57  ;;  %v4271_v0 = vshll.u32 %v9087_v28, 16  ;;  %v9218_v46 = vld [vmem:[%s14835_s0 + $0x4c] sm:$0xf]  ;;  %v9219_v44 = vld [vmem:[%s14835_s0 + $0x50] sm:$0x1] }
 0x1c6   :  { %7471 = vmatprep.mubr.bf16.mxu0 %v9174_v42  ;;  %9547 = vmatprep.mubr.bf16.mxu1 %v9335_v29  ;;  %v4275_v11 = vshrl.u32 %v9087_v28, 16  ;;  %v4281_v34 = vshll.u32 %v9088_v1, 16  ;;  %v4267_v59 = vrot.slane %v4265_v51, 5  ;;  %v4286_v19 = vshrl.u32 %v9089_v17, 16  ;;  %v9220_v24 = vld [vmem:[%s14835_s0 + $0x54] sm:$0xe] }
 0x1c7   :  { %v5336_v4 = vsel %vm10531_vm5, %v5334_v52, %v5335_v63  ;;  %v4273_v28 = vrot.slane %v4271_v0, 5  ;;  %v4289_v39 = vshll.u32 %v9089_v17, 16  ;;  %v4295_v63 = vshll.u32 %v9090_v61, 16  ;;  %v9221_v17 = vld [vmem:[%s14835_s0 + $0x58] sm:$0xf] }
 0x1c8   :  { %v9336_v36 = vcombine.low %v5333_v47, %v5336_v4  ;;  %v4277_v42 = vrot.slane %v4275_v11, 4  ;;  %v4283_v58 = vrot.slane %v4281_v34, 5  ;;  %v4268_v13 = vor.u32 %v4267_v59, %v4264_v22 }
 0x1c9   :  { %v4288_v1 = vrot.slane %v4286_v19, 4  ;;  %v4299_v57 = vshrl.u32 %v9090_v61, 16  ;;  %v4305_v29 = vshll.u32 %v9091_v15, 16  ;;  %v9305_v47 = vrot.slane %v9217_v6, 9  ;;  %v9222_v19 = vld [vmem:[%s14835_s0 + $0x5c] sm:$0x1] }
 0x1ca   :  { %9548 = vmatmul.mubr.bf16.gmra.mrb[132].mxu1 %v9336_v36  ;;  %v4278_v20 = vor.u32 %v4277_v42, %v4273_v28  ;;  %v4269_v52 = vrot.slane %v4268_v13, 4  ;;  %v4291_v51 = vrot.slane %v4289_v39, 5  ;;  %v4297_v0 = vrot.slane %v4295_v63, 5  ;;  %v9092_v6 = vld [vmem:[%s14835_s0 + $0x54] sm:$0xf] }
 0x1cb   :  { %v5339_v11 = vrot.slane %v9218_v46, 5  ;;  %v5342_v22 = vrot.slane %v9219_v44, 5  ;;  %v4307_v42 = vrot.slane %v4305_v29, 5  ;;  %v9306_v44 = vrot.slane %v9220_v24, 9  ;;  %v9093_v63 = vld [vmem:[%s14835_s0 + $0x58] sm:$0xf] }
 0x1cc   :  { %7472 = vmatmul.mubr.bf16.gmra.mrb[4].mxu0 %v10241_v8  ;;  %v4279_v34 = vrot.slane %v4278_v20, 4  ;;  %v4301_v8 = vrot.slane %v4299_v57, 4  ;;  %v4274_v61 = vsel %vm10438_vm2, %v4269_v52, %v4273_v28  ;;  %v4292_v15 = vor.u32 %v4291_v51, %v4288_v1 }
 0x1cd   :  { %7479 = vmatprep.mubr.bf16.mxu0 %v9175_v26  ;;  %v10242_v26 = vld [vmem:[%s14835_s0 + $0x30] sm:$0xff]   ;;  %v5340_v4 = vsel %vm10531_vm5, %v9305_v47, %v5339_v11  ;;  %v5341_v59 = vrot.slane %v5339_v11, 4  ;;  %v5346_v39 = vrot.slane %v9221_v17, 5  ;;  %v5349_v47 = vrot.slane %v9222_v19, 5  ;;  %v9095_v17 = vld [vmem:[%s14835_s0 + $0x60] sm:$0xf] }
 0x1ce   :  { %v4284_v46 = vsel %vm10438_vm2, %v4279_v34, %v4283_v58  ;;  %v4302_v36 = vor.u32 %v4301_v8, %v4297_v0  ;;  %v4293_v13 = vrot.slane %v4292_v15, 4  ;;  %v9094_v58 = vld [vmem:[%s14835_s0 + $0x5c] sm:$0x1]  ;;  %v4310_v51 = vshrl.u32 %v9092_v6, 16  ;;  %v9096_v15 = vld [vmem:[%s14835_s0 + $0x64] sm:$0xf] }
 0x1cf   :  { %v9176_v28 = vcombine.low %v4274_v61, %v4284_v46  ;;  %v5343_v1 = vsel %vm10531_vm5, %v5341_v59, %v5342_v22  ;;  %v5347_v29 = vsel %vm10531_vm5, %v9306_v44, %v5346_v39  ;;  %v5348_v52 = vrot.slane %v5346_v39, 4  ;;  %v9097_v44 = vld [vmem:[%s14835_s0 + $0x68] sm:$0x1] }
 0x1d0   :  { %v4303_v20 = vrot.slane %v4302_v36, 4  ;;  %v9337_v57 = vcombine.low %v5340_v4, %v5343_v1  ;;  %v4298_v24 = vsel %vm10438_vm2, %v4293_v13, %v4297_v0  ;;  %v4313_v34 = vshll.u32 %v9092_v6, 16  ;;  %v9223_v4 = vld [vmem:[%s14835_s0 + $0x60] sm:$0xe] }
 0x1d1   :  { %v4319_v8 = vshll.u32 %v9093_v63, 16  ;;  %v4323_v22 = vshrl.u32 %v9093_v63, 16  ;;  %v5350_v0 = vsel %vm10531_vm5, %v5348_v52, %v5349_v47  ;;  %v4329_v61 = vshll.u32 %v9094_v58, 16  ;;  %v10243_v36 = vld [vmem:[%s14835_s0 + $0x3c] sm:$0xff]   ;;  %v9226_v52 = vld [vmem:[%s14835_s0 + $0x6c] sm:$0xe] }
 0x1d2   :  { %v4308_v11 = vsel %vm10438_vm2, %v4303_v20, %v4307_v42  ;;  %9551 = vmatprep.mubr.bf16.mxu1 %v9337_v57  ;;  %v9338_v59 = vcombine.low %v5347_v29, %v5350_v0  ;;  %v4315_v19 = vrot.slane %v4313_v34, 5  ;;  %v4337_v39 = vshll.u32 %v9095_v17, 16  ;;  %v9224_v20 = vld [vmem:[%s14835_s0 + $0x64] sm:$0xf]  ;;  %v9225_v57 = vld [vmem:[%s14835_s0 + $0x68] sm:$0x1] }
 0x1d3   :  { %v4321_v6 = vrot.slane %v4319_v8, 5  ;;  %v4325_v46 = vrot.slane %v4323_v22, 4  ;;  %v9177_v42 = vcombine.low %v4298_v24, %v4308_v11  ;;  %v4343_v63 = vshll.u32 %v9096_v15, 16 }
 0x1d4   :  { %7480 = vmatmul.mubr.bf16.gmra.mrb[8].mxu0 %v10242_v26  ;;  %v4312_v26 = vrot.slane %v4310_v51, 4  ;;  %9552 = vmatmul.mubr.bf16.gmra.mrb[136].mxu1 %v9338_v59  ;;  %v4331_v47 = vrot.slane %v4329_v61, 5  ;;  %v4347_v24 = vshrl.u32 %v9096_v15, 16  ;;  %v9307_v29 = vrot.slane %v9223_v4, 9  ;;  %v9227_v51 = vld [vmem:[%s14835_s0 + $0x70] sm:$0xf] }
 0x1d5   :  { %7487 = vmatprep.mubr.bf16.mxu0 %v9176_v28  ;;  %v4334_v28 = vshrl.u32 %v9095_v17, 16  ;;  %v4326_v1 = vor.u32 %v4325_v46, %v4321_v6  ;;  %v4339_v8 = vrot.slane %v4337_v39, 5  ;;  %v4345_v22 = vrot.slane %v4343_v63, 5  ;;  %v9228_v15 = vld [vmem:[%s14835_s0 + $0x74] sm:$0x1]  ;;  %v10244_v63 = vld [vmem:[%s14835_s0 + $0x48] sm:$0xff]  }
 0x1d6   :  { %v4316_v13 = vor.u32 %v4315_v19, %v4312_v26  ;;  %v4349_v17 = vrot.slane %v4347_v24, 4  ;;  %v4353_v0 = vshll.u32 %v9097_v44, 16  ;;  %v5353_v26 = vrot.slane %v9224_v20, 5  ;;  %v9098_v19 = vld [vmem:[%s14835_s0 + $0x6c] sm:$0xf] }
 0x1d7   :  { %v4336_v58 = vrot.slane %v4334_v28, 4  ;;  %v4327_v34 = vrot.slane %v4326_v1, 4  ;;  %v5356_v61 = vrot.slane %v9225_v57, 5  ;;  %v9308_v1 = vrot.slane %v9226_v52, 9 }
 0x1d8   :  { %v4317_v11 = vrot.slane %v4316_v13, 4  ;;  %v5354_v44 = vsel %vm10531_vm5, %v9307_v29, %v5353_v26  ;;  %v5355_v28 = vrot.slane %v5353_v26, 4  ;;  %v5360_v39 = vrot.slane %v9227_v51, 5 }
 0x1d9   :  { %v4340_v59 = vor.u32 %v4339_v8, %v4336_v58  ;;  %v4332_v46 = vsel %vm10438_vm2, %v4327_v34, %v4331_v47  ;;  %v4355_v57 = vrot.slane %v4353_v0, 5  ;;  %v9100_v58 = vld [vmem:[%s14835_s0 + $0x74] sm:$0x1]  ;;  %v4358_v24 = vshrl.u32 %v9098_v19, 16  ;;  %v9101_v0 = vld [vmem:[%s14835_s0 + $0x78] sm:$0xf] }
 0x1da   :  { %v4322_v4 = vsel %vm10438_vm2, %v4317_v11, %v4321_v6  ;;  %v9099_v6 = vld [vmem:[%s14835_s0 + $0x70] sm:$0xf]  ;;  %v5357_v47 = vsel %vm10531_vm5, %v5355_v28, %v5356_v61  ;;  %v5361_v51 = vsel %vm10531_vm5, %v9308_v1, %v5360_v39  ;;  %v5362_v11 = vrot.slane %v5360_v39, 4  ;;  %v9230_v1 = vld [vmem:[%s14835_s0 + $0x7c] sm:$0xf] }
 0x1db   :  { %v4341_v13 = vrot.slane %v4340_v59, 4  ;;  %v9178_v29 = vcombine.low %v4322_v4, %v4332_v46  ;;  %v9339_v52 = vcombine.low %v5354_v44, %v5357_v47  ;;  %v4360_v34 = vrot.slane %v4358_v24, 4  ;;  %v9102_v4 = vld [vmem:[%s14835_s0 + $0x7c] sm:$0xf]  ;;  %v9229_v59 = vld [vmem:[%s14835_s0 + $0x78] sm:$0xe] }
 0x1dc   :  { %7488 = vmatmul.mubr.bf16.gmra.mrb[12].mxu0 %v10243_v36  ;;  %v4350_v36 = vor.u32 %v4349_v17, %v4345_v22  ;;  %v4361_v8 = vshll.u32 %v9098_v19, 16  ;;  %v4367_v17 = vshll.u32 %v9099_v6, 16  ;;  %v4377_v28 = vshll.u32 %v9100_v58, 16  ;;  %v9103_v24 = vld [vmem:[%s14835_s0 + $0x80] sm:$0x1] }
 0x1dd   :  { %7495 = vmatprep.mubr.bf16.mxu0 %v9177_v42  ;;  %v5363_v42 = vrot.slane %v9228_v15, 5  ;;  %v4346_v26 = vsel %vm10438_vm2, %v4341_v13, %v4345_v22  ;;  %9555 = vmatprep.mubr.bf16.mxu1 %v9339_v52  ;;  %v4371_v15 = vshrl.u32 %v9099_v6, 16  ;;  %v4382_v13 = vshrl.u32 %v9101_v0, 16 }
 0x1de   :  { %v4351_v20 = vrot.slane %v4350_v36, 4  ;;  %v4363_v36 = vrot.slane %v4361_v8, 5  ;;  %v4369_v22 = vrot.slane %v4367_v17, 5  ;;  %v4391_v6 = vshll.u32 %v9102_v4, 16  ;;  %v9232_v17 = vld [vmem:[%s14835_s0 + $0x84] sm:$0xe] }
 0x1df   :  { %v5364_v61 = vsel %vm10531_vm5, %v5362_v11, %v5363_v42  ;;  %v4373_v44 = vrot.slane %v4371_v15, 4  ;;  %v4385_v42 = vshll.u32 %v9101_v0, 16  ;;  %v4395_v47 = vshrl.u32 %v9102_v4, 16  ;;  %v9233_v4 = vld [vmem:[%s14835_s0 + $0x88] sm:$0xf] }
 0x1e0   :  { %v4356_v19 = vsel %vm10438_vm2, %v4351_v20, %v4355_v57  ;;  %v9340_v46 = vcombine.low %v5361_v51, %v5364_v61  ;;  %v4364_v39 = vor.u32 %v4363_v36, %v4360_v34  ;;  %v10245_v20 = vld [vmem:[%s14835_s0 + $0x54] sm:$0xff]   ;;  %v9309_v52 = vrot.slane %v9229_v59, 9  ;;  %v9234_v59 = vld [vmem:[%s14835_s0 + $0x8c] sm:$0x1] }
 0x1e1   :  { %v9179_v57 = vcombine.low %v4346_v26, %v4356_v19  ;;  %v4374_v58 = vor.u32 %v4373_v44, %v4369_v22  ;;  %v4387_v11 = vrot.slane %v4385_v42, 5  ;;  %v13483_v34 = vrot.slane %v4391_v6, 5 }
 0x1e2   :  { %9556 = vmatmul.mubr.bf16.gmra.mrb[140].mxu1 %v9340_v46  ;;  %v4365_v51 = vrot.slane %v4364_v39, 4  ;;  %v4397_v8 = vrot.slane %v4395_v47, 4  ;;  %v4379_v61 = vrot.slane %v4377_v28, 5  ;;  %v5367_v15 = vrot.slane %v9230_v1, 5  ;;  %v9104_v46 = vld [vmem:[%s14835_s0 + $0x84] sm:$0xf] }
 0x1e3   :  { %v4375_v0 = vrot.slane %v4374_v58, 4  ;;  %v4401_v19 = vshll.u32 %v9103_v24, 16  ;;  %v5374_v42 = vrot.slane %v9233_v4, 5  ;;  %v9105_v58 = vld [vmem:[%s14835_s0 + $0x88] sm:$0xf]  ;;  %v4406_v24 = vshrl.u32 %v9104_v46, 16 }
 0x1e4   :  { %7496 = vmatmul.mubr.bf16.gmra.mrb[16].mxu0 %v10244_v63  ;;  %v9231_v63 = vld [vmem:[%s14835_s0 + $0x80] sm:$0x1]  ;;  %v5368_v44 = vsel %vm10531_vm5, %v9309_v52, %v5367_v15  ;;  %v5369_v28 = vrot.slane %v5367_v15, 4  ;;  %v4370_v1 = vsel %vm10438_vm2, %v4365_v51, %v4369_v22  ;;  %v4398_v39 = vor.u32 %v4397_v8, %v13483_v34  ;;  %v9107_v22 = vld [vmem:[%s14835_s0 + $0x90] sm:$0xf] }
 0x1e5   :  { %7503 = vmatprep.mubr.bf16.mxu0 %v9178_v29  ;;  %v4384_v29 = vrot.slane %v4382_v13, 4  ;;  %v5370_v26 = vrot.slane %v9231_v63, 5  ;;  %v9310_v13 = vrot.slane %v9232_v17, 9  ;;  %v4380_v6 = vsel %vm10438_vm2, %v4375_v0, %v4379_v61  ;;  %v10246_v17 = vld [vmem:[%s14835_s0 + $0x60] sm:$0xff]   ;;  %v9108_v4 = vld [vmem:[%s14835_s0 + $0x94] sm:$0xf] }
 0x1e6   :  { %v5377_v63 = vrot.slane %v9234_v59, 5  ;;  %v5376_v51 = vrot.slane %v5374_v42, 4  ;;  %v4409_v8 = vshll.u32 %v9104_v46, 16  ;;  %v9180_v0 = vcombine.low %v4370_v1, %v4380_v6  ;;  %v9235_v46 = vld [vmem:[%s14835_s0 + $0x90] sm:$0xe] }
 0x1e7   :  { %v4388_v36 = vor.u32 %v4387_v11, %v4384_v29  ;;  %v5371_v47 = vsel %vm10531_vm5, %v5369_v28, %v5370_v26  ;;  %v9106_v11 = vld [vmem:[%s14835_s0 + $0x8c] sm:$0x1]  ;;  %v4399_v61 = vrot.slane %v4398_v39, 4  ;;  %v4415_v15 = vshll.u32 %v9105_v58, 16  ;;  %v9236_v39 = vld [vmem:[%s14835_s0 + $0x94] sm:$0xf] }
 0x1e8   :  { %v9341_v29 = vcombine.low %v5368_v44, %v5371_v47  ;;  %v4419_v26 = vshrl.u32 %v9105_v58, 16  ;;  %v4408_v59 = vrot.slane %v4406_v24, 4  ;;  %v4430_v44 = vshrl.u32 %v9107_v22, 16 }
 0x1e9   :  { %v4389_v52 = vrot.slane %v4388_v36, 4  ;;  %v4411_v36 = vrot.slane %v4409_v8, 5  ;;  %v4433_v6 = vshll.u32 %v9107_v22, 16  ;;  %v4439_v47 = vshll.u32 %v9108_v4, 16 }
 0x1ea   :  { %9559 = vmatprep.mubr.bf16.mxu1 %v9341_v29  ;;  %v4421_v1 = vrot.slane %v4419_v26, 4  ;;  %v4425_v24 = vshll.u32 %v9106_v11, 16  ;;  %v4443_v29 = vshrl.u32 %v9108_v4, 16  ;;  %v4432_v22 = vrot.slane %v4430_v44, 4  ;;  %v9109_v44 = vld [vmem:[%s14835_s0 + $0x98] sm:$0x1] }
 0x1eb   :  { %v5381_v8 = vrot.slane %v9236_v39, 5 }
 0x1ec   :  { %7504 = vmatmul.mubr.bf16.gmra.mrb[20].mxu0 %v10245_v20  ;;  %v4403_v20 = vrot.slane %v4401_v19, 5  ;;  %v5378_v19 = vsel %vm10531_vm5, %v5376_v51, %v5377_v63  ;;  %v9237_v63 = vld [vmem:[%s14835_s0 + $0x98] sm:$0x1]  ;;  %v9238_v51 = vld [vmem:[%s14835_s0 + $0x9c] sm:$0xe]  ;;  %v4445_v26 = vrot.slane %v4443_v29, 4 }
 0x1ed   :  { %7511 = vmatprep.mubr.bf16.mxu0 %v9179_v57  ;;  %v5375_v57 = vsel %vm10531_vm5, %v9310_v13, %v5374_v42  ;;  %v13528_v13 = vrot.slane %v4415_v15, 5  ;;  %v4394_v42 = vsel %vm10438_vm2, %v4389_v52, %v13483_v34  ;;  %v4412_v34 = vor.u32 %v4411_v36, %v4408_v59 }
 0x1ee   :  { %v9342_v28 = vcombine.low %v5375_v57, %v5378_v19  ;;  %v4404_v58 = vsel %vm10438_vm2, %v4399_v61, %v4403_v20  ;;  %v9311_v57 = vrot.slane %v9235_v46, 9  ;;  %v4435_v52 = vrot.slane %v4433_v6, 5  ;;  %v9240_v61 = vld [vmem:[%s14835_s0 + $0xa4] sm:$0x1]  ;;  %v10247_v19 = vld [vmem:[%s14835_s0 + $0x6c] sm:$0xff]  }
 0x1ef   :  { %v4422_v15 = vor.u32 %v4421_v1, %v13528_v13  ;;  %v13548_v20 = vrot.slane %v4439_v47, 5  ;;  %v5384_v11 = vrot.slane %v9237_v63, 5  ;;  %v5383_v4 = vrot.slane %v5381_v8, 4 }
 0x1f0   :  { %9560 = vmatmul.mubr.bf16.gmra.mrb[144].mxu1 %v9342_v28  ;;  %v9181_v59 = vcombine.low %v4394_v42, %v4404_v58  ;;  %v4427_v36 = vrot.slane %v4425_v24, 5  ;;  %v9312_v46 = vrot.slane %v9238_v51, 9  ;;  %v4413_v1 = vrot.slane %v4412_v34, 4  ;;  %v9110_v42 = vld [vmem:[%s14835_s0 + $0x9c] sm:$0xf] }
 0x1f1   :  { %v4436_v39 = vor.u32 %v4435_v52, %v4432_v22  ;;  %v5385_v6 = vsel %vm10531_vm5, %v5383_v4, %v5384_v11  ;;  %v5391_v47 = vrot.slane %v9240_v61, 5  ;;  %v4423_v63 = vrot.slane %v4422_v15, 4  ;;  %v9111_v51 = vld [vmem:[%s14835_s0 + $0xa0] sm:$0xf]  ;;  %v9241_v11 = vld [vmem:[%s14835_s0 + $0xa8] sm:$0xe] }
 0x1f2   :  { %v4446_v58 = vor.u32 %v4445_v26, %v13548_v20  ;;  %v4449_v24 = vshll.u32 %v9109_v44, 16  ;;  %v4457_v15 = vshll.u32 %v9110_v42, 16  ;;  %v4418_v61 = vsel %vm10438_vm2, %v4413_v1, %v13528_v13  ;;  %v9242_v13 = vld [vmem:[%s14835_s0 + $0xac] sm:$0xf] }
 0x1f3   :  { %v4437_v22 = vrot.slane %v4436_v39, 4  ;;  %v4428_v26 = vsel %vm10438_vm2, %v4423_v63, %v4427_v36  ;;  %v4463_v4 = vshll.u32 %v9111_v51, 16  ;;  %v9243_v36 = vld [vmem:[%s14835_s0 + $0xb0] sm:$0x1]  ;;  %v9114_v1 = vld [vmem:[%s14835_s0 + $0xac] sm:$0xf] }
 0x1f4   :  { %7512 = vmatmul.mubr.bf16.gmra.mrb[24].mxu0 %v10246_v17  ;;  %v9239_v17 = vld [vmem:[%s14835_s0 + $0xa0] sm:$0xf]  ;;  %v4447_v44 = vrot.slane %v4446_v58, 4  ;;  %v9313_v39 = vrot.slane %v9241_v11, 9  ;;  %v9182_v63 = vcombine.low %v4418_v61, %v4428_v26  ;;  %v4491_v40 = vshrl.u32 %v9114_v1, 16 }
 0x1f5   :  { %7519 = vmatprep.mubr.bf16.mxu0 %v9180_v0  ;;  %v5382_v0 = vsel %vm10531_vm5, %v9311_v57, %v5381_v8  ;;  %v5388_v28 = vrot.slane %v9239_v17, 5  ;;  %v4454_v17 = vshrl.u32 %v9110_v42, 16  ;;  %v9246_v42 = vld [vmem:[%s14835_s0 + $0xbc] sm:$0x1]  ;;  %v13612_v58 = vrot.slane %v4463_v4, 5 }
 0x1f6   :  { %v9343_v29 = vcombine.low %v5382_v0, %v5385_v6  ;;  %v9112_v0 = vld [vmem:[%s14835_s0 + $0xa4] sm:$0x1]  ;;  %v9244_v6 = vld [vmem:[%s14835_s0 + $0xb4] sm:$0xe]  ;;  %v4487_v4 = vshll.u32 %v9114_v1, 16 }
 0x1f7   :  { %v5389_v57 = vsel %vm10531_vm5, %v9312_v46, %v5388_v28  ;;  %v5390_v8 = vrot.slane %v5388_v28, 4  ;;  %v4451_v46 = vrot.slane %v4449_v24, 5  ;;  %v10248_v28 = vld [vmem:[%s14835_s0 + $0x78] sm:$0xff]   ;;  %v4473_v11 = vshll.u32 %v9112_v0, 16 }
 0x1f8   :  { %9563 = vmatprep.mubr.bf16.mxu1 %v9343_v29  ;;  %v4442_v29 = vsel %vm10438_vm2, %v4437_v22, %v13548_v20  ;;  %v9314_v26 = vrot.slane %v9244_v6, 9 }
 0x1f9   :  { %v5392_v34 = vsel %vm10531_vm5, %v5390_v8, %v5391_v47  ;;  %v9245_v47 = vld [vmem:[%s14835_s0 + $0xb8] sm:$0xf]  ;;  %v4459_v8 = vrot.slane %v4457_v15, 5 }
 0x1fa   :  { %v9344_v52 = vcombine.low %v5389_v57, %v5392_v34  ;;  %v4456_v57 = vrot.slane %v4454_v17, 4  ;;  %v5398_v34 = vrot.slane %v9243_v36, 5  ;;  %v5402_v17 = vrot.slane %v9245_v47, 5  ;;  %v10249_v36 = vld [vmem:[%s14835_s0 + $0x84] sm:$0xff]  }
 0x1fc   :  { %7520 = vmatmul.mubr.bf16.gmra.mrb[28].mxu0 %v10247_v19  ;;  %v4467_v19 = vshrl.u32 %v9111_v51, 16  ;;  %9564 = vmatmul.mubr.bf16.gmra.mrb[148].mxu1 %v9344_v52  ;;  %v5395_v51 = vrot.slane %v9242_v13, 5  ;;  %v4452_v52 = vsel %vm10438_vm2, %v4447_v44, %v4451_v46  ;;  %v4460_v15 = vor.u32 %v4459_v8, %v4456_v57  ;;  %v10265_v13 = vld [vmem:[%s14836_s3] sm:$0xff]   ;;  %v9116_v57 = vld [vmem:[%s14835_s0 + $0xb4] sm:$0xf] }
 0x1fd   :  { %7527 = vmatprep.mubr.bf16.mxu0 %v9181_v59  ;;  %v9113_v59 = vld [vmem:[%s14835_s0 + $0xa8] sm:$0xf]  ;;  %v5404_v46 = vrot.slane %v5402_v17, 4  ;;  %9607 = vmatprep.subr.bf16.mxu1 %v10265_v13  ;;  %v9183_v1 = vcombine.low %v4442_v29, %v4452_v52  ;;  %v9247_v52 = vld [vmem:[%s14835_s0 + $0xc0] sm:$0xe] }
 0x1fe   :  { %v4469_v24 = vrot.slane %v4467_v19, 4  ;;  %v4478_v61 = vshrl.u32 %v9113_v59, 16  ;;  %v4481_v10 = vshll.u32 %v9113_v59, 16  ;;  %v5396_v20 = vsel %vm10531_vm5, %v9313_v39, %v5395_v51  ;;  %v9115_v39 = vld [vmem:[%s14835_s0 + $0xb0] sm:$0x1]  ;;  %9608 = vmatpush3.bf16.msra.mxu1 %v10265_v13 }
 0x1ff   :  { %v5397_v22 = vrot.slane %v5395_v51, 4  ;;  %v5405_v19 = vrot.slane %v9246_v42, 5  ;;  %v5403_v59 = vsel %vm10531_vm5, %v9314_v26, %v5402_v17  ;;  %v4461_v8 = vrot.slane %v4460_v15, 4  ;;  %v9117_v51 = vld [vmem:[%s14835_s0 + $0xb8] sm:$0xf] }
 0x200   :  { %v4470_v0 = vor.u32 %v4469_v24, %v13612_v58  ;;  %v4480_v6 = vrot.slane %v4478_v61, 4  ;;  %v4483_v47 = vrot.slane %v4481_v10, 5  ;;  %v13637_v42 = vrot.slane %v4487_v4, 5  ;;  %v9248_v61 = vld [vmem:[%s14835_s0 + $0xc4] sm:$0xf] }
 0x201   :  { %v5399_v44 = vsel %vm10531_vm5, %v5397_v22, %v5398_v34  ;;  %v4493_v24 = vrot.slane %v4491_v40, 4  ;;  %v4475_v10 = vrot.slane %v4473_v11, 5  ;;  %v4497_v26 = vshll.u32 %v9115_v39, 16  ;;  %v9249_v22 = vld [vmem:[%s14835_s0 + $0xc8] sm:$0x1] }
 0x202   :  { %v4471_v34 = vrot.slane %v4470_v0, 4  ;;  %v4505_v40 = vshll.u32 %v9116_v57, 16  ;;  %v10267_v11 = vld [vmem:[%s14836_s3 + $0x8] sm:$0xff]   ;;  %v4484_v17 = vor.u32 %v4483_v47, %v4480_v6  ;;  %v9251_v4 = vld [vmem:[%s14835_s0 + $0xd0] sm:$0xf]  ;;  %v4511_v0 = vshll.u32 %v9117_v51, 16 }
 0x203   :  { %v9250_v15 = vld [vmem:[%s14835_s0 + $0xcc] sm:$0xe]  ;;  %v4494_v13 = vor.u32 %v4493_v24, %v13637_v42  ;;  %9609 = vmatprep.subr.bf16.mxu1 %v10267_v11  ;;  %v5412_v39 = vrot.slane %v9249_v22, 5  ;;  %v9252_v6 = vld [vmem:[%s14835_s0 + $0xd4] sm:$0x1]  ;;  %v4499_v47 = vrot.slane %v4497_v26, 5 }
 0x204   :  { %7528 = vmatmul.mubr.bf16.gmra.mrb[32].mxu0 %v10248_v28  ;;  %v9345_v28 = vcombine.low %v5396_v20, %v5399_v44  ;;  %v4502_v20 = vshrl.u32 %v9116_v57, 16  ;;  %v9119_v44 = vld [vmem:[%s14835_s0 + $0xc0] sm:$0xf]  ;;  %9610 = vmatpush3.bf16.msra.mxu1 %v10267_v11  ;;  %v4507_v57 = vrot.slane %v4505_v40, 5  ;;  %v9316_v24 = vrot.slane %v9250_v15, 9 }
 0x205   :  { %7535 = vmatprep.mubr.bf16.mxu0 %v9182_v63  ;;  %v5406_v63 = vsel %vm10531_vm5, %v5404_v46, %v5405_v19  ;;  %v4466_v19 = vsel %vm10438_vm2, %v4461_v8, %v13612_v58  ;;  %v10268_v46 = vld [vmem:[%s14836_s3 + $0x10] sm:$0xff]   ;;  %v4476_v58 = vsel %vm10438_vm2, %v4471_v34, %v4475_v10  ;;  %v9120_v8 = vld [vmem:[%s14835_s0 + $0xc4] sm:$0xf]  ;;  %v4485_v34 = vrot.slane %v4484_v17, 4  ;;  %v10270_v17 = vld [vmem:[%s14836_s3 + $0x18] sm:$0xff]  }
 0x206   :  { %9567 = vmatprep.mubr.bf16.mxu1 %v9345_v28  ;;  %v9346_v29 = vcombine.low %v5403_v59, %v5406_v63  ;;  %v9315_v59 = vrot.slane %v9247_v52, 9  ;;  %v4515_v28 = vshrl.u32 %v9117_v51, 16  ;;  %v4504_v63 = vrot.slane %v4502_v20, 4  ;;  %9611 = vmatprep.subr.bf16.mxu1 %v10268_v46 }
 0x207   :  { %v5416_v52 = vrot.slane %v9251_v4, 5  ;;  %v9184_v22 = vcombine.low %v4466_v19, %v4476_v58  ;;  %v4495_v11 = vrot.slane %v4494_v13, 4  ;;  %v13685_v26 = vrot.slane %v4511_v0, 5  ;;  %v9118_v19 = vld [vmem:[%s14835_s0 + $0xbc] sm:$0x1] }
 0x208   :  { %9568 = vmatmul.mubr.bf16.gmra.mrb[152].mxu1 %v9346_v29  ;;  %v5419_v20 = vrot.slane %v9252_v6, 5  ;;  %v4517_v14 = vrot.slane %v4515_v28, 4  ;;  %v4526_v32 = vshrl.u32 %v9119_v44, 16  ;;  %v4529_v15 = vshll.u32 %v9119_v44, 16 }
 0x209   :  { %9612 = vmatpush3.bf16.msra.mxu1 %v10268_v46  ;;  %v4508_v13 = vor.u32 %v4507_v57, %v4504_v63  ;;  %v5418_v58 = vrot.slane %v5416_v52, 4  ;;  %v4535_v44 = vshll.u32 %v9120_v8, 16  ;;  %v4539_v28 = vshrl.u32 %v9120_v8, 16  ;;  %v9253_v8 = vld [vmem:[%s14835_s0 + $0xf0] sm:$0xe] }
 0x20a   :  { %9613 = vmatprep.subr.bf16.mxu1 %v10270_v17  ;;  %v4490_v46 = vsel %vm10438_vm2, %v4485_v34, %v13637_v42  ;;  %v4518_v6 = vor.u32 %v4517_v14, %v13685_v26  ;;  %v4521_v63 = vshll.u32 %v9118_v19, 16  ;;  %v9254_v42 = vld [vmem:[%s14835_s0 + $0xf4] sm:$0xf]  ;;  %v9122_v34 = vld [vmem:[%s14835_s0 + $0xcc] sm:$0xf] }
 0x20b   :  { %v4509_v14 = vrot.slane %v4508_v13, 4 }
 0x20c   :  { %7536 = vmatmul.mubr.bf16.gmra.mrb[36].mxu0 %v10249_v36  ;;  %v10250_v36 = vld [vmem:[%s14835_s0 + $0x90] sm:$0xff]   ;;  %v4519_v13 = vrot.slane %v4518_v6, 4 }
 0x20d   :  { %7543 = vmatprep.mubr.bf16.mxu0 %v9183_v1  ;;  %v5409_v1 = vrot.slane %v9248_v61, 5  ;;  %9614 = vmatpush3.bf16.msra.mxu1 %v10270_v17  ;;  %v9317_v17 = vrot.slane %v9253_v8, 9 }
 0x20f   :  { %v5410_v51 = vsel %vm10531_vm5, %v9315_v59, %v5409_v1  ;;  %v5411_v10 = vrot.slane %v5409_v1, 4  ;;  %v5417_v59 = vsel %vm10531_vm5, %v9316_v24, %v5416_v52  ;;  %v5420_v1 = vsel %vm10531_vm5, %v5418_v58, %v5419_v20 }
 0x210   :  { %v9348_v57 = vcombine.low %v5417_v59, %v5420_v1  ;;  %v4528_v24 = vrot.slane %v4526_v32, 4  ;;  %v9123_v32 = vld [vmem:[%s14835_s0 + $0xd0] sm:$0xf]  ;;  %v9258_v59 = vld [vmem:[%s14835_s0 + $0x104] sm:$0x1]  ;;  %v5423_v1 = vrot.slane %v9254_v42, 5 }
 0x211   :  { %v4563_v42 = vshrl.u32 %v9123_v32, 16 }
 0x214   :  { %v13681_v29 = vpop.f32.mrb[64].mxu1  ;;  %7544 = vmatmul.mubr.bf16.gmra.mrb[40].mxu0 %v10250_v36  ;;  %v9121_v36 = vld [vmem:[%s14835_s0 + $0xc8] sm:$0x1] }
 0x215   :  { %14853 = vst [vmem:[#allocation8_spill] sm:$0xff] %v13681_v29  ;;  %v7017_v61 = vpop.f32.mrb[65].mxu1  ;;  %v5413_v29 = vsel %vm10531_vm5, %v5411_v10, %v5412_v39  ;;  %7551 = vmatprep.mubr.bf16.mxu0 %v9184_v22  ;;  %v4500_v39 = vsel %vm10438_vm2, %v4495_v11, %v4499_v47  ;;  %v10271_v47 = vld [vmem:[%s14836_s3 + $0x20] sm:$0xff]   ;;  %v4541_v22 = vrot.slane %v4539_v28, 4  ;;  %v9256_v11 = vld [vmem:[%s14835_s0 + $0xfc] sm:$0xe] }
 0x216   :  { %v13687_v40 = vpop.f32.mrb[66].mxu1  ;;  %v9347_v0 = vcombine.low %v5410_v51, %v5413_v29  ;;  %v4531_v29 = vrot.slane %v4529_v15, 5  ;;  %v9255_v51 = vld [vmem:[%s14835_s0 + $0xf8] sm:$0x1]  ;;  %v10251_v10 = vld [vmem:[%s14835_s0 + $0x9c] sm:$0xff]   ;;  %v13730_v61 = vrot.slane %v4535_v44, 5  ;;  %9615 = vmatprep.subr.bf16.mxu1 %v10271_v47  ;;  %v9185_v15 = vcombine.low %v4490_v46, %v4500_v39 }
 0x217   :  { %14854 = vst [vmem:[#allocation9_spill] sm:$0xff] %v13687_v40  ;;  %v7020_v4 = vpop.f32.mrb[67].mxu1  ;;  %9616 = vmatpush3.bf16.msra.mxu1 %v10271_v47  ;;  %v4514_v44 = vsel %vm10438_vm2, %v4509_v14, %v13685_v26  ;;  %v4545_v46 = vshll.u32 %v9121_v36, 16  ;;  %v10273_v39 = vld [vmem:[%s14836_s3 + $0x28] sm:$0xff]   ;;  %v9318_v8 = vrot.slane %v9256_v11, 9  ;;  %v4553_v47 = vshll.u32 %v9122_v34, 16 }
 0x218   :  { %9571 = vmatprep.mubr.bf16.mxu1 %v9347_v0  ;;  %v9257_v4 = vld [vmem:[%s14835_s0 + $0x100] sm:$0xf]  ;;  %v4523_v0 = vrot.slane %v4521_v63, 5  ;;  %v4532_v28 = vor.u32 %v4531_v29, %v4528_v24  ;;  %v4542_v6 = vor.u32 %v4541_v22, %v13730_v61  ;;  %v4550_v63 = vshrl.u32 %v9122_v34, 16  ;;  %9617 = vmatprep.subr.bf16.mxu1 %v10273_v39  ;;  %v10274_v29 = vld [vmem:[%s14836_s3 + $0x30] sm:$0xff]   ;;  %v10252_v22 = vld [vmem:[%s14835_s0 + $0xa8] sm:$0xff]  }
 0x219   :  { %9572 = vmatmul.mubr.bf16.gmra.mrb[156].mxu1 %v9348_v57  ;;  %v5426_v57 = vrot.slane %v9255_v51, 5  ;;  %v5425_v26 = vrot.slane %v5423_v1, 4  ;;  %v5430_v14 = vrot.slane %v9257_v4, 5  ;;  %v5433_v24 = vrot.slane %v9258_v59, 5  ;;  %v9125_v34 = vld [vmem:[%s14835_s0 + $0xf0] sm:$0xf] }
 0x21a   :  { %v4524_v36 = vsel %vm10438_vm2, %v4519_v13, %v4523_v0  ;;  %v4547_v51 = vrot.slane %v4545_v46, 5  ;;  %v4533_v11 = vrot.slane %v4532_v28, 4  ;;  %v4543_v46 = vrot.slane %v4542_v6, 4 }
 0x21b   :  { %9618 = vmatpush3.bf16.msra.mxu1 %v10273_v39  ;;  %v5431_v4 = vsel %vm10531_vm5, %v9318_v8, %v5430_v14  ;;  %v5432_v13 = vrot.slane %v5430_v14, 4  ;;  %v9186_v59 = vcombine.low %v4514_v44, %v4524_v36  ;;  %v4552_v39 = vrot.slane %v4550_v63, 4  ;;  %v9259_v63 = vld [vmem:[%s14835_s0 + $0x108] sm:$0xe] }
 0x21c   :  { %v13728_v52 = vpop.f32.mrb[68].mxu1  ;;  %7552 = vmatmul.mubr.bf16.gmra.mrb[44].mxu0 %v10251_v10  ;;  %v5427_v10 = vsel %vm10531_vm5, %v5425_v26, %v5426_v57  ;;  %9619 = vmatprep.subr.bf16.mxu1 %v10274_v29  ;;  %v4555_v57 = vrot.slane %v4553_v47, 5  ;;  %v4577_v44 = vshll.u32 %v9125_v34, 16 }
 0x21d   :  { %14855 = vst [vmem:[#allocation10_spill] sm:$0xff] %v13728_v52  ;;  %v7025_v20 = vpop.f32.mrb[69].mxu1  ;;  %7559 = vmatprep.mubr.bf16.mxu0 %v9185_v15  ;;  %v9126_v15 = vld [vmem:[%s14835_s0 + $0xf4] sm:$0xf]  ;;  %v5434_v8 = vsel %vm10531_vm5, %v5432_v13, %v5433_v24  ;;  %v4538_v24 = vsel %vm10438_vm2, %v4533_v11, %v13730_v61  ;;  %v9128_v61 = vld [vmem:[%s14835_s0 + $0xfc] sm:$0xf] }
 0x21e   :  { %v13741_v19 = vpop.f32.mrb[70].mxu1  ;;  %v4559_v20 = vshll.u32 %v9123_v32, 16  ;;  %v4583_v6 = vshll.u32 %v9126_v15, 16  ;;  %v4587_v36 = vshrl.u32 %v9126_v15, 16  ;;  %v9262_v15 = vld [vmem:[%s14835_s0 + $0x114] sm:$0xe] }
 0x21f   :  { %14856 = vst [vmem:[#allocation11_spill] sm:$0xff] %v13741_v19  ;;  %v7028_v58 = vpop.f32.mrb[71].mxu1  ;;  %9620 = vmatpush3.bf16.msra.mxu1 %v10274_v29  ;;  %v4548_v29 = vsel %vm10438_vm2, %v4543_v46, %v4547_v51  ;;  %v9319_v11 = vrot.slane %v9259_v63, 9  ;;  %v9263_v51 = vld [vmem:[%s14835_s0 + $0x118] sm:$0xf]  ;;  %v4579_v13 = vrot.slane %v4577_v44, 5 }
 0x220   :  { %v5424_v58 = vsel %vm10531_vm5, %v9317_v17, %v5423_v1  ;;  %v9124_v1 = vld [vmem:[%s14835_s0 + $0xd4] sm:$0x1]  ;;  %v13780_v26 = vrot.slane %v4559_v20, 5  ;;  %v9127_v20 = vld [vmem:[%s14835_s0 + $0xf8] sm:$0x1]  ;;  %v4598_v52 = vshrl.u32 %v9128_v61, 16 }
 0x221   :  { %v9349_v17 = vcombine.low %v5424_v58, %v5427_v10  ;;  %v4574_v58 = vshrl.u32 %v9125_v34, 16  ;;  %v9350_v10 = vcombine.low %v5431_v4, %v5434_v8  ;;  %v4569_v47 = vshll.u32 %v9124_v1, 16  ;;  %v10276_v1 = vld [vmem:[%s14836_s3 + $0x38] sm:$0xff]   ;;  %v9129_v8 = vld [vmem:[%s14835_s0 + $0x100] sm:$0xf] }
 0x222   :  { %v4556_v34 = vor.u32 %v4555_v57, %v4552_v39  ;;  %v9187_v57 = vcombine.low %v4538_v24, %v4548_v29  ;;  %v9264_v44 = vld [vmem:[%s14835_s0 + $0x11c] sm:$0x1]  ;;  %9621 = vmatprep.subr.bf16.mxu1 %v10276_v1  ;;  %v9320_v24 = vrot.slane %v9262_v15, 9  ;;  %v5444_v29 = vrot.slane %v9263_v51, 5  ;;  %v9131_v15 = vld [vmem:[%s14835_s0 + $0x108] sm:$0xf] }
 0x223   :  { %9575 = vmatprep.mubr.bf16.mxu1 %v9349_v17  ;;  %v4576_v4 = vrot.slane %v4574_v58, 4  ;;  %v4571_v58 = vrot.slane %v4569_v47, 5  ;;  %9622 = vmatpush3.bf16.msra.mxu1 %v10276_v1  ;;  %v4611_v40 = vshrl.u32 %v9129_v8, 16  ;;  %v9265_v1 = vld [vmem:[%s14835_s0 + $0x120] sm:$0xe] }
 0x224   :  { %v13768_v32 = vpop.f32.mrb[72].mxu1  ;;  %7560 = vmatmul.mubr.bf16.gmra.mrb[48].mxu0 %v10252_v22  ;;  %9576 = vmatmul.mubr.bf16.gmra.mrb[160].mxu1 %v9350_v10  ;;  %v9261_v22 = vld [vmem:[%s14835_s0 + $0x110] sm:$0x1]  ;;  %v4593_v10 = vshll.u32 %v9127_v20, 16  ;;  %v4601_v20 = vshll.u32 %v9128_v61, 16 }
 0x225   :  { %14857 = vst [vmem:[#allocation12_spill] sm:$0xff] %v13768_v32  ;;  %v7033_v0 = vpop.f32.mrb[73].mxu1  ;;  %v4565_v32 = vrot.slane %v4563_v42, 4  ;;  %v9260_v42 = vld [vmem:[%s14835_s0 + $0x10c] sm:$0xf]  ;;  %7567 = vmatprep.mubr.bf16.mxu0 %v9186_v59  ;;  %v4589_v59 = vrot.slane %v4587_v36, 4 }
 0x226   :  { %v13778_v28 = vpop.f32.mrb[74].mxu1  ;;  %v13811_v0 = vrot.slane %v4583_v6, 5  ;;  %v5437_v46 = vrot.slane %v9260_v42, 5  ;;  %v4557_v36 = vrot.slane %v4556_v34, 4  ;;  %v4595_v51 = vrot.slane %v4593_v10, 5 }
 0x227   :  { %14858 = vst [vmem:[#allocation13_spill] sm:$0xff] %v13778_v28  ;;  %v7036_v14 = vpop.f32.mrb[75].mxu1  ;;  %v4566_v17 = vor.u32 %v4565_v32, %v13780_v26  ;;  %v10253_v32 = vld [vmem:[%s14835_s0 + $0xb4] sm:$0xff]   ;;  %v4625_v10 = vshll.u32 %v9131_v15, 16 }
 0x228   :  { %v5440_v14 = vrot.slane %v9261_v22, 5  ;;  %v5438_v63 = vsel %vm10531_vm5, %v9319_v11, %v5437_v46  ;;  %v5439_v42 = vrot.slane %v5437_v46, 4  ;;  %v4580_v22 = vor.u32 %v4579_v13, %v4576_v4  ;;  %v9130_v13 = vld [vmem:[%s14835_s0 + $0x104] sm:$0x1] }
 0x229   :  { %v4567_v47 = vrot.slane %v4566_v17, 4  ;;  %v4590_v19 = vor.u32 %v4589_v59, %v13811_v0  ;;  %v5446_v11 = vrot.slane %v5444_v29, 4  ;;  %v4607_v46 = vshll.u32 %v9129_v8, 16  ;;  %v9132_v59 = vld [vmem:[%s14835_s0 + $0x10c] sm:$0xf] }
 0x22a   :  { %v5441_v34 = vsel %vm10531_vm5, %v5439_v42, %v5440_v14  ;;  %v5447_v17 = vrot.slane %v9264_v44, 5  ;;  %v4562_v4 = vsel %vm10438_vm2, %v4557_v36, %v13780_v26  ;;  %v10254_v26 = vld [vmem:[%s14835_s0 + $0xc0] sm:$0xff]   ;;  %v4603_v44 = vrot.slane %v4601_v20, 5 }
 0x22b   :  { %v4572_v61 = vsel %vm10438_vm2, %v4567_v47, %v4571_v58  ;;  %v4600_v58 = vrot.slane %v4598_v52, 4  ;;  %v4622_v36 = vshrl.u32 %v9131_v15, 16  ;;  %v9266_v42 = vld [vmem:[%s14835_s0 + $0x124] sm:$0xf]  ;;  %v9267_v52 = vld [vmem:[%s14835_s0 + $0x128] sm:$0x1] }
 0x22c   :  { %v13819_v39 = vpop.f32.mrb[76].mxu1  ;;  %7568 = vmatmul.mubr.bf16.gmra.mrb[52].mxu0 %v10253_v32  ;;  %v4581_v32 = vrot.slane %v4580_v22, 4  ;;  %v5448_v8 = vsel %vm10531_vm5, %v5446_v11, %v5447_v17  ;;  %v4613_v22 = vrot.slane %v4611_v40, 4  ;;  %v4635_v20 = vshrl.u32 %v9132_v59, 16 }
 0x22d   :  { %14859 = vst [vmem:[#allocation14_spill] sm:$0xff] %v13819_v39  ;;  %v7041_v6 = vpop.f32.mrb[77].mxu1  ;;  %7575 = vmatprep.mubr.bf16.mxu0 %v9187_v57  ;;  %v4591_v57 = vrot.slane %v4590_v19, 4  ;;  %v4617_v15 = vshll.u32 %v9130_v13, 16  ;;  %v9321_v40 = vrot.slane %v9265_v1, 9  ;;  %v5451_v1 = vrot.slane %v9266_v42, 5 }
 0x22e   :  { %v13829_v39 = vpop.f32.mrb[78].mxu1  ;;  %v9351_v6 = vcombine.low %v5438_v63, %v5441_v34  ;;  %v4631_v34 = vshll.u32 %v9132_v59, 16  ;;  %v4624_v59 = vrot.slane %v4622_v36, 4 }
 0x22f   :  { %14860 = vst [vmem:[#allocation15_spill] sm:$0xff] %v13829_v39  ;;  %v7044_v28 = vpop.f32.mrb[79].mxu1  ;;  %v4596_v17 = vsel %vm10438_vm2, %v4591_v57, %v4595_v51  ;;  %v4619_v36 = vrot.slane %v4617_v15, 5  ;;  %v5453_v42 = vrot.slane %v5451_v1, 4 }
 0x230   :  { %v5445_v28 = vsel %vm10531_vm5, %v9320_v24, %v5444_v29  ;;  %9579 = vmatprep.mubr.bf16.mxu1 %v9351_v6  ;;  %v9188_v24 = vcombine.low %v4562_v4, %v4572_v61  ;;  %v13863_v29 = vrot.slane %v4607_v46, 5  ;;  %v9268_v6 = vld [vmem:[%s14835_s0 + $0x12c] sm:$0xe]  ;;  %v4586_v46 = vsel %vm10438_vm2, %v4581_v32, %v13811_v0  ;;  %v9133_v61 = vld [vmem:[%s14835_s0 + $0x110] sm:$0x1] }
 0x231   :  { %v9352_v63 = vcombine.low %v5445_v28, %v5448_v8  ;;  %v9269_v28 = vld [vmem:[%s14835_s0 + $0x130] sm:$0xf]  ;;  %v4604_v4 = vor.u32 %v4603_v44, %v4600_v58  ;;  %v4627_v8 = vrot.slane %v4625_v10, 5  ;;  %v9270_v0 = vld [vmem:[%s14835_s0 + $0x134] sm:$0x1]  ;;  %v5454_v32 = vrot.slane %v9267_v52, 5 }
 0x232   :  { %v4614_v13 = vor.u32 %v4613_v22, %v13863_v29  ;;  %v9322_v51 = vrot.slane %v9268_v6, 9  ;;  %v5458_v57 = vrot.slane %v9269_v28, 5  ;;  %v10255_v58 = vld [vmem:[%s14835_s0 + $0xcc] sm:$0xff]   ;;  %v9189_v44 = vcombine.low %v4586_v46, %v4596_v17  ;;  %v9134_v10 = vld [vmem:[%s14835_s0 + $0x114] sm:$0xf] }
 0x233   :  { %9580 = vmatmul.mubr.bf16.gmra.mrb[164].mxu1 %v9352_v63  ;;  %v4637_v63 = vrot.slane %v4635_v20, 4  ;;  %v4605_v22 = vrot.slane %v4604_v4, 4  ;;  %v9135_v52 = vld [vmem:[%s14835_s0 + $0x118] sm:$0xf]  ;;  %v5461_v6 = vrot.slane %v9270_v0, 5  ;;  %v4628_v15 = vor.u32 %v4627_v8, %v4624_v59 }
 0x234   :  { %v13858_v14 = vpop.f32.mrb[80].mxu1  ;;  %7576 = vmatmul.mubr.bf16.gmra.mrb[56].mxu0 %v10254_v26  ;;  %v13888_v26 = vrot.slane %v4631_v34, 5  ;;  %v5459_v34 = vsel %vm10531_vm5, %v9322_v51, %v5458_v57  ;;  %v5460_v20 = vrot.slane %v5458_v57, 4  ;;  %v4615_v46 = vrot.slane %v4614_v13, 4  ;;  %v9138_v59 = vld [vmem:[%s14835_s0 + $0x124] sm:$0xf] }
 0x235   :  { %14861 = vst [vmem:[#allocation16_spill] sm:$0xff] %v13858_v14  ;;  %v7049_v47 = vpop.f32.mrb[81].mxu1  ;;  %7583 = vmatprep.mubr.bf16.mxu0 %v9188_v24  ;;  %v4641_v28 = vshll.u32 %v9133_v61, 16  ;;  %v4649_v51 = vshll.u32 %v9134_v10, 16  ;;  %v4655_v57 = vshll.u32 %v9135_v52, 16  ;;  %v4659_v0 = vshrl.u32 %v9135_v52, 16 }
 0x236   :  { %v13868_v19 = vpop.f32.mrb[82].mxu1  ;;  %v5452_v47 = vsel %vm10531_vm5, %v9321_v40, %v5451_v1  ;;  %v5455_v40 = vsel %vm10531_vm5, %v5453_v42, %v5454_v32  ;;  %v4638_v4 = vor.u32 %v4637_v63, %v13888_v26  ;;  %v4646_v1 = vshrl.u32 %v9134_v10, 16  ;;  %v9137_v61 = vld [vmem:[%s14835_s0 + $0x120] sm:$0xf]  ;;  %v9271_v8 = vld [vmem:[%s14835_s0 + $0x138] sm:$0xe] }
 0x237   :  { %14862 = vst [vmem:[#allocation17_spill] sm:$0xff] %v13868_v19  ;;  %v7052_v11 = vpop.f32.mrb[83].mxu1  ;;  %v5462_v19 = vsel %vm10531_vm5, %v5460_v20, %v5461_v6  ;;  %v9272_v13 = vld [vmem:[%s14835_s0 + $0x13c] sm:$0xf]  ;;  %v9273_v32 = vld [vmem:[%s14835_s0 + $0x140] sm:$0x1] }
 0x238   :  { %v10256_v63 = vld [vmem:[%s14835_s0 + $0xf0] sm:$0xff]   ;;  %v4643_v10 = vrot.slane %v4641_v28, 5  ;;  %v13938_v42 = vrot.slane %v4655_v57, 5  ;;  %v9323_v20 = vrot.slane %v9271_v8, 9  ;;  %v9275_v6 = vld [vmem:[%s14835_s0 + $0x148] sm:$0xf] }
 0x239   :  { %v4673_v28 = vshll.u32 %v9137_v61, 16  ;;  %v4683_v57 = vshrl.u32 %v9138_v59, 16 }
 0x23c   :  { %v13898_v24 = vpop.f32.mrb[84].mxu1  ;;  %7584 = vmatmul.mubr.bf16.gmra.mrb[60].mxu0 %v10255_v58  ;;  %v4629_v58 = vrot.slane %v4628_v15, 4  ;;  %v4670_v15 = vshrl.u32 %v9137_v61, 16 }
 0x23d   :  { %14863 = vst [vmem:[#allocation18_spill] sm:$0xff] %v13898_v24  ;;  %v7057_v11 = vpop.f32.mrb[85].mxu1  ;;  %v9353_v24 = vcombine.low %v5452_v47, %v5455_v40  ;;  %7591 = vmatprep.mubr.bf16.mxu0 %v9189_v44  ;;  %v4639_v44 = vrot.slane %v4638_v4, 4  ;;  %v4651_v47 = vrot.slane %v4649_v51, 5  ;;  %v4679_v40 = vshll.u32 %v9138_v59, 16 }
 0x23e   :  { %v13907_v17 = vpop.f32.mrb[86].mxu1  ;;  %v9354_v11 = vcombine.low %v5459_v34, %v5462_v19  ;;  %v4620_v19 = vsel %vm10438_vm2, %v4615_v46, %v4619_v36  ;;  %v4648_v36 = vrot.slane %v4646_v1, 4  ;;  %v5465_v4 = vrot.slane %v9272_v13, 5 }
 0x23f   :  { %14864 = vst [vmem:[#allocation19_spill] sm:$0xff] %v13907_v17  ;;  %v7060_v14 = vpop.f32.mrb[87].mxu1  ;;  %9583 = vmatprep.mubr.bf16.mxu1 %v9353_v24  ;;  %v4661_v24 = vrot.slane %v4659_v0, 4  ;;  %v4634_v51 = vsel %vm10438_vm2, %v4629_v58, %v13888_v26  ;;  %v5468_v0 = vrot.slane %v9273_v32, 5  ;;  %v5472_v59 = vrot.slane %v9275_v6, 5 }
 0x240   :  { %v4610_v14 = vsel %vm10438_vm2, %v4605_v22, %v13863_v29  ;;  %9584 = vmatmul.mubr.bf16.gmra.mrb[168].mxu1 %v9354_v11  ;;  %v9136_v29 = vld [vmem:[%s14835_s0 + $0x11c] sm:$0x1]  ;;  %v9274_v22 = vld [vmem:[%s14835_s0 + $0x144] sm:$0xe]  ;;  %v9276_v11 = vld [vmem:[%s14835_s0 + $0x14c] sm:$0x1] }
 0x241   :  { %v9190_v34 = vcombine.low %v4610_v14, %v4620_v19  ;;  %v4644_v14 = vsel %vm10438_vm2, %v4639_v44, %v4643_v10  ;;  %v4652_v19 = vor.u32 %v4651_v47, %v4648_v36  ;;  %v4662_v61 = vor.u32 %v4661_v24, %v13938_v42  ;;  %v9139_v44 = vld [vmem:[%s14835_s0 + $0x128] sm:$0x1] }
 0x242   :  { %v4665_v13 = vshll.u32 %v9136_v29, 16  ;;  %v9324_v26 = vrot.slane %v9274_v22, 9  ;;  %v4672_v32 = vrot.slane %v4670_v15, 4  ;;  %v4675_v58 = vrot.slane %v4673_v28, 5  ;;  %v9140_v15 = vld [vmem:[%s14835_s0 + $0x12c] sm:$0xf] }
 0x243   :  { %v4685_v10 = vrot.slane %v4683_v57, 4  ;;  %v5474_v36 = vrot.slane %v5472_v59, 4  ;;  %v4653_v47 = vrot.slane %v4652_v19, 4  ;;  %v4663_v24 = vrot.slane %v4662_v61, 4  ;;  %v9141_v28 = vld [vmem:[%s14835_s0 + $0x130] sm:$0xf] }
 0x244   :  { %v13943_v52 = vpop.f32.mrb[88].mxu1  ;;  %7592 = vmatmul.mubr.bf16.gmra.mrb[64].mxu0 %v10256_v63  ;;  %v5473_v29 = vsel %vm10531_vm5, %v9324_v26, %v5472_v59  ;;  %v4667_v22 = vrot.slane %v4665_v13, 5  ;;  %v4689_v57 = vshll.u32 %v9139_v44, 16  ;;  %v4676_v61 = vor.u32 %v4675_v58, %v4672_v32  ;;  %v9142_v32 = vld [vmem:[%s14835_s0 + $0x134] sm:$0x1] }
 0x245   :  { %14865 = vst [vmem:[#allocation20_spill] sm:$0xff] %v13943_v52  ;;  %v7065_v46 = vpop.f32.mrb[89].mxu1  ;;  %7599 = vmatprep.mubr.bf16.mxu0 %v9190_v34  ;;  %v13961_v52 = vrot.slane %v4679_v40, 5  ;;  %v4658_v26 = vsel %vm10438_vm2, %v4653_v47, %v13938_v42  ;;  %v4694_v58 = vshrl.u32 %v9140_v15, 16  ;;  %v9143_v44 = vld [vmem:[%s14835_s0 + $0x138] sm:$0xf] }
 0x246   :  { %v13948_v1 = vpop.f32.mrb[90].mxu1  ;;  %v5466_v46 = vsel %vm10531_vm5, %v9323_v20, %v5465_v4  ;;  %v10257_v20 = vld [vmem:[%s14835_s0 + $0xfc] sm:$0xff]   ;;  %v4668_v59 = vsel %vm10438_vm2, %v4663_v24, %v4667_v22  ;;  %v4707_v47 = vshrl.u32 %v9141_v28, 16 }
 0x247   :  { %14866 = vst [vmem:[#allocation21_spill] sm:$0xff] %v13948_v1  ;;  %v7068_v8 = vpop.f32.mrb[91].mxu1  ;;  %v5467_v1 = vrot.slane %v5465_v4, 4  ;;  %v4686_v13 = vor.u32 %v4685_v10, %v13961_v52  ;;  %v9280_v10 = vld [vmem:[%s14835_s0 + $0x15c] sm:$0xe]  ;;  %v9192_v22 = vcombine.low %v4658_v26, %v4668_v59 }
 0x248   :  { %v5475_v8 = vrot.slane %v9276_v11, 5  ;;  %v9277_v11 = vld [vmem:[%s14835_s0 + $0x150] sm:$0xe] }
 0x249   :  { %v5469_v63 = vsel %vm10531_vm5, %v5467_v1, %v5468_v0  ;;  %v9191_v1 = vcombine.low %v4634_v51, %v4644_v14  ;;  %v9279_v51 = vld [vmem:[%s14835_s0 + $0x158] sm:$0x1]  ;;  %v9325_v42 = vrot.slane %v9277_v11, 9 }
 0x24a   :  { %v9355_v34 = vcombine.low %v5466_v46, %v5469_v63  ;;  %v5476_v40 = vsel %vm10531_vm5, %v5474_v36, %v5475_v8  ;;  %v9278_v46 = vld [vmem:[%s14835_s0 + $0x154] sm:$0xf]  ;;  %v4697_v8 = vshll.u32 %v9140_v15, 16  ;;  %v9281_v63 = vld [vmem:[%s14835_s0 + $0x160] sm:$0xf]  ;;  %v4703_v36 = vshll.u32 %v9141_v28, 16 }
 0x24b   :  { %v9356_v0 = vcombine.low %v5473_v29, %v5476_v40  ;;  %v4691_v29 = vrot.slane %v4689_v57, 5  ;;  %v5479_v24 = vrot.slane %v9278_v46, 5  ;;  %v4687_v15 = vrot.slane %v4686_v13, 4  ;;  %v9144_v40 = vld [vmem:[%s14835_s0 + $0x13c] sm:$0xf]  ;;  %v10258_v28 = vld [vmem:[%s14835_s0 + $0x108] sm:$0xff]  }
 0x24c   :  { %v13973_v6 = vpop.f32.mrb[92].mxu1  ;;  %9587 = vmatprep.mubr.bf16.mxu1 %v9355_v34  ;;  %7600 = vmatmul.mubr.bf16.gmra.mrb[68].mxu0 %v10257_v20  ;;  %v4677_v34 = vrot.slane %v4676_v61, 4  ;;  %v4699_v20 = vrot.slane %v4697_v8, 5  ;;  %v4713_v61 = vshll.u32 %v9142_v32, 16  ;;  %v4718_v13 = vshrl.u32 %v9143_v44, 16 }
 0x24d   :  { %14867 = vst [vmem:[#allocation22_spill] sm:$0xff] %v13973_v6  ;;  %v7073_v4 = vpop.f32.mrb[93].mxu1  ;;  %9588 = vmatmul.mubr.bf16.gmra.mrb[172].mxu1 %v9356_v0  ;;  %7607 = vmatprep.mubr.bf16.mxu0 %v9191_v1  ;;  %v4696_v0 = vrot.slane %v4694_v58, 4  ;;  %v5480_v11 = vsel %vm10531_vm5, %v9325_v42, %v5479_v24  ;;  %v9282_v1 = vld [vmem:[%s14835_s0 + $0x164] sm:$0x1]  ;;  %v9326_v46 = vrot.slane %v9280_v10, 9 }
 0x24e   :  { %v13986_v19 = vpop.f32.mrb[94].mxu1  ;;  %v5482_v4 = vrot.slane %v9279_v51, 5  ;;  %v5486_v51 = vrot.slane %v9281_v63, 5  ;;  %v14025_v59 = vrot.slane %v4703_v36, 5  ;;  %v4709_v58 = vrot.slane %v4707_v47, 4 }
 0x24f   :  { %14868 = vst [vmem:[#allocation23_spill] sm:$0xff] %v13986_v19  ;;  %v7076_v14 = vpop.f32.mrb[95].mxu1  ;;  %v4721_v8 = vshll.u32 %v9143_v44, 16  ;;  %v4727_v19 = vshll.u32 %v9144_v40, 16  ;;  %v4731_v6 = vshrl.u32 %v9144_v40, 16  ;;  %v5489_v44 = vrot.slane %v9282_v1, 5 }
 0x250   :  { %v5481_v14 = vrot.slane %v5479_v24, 4  ;;  %v5488_v39 = vrot.slane %v5486_v51, 4  ;;  %v14034_v32 = vld [vmem:[%s14835_s0 + $0x140] sm:$0x1]  ;;  %v5487_v10 = vsel %vm10531_vm5, %v9326_v46, %v5486_v51  ;;  %v9283_v63 = vld [vmem:[%s14835_s0 + $0x168] sm:$0xe]  ;;  %v4682_v36 = vsel %vm10438_vm2, %v4677_v34, %v13961_v52 }
 0x251   :  { %v9284_v47 = vld [vmem:[%s14835_s0 + $0x16c] sm:$0xf]  ;;  %v9285_v40 = vld [vmem:[%s14835_s0 + $0x170] sm:$0x1]  ;;  %v14056_v52 = vrot.slane %v4713_v61, 5  ;;  %v4720_v34 = vrot.slane %v4718_v13, 4 }
 0x252   :  { %v5483_v42 = vsel %vm10531_vm5, %v5481_v14, %v5482_v4  ;;  %v9286_v4 = vld [vmem:[%s14835_s0 + $0x174] sm:$0xe]  ;;  %v4733_v14 = vrot.slane %v4731_v6, 4  ;;  %v9327_v61 = vrot.slane %v9283_v63, 9  ;;  %v5493_v13 = vrot.slane %v9284_v47, 5 }
 0x253   :  { %v9357_v17 = vcombine.low %v5480_v11, %v5483_v42  ;;  %v14069_v11 = vrot.slane %v4727_v19, 5  ;;  %v5496_v46 = vrot.slane %v9285_v40, 5  ;;  %v9147_v19 = vld [vmem:[%s14835_s0 + $0x148] sm:$0xf]  ;;  %v9328_v6 = vrot.slane %v9286_v4, 9 }
 0x254   :  { %v14023_v57 = vpop.f32.mrb[96].mxu1  ;;  %7608 = vmatmul.mubr.bf16.gmra.mrb[72].mxu0 %v10258_v28  ;;  %v9290_v4 = vld [vmem:[%s14835_s0 + $0x184] sm:$0xf] }
 0x255   :  { %14869 = vst [vmem:[#allocation24_spill] sm:$0xff] %v14023_v57  ;;  %v7081_v26 = vpop.f32.mrb[97].mxu1  ;;  %v4700_v57 = vor.u32 %v4699_v20, %v4696_v0  ;;  %9591 = vmatprep.mubr.bf16.mxu1 %v9357_v17  ;;  %7615 = vmatprep.mubr.bf16.mxu0 %v9192_v22  ;;  %v4710_v0 = vor.u32 %v4709_v58, %v14025_v59  ;;  %v10259_v22 = vld [vmem:[%s14835_s0 + $0x114] sm:$0xff]   ;;  %v4723_v20 = vrot.slane %v4721_v8, 5  ;;  %v4737_v58 = vshll.u32 %v14034_v32, 16 }
 0x256   :  { %v14029_v24 = vpop.f32.mrb[98].mxu1  ;;  %v5490_v17 = vsel %vm10531_vm5, %v5488_v39, %v5489_v44  ;;  %v9146_v39 = vld [vmem:[%s14835_s0 + $0x144] sm:$0xf]  ;;  %v5495_v44 = vrot.slane %v5493_v13, 4 }
 0x257   :  { %v7084_v43 = vpop.f32.mrb[99].mxu1  ;;  %v9358_v1 = vcombine.low %v5487_v10, %v5490_v17  ;;  %v4701_v28 = vrot.slane %v4700_v57, 4  ;;  %v4711_v42 = vrot.slane %v4710_v0, 4  ;;  %v5494_v10 = vsel %vm10531_vm5, %v9327_v61, %v5493_v13 }
 0x258   :  { %v4692_v43 = vsel %vm10438_vm2, %v4687_v15, %v4691_v29  ;;  %v9287_v29 = vld [vmem:[%s14835_s0 + $0x178] sm:$0xf]  ;;  %v9288_v15 = vld [vmem:[%s14835_s0 + $0x17c] sm:$0x1]  ;;  %v4724_v40 = vor.u32 %v4723_v20, %v4720_v34  ;;  %v5497_v34 = vsel %vm10531_vm5, %v5495_v44, %v5496_v46  ;;  %v9292_v20 = vld [vmem:[%s14835_s0 + $0x18c] sm:$0xe] }
 0x259   :  { %v9193_v26 = vcombine.low %v4682_v36, %v4692_v43  ;;  %9592 = vmatmul.mubr.bf16.gmra.mrb[176].mxu1 %v9358_v1  ;;  %v5500_v8 = vrot.slane %v9287_v29, 5  ;;  %v5503_v63 = vrot.slane %v9288_v15, 5  ;;  %v9289_v43 = vld [vmem:[%s14835_s0 + $0x180] sm:$0xe]  ;;  %v4706_v17 = vsel %vm10438_vm2, %v4701_v28, %v14025_v59  ;;  %v9291_v15 = vld [vmem:[%s14835_s0 + $0x188] sm:$0x1] }
 0x25a   :  { %v4734_v29 = vor.u32 %v4733_v14, %v14069_v11  ;;  %v4742_v1 = vshrl.u32 %v9146_v39, 16  ;;  %v4745_v61 = vshll.u32 %v9146_v39, 16  ;;  %v9359_v13 = vcombine.low %v5494_v10, %v5497_v34  ;;  %v9148_v28 = vld [vmem:[%s14835_s0 + $0x14c] sm:$0x1]  ;;  %v10260_v39 = vld [vmem:[%s14835_s0 + $0x120] sm:$0xff]  }
 0x25b   :  { %v5501_v32 = vsel %vm10531_vm5, %v9328_v6, %v5500_v8  ;;  %v5502_v36 = vrot.slane %v5500_v8, 4  ;;  %v4716_v14 = vsel %vm10438_vm2, %v4711_v42, %v14056_v52  ;;  %v4751_v46 = vshll.u32 %v9147_v19, 16  ;;  %v9294_v52 = vld [vmem:[%s14835_s0 + $0x194] sm:$0x1] }
 0x25c   :  { %v14074_v51 = vpop.f32.mrb[100].mxu1  ;;  %7616 = vmatmul.mubr.bf16.gmra.mrb[76].mxu0 %v10259_v22  ;;  %v4755_v6 = vshrl.u32 %v9147_v19, 16  ;;  %v9293_v22 = vld [vmem:[%s14835_s0 + $0x190] sm:$0xf]  ;;  %9595 = vmatprep.mubr.bf16.mxu1 %v9359_v13  ;;  %v9329_v10 = vrot.slane %v9289_v43, 9  ;;  %v4735_v42 = vrot.slane %v4734_v29, 4 }
 0x25d   :  { %v7089_v57 = vpop.f32.mrb[101].mxu1  ;;  %v5504_v59 = vsel %vm10531_vm5, %v5502_v36, %v5503_v63  ;;  %7623 = vmatprep.mubr.bf16.mxu0 %v9193_v26  ;;  %v4725_v26 = vrot.slane %v4724_v40, 4  ;;  %v5507_v44 = vrot.slane %v9290_v4, 5  ;;  %v5510_v19 = vrot.slane %v9291_v15, 5  ;;  %v9149_v40 = vld [vmem:[%s14835_s0 + $0x150] sm:$0xf] }
 0x25e   :  { %v14082_v47 = vpop.f32.mrb[102].mxu1  ;;  %v9360_v8 = vcombine.low %v5501_v32, %v5504_v59  ;;  %v4739_v57 = vrot.slane %v4737_v58, 5  ;;  %v9330_v63 = vrot.slane %v9292_v20, 9  ;;  %v9194_v36 = vcombine.low %v4706_v17, %v4716_v14  ;;  %v9150_v17 = vld [vmem:[%s14835_s0 + $0x154] sm:$0xf] }
 0x25f   :  { %14870 = vst [vmem:[#allocation25_spill] sm:$0xff] %v14082_v47  ;;  %v7092_v0 = vpop.f32.mrb[103].mxu1  ;;  %v4747_v34 = vrot.slane %v4745_v61, 5  ;;  %v5514_v58 = vrot.slane %v9293_v22, 5  ;;  %v14126_v13 = vrot.slane %v4751_v46, 5  ;;  %v4757_v59 = vrot.slane %v4755_v6, 4 }
 0x260   :  { %v4744_v0 = vrot.slane %v4742_v1, 4  ;;  %v5508_v4 = vsel %vm10531_vm5, %v9329_v10, %v5507_v44  ;;  %v5509_v29 = vrot.slane %v5507_v44, 4  ;;  %v4761_v20 = vshll.u32 %v9148_v28, 16  ;;  %v9295_v28 = vld [vmem:[%s14835_s0 + $0x198] sm:$0xe] }
 0x261   :  { %9596 = vmatmul.mubr.bf16.gmra.mrb[180].mxu1 %v9360_v8  ;;  %v5515_v1 = vsel %vm10531_vm5, %v9330_v63, %v5514_v58  ;;  %v5516_v61 = vrot.slane %v5514_v58, 4  ;;  %v5517_v14 = vrot.slane %v9294_v52, 5  ;;  %v4730_v46 = vsel %vm10438_vm2, %v4725_v26, %v14069_v11  ;;  %v9296_v11 = vld [vmem:[%s14835_s0 + $0x19c] sm:$0xf] }
 0x262   :  { %v4766_v6 = vshrl.u32 %v9149_v40, 16  ;;  %v4769_v22 = vshll.u32 %v9149_v40, 16  ;;  %v5511_v10 = vsel %vm10531_vm5, %v5509_v29, %v5510_v19  ;;  %v4740_v44 = vsel %vm10438_vm2, %v4735_v42, %v4739_v57  ;;  %v9297_v57 = vld [vmem:[%s14835_s0 + $0x1a0] sm:$0x1]  ;;  %v9298_v42 = vld [vmem:[%s14835_s0 + $0x1a4] sm:$0xe] }
 0x263   :  { %v4748_v63 = vor.u32 %v4747_v34, %v4744_v0  ;;  %v9361_v52 = vcombine.low %v5508_v4, %v5511_v10  ;;  %v5518_v58 = vsel %vm10531_vm5, %v5516_v61, %v5517_v14  ;;  %v4758_v26 = vor.u32 %v4757_v59, %v14126_v13  ;;  %v9300_v61 = vld [vmem:[%s14835_s0 + $0x1ac] sm:$0x1] }
 0x264   :  { %v14121_v32 = vpop.f32.mrb[104].mxu1  ;;  %7624 = vmatmul.mubr.bf16.gmra.mrb[80].mxu0 %v10260_v39  ;;  %v4775_v19 = vshll.u32 %v9150_v17, 16  ;;  %v9152_v39 = vld [vmem:[%s14835_s0 + $0x15c] sm:$0xf]  ;;  %v9362_v40 = vcombine.low %v5515_v1, %v5518_v58  ;;  %v4763_v0 = vrot.slane %v4761_v20, 5  ;;  %v4779_v34 = vshrl.u32 %v9150_v17, 16 }
 0x265   :  { %14871 = vst [vmem:[#allocation26_spill] sm:$0xff] %v14121_v32  ;;  %v7097_v43 = vpop.f32.mrb[105].mxu1  ;;  %7631 = vmatprep.mubr.bf16.mxu0 %v9194_v36  ;;  %v9153_v36 = vld [vmem:[%s14835_s0 + $0x160] sm:$0xf]  ;;  %9599 = vmatprep.mubr.bf16.mxu1 %v9361_v52  ;;  %v9195_v59 = vcombine.low %v4730_v46, %v4740_v44  ;;  %v4768_v4 = vrot.slane %v4766_v6, 4  ;;  %v5521_v29 = vrot.slane %v9296_v11, 5 }
 0x266   :  { %v14130_v15 = vpop.f32.mrb[106].mxu1  ;;  %v9331_v43 = vrot.slane %v9295_v28, 9  ;;  %v9299_v1 = vld [vmem:[%s14835_s0 + $0x1a8] sm:$0xf]  ;;  %v10261_v20 = vld [vmem:[%s14835_s0 + $0x12c] sm:$0xff]   ;;  %v4749_v14 = vrot.slane %v4748_v63, 4 }
 0x267   :  { %14872 = vst [vmem:[#allocation27_spill] sm:$0xff] %v14130_v15  ;;  %v7100_v8 = vpop.f32.mrb[107].mxu1  ;;  %v5524_v46 = vrot.slane %v9297_v57, 5  ;;  %v9332_v6 = vrot.slane %v9298_v42, 9  ;;  %v4759_v28 = vrot.slane %v4758_v26, 4  ;;  %v14179_v52 = vrot.slane %v4775_v19, 5 }
 0x268   :  { %v4771_v8 = vrot.slane %v4769_v22, 5  ;;  %v9151_v44 = vld [vmem:[%s14835_s0 + $0x158] sm:$0x1]  ;;  %v5522_v58 = vsel %vm10531_vm5, %v9331_v43, %v5521_v29  ;;  %v5523_v11 = vrot.slane %v5521_v29, 4  ;;  %v4790_v63 = vshrl.u32 %v9152_v39, 16 }
 0x269   :  { %9600 = vmatmul.mubr.bf16.gmra.mrb[184].mxu1 %v9362_v40  ;;  %v5528_v22 = vrot.slane %v9299_v1, 5  ;;  %v5531_v40 = vrot.slane %v9300_v61, 5  ;;  %v4793_v42 = vshll.u32 %v9152_v39, 16  ;;  %v4803_v26 = vshrl.u32 %v9153_v36, 16 }
 0x26a   :  { %v5525_v32 = vsel %vm10531_vm5, %v5523_v11, %v5524_v46  ;;  %v4772_v29 = vor.u32 %v4771_v8, %v4768_v4  ;;  %v4785_v1 = vshll.u32 %v9151_v44, 16  ;;  %v4764_v39 = vsel %vm10438_vm2, %v4759_v28, %v4763_v0  ;;  %v9154_v0 = vld [vmem:[%s14835_s0 + $0x164] sm:$0x1] }
 0x26b   :  { %v9363_v19 = vcombine.low %v5522_v58, %v5525_v32  ;;  %v5529_v47 = vsel %vm10531_vm5, %v9332_v6, %v5528_v22  ;;  %v5530_v43 = vrot.slane %v5528_v22, 4  ;;  %v4792_v61 = vrot.slane %v4790_v63, 4 }
 0x26c   :  { %v14174_v17 = vpop.f32.mrb[108].mxu1  ;;  %7632 = vmatmul.mubr.bf16.gmra.mrb[84].mxu0 %v10261_v20  ;;  %v4795_v20 = vrot.slane %v4793_v42, 5  ;;  %v4805_v6 = vrot.slane %v4803_v26, 4  ;;  %v4773_v28 = vrot.slane %v4772_v29, 4  ;;  %v4787_v58 = vrot.slane %v4785_v1, 5 }
 0x26d   :  { %14873 = vst [vmem:[#allocation28_spill] sm:$0xff] %v14174_v17  ;;  %v7105_v10 = vpop.f32.mrb[109].mxu1  ;;  %v4781_v17 = vrot.slane %v4779_v34, 4  ;;  %7639 = vmatprep.mubr.bf16.mxu0 %v9195_v59  ;;  %v4754_v34 = vsel %vm10438_vm2, %v4749_v14, %v14126_v13  ;;  %9603 = vmatprep.mubr.bf16.mxu1 %v9363_v19  ;;  %v5532_v32 = vsel %vm10531_vm5, %v5530_v43, %v5531_v40  ;;  %v10262_v13 = vld [vmem:[%s14835_s0 + $0x138] sm:$0xff]   ;;  %v4809_v40 = vshll.u32 %v9154_v0, 16 }
 0x26e   :  { %v14183_v15 = vpop.f32.mrb[110].mxu1  ;;  %v4799_v10 = vshll.u32 %v9153_v36, 16  ;;  %v9364_v59 = vcombine.low %v5529_v47, %v5532_v32  ;;  %v9196_v14 = vcombine.low %v4754_v34, %v4764_v39  ;;  %v9156_v47 = vld [vmem:[%s14835_s0 + $0x16c] sm:$0xf]  ;;  %v4796_v63 = vor.u32 %v4795_v20, %v4792_v61  ;;  %v10263_v39 = vld [vmem:[%s14835_s0 + $0x144] sm:$0xff]  }
 0x26f   :  { %v7108_v57 = vpop.f32.mrb[111].mxu1  ;;  %v4782_v36 = vor.u32 %v4781_v17, %v14179_v52  ;;  %v4817_v42 = vshll.u32 %v9155_v30, 16  ;;  %v4827_v26 = vshrl.u32 %v9156_v47, 16  ;;  %v4778_v19 = vsel %vm10438_vm2, %v4773_v28, %v14179_v52  ;;  %v9157_v52 = vld [vmem:[%s14835_s0 + $0x170] sm:$0x1] }
 0x270   :  { %v4801_v46 = vrot.slane %v4799_v10, 5  ;;  %v4814_v57 = vshrl.u32 %v9155_v30, 16  ;;  %v4823_v10 = vshll.u32 %v9156_v47, 16  ;;  %v4797_v34 = vrot.slane %v4796_v63, 4 }
 0x271   :  { %9604 = vmatmul.mubr.bf16.gmra.mrb[188].mxu1 %v9364_v59  ;;  %v4783_v44 = vrot.slane %v4782_v36, 4  ;;  %v4811_v1 = vrot.slane %v4809_v40, 5  ;;  %v4819_v32 = vrot.slane %v4817_v42, 5  ;;  %v10264_v42 = vld [vmem:[%s14835_s0 + $0x150] sm:$0xff]  }
 0x272   :  { %v4806_v22 = vor.u32 %v4805_v6, %v4801_v46  ;;  %v4816_v61 = vrot.slane %v4814_v57, 4  ;;  %v4825_v20 = vrot.slane %v4823_v10, 5  ;;  %v4829_v6 = vrot.slane %v4827_v26, 4 }
 0x273   :  { %v4788_v43 = vsel %vm10438_vm2, %v4783_v44, %v4787_v58  ;;  %v4802_v47 = vsel %vm10438_vm2, %v4797_v34, %v4801_v46 }
 0x274   :  { %v14200_v4 = vpop.f32.mrb[112].mxu1  ;;  %7640 = vmatmul.mubr.bf16.gmra.mrb[88].mxu0 %v10262_v13  ;;  %v4807_v29 = vrot.slane %v4806_v22, 4  ;;  %v9197_v13 = vcombine.low %v4778_v19, %v4788_v43  ;;  %v4820_v44 = vor.u32 %v4819_v32, %v4816_v61  ;;  %v4830_v58 = vor.u32 %v4829_v6, %v4825_v20  ;;  %v9160_v6 = vld [vmem:[%s14835_s0 + $0x17c] sm:$0x1] }
 0x275   :  { %v7113_v17 = vpop.f32.mrb[113].mxu1  ;;  %7647 = vmatprep.mubr.bf16.mxu0 %v9196_v14  ;;  %v9159_v14 = vld [vmem:[%s14835_s0 + $0x178] sm:$0xf] }
 0x276   :  { %v14211_v8 = vpop.f32.mrb[114].mxu1  ;;  %v9158_v17 = vld [vmem:[%s14835_s0 + $0x174] sm:$0xf]  ;;  %v4812_v28 = vsel %vm10438_vm2, %v4807_v29, %v4811_v1  ;;  %v4847_v40 = vshll.u32 %v9159_v14, 16  ;;  %v4851_v57 = vshrl.u32 %v9159_v14, 16  ;;  %v4821_v46 = vrot.slane %v4820_v44, 4 }
 0x277   :  { %v7116_v11 = vpop.f32.mrb[115].mxu1  ;;  %v4838_v63 = vshrl.u32 %v9158_v17, 16  ;;  %v4841_v22 = vshll.u32 %v9158_v17, 16  ;;  %v9198_v26 = vcombine.low %v4802_v47, %v4812_v28  ;;  %v4831_v19 = vrot.slane %v4830_v58, 4 }
 0x278   :  { %v4833_v11 = vshll.u32 %v9157_v52, 16  ;;  %v4853_v61 = vrot.slane %v4851_v57, 4  ;;  %v9162_v52 = vld [vmem:[%s14835_s0 + $0x184] sm:$0xf]  ;;  %v4826_v17 = vsel %vm10438_vm2, %v4821_v46, %v4825_v20  ;;  %v4857_v28 = vshll.u32 %v9160_v6, 16 }
 0x279   :  { %v4840_v29 = vrot.slane %v4838_v63, 4  ;;  %v4843_v1 = vrot.slane %v4841_v22, 5  ;;  %v4875_v63 = vshrl.u32 %v9162_v52, 16  ;;  %v10266_v22 = vld [vmem:[%s14835_s0 + $0x15c] sm:$0xff]   ;;  %v9164_v20 = vld [vmem:[%s14835_s0 + $0x18c] sm:$0xf] }
 0x27a   :  { %v4835_v43 = vrot.slane %v4833_v11, 5  ;;  %v4871_v11 = vshll.u32 %v9162_v52, 16  ;;  %v4886_v52 = vshrl.u32 %v9164_v20, 16 }
 0x27b   :  { %v4877_v6 = vrot.slane %v4875_v63, 4  ;;  %v10269_v63 = vld [vmem:[%s14835_s0 + $0x168] sm:$0xff]  }
 0x27c   :  { %v14221_v36 = vpop.f32.mrb[116].mxu1  ;;  %7648 = vmatmul.mubr.bf16.gmra.mrb[92].mxu0 %v10263_v39  ;;  %v4849_v39 = vrot.slane %v4847_v40, 5  ;;  %v4836_v14 = vsel %vm10438_vm2, %v4831_v19, %v4835_v43  ;;  %v4859_v19 = vrot.slane %v4857_v28, 5  ;;  %v9165_v43 = vld [vmem:[%s14835_s0 + $0x190] sm:$0xf] }
 0x27d   :  { %v7121_v59 = vpop.f32.mrb[117].mxu1  ;;  %7655 = vmatprep.mubr.bf16.mxu0 %v9197_v13  ;;  %v9161_v13 = vld [vmem:[%s14835_s0 + $0x180] sm:$0xf] }
 0x27e   :  { %v14226_v0 = vpop.f32.mrb[118].mxu1  ;;  %v4854_v47 = vor.u32 %v4853_v61, %v4849_v39  ;;  %v4862_v44 = vshrl.u32 %v9161_v13, 16  ;;  %v4865_v58 = vshll.u32 %v9161_v13, 16  ;;  %v4873_v61 = vrot.slane %v4871_v11, 5  ;;  %v9163_v13 = vld [vmem:[%s14835_s0 + $0x188] sm:$0x1] }
 0x27f   :  { %14874 = vst [vmem:[#allocation29_spill] sm:$0xff] %v14226_v0  ;;  %v7124_v30 = vpop.f32.mrb[119].mxu1  ;;  %v4881_v11 = vshll.u32 %v9163_v13, 16 }
 0x280   :  { %v4844_v30 = vor.u32 %v4843_v1, %v4840_v29  ;;  %v4855_v46 = vrot.slane %v4854_v47, 4  ;;  %v4864_v29 = vrot.slane %v4862_v44, 4  ;;  %v4867_v1 = vrot.slane %v4865_v58, 5 }
 0x281   :  { %v4899_v47 = vshrl.u32 %v9165_v43, 16  ;;  %v4878_v58 = vor.u32 %v4877_v6, %v4873_v61  ;;  %v9168_v6 = vld [vmem:[%s14835_s0 + $0x19c] sm:$0xf] }
 0x282   :  { %v4860_v28 = vsel %vm10438_vm2, %v4855_v46, %v4859_v19  ;;  %v4868_v44 = vor.u32 %v4867_v1, %v4864_v29  ;;  %v9167_v46 = vld [vmem:[%s14835_s0 + $0x198] sm:$0xf]  ;;  %v4883_v1 = vrot.slane %v4881_v11, 5  ;;  %v4923_v11 = vshrl.u32 %v9168_v6, 16 }
 0x283   :  { %v4879_v29 = vrot.slane %v4878_v58, 4  ;;  %v4919_v58 = vshll.u32 %v9168_v6, 16 }
 0x284   :  { %v14241_v10 = vpop.f32.mrb[120].mxu1  ;;  %7656 = vmatmul.mubr.bf16.gmra.mrb[96].mxu0 %v10264_v42  ;;  %v9199_v42 = vcombine.low %v4826_v17, %v4836_v14  ;;  %v4889_v17 = vshll.u32 %v9164_v20, 16  ;;  %v4888_v20 = vrot.slane %v4886_v52, 4 }
 0x285   :  { %14875 = vst [vmem:[#allocation30_spill] sm:$0xff] %v14241_v10  ;;  %v7129_v34 = vpop.f32.mrb[121].mxu1  ;;  %7663 = vmatprep.mubr.bf16.mxu0 %v9198_v26  ;;  %v4845_v26 = vrot.slane %v4844_v30, 4  ;;  %v4895_v30 = vshll.u32 %v9165_v43, 16  ;;  %v4869_v43 = vrot.slane %v4868_v44, 4 }
 0x286   :  { %v14243_v32 = vpop.f32.mrb[122].mxu1 }
 0x287   :  { %14876 = vst [vmem:[#allocation31_spill] sm:$0xff] %v14243_v32  ;;  %v7132_v59 = vpop.f32.mrb[123].mxu1  ;;  %v4850_v14 = vsel %vm10438_vm2, %v4845_v26, %v4849_v39  ;;  %v14284_v39 = vrot.slane %v4895_v30, 5  ;;  %v4901_v26 = vrot.slane %v4899_v47, 4  ;;  %v4910_v30 = vshrl.u32 %v9167_v46, 16 }
 0x288   :  { %v4913_v47 = vshll.u32 %v9167_v46, 16 }
 0x289   :  { %v4902_v44 = vor.u32 %v4901_v26, %v14284_v39  ;;  %v10272_v26 = vld [vmem:[%s14835_s0 + $0x174] sm:$0xff]   ;;  %v4912_v32 = vrot.slane %v4910_v30, 4 }
 0x28c   :  { %v14261_v40 = vpop.f32.mrb[124].mxu1  ;;  %7664 = vmatmul.mubr.bf16.gmra.mrb[100].mxu0 %v10266_v22  ;;  %v9166_v22 = vld [vmem:[%s14835_s0 + $0x194] sm:$0x1] }
 0x28d   :  { %14877 = vst [vmem:[#allocation32_spill] sm:$0xff] %v14261_v40  ;;  %v7137_v57 = vpop.f32.mrb[125].mxu1  ;;  %7671 = vmatprep.mubr.bf16.mxu0 %v9199_v42  ;;  %v9200_v42 = vcombine.low %v4850_v14, %v4860_v28  ;;  %v4905_v52 = vshll.u32 %v9166_v22, 16  ;;  %v4874_v40 = vsel %vm10438_vm2, %v4869_v43, %v4873_v61  ;;  %v4903_v61 = vrot.slane %v4902_v44, 4  ;;  %v9169_v43 = vld [vmem:[%s14835_s0 + $0x1a0] sm:$0x1] }
 0x28e   :  { %v14269_v34 = vpop.f32.mrb[126].mxu1  ;;  %v4891_v57 = vrot.slane %v4889_v17, 5  ;;  %v4929_v44 = vshll.u32 %v9169_v43, 16 }
 0x28f   :  { %14878 = vst [vmem:[#allocation33_spill] sm:$0xff] %v14269_v34  ;;  %v7140_v59 = vpop.f32.mrb[127].mxu1 }
 0x290   :  { %v14297_v59 = vld [vmem:[%s14837_s2] ss:$0 sm:$0xff]  ;;  %v4892_v14 = vor.u32 %v4891_v57, %v4888_v20  ;;  %v4907_v57 = vrot.slane %v4905_v52, 5 }
 0x291   :  { %v6599_v34 = vadd.f32 %v14297_v59, %v12331_v54  ;;  %v6602_v22 = vadd.f32 %v14297_v59, %v12370_v48  ;;  %v4915_v54 = vrot.slane %v4913_v47, 5  ;;  %v4925_v48 = vrot.slane %v4923_v11, 4 }
 0x292   :  { %v4893_v6 = vrot.slane %v4892_v14, 4  ;;  %v9171_v14 = vld [vmem:[%s14835_s0 + $0x1a8] sm:$0xf]  ;;  %v6631_v38 = vadd.f32 %v14297_v59, %v12634_v33 }
 0x293   :  { %v4916_v47 = vor.u32 %v4915_v54, %v4912_v32  ;;  %v4931_v54 = vrot.slane %v4929_v44, 5 }
 0x294   :  { %v14289_v19 = vpop.f32.mrb[128].mxu1  ;;  %7672 = vmatmul.mubr.bf16.gmra.mrb[104].mxu0 %v10269_v63  ;;  %v4884_v63 = vsel %vm10438_vm2, %v4879_v29, %v4883_v1  ;;  %v4921_v29 = vrot.slane %v4919_v58, 5 }
 0x295   :  { %v7754_v13 = vpop.f32.mrb[129].mxu1  ;;  %7679 = vmatprep.mubr.bf16.mxu0 %v9200_v42  ;;  %v9201_v0 = vcombine.low %v4874_v40, %v4884_v63  ;;  %v4898_v40 = vsel %vm10438_vm2, %v4893_v6, %v14284_v39  ;;  %v6607_v63 = vadd.f32 %v14297_v59, %v12389_v41  ;;  %v4917_v41 = vrot.slane %v4916_v47, 4 }
 0x296   :  { %v14299_v17 = vpop.f32.mrb[130].mxu1  ;;  %v6615_v47 = vadd.f32 %v14297_v59, %v12467_v18  ;;  %v10277_v18 = vld [vmem:[%s14835_s0 + $0x18c] sm:$0xff]  }
 0x297   :  { %v7757_v28 = vpop.f32.mrb[131].mxu1  ;;  %v7465_v20 = vpop.f32.mrb[0].mxu0 }
 0x298   :  { %v9720_v42 = vadd.f32 %v7465_v20, %v6599_v34  ;;  %v7467_v46 = vpop.f32.mrb[1].mxu0  ;;  %v9170_v20 = vld [vmem:[%s14835_s0 + $0x1a4] sm:$0xf] }
 0x299   :  { %v7468_v10 = vpop.f32.mrb[2].mxu0  ;;  %v4934_v58 = vshrl.u32 %v9170_v20, 16  ;;  %v4937_v11 = vshll.u32 %v9170_v20, 16 }
 0x29a   :  { %v9722_v1 = vadd.f32 %v7468_v10, %v6602_v22  ;;  %v7755_v52 = vadd.f32 %v9720_v42, %v7754_v13  ;;  %v7470_v34 = vpop.f32.mrb[3].mxu0  ;;  %v4908_v10 = vsel %vm10438_vm2, %v4903_v61, %v4907_v57  ;;  %v4926_v13 = vor.u32 %v4925_v48, %v4921_v29 }
 0x29b   :  { %v4943_v42 = vshll.u32 %v9171_v14, 16  ;;  %v9202_v6 = vcombine.low %v4898_v40, %v4908_v10 }
 0x29c   :  { %v7758_v30 = vadd.f32 %v9722_v1, %v7757_v28  ;;  %7680 = vmatmul.mubr.bf16.gmra.mrb[108].mxu0 %v10272_v26  ;;  %v4947_v28 = vshrl.u32 %v9171_v14, 16  ;;  %v6610_v26 = vadd.f32 %v14297_v59, %v12401_v50  ;;  %v4927_v48 = vrot.slane %v4926_v13, 4 }
 0x29d   :  { %7687 = vmatprep.mubr.bf16.mxu0 %v9201_v0  ;;  %v10275_v0 = vld [vmem:[%s14835_s0 + $0x180] sm:$0xff]   ;;  %v9549_v57 = vpop.f32.mrb[132].mxu1  ;;  %v4936_v1 = vrot.slane %v4934_v58, 4 }
 0x29e   :  { %v8009_v22 = vpack.c.bf16 %v7758_v30, %v7755_v52  ;;  %v7770_v43 = vpop.f32.mrb[133].mxu1  ;;  %v4939_v52 = vrot.slane %v4937_v11, 5  ;;  %v9172_v30 = vld [vmem:[%s14835_s0 + $0x1ac] sm:$0x1]  ;;  %v4932_v13 = vsel %vm10438_vm2, %v4927_v48, %v4931_v54 }
 0x29f   :  { %v7473_v46 = vpop.f32.mrb[4].mxu0  ;;  %v9550_v14 = vpop.f32.mrb[134].mxu1  ;;  %v4953_v44 = vshll.u32 %v9172_v30, 16 }
 0x2a0   :  { %v9724_v39 = vadd.f32 %v7473_v46, %v6607_v63  ;;  %v7475_v32 = vpop.f32.mrb[5].mxu0  ;;  %9623 = vmatprep.mubr.bf16.mxu1 %v8009_v22  ;;  %v4945_v63 = vrot.slane %v4943_v42, 5  ;;  %v4949_v22 = vrot.slane %v4947_v28, 4  ;;  %v7773_v46 = vpop.f32.mrb[135].mxu1  ;;  %v4940_v58 = vor.u32 %v4939_v52, %v4936_v1 }
 0x2a1   :  { %v7476_v61 = vpop.f32.mrb[6].mxu0  ;;  %v6618_v28 = vadd.f32 %v14297_v59, %v12515_v21  ;;  %v4955_v32 = vrot.slane %v4953_v44, 5  ;;  %v6623_v52 = vadd.f32 %v14297_v59, %v12569_v49  ;;  %v10278_v49 = vld [vmem:[%s14835_s0 + $0x198] sm:$0xff]  }
 0x2a2   :  { %v7763_v34 = vadd.f32 %v9724_v39, %v14289_v19  ;;  %v9726_v20 = vadd.f32 %v7476_v61, %v6610_v26  ;;  %v7478_v50 = vpop.f32.mrb[7].mxu0  ;;  %v4922_v19 = vsel %vm10438_vm2, %v4917_v41, %v4921_v29  ;;  %v4950_v11 = vor.u32 %v4949_v22, %v4945_v63 }
 0x2a3   :  { %v9203_v29 = vcombine.low %v4922_v19, %v4932_v13  ;;  %v4941_v54 = vrot.slane %v4940_v58, 4 }
 0x2a4   :  { %v7766_v40 = vadd.f32 %v9726_v20, %v14299_v17  ;;  %7688 = vmatmul.mubr.bf16.gmra.mrb[112].mxu0 %v10275_v0  ;;  %v4951_v41 = vrot.slane %v4950_v11, 4 }
 0x2a5   :  { %7695 = vmatprep.mubr.bf16.mxu0 %v9202_v6  ;;  %v4946_v50 = vsel %vm10438_vm2, %v4941_v54, %v4945_v63 }
 0x2a6   :  { %v8010_v10 = vpack.c.bf16 %v7766_v40, %v7763_v34  ;;  %v4956_v30 = vsel %vm10438_vm2, %v4951_v41, %v4955_v32  ;;  %v6642_v41 = vadd.f32 %v14297_v59, %v12783_v35 }
 0x2a7   :  { %v7481_v42 = vpop.f32.mrb[8].mxu0  ;;  %v9553_v1 = vpop.f32.mrb[136].mxu1  ;;  %v9204_v44 = vcombine.low %v4946_v50, %v4956_v30 }
 0x2a8   :  { %v9728_v17 = vadd.f32 %v7481_v42, %v6615_v47  ;;  %v7483_v26 = vpop.f32.mrb[9].mxu0  ;;  %9624 = vmatmul.mubr.bf16.vlgmr.msra.gmra.mrb[192].mxu1 %v8010_v10  ;;  %v7786_v21 = vpop.f32.mrb[137].mxu1  ;;  %v6634_v42 = vadd.f32 %v14297_v59, %v12686_v56  ;;  %v6639_v56 = vadd.f32 %v14297_v59, %v12727_v9  ;;  %v6650_v9 = vadd.f32 %v14297_v59, %v12838_v53 }
 0x2a9   :  { %v7484_v39 = vpop.f32.mrb[10].mxu0  ;;  %v9554_v20 = vpop.f32.mrb[138].mxu1 }
 0x2aa   :  { %v9730_v0 = vadd.f32 %v7484_v39, %v6618_v28  ;;  %v7771_v6 = vadd.f32 %v9728_v17, %v7770_v43  ;;  %v7486_v61 = vpop.f32.mrb[11].mxu0  ;;  %v7789_v22 = vpop.f32.mrb[139].mxu1 }
 0x2ac   :  { %v7774_v48 = vadd.f32 %v9730_v0, %v7773_v46  ;;  %7696 = vmatmul.mubr.bf16.gmra.mrb[116].mxu0 %v10277_v18  ;;  %v6626_v46 = vadd.f32 %v14297_v59, %v12598_v27 }
 0x2ad   :  { %7703 = vmatprep.mubr.bf16.mxu0 %v9203_v29 }
 0x2ae   :  { %v8011_v34 = vpack.c.bf16 %v7774_v48, %v7771_v6 }
 0x2af   :  { %v7489_v43 = vpop.f32.mrb[12].mxu0 }
 0x2b0   :  { %v9732_v40 = vadd.f32 %v7489_v43, %v6623_v52  ;;  %v7491_v47 = vpop.f32.mrb[13].mxu0  ;;  %9627 = vmatprep.mubr.bf16.mxu1 %v8011_v34 }
 0x2b1   :  { %v7492_v19 = vpop.f32.mrb[14].mxu0 }
 0x2b2   :  { %v7779_v10 = vadd.f32 %v9732_v40, %v9549_v57  ;;  %v9734_v13 = vadd.f32 %v7492_v19, %v6626_v46  ;;  %v7494_v63 = vpop.f32.mrb[15].mxu0  ;;  %v10279_v57 = vld [vmem:[%s14835_s0 + $0x1a4] sm:$0xff]  }
 0x2b4   :  { %v7782_v58 = vadd.f32 %v9734_v13, %v9550_v14  ;;  %7704 = vmatmul.mubr.bf16.gmra.mrb[120].mxu0 %v10278_v49 }
 0x2b5   :  { %7711 = vmatprep.mubr.bf16.mxu0 %v9204_v44  ;;  %v9557_v18 = vpop.f32.mrb[140].mxu1 }
 0x2b6   :  { %v8012_v11 = vpack.c.bf16 %v7782_v58, %v7779_v10  ;;  %v7802_v32 = vpop.f32.mrb[141].mxu1 }
 0x2b7   :  { %v7497_v27 = vpop.f32.mrb[16].mxu0  ;;  %v9558_v0 = vpop.f32.mrb[142].mxu1 }
 0x2b8   :  { %v9736_v28 = vadd.f32 %v7497_v27, %v6631_v38  ;;  %v7499_v17 = vpop.f32.mrb[17].mxu0  ;;  %9628 = vmatmul.mubr.bf16.gmra.mrb[196].mxu1 %v8012_v11  ;;  %v7805_v6 = vpop.f32.mrb[143].mxu1  ;;  %v6658_v27 = vadd.f32 %v14297_v59, %v12896_v16  ;;  %v6666_v16 = vadd.f32 %v14297_v59, %v12928_v62 }
 0x2b9   :  { %v7500_v26 = vpop.f32.mrb[18].mxu0 }
 0x2ba   :  { %v9738_v14 = vadd.f32 %v7500_v26, %v6634_v42  ;;  %v7787_v39 = vadd.f32 %v9736_v28, %v7786_v21  ;;  %v7502_v29 = vpop.f32.mrb[19].mxu0 }
 0x2bc   :  { %v7790_v33 = vadd.f32 %v9738_v14, %v7789_v22  ;;  %7712 = vmatmul.mubr.bf16.gmra.mrb[124].mxu0 %v10279_v57  ;;  %v6647_v22 = vadd.f32 %v14297_v59, %v12806_v3  ;;  %v6655_v3 = vadd.f32 %v14297_v59, %v12873_v7  ;;  %v6663_v7 = vadd.f32 %v14297_v59, %v12917_v60 }
 0x2be   :  { %v8013_v61 = vpack.c.bf16 %v7790_v33, %v7787_v39 }
 0x2bf   :  { %v7505_v54 = vpop.f32.mrb[20].mxu0 }
 0x2c0   :  { %v9740_v48 = vadd.f32 %v7505_v54, %v6639_v56  ;;  %v7507_v52 = vpop.f32.mrb[21].mxu0  ;;  %9631 = vmatprep.mubr.bf16.mxu1 %v8013_v61 }
 0x2c1   :  { %v7508_v34 = vpop.f32.mrb[22].mxu0 }
 0x2c2   :  { %v7795_v50 = vadd.f32 %v9740_v48, %v9553_v1  ;;  %v9742_v21 = vadd.f32 %v7508_v34, %v6642_v41  ;;  %v7510_v30 = vpop.f32.mrb[23].mxu0 }
 0x2c3   :  { %v9561_v47 = vpop.f32.mrb[144].mxu1 }
 0x2c4   :  { %v7798_v43 = vadd.f32 %v9742_v21, %v9554_v20  ;;  %v7818_v35 = vpop.f32.mrb[145].mxu1 }
 0x2c5   :  { %v9562_v10 = vpop.f32.mrb[146].mxu1 }
 0x2c6   :  { %v8014_v46 = vpack.c.bf16 %v7798_v43, %v7795_v50  ;;  %v7821_v58 = vpop.f32.mrb[147].mxu1  ;;  %v6674_v43 = vadd.f32 %v14297_v59, %v12966_v31 }
 0x2c7   :  { %v7513_v40 = vpop.f32.mrb[24].mxu0 }
 0x2c8   :  { %v9744_v49 = vadd.f32 %v7513_v40, %v6647_v22  ;;  %v7515_v19 = vpop.f32.mrb[25].mxu0  ;;  %9632 = vmatmul.mubr.bf16.gmra.mrb[200].mxu1 %v8014_v46 }
 0x2c9   :  { %v7516_v44 = vpop.f32.mrb[26].mxu0 }
 0x2ca   :  { %v9746_v13 = vadd.f32 %v7516_v44, %v6650_v9  ;;  %v7803_v1 = vadd.f32 %v9744_v49, %v7802_v32  ;;  %v7518_v63 = vpop.f32.mrb[27].mxu0 }
 0x2cb   :  { %v6682_v63 = vadd.f32 %v14297_v59, %v13037_v5  ;;  %v6690_v5 = vadd.f32 %v14297_v59, %v13098_v37 }
 0x2cc   :  { %v7806_v20 = vadd.f32 %v9746_v13, %v7805_v6 }
 0x2ce   :  { %v8015_v38 = vpack.c.bf16 %v7806_v20, %v7803_v1 }
 0x2cf   :  { %v7521_v11 = vpop.f32.mrb[28].mxu0  ;;  %v9565_v14 = vpop.f32.mrb[148].mxu1 }
 0x2d0   :  { %v9748_v53 = vadd.f32 %v7521_v11, %v6655_v3  ;;  %v7523_v42 = vpop.f32.mrb[29].mxu0  ;;  %9635 = vmatprep.mubr.bf16.mxu1 %v8015_v38  ;;  %v7834_v39 = vpop.f32.mrb[149].mxu1 }
 0x2d1   :  { %v7524_v28 = vpop.f32.mrb[30].mxu0  ;;  %v9566_v32 = vpop.f32.mrb[150].mxu1 }
 0x2d2   :  { %v7811_v17 = vadd.f32 %v9748_v53, %v9557_v18  ;;  %v9750_v57 = vadd.f32 %v7524_v28, %v6658_v27  ;;  %v7526_v26 = vpop.f32.mrb[31].mxu0  ;;  %v7837_v33 = vpop.f32.mrb[151].mxu1 }
 0x2d4   :  { %v7814_v29 = vadd.f32 %v9750_v57, %v9558_v0  ;;  %v6671_v0 = vadd.f32 %v14297_v59, %v12947_v2  ;;  %v6679_v2 = vadd.f32 %v14297_v59, %v13011_v12  ;;  %v6687_v12 = vadd.f32 %v14297_v59, %v13072_v45 }
 0x2d5   :  { %v6698_v45 = vadd.f32 %v14297_v59, %v13131_v55  ;;  %v14879_v55 = vld [vmem:[#allocation3_spill] sm:$0xff] }
 0x2d6   :  { %v8016_v6 = vpack.c.bf16 %v7814_v29, %v7811_v17 }
 0x2d7   :  { %v7529_v56 = vpop.f32.mrb[32].mxu0 }
 0x2d8   :  { %v9752_v61 = vadd.f32 %v7529_v56, %v6663_v7  ;;  %v7531_v54 = vpop.f32.mrb[33].mxu0  ;;  %9636 = vmatmul.mubr.bf16.gmra.mrb[204].mxu1 %v8016_v6  ;;  %v6695_v56 = vadd.f32 %v14297_v59, %v13124_v25  ;;  %v6703_v25 = vadd.f32 %v14297_v59, %v13170_v23 }
 0x2d9   :  { %v7532_v41 = vpop.f32.mrb[34].mxu0 }
 0x2da   :  { %v9754_v18 = vadd.f32 %v7532_v41, %v6666_v16  ;;  %v7819_v48 = vadd.f32 %v9752_v61, %v7818_v35  ;;  %v7534_v52 = vpop.f32.mrb[35].mxu0 }
 0x2db   :  { %v14386_v21 = vpop.f32.mrb[152].mxu1 }
 0x2dc   :  { %v7822_v34 = vadd.f32 %v9754_v18, %v7821_v58  ;;  %v7850_v30 = vpop.f32.mrb[153].mxu1 }
 0x2dd   :  { %v9570_v46 = vpop.f32.mrb[154].mxu1 }
 0x2de   :  { %v8017_v50 = vpack.c.bf16 %v7822_v34, %v7819_v48  ;;  %v7853_v9 = vpop.f32.mrb[155].mxu1 }
 0x2df   :  { %v7537_v60 = vpop.f32.mrb[36].mxu0 }
 0x2e0   :  { %v9756_v62 = vadd.f32 %v7537_v60, %v6671_v0  ;;  %v7539_v22 = vpop.f32.mrb[37].mxu0  ;;  %9639 = vmatprep.mubr.bf16.mxu1 %v8017_v50 }
 0x2e1   :  { %v7540_v40 = vpop.f32.mrb[38].mxu0 }
 0x2e2   :  { %v7827_v49 = vadd.f32 %v9756_v62, %v9561_v47  ;;  %v9758_v19 = vadd.f32 %v7540_v40, %v6674_v43  ;;  %v7542_v35 = vpop.f32.mrb[39].mxu0  ;;  %v6706_v62 = vadd.f32 %v14297_v59, %v14879_v55 }
 0x2e4   :  { %v7830_v44 = vadd.f32 %v9758_v19, %v9562_v10 }
 0x2e6   :  { %v8018_v13 = vpack.c.bf16 %v7830_v44, %v7827_v49 }
 0x2e7   :  { %v7545_v1 = vpop.f32.mrb[40].mxu0 }
 0x2e8   :  { %v9760_v58 = vadd.f32 %v7545_v1, %v6679_v2  ;;  %v7547_v31 = vpop.f32.mrb[41].mxu0  ;;  %9640 = vmatmul.mubr.bf16.gmra.mrb[208].mxu1 %v8018_v13 }
 0x2e9   :  { %v7548_v20 = vpop.f32.mrb[42].mxu0  ;;  %v14881_v31 = vld [vmem:[#allocation5_spill] sm:$0xff] }
 0x2ea   :  { %v9762_v3 = vadd.f32 %v7548_v20, %v6682_v63  ;;  %v7835_v38 = vadd.f32 %v9760_v58, %v7834_v39  ;;  %v7550_v11 = vpop.f32.mrb[43].mxu0  ;;  %v6714_v20 = vadd.f32 %v14297_v59, %v14881_v31 }
 0x2ec   :  { %v14394_v27 = vpop.f32.mrb[156].mxu1  ;;  %v7838_v47 = vadd.f32 %v9762_v3, %v7837_v33 }
 0x2ed   :  { %v7866_v53 = vpop.f32.mrb[157].mxu1 }
 0x2ee   :  { %v14396_v10 = vpop.f32.mrb[158].mxu1  ;;  %v8019_v42 = vpack.c.bf16 %v7838_v47, %v7835_v38 }
 0x2ef   :  { %v7869_v28 = vpop.f32.mrb[159].mxu1  ;;  %v7553_v17 = vpop.f32.mrb[44].mxu0 }
 0x2f0   :  { %v9764_v57 = vadd.f32 %v7553_v17, %v6687_v12  ;;  %v7555_v26 = vpop.f32.mrb[45].mxu0  ;;  %9643 = vmatprep.mubr.bf16.mxu1 %v8019_v42  ;;  %v14882_v17 = vld [vmem:[#allocation6_spill] sm:$0xff] }
 0x2f1   :  { %v7556_v39 = vpop.f32.mrb[46].mxu0 }
 0x2f2   :  { %v7843_v29 = vadd.f32 %v9764_v57, %v9565_v14  ;;  %v9766_v7 = vadd.f32 %v7556_v39, %v6690_v5  ;;  %v7558_v6 = vpop.f32.mrb[47].mxu0  ;;  %v6719_v5 = vadd.f32 %v14297_v59, %v14882_v17  ;;  %v14883_v39 = vld [vmem:[#allocation7_spill] sm:$0xff]  ;;  %v14889_v17 = vld [vmem:[#allocation13_spill] sm:$0xff] }
 0x2f4   :  { %v7846_v33 = vadd.f32 %v9766_v7, %v9566_v32 }
 0x2f6   :  { %v8020_v16 = vpack.c.bf16 %v7846_v33, %v7843_v29  ;;  %v6722_v29 = vadd.f32 %v14297_v59, %v14883_v39 }
 0x2f7   :  { %v7561_v61 = vpop.f32.mrb[48].mxu0  ;;  %v14406_v37 = vpop.f32.mrb[160].mxu1 }
 0x2f8   :  { %v9768_v54 = vadd.f32 %v7561_v61, %v6695_v56  ;;  %v7563_v41 = vpop.f32.mrb[49].mxu0  ;;  %9644 = vmatmul.mubr.bf16.gmra.mrb[212].mxu1 %v8020_v16  ;;  %v7882_v48 = vpop.f32.mrb[161].mxu1 }
 0x2f9   :  { %v7564_v18 = vpop.f32.mrb[50].mxu0  ;;  %v14408_v0 = vpop.f32.mrb[162].mxu1 }
 0x2fa   :  { %v9770_v52 = vadd.f32 %v7564_v18, %v6698_v45  ;;  %v7851_v14 = vadd.f32 %v9768_v54, %v7850_v30  ;;  %v7566_v34 = vpop.f32.mrb[51].mxu0  ;;  %v7885_v32 = vpop.f32.mrb[163].mxu1  ;;  %v14884_v18 = vld [vmem:[#allocation8_spill] sm:$0xff] }
 0x2fc   :  { %v7854_v50 = vadd.f32 %v9770_v52, %v7853_v9  ;;  %v14880_v9 = vld [vmem:[#allocation4_spill] sm:$0xff]  ;;  %v9783_v52 = vadd.f32 %v14297_v59, %v14884_v18 }
 0x2fd   :  { %v6711_v13 = vadd.f32 %v14297_v59, %v14880_v9  ;;  %v14887_v9 = vld [vmem:[#allocation11_spill] sm:$0xff] }
 0x2fe   :  { %v8021_v60 = vpack.c.bf16 %v7854_v50, %v7851_v14  ;;  %v14885_v50 = vld [vmem:[#allocation9_spill] sm:$0xff] }
 0x2ff   :  { %v7569_v43 = vpop.f32.mrb[52].mxu0 }
 0x300   :  { %v9772_v22 = vadd.f32 %v7569_v43, %v6703_v25  ;;  %v7571_v40 = vpop.f32.mrb[53].mxu0  ;;  %9647 = vmatprep.mubr.bf16.mxu1 %v8021_v60  ;;  %v9785_v25 = vadd.f32 %v14297_v59, %v14885_v50 }
 0x301   :  { %v7572_v49 = vpop.f32.mrb[54].mxu0 }
 0x302   :  { %v7859_v19 = vadd.f32 %v9772_v22, %v14386_v21  ;;  %v9774_v30 = vadd.f32 %v7572_v49, %v6706_v62  ;;  %v7574_v35 = vpop.f32.mrb[55].mxu0  ;;  %v14886_v49 = vld [vmem:[#allocation10_spill] sm:$0xff] }
 0x304   :  { %v7862_v44 = vadd.f32 %v9774_v30, %v9570_v46 }
 0x306   :  { %v14415_v2 = vpop.f32.mrb[164].mxu1  ;;  %v8022_v23 = vpack.c.bf16 %v7862_v44, %v7859_v19  ;;  %v9787_v19 = vadd.f32 %v14297_v59, %v14886_v49 }
 0x307   :  { %v14419_v1 = vpop.f32.mrb[165].mxu1  ;;  %v7577_v63 = vpop.f32.mrb[56].mxu0 }
 0x308   :  { %v14421_v58 = vpop.f32.mrb[166].mxu1  ;;  %v9776_v3 = vadd.f32 %v7577_v63, %v6711_v13  ;;  %v7579_v38 = vpop.f32.mrb[57].mxu0  ;;  %9648 = vmatmul.mubr.bf16.gmra.mrb[216].mxu1 %v8022_v23  ;;  %v9789_v13 = vadd.f32 %v14297_v59, %v14887_v9  ;;  %v14893_v9 = vld [vmem:[#allocation17_spill] sm:$0xff] }
 0x309   :  { %v7901_v21 = vpop.f32.mrb[167].mxu1  ;;  %v7580_v11 = vpop.f32.mrb[58].mxu0 }
 0x30a   :  { %v9778_v46 = vadd.f32 %v7580_v11, %v6714_v20  ;;  %v7867_v47 = vadd.f32 %v9776_v3, %v7866_v53  ;;  %v7582_v12 = vpop.f32.mrb[59].mxu0 }
 0x30c   :  { %v7870_v42 = vadd.f32 %v9778_v46, %v7869_v28  ;;  %v14888_v46 = vld [vmem:[#allocation12_spill] sm:$0xff] }
 0x30e   :  { %v8023_v57 = vpack.c.bf16 %v7870_v42, %v7867_v47  ;;  %v9791_v47 = vadd.f32 %v14297_v59, %v14888_v46 }
 0x30f   :  { %v7585_v26 = vpop.f32.mrb[60].mxu0 }
 0x310   :  { %v9780_v7 = vadd.f32 %v7585_v26, %v6719_v5  ;;  %v7587_v6 = vpop.f32.mrb[61].mxu0  ;;  %9651 = vmatprep.mubr.bf16.mxu1 %v8023_v57  ;;  %v9793_v5 = vadd.f32 %v14297_v59, %v14889_v17 }
 0x311   :  { %v7588_v56 = vpop.f32.mrb[62].mxu0 }
 0x312   :  { %v7875_v53 = vadd.f32 %v9780_v7, %v14394_v27  ;;  %v9782_v61 = vadd.f32 %v7588_v56, %v6722_v29  ;;  %v7590_v28 = vpop.f32.mrb[63].mxu0 }
 0x313   :  { %v14429_v33 = vpop.f32.mrb[168].mxu1 }
 0x314   :  { %v14431_v16 = vpop.f32.mrb[169].mxu1  ;;  %v7878_v41 = vadd.f32 %v9782_v61, %v14396_v10  ;;  %v14890_v61 = vld [vmem:[#allocation14_spill] sm:$0xff] }
 0x315   :  { %v14434_v45 = vpop.f32.mrb[170].mxu1  ;;  %v9795_v28 = vadd.f32 %v14297_v59, %v14890_v61 }
 0x316   :  { %v14436_v54 = vpop.f32.mrb[171].mxu1  ;;  %v8024_v14 = vpack.c.bf16 %v7878_v41, %v7875_v53 }
 0x317   :  { %v7593_v34 = vpop.f32.mrb[64].mxu0 }
 0x318   :  { %v9784_v60 = vadd.f32 %v9783_v52, %v7593_v34  ;;  %v7595_v43 = vpop.f32.mrb[65].mxu0  ;;  %9652 = vmatmul.mubr.bf16.gmra.mrb[220].mxu1 %v8024_v14  ;;  %v14891_v14 = vld [vmem:[#allocation15_spill] sm:$0xff] }
 0x319   :  { %v7596_v27 = vpop.f32.mrb[66].mxu0  ;;  %v9797_v34 = vadd.f32 %v14297_v59, %v14891_v14 }
 0x31a   :  { %v9786_v55 = vadd.f32 %v9785_v25, %v7596_v27  ;;  %v7883_v62 = vadd.f32 %v9784_v60, %v7882_v48  ;;  %v7598_v22 = vpop.f32.mrb[67].mxu0 }
 0x31c   :  { %v7886_v40 = vadd.f32 %v9786_v55, %v7885_v32 }
 0x31e   :  { %v8025_v10 = vpack.c.bf16 %v7886_v40, %v7883_v62  ;;  %v14892_v40 = vld [vmem:[#allocation16_spill] sm:$0xff] }
 0x31f   :  { %v7601_v35 = vpop.f32.mrb[68].mxu0  ;;  %v9799_v49 = vadd.f32 %v14297_v59, %v14892_v40 }
 0x320   :  { %v14445_v30 = vpop.f32.mrb[172].mxu1  ;;  %v9788_v23 = vadd.f32 %v9787_v19, %v7601_v35  ;;  %v7603_v63 = vpop.f32.mrb[69].mxu0  ;;  %9655 = vmatprep.mubr.bf16.mxu1 %v8025_v10 }
 0x321   :  { %v14447_v44 = vpop.f32.mrb[173].mxu1  ;;  %v7604_v48 = vpop.f32.mrb[70].mxu0 }
 0x322   :  { %v14451_v31 = vpop.f32.mrb[174].mxu1  ;;  %v7891_v32 = vadd.f32 %v9788_v23, %v14406_v37  ;;  %v9790_v3 = vadd.f32 %v9789_v13, %v7604_v48  ;;  %v7606_v38 = vpop.f32.mrb[71].mxu0 }
 0x323   :  { %v14453_v20 = vpop.f32.mrb[175].mxu1 }
 0x324   :  { %v7894_v11 = vadd.f32 %v9790_v3, %v14408_v0 }
 0x326   :  { %v8026_v12 = vpack.c.bf16 %v7894_v11, %v7891_v32 }
 0x327   :  { %v7609_v42 = vpop.f32.mrb[72].mxu0 }
 0x328   :  { %v9792_v57 = vadd.f32 %v9791_v47, %v7609_v42  ;;  %v7611_v26 = vpop.f32.mrb[73].mxu0  ;;  %9656 = vmatmul.mubr.bf16.gmra.mrb[224].mxu1 %v8026_v12  ;;  %v14894_v47 = vld [vmem:[#allocation18_spill] sm:$0xff] }
 0x329   :  { %v7612_v39 = vpop.f32.mrb[74].mxu0  ;;  %v9803_v12 = vadd.f32 %v14297_v59, %v14894_v47 }
 0x32a   :  { %v9794_v29 = vadd.f32 %v9793_v5, %v7612_v39  ;;  %v7899_v7 = vadd.f32 %v9792_v57, %v14419_v1  ;;  %v7614_v37 = vpop.f32.mrb[75].mxu0  ;;  %v14895_v57 = vld [vmem:[#allocation19_spill] sm:$0xff] }
 0x32b   :  { %v9805_v26 = vadd.f32 %v14297_v59, %v14895_v57  ;;  %v9817_v57 = vadd.f32 %v14297_v59, %v14029_v24 }
 0x32c   :  { %v14462_v6 = vpop.f32.mrb[176].mxu1  ;;  %v7902_v56 = vadd.f32 %v9794_v29, %v7901_v21 }
 0x32d   :  { %v14464_v0 = vpop.f32.mrb[177].mxu1 }
 0x32e   :  { %v14466_v53 = vpop.f32.mrb[178].mxu1  ;;  %v8027_v41 = vpack.c.bf16 %v7902_v56, %v7899_v7 }
 0x32f   :  { %v14470_v18 = vpop.f32.mrb[179].mxu1  ;;  %v7617_v52 = vpop.f32.mrb[76].mxu0 }
 0x330   :  { %v9796_v50 = vadd.f32 %v9795_v28, %v7617_v52  ;;  %v7619_v1 = vpop.f32.mrb[77].mxu0  ;;  %9659 = vmatprep.mubr.bf16.mxu1 %v8027_v41  ;;  %v14896_v41 = vld [vmem:[#allocation20_spill] sm:$0xff] }
 0x331   :  { %v7620_v25 = vpop.f32.mrb[78].mxu0  ;;  %v9807_v52 = vadd.f32 %v14297_v59, %v14896_v41  ;;  %v14901_v41 = vld [vmem:[#allocation25_spill] sm:$0xff] }
 0x332   :  { %v7907_v21 = vadd.f32 %v9796_v50, %v14415_v2  ;;  %v9798_v60 = vadd.f32 %v9797_v34, %v7620_v25  ;;  %v7622_v43 = vpop.f32.mrb[79].mxu0  ;;  %v9801_v2 = vadd.f32 %v14297_v59, %v14893_v9  ;;  %v14897_v25 = vld [vmem:[#allocation21_spill] sm:$0xff] }
 0x334   :  { %v14475_v27 = vpop.f32.mrb[180].mxu1  ;;  %v7910_v55 = vadd.f32 %v9798_v60, %v14421_v58 }
 0x335   :  { %v14478_v62 = vpop.f32.mrb[181].mxu1 }
 0x336   :  { %v14480_v22 = vpop.f32.mrb[182].mxu1  ;;  %v8028_v19 = vpack.c.bf16 %v7910_v55, %v7907_v21 }
 0x337   :  { %v14484_v10 = vpop.f32.mrb[183].mxu1  ;;  %v7625_v35 = vpop.f32.mrb[80].mxu0 }
 0x338   :  { %v9800_v13 = vadd.f32 %v9799_v49, %v7625_v35  ;;  %v7627_v23 = vpop.f32.mrb[81].mxu0  ;;  %9660 = vmatmul.mubr.bf16.gmra.mrb[228].mxu1 %v8028_v19  ;;  %v14898_v19 = vld [vmem:[#allocation22_spill] sm:$0xff] }
 0x339   :  { %v7628_v63 = vpop.f32.mrb[82].mxu0  ;;  %v9811_v35 = vadd.f32 %v14297_v59, %v14898_v19 }
 0x33a   :  { %v9802_v48 = vadd.f32 %v9801_v2, %v7628_v63  ;;  %v7915_v58 = vadd.f32 %v9800_v13, %v14431_v16  ;;  %v7630_v32 = vpop.f32.mrb[83].mxu0  ;;  %v14899_v13 = vld [vmem:[#allocation23_spill] sm:$0xff] }
 0x33b   :  { %v9813_v23 = vadd.f32 %v14297_v59, %v14899_v13  ;;  %v14904_v13 = vld [vmem:[#allocation28_spill] sm:$0xff] }
 0x33c   :  { %v14489_v3 = vpop.f32.mrb[184].mxu1  ;;  %v7918_v38 = vadd.f32 %v9802_v48, %v14436_v54 }
 0x33d   :  { %v14492_v11 = vpop.f32.mrb[185].mxu1 }
 0x33e   :  { %v14494_v46 = vpop.f32.mrb[186].mxu1  ;;  %v8029_v42 = vpack.c.bf16 %v7918_v38, %v7915_v58 }
 0x33f   :  { %v14498_v17 = vpop.f32.mrb[187].mxu1  ;;  %v7633_v5 = vpop.f32.mrb[84].mxu0 }
 0x340   :  { %v9804_v16 = vadd.f32 %v9803_v12, %v7633_v5  ;;  %v7635_v39 = vpop.f32.mrb[85].mxu0  ;;  %9663 = vmatprep.mubr.bf16.mxu1 %v8029_v42  ;;  %v14900_v12 = vld [vmem:[#allocation24_spill] sm:$0xff] }
 0x341   :  { %v7636_v29 = vpop.f32.mrb[86].mxu0 }
 0x342   :  { %v7923_v54 = vadd.f32 %v9804_v16, %v14429_v33  ;;  %v9806_v7 = vadd.f32 %v9805_v26, %v7636_v29  ;;  %v7638_v37 = vpop.f32.mrb[87].mxu0  ;;  %v9809_v33 = vadd.f32 %v14297_v59, %v14897_v25 }
 0x344   :  { %v7926_v56 = vadd.f32 %v9806_v7, %v14434_v45  ;;  %v14504_v61 = vpop.f32.mrb[188].mxu1 }
 0x345   :  { %v14506_v28 = vpop.f32.mrb[189].mxu1 }
 0x346   :  { %v8030_v14 = vpack.c.bf16 %v7926_v56, %v7923_v54  ;;  %v14510_v34 = vpop.f32.mrb[190].mxu1 }
 0x347   :  { %v7641_v50 = vpop.f32.mrb[88].mxu0  ;;  %v14512_v1 = vpop.f32.mrb[191].mxu1 }
 0x348   :  { %v9808_v21 = vadd.f32 %v9807_v52, %v7641_v50  ;;  %v7643_v60 = vpop.f32.mrb[89].mxu0  ;;  %9664 = vmatmul.mubr.bf16.gmra.mrb[232].mxu1 %v8030_v14  ;;  %v9821_v52 = vadd.f32 %v14297_v59, %v14901_v41 }
 0x349   :  { %v7644_v45 = vpop.f32.mrb[90].mxu0  ;;  %v14902_v60 = vld [vmem:[#allocation26_spill] sm:$0xff] }
 0x34a   :  { %v9810_v43 = vadd.f32 %v9809_v33, %v7644_v45  ;;  %v7931_v55 = vadd.f32 %v9808_v21, %v14447_v44  ;;  %v7646_v40 = vpop.f32.mrb[91].mxu0 }
 0x34c   :  { %v7934_v49 = vadd.f32 %v9810_v43, %v14453_v20  ;;  %v9815_v20 = vadd.f32 %v14297_v59, %v14900_v12  ;;  %v14903_v43 = vld [vmem:[#allocation27_spill] sm:$0xff] }
 0x34e   :  { %v8031_v9 = vpack.c.bf16 %v7934_v49, %v7931_v55  ;;  %v9825_v55 = vadd.f32 %v14297_v59, %v14903_v43  ;;  %v14907_v43 = vld [vmem:[#allocation31_spill] sm:$0xff] }
 0x34f   :  { %v7649_v2 = vpop.f32.mrb[92].mxu0 }
 0x350   :  { %v9812_v63 = vadd.f32 %v9811_v35, %v7649_v2  ;;  %v7651_v48 = vpop.f32.mrb[93].mxu0  ;;  %9667 = vmatprep.mubr.bf16.mxu1 %v8031_v9 }
 0x351   :  { %v7652_v58 = vpop.f32.mrb[94].mxu0  ;;  %v9829_v48 = vadd.f32 %v14297_v59, %v14183_v15 }
 0x352   :  { %v7939_v32 = vadd.f32 %v9812_v63, %v14445_v30  ;;  %v9814_v38 = vadd.f32 %v9813_v23, %v7652_v58  ;;  %v7654_v47 = vpop.f32.mrb[95].mxu0 }
 0x354   :  { %v7942_v44 = vadd.f32 %v9814_v38, %v14451_v31  ;;  %v9819_v31 = vadd.f32 %v14297_v59, %v14074_v51 }
 0x356   :  { %v8032_v42 = vpack.c.bf16 %v7942_v44, %v7939_v32 }
 0x357   :  { %v7657_v5 = vpop.f32.mrb[96].mxu0 }
 0x358   :  { %v9816_v26 = vadd.f32 %v9815_v20, %v7657_v5  ;;  %v7659_v16 = vpop.f32.mrb[97].mxu0  ;;  %9668 = vmatmul.mubr.bf16.gmra.mrb[236].mxu1 %v8032_v42  ;;  %v9833_v5 = vadd.f32 %v14297_v59, %v14211_v8 }
 0x359   :  { %v7660_v39 = vpop.f32.mrb[98].mxu0 }
 0x35a   :  { %v9818_v29 = vadd.f32 %v9817_v57, %v7660_v39  ;;  %v7947_v54 = vadd.f32 %v9816_v26, %v14464_v0  ;;  %v7662_v30 = vpop.f32.mrb[99].mxu0 }
 0x35c   :  { %v7950_v7 = vadd.f32 %v9818_v29, %v14470_v18  ;;  %v9823_v18 = vadd.f32 %v14297_v59, %v14902_v60  ;;  %v14906_v60 = vld [vmem:[#allocation30_spill] sm:$0xff] }
 0x35e   :  { %v8033_v37 = vpack.c.bf16 %v7950_v7, %v7947_v54 }
 0x35f   :  { %v7665_v56 = vpop.f32.mrb[100].mxu0 }
 0x360   :  { %v9820_v14 = vadd.f32 %v9819_v31, %v7665_v56  ;;  %v7667_v24 = vpop.f32.mrb[101].mxu0  ;;  %9671 = vmatprep.mubr.bf16.mxu1 %v8033_v37  ;;  %v9835_v31 = vadd.f32 %v14297_v59, %v14221_v36 }
 0x361   :  { %v7668_v50 = vpop.f32.mrb[102].mxu0 }
 0x362   :  { %v7955_v25 = vadd.f32 %v9820_v14, %v14462_v6  ;;  %v9822_v33 = vadd.f32 %v9821_v52, %v7668_v50  ;;  %v7670_v21 = vpop.f32.mrb[103].mxu0  ;;  %v14905_v52 = vld [vmem:[#allocation29_spill] sm:$0xff] }
 0x363   :  { %v9837_v14 = vadd.f32 %v14297_v59, %v14905_v52 }
 0x364   :  { %v7958_v0 = vadd.f32 %v9822_v33, %v14466_v53  ;;  %v9827_v53 = vadd.f32 %v14297_v59, %v14904_v13 }
 0x366   :  { %v8034_v45 = vpack.c.bf16 %v7958_v0, %v7955_v25 }
 0x367   :  { %v7673_v51 = vpop.f32.mrb[104].mxu0 }
 0x368   :  { %v9824_v40 = vadd.f32 %v9823_v18, %v7673_v51  ;;  %v7675_v49 = vpop.f32.mrb[105].mxu0  ;;  %9672 = vmatmul.mubr.bf16.gmra.mrb[240].mxu1 %v8034_v45  ;;  %v9839_v18 = vadd.f32 %v14297_v59, %v14906_v60 }
 0x369   :  { %v7676_v19 = vpop.f32.mrb[106].mxu0 }
 0x36a   :  { %v9826_v35 = vadd.f32 %v9825_v55, %v7676_v19  ;;  %v7963_v9 = vadd.f32 %v9824_v40, %v14478_v62  ;;  %v7678_v6 = vpop.f32.mrb[107].mxu0  ;;  %v9841_v55 = vadd.f32 %v14297_v59, %v14907_v43 }
 0x36c   :  { %v7966_v2 = vadd.f32 %v9826_v35, %v14484_v10  ;;  %v9831_v10 = vadd.f32 %v14297_v59, %v14200_v4  ;;  %v10280_v59 = vld [vmem:[%s14837_s2] ss:$0 sm:$0xff] }
 0x36e   :  { %v8035_v23 = vpack.c.bf16 %v7966_v2, %v7963_v9 }
 0x36f   :  { %v7681_v63 = vpop.f32.mrb[108].mxu0 }
 0x370   :  { %v9828_v58 = vadd.f32 %v9827_v53, %v7681_v63  ;;  %v7683_v32 = vpop.f32.mrb[109].mxu0  ;;  %9675 = vmatprep.mubr.bf16.mxu1 %v8035_v23  ;;  %v14908_v63 = vld [vmem:[#allocation32_spill] sm:$0xff] }
 0x371   :  { %v7684_v38 = vpop.f32.mrb[110].mxu0 }
 0x372   :  { %v7971_v47 = vadd.f32 %v9828_v58, %v14475_v27  ;;  %v9830_v44 = vadd.f32 %v9829_v48, %v7684_v38  ;;  %v7686_v12 = vpop.f32.mrb[111].mxu0  ;;  %v14555_v27 = vld [vmem:[%s14838_s4] ss:$0 sm:$0xff]  ;;  %v9843_v48 = vadd.f32 %v10280_v59, %v14908_v63 }
 0x374   :  { %v7974_v62 = vadd.f32 %v9830_v44, %v14480_v22 }
 0x376   :  { %v8036_v20 = vpack.c.bf16 %v7974_v62, %v7971_v47  ;;  %v14909_v47 = vld [vmem:[#allocation33_spill] sm:$0xff] }
 0x377   :  { %v7689_v42 = vpop.f32.mrb[112].mxu0  ;;  %v9845_v44 = vadd.f32 %v10280_v59, %v14909_v47 }
 0x378   :  { %v9832_v57 = vadd.f32 %v9831_v10, %v7689_v42  ;;  %v7691_v15 = vpop.f32.mrb[113].mxu0  ;;  %9676 = vmatmul.mubr.bf16.gmra.mrb[244].mxu1 %v8036_v20 }
 0x379   :  { %v7692_v26 = vpop.f32.mrb[114].mxu0 }
 0x37a   :  { %v7979_v16 = vadd.f32 %v9832_v57, %v14492_v11  ;;  %v9834_v22 = vadd.f32 %v9833_v5, %v7692_v26  ;;  %v7694_v39 = vpop.f32.mrb[115].mxu0 }
 0x37b   :  { %v9625_v29 = vpop.f32.mrb[192].mxu1 }
 0x37c   :  { %v7982_v4 = vadd.f32 %v9834_v22, %v14498_v17  ;;  %v8155_v54 = vadd.f32 %v9625_v29, %v14555_v27  ;;  %v8146_v30 = vpop.f32.mrb[193].mxu1 }
 0x37d   :  { %v8147_v8 = vadd.f32 %v14555_v27, %v8146_v30  ;;  %v9626_v7 = vpop.f32.mrb[194].mxu1 }
 0x37e   :  { %8403 = vst [vmem:[%s14839_s5 + $0x10] sm:$0xff] %v8155_v54  ;;  %v8158_v11 = vadd.f32 %v9626_v7, %v14555_v27  ;;  %v8149_v37 = vpop.f32.mrb[195].mxu1  ;;  %v8037_v56 = vpack.c.bf16 %v7982_v4, %v7979_v16 }
 0x37f   :  { %8401 = vst [vmem:[%s14839_s5] sm:$0xff] %v8147_v8  ;;  %v8150_v17 = vadd.f32 %v14555_v27, %v8149_v37  ;;  %v7697_v41 = vpop.f32.mrb[116].mxu0 }
 0x380   :  { %8404 = vst [vmem:[%s14839_s5 + $0x18] sm:$0xff] %v8158_v11  ;;  %v9836_v36 = vadd.f32 %v9835_v31, %v7697_v41  ;;  %v7699_v24 = vpop.f32.mrb[117].mxu0  ;;  %9679 = vmatprep.mubr.bf16.mxu1 %v8037_v56 }
 0x381   :  { %8402 = vst [vmem:[%s14839_s5 + $0x8] sm:$0xff] %v8150_v17  ;;  %v7700_v50 = vpop.f32.mrb[118].mxu0 }
 0x382   :  { %v7987_v25 = vadd.f32 %v9836_v36, %v14489_v3  ;;  %v9838_v33 = vadd.f32 %v9837_v14, %v7700_v50  ;;  %v7702_v21 = vpop.f32.mrb[119].mxu0 }
 0x384   :  { %v7990_v0 = vadd.f32 %v9838_v33, %v14494_v46 }
 0x386   :  { %v8038_v45 = vpack.c.bf16 %v7990_v0, %v7987_v25 }
 0x387   :  { %v7705_v51 = vpop.f32.mrb[120].mxu0 }
 0x388   :  { %v9840_v40 = vadd.f32 %v9839_v18, %v7705_v51  ;;  %v7707_v49 = vpop.f32.mrb[121].mxu0  ;;  %9680 = vmatmul.mubr.bf16.gmra.mrb[248].mxu1 %v8038_v45 }
 0x389   :  { %v7708_v19 = vpop.f32.mrb[122].mxu0 }
 0x38a   :  { %v7995_v35 = vadd.f32 %v9840_v40, %v14506_v28  ;;  %v9842_v9 = vadd.f32 %v9841_v55, %v7708_v19  ;;  %v7710_v3 = vpop.f32.mrb[123].mxu0 }
 0x38b   :  { %v9629_v6 = vpop.f32.mrb[196].mxu1 }
 0x38c   :  { %v7998_v2 = vadd.f32 %v9842_v9, %v14512_v1  ;;  %v8171_v46 = vadd.f32 %v9629_v6, %v14555_v27  ;;  %v8162_v13 = vpop.f32.mrb[197].mxu1 }
 0x38d   :  { %v8163_v53 = vadd.f32 %v14555_v27, %v8162_v13  ;;  %v9630_v23 = vpop.f32.mrb[198].mxu1 }
 0x38e   :  { %8407 = vst [vmem:[%s14839_s5 + $0x30] sm:$0xff] %v8171_v46  ;;  %v8174_v28 = vadd.f32 %v9630_v23, %v14555_v27  ;;  %v8165_v58 = vpop.f32.mrb[199].mxu1  ;;  %v8039_v1 = vpack.c.bf16 %v7998_v2, %v7995_v35 }
 0x38f   :  { %8405 = vst [vmem:[%s14839_s5 + $0x20] sm:$0xff] %v8163_v53  ;;  %v8166_v32 = vadd.f32 %v14555_v27, %v8165_v58  ;;  %v7713_v38 = vpop.f32.mrb[124].mxu0 }
 0x390   :  { %8408 = vst [vmem:[%s14839_s5 + $0x38] sm:$0xff] %v8174_v28  ;;  %v9844_v12 = vadd.f32 %v9843_v48, %v7713_v38  ;;  %v7715_v62 = vpop.f32.mrb[125].mxu0  ;;  %9683 = vmatprep.mubr.bf16.mxu1 %v8039_v1 }
 0x391   :  { %8406 = vst [vmem:[%s14839_s5 + $0x28] sm:$0xff] %v8166_v32  ;;  %v7716_v10 = vpop.f32.mrb[126].mxu0 }
 0x392   :  { %v8003_v20 = vadd.f32 %v9844_v12, %v14504_v61  ;;  %v9846_v42 = vadd.f32 %v9845_v44, %v7716_v10  ;;  %v7718_v5 = vpop.f32.mrb[127].mxu0 }
 0x394   :  { %v8006_v57 = vadd.f32 %v9846_v42, %v14510_v34 }
 0x396   :  { %v8040_v15 = vpack.c.bf16 %v8006_v57, %v8003_v20 }
 0x398   :  { %9684 = vmatmul.mubr.bf16.gmra.mrb[252].mxu1 %v8040_v15 }
 0x39b   :  { %v9633_v26 = vpop.f32.mrb[200].mxu1 }
 0x39c   :  { %v8187_v16 = vadd.f32 %v9633_v26, %v14555_v27  ;;  %v8178_v22 = vpop.f32.mrb[201].mxu1 }
 0x39d   :  { %v8179_v39 = vadd.f32 %v14555_v27, %v8178_v22  ;;  %v9634_v29 = vpop.f32.mrb[202].mxu1 }
 0x39e   :  { %8411 = vst [vmem:[%s14839_s5 + $0x50] sm:$0xff] %v8187_v16  ;;  %v8190_v4 = vadd.f32 %v9634_v29, %v14555_v27  ;;  %v8181_v61 = vpop.f32.mrb[203].mxu1 }
 0x39f   :  { %8409 = vst [vmem:[%s14839_s5 + $0x40] sm:$0xff] %v8179_v39  ;;  %v8182_v34 = vadd.f32 %v14555_v27, %v8181_v61 }
 0x3a0   :  { %8412 = vst [vmem:[%s14839_s5 + $0x58] sm:$0xff] %v8190_v4 }
 0x3a1   :  { %8410 = vst [vmem:[%s14839_s5 + $0x48] sm:$0xff] %v8182_v34 }
 0x3ab   :  { %v9637_v54 = vpop.f32.mrb[204].mxu1 }
 0x3ac   :  { %v8203_v30 = vadd.f32 %v9637_v54, %v14555_v27  ;;  %v8194_v8 = vpop.f32.mrb[205].mxu1 }
 0x3ad   :  { %v8195_v7 = vadd.f32 %v14555_v27, %v8194_v8  ;;  %v9638_v31 = vpop.f32.mrb[206].mxu1 }
 0x3ae   :  { %8415 = vst [vmem:[%s14839_s5 + $0x70] sm:$0xff] %v8203_v30  ;;  %v8206_v11 = vadd.f32 %v9638_v31, %v14555_v27  ;;  %v8197_v37 = vpop.f32.mrb[207].mxu1 }
 0x3af   :  { %8413 = vst [vmem:[%s14839_s5 + $0x60] sm:$0xff] %v8195_v7  ;;  %v8198_v56 = vadd.f32 %v14555_v27, %v8197_v37 }
 0x3b0   :  { %8416 = vst [vmem:[%s14839_s5 + $0x78] sm:$0xff] %v8206_v11 }
 0x3b1   :  { %8414 = vst [vmem:[%s14839_s5 + $0x68] sm:$0xff] %v8198_v56 }
 0x3bb   :  { %v9641_v17 = vpop.f32.mrb[208].mxu1 }
 0x3bc   :  { %v8219_v41 = vadd.f32 %v9641_v17, %v14555_v27  ;;  %v8210_v52 = vpop.f32.mrb[209].mxu1 }
 0x3bd   :  { %v8211_v14 = vadd.f32 %v14555_v27, %v8210_v52  ;;  %v9642_v36 = vpop.f32.mrb[210].mxu1 }
 0x3be   :  { %8419 = vst [vmem:[%s14839_s5 + $0x90] sm:$0xff] %v8219_v41  ;;  %v8222_v24 = vadd.f32 %v9642_v36, %v14555_v27  ;;  %v8213_v50 = vpop.f32.mrb[211].mxu1 }
 0x3bf   :  { %8417 = vst [vmem:[%s14839_s5 + $0x80] sm:$0xff] %v8211_v14  ;;  %v8214_v25 = vadd.f32 %v14555_v27, %v8213_v50 }
 0x3c0   :  { %8420 = vst [vmem:[%s14839_s5 + $0x98] sm:$0xff] %v8222_v24 }
 0x3c1   :  { %8418 = vst [vmem:[%s14839_s5 + $0x88] sm:$0xff] %v8214_v25 }
 0x3cb   :  { %v9645_v33 = vpop.f32.mrb[212].mxu1 }
 0x3cc   :  { %v8235_v21 = vadd.f32 %v9645_v33, %v14555_v27  ;;  %v8226_v0 = vpop.f32.mrb[213].mxu1 }
 0x3cd   :  { %v8227_v60 = vadd.f32 %v14555_v27, %v8226_v0  ;;  %v9646_v18 = vpop.f32.mrb[214].mxu1 }
 0x3ce   :  { %8423 = vst [vmem:[%s14839_s5 + $0xb0] sm:$0xff] %v8235_v21  ;;  %v8238_v45 = vadd.f32 %v9646_v18, %v14555_v27  ;;  %v8229_v51 = vpop.f32.mrb[215].mxu1 }
 0x3cf   :  { %8421 = vst [vmem:[%s14839_s5 + $0xa0] sm:$0xff] %v8227_v60  ;;  %v8230_v43 = vadd.f32 %v14555_v27, %v8229_v51 }
 0x3d0   :  { %8424 = vst [vmem:[%s14839_s5 + $0xb8] sm:$0xff] %v8238_v45 }
 0x3d1   :  { %8422 = vst [vmem:[%s14839_s5 + $0xa8] sm:$0xff] %v8230_v43 }
 0x3db   :  { %v9649_v55 = vpop.f32.mrb[216].mxu1 }
 0x3dc   :  { %v8251_v40 = vadd.f32 %v9649_v55, %v14555_v27  ;;  %v8242_v49 = vpop.f32.mrb[217].mxu1 }
 0x3dd   :  { %v8243_v19 = vadd.f32 %v14555_v27, %v8242_v49  ;;  %v9650_v35 = vpop.f32.mrb[218].mxu1 }
 0x3de   :  { %8427 = vst [vmem:[%s14839_s5 + $0xd0] sm:$0xff] %v8251_v40  ;;  %v8254_v9 = vadd.f32 %v9650_v35, %v14555_v27  ;;  %v8245_v3 = vpop.f32.mrb[219].mxu1 }
 0x3df   :  { %8425 = vst [vmem:[%s14839_s5 + $0xc0] sm:$0xff] %v8243_v19  ;;  %v8246_v6 = vadd.f32 %v14555_v27, %v8245_v3 }
 0x3e0   :  { %8428 = vst [vmem:[%s14839_s5 + $0xd8] sm:$0xff] %v8254_v9 }
 0x3e1   :  { %8426 = vst [vmem:[%s14839_s5 + $0xc8] sm:$0xff] %v8246_v6 }
 0x3eb   :  { %v9653_v2 = vpop.f32.mrb[220].mxu1 }
 0x3ec   :  { %v8267_v46 = vadd.f32 %v9653_v2, %v14555_v27  ;;  %v8258_v13 = vpop.f32.mrb[221].mxu1 }
 0x3ed   :  { %v8259_v53 = vadd.f32 %v14555_v27, %v8258_v13  ;;  %v9654_v23 = vpop.f32.mrb[222].mxu1 }
 0x3ee   :  { %8431 = vst [vmem:[%s14839_s5 + $0xf0] sm:$0xff] %v8267_v46  ;;  %v8270_v59 = vadd.f32 %v9654_v23, %v14555_v27  ;;  %v8261_v63 = vpop.f32.mrb[223].mxu1 }
 0x3ef   :  { %8429 = vst [vmem:[%s14839_s5 + $0xe0] sm:$0xff] %v8259_v53  ;;  %v8262_v48 = vadd.f32 %v14555_v27, %v8261_v63 }
 0x3f0   :  { %8432 = vst [vmem:[%s14839_s5 + $0xf8] sm:$0xff] %v8270_v59 }
 0x3f1   :  { %8430 = vst [vmem:[%s14839_s5 + $0xe8] sm:$0xff] %v8262_v48 }
 0x3fb   :  { %v9657_v28 = vpop.f32.mrb[224].mxu1 }
 0x3fc   :  { %v8283_v58 = vadd.f32 %v9657_v28, %v14555_v27  ;;  %v8274_v1 = vpop.f32.mrb[225].mxu1 }
 0x3fd   :  { %v8275_v32 = vadd.f32 %v14555_v27, %v8274_v1  ;;  %v9658_v38 = vpop.f32.mrb[226].mxu1 }
 0x3fe   :  { %8435 = vst [vmem:[%s14839_s5 + $0x110] sm:$0xff] %v8283_v58  ;;  %v8286_v47 = vadd.f32 %v9658_v38, %v14555_v27  ;;  %v8277_v44 = vpop.f32.mrb[227].mxu1 }
 0x3ff   :  { %8433 = vst [vmem:[%s14839_s5 + $0x100] sm:$0xff] %v8275_v32  ;;  %v8278_v12 = vadd.f32 %v14555_v27, %v8277_v44 }
 0x400   :  { %8436 = vst [vmem:[%s14839_s5 + $0x118] sm:$0xff] %v8286_v47 }
 0x401   :  { %8434 = vst [vmem:[%s14839_s5 + $0x108] sm:$0xff] %v8278_v12 }
 0x40b   :  { %v9661_v62 = vpop.f32.mrb[228].mxu1 }
 0x40c   :  { %v8299_v10 = vadd.f32 %v9661_v62, %v14555_v27  ;;  %v8290_v20 = vpop.f32.mrb[229].mxu1 }
 0x40d   :  { %v8291_v42 = vadd.f32 %v14555_v27, %v8290_v20  ;;  %v9662_v5 = vpop.f32.mrb[230].mxu1 }
 0x40e   :  { %8439 = vst [vmem:[%s14839_s5 + $0x130] sm:$0xff] %v8299_v10  ;;  %v8302_v57 = vadd.f32 %v9662_v5, %v14555_v27  ;;  %v8293_v15 = vpop.f32.mrb[231].mxu1 }
 0x40f   :  { %8437 = vst [vmem:[%s14839_s5 + $0x120] sm:$0xff] %v8291_v42  ;;  %v8294_v26 = vadd.f32 %v14555_v27, %v8293_v15 }
 0x410   :  { %8440 = vst [vmem:[%s14839_s5 + $0x138] sm:$0xff] %v8302_v57 }
 0x411   :  { %8438 = vst [vmem:[%s14839_s5 + $0x128] sm:$0xff] %v8294_v26 }
 0x41b   :  { %v9665_v16 = vpop.f32.mrb[232].mxu1 }
 0x41c   :  { %v8315_v22 = vadd.f32 %v9665_v16, %v14555_v27  ;;  %v8306_v39 = vpop.f32.mrb[233].mxu1 }
 0x41d   :  { %v8307_v29 = vadd.f32 %v14555_v27, %v8306_v39  ;;  %v9666_v4 = vpop.f32.mrb[234].mxu1 }
 0x41e   :  { %8443 = vst [vmem:[%s14839_s5 + $0x150] sm:$0xff] %v8315_v22  ;;  %v8318_v61 = vadd.f32 %v9666_v4, %v14555_v27  ;;  %v8309_v34 = vpop.f32.mrb[235].mxu1 }
 0x41f   :  { %8441 = vst [vmem:[%s14839_s5 + $0x140] sm:$0xff] %v8307_v29  ;;  %v8310_v54 = vadd.f32 %v14555_v27, %v8309_v34 }
 0x420   :  { %8444 = vst [vmem:[%s14839_s5 + $0x158] sm:$0xff] %v8318_v61 }
 0x421   :  { %8442 = vst [vmem:[%s14839_s5 + $0x148] sm:$0xff] %v8310_v54 }
 0x42b   :  { %v9669_v30 = vpop.f32.mrb[236].mxu1 }
 0x42c   :  { %v8331_v8 = vadd.f32 %v9669_v30, %v14555_v27  ;;  %v8322_v7 = vpop.f32.mrb[237].mxu1 }
 0x42d   :  { %v8323_v31 = vadd.f32 %v14555_v27, %v8322_v7  ;;  %v9670_v11 = vpop.f32.mrb[238].mxu1 }
 0x42e   :  { %8447 = vst [vmem:[%s14839_s5 + $0x170] sm:$0xff] %v8331_v8  ;;  %v8334_v37 = vadd.f32 %v9670_v11, %v14555_v27  ;;  %v8325_v56 = vpop.f32.mrb[239].mxu1 }
 0x42f   :  { %8445 = vst [vmem:[%s14839_s5 + $0x160] sm:$0xff] %v8323_v31  ;;  %v8326_v17 = vadd.f32 %v14555_v27, %v8325_v56 }
 0x430   :  { %8448 = vst [vmem:[%s14839_s5 + $0x178] sm:$0xff] %v8334_v37 }
 0x431   :  { %8446 = vst [vmem:[%s14839_s5 + $0x168] sm:$0xff] %v8326_v17 }
 0x43b   :  { %v9673_v41 = vpop.f32.mrb[240].mxu1 }
 0x43c   :  { %v8347_v52 = vadd.f32 %v9673_v41, %v14555_v27  ;;  %v8338_v14 = vpop.f32.mrb[241].mxu1 }
 0x43d   :  { %v8339_v36 = vadd.f32 %v14555_v27, %v8338_v14  ;;  %v9674_v24 = vpop.f32.mrb[242].mxu1 }
 0x43e   :  { %8451 = vst [vmem:[%s14839_s5 + $0x190] sm:$0xff] %v8347_v52  ;;  %v8350_v50 = vadd.f32 %v9674_v24, %v14555_v27  ;;  %v8341_v25 = vpop.f32.mrb[243].mxu1 }
 0x43f   :  { %8449 = vst [vmem:[%s14839_s5 + $0x180] sm:$0xff] %v8339_v36  ;;  %v8342_v33 = vadd.f32 %v14555_v27, %v8341_v25 }
 0x440   :  { %8452 = vst [vmem:[%s14839_s5 + $0x198] sm:$0xff] %v8350_v50 }
 0x441   :  { %8450 = vst [vmem:[%s14839_s5 + $0x188] sm:$0xff] %v8342_v33 }
 0x44b   :  { %v9677_v21 = vpop.f32.mrb[244].mxu1 }
 0x44c   :  { %v8363_v0 = vadd.f32 %v9677_v21, %v14555_v27  ;;  %v8354_v60 = vpop.f32.mrb[245].mxu1 }
 0x44d   :  { %v8355_v18 = vadd.f32 %v14555_v27, %v8354_v60  ;;  %v9678_v45 = vpop.f32.mrb[246].mxu1 }
 0x44e   :  { %8455 = vst [vmem:[%s14839_s5 + $0x1b0] sm:$0xff] %v8363_v0  ;;  %v8366_v51 = vadd.f32 %v9678_v45, %v14555_v27  ;;  %v8357_v43 = vpop.f32.mrb[247].mxu1 }
 0x44f   :  { %8453 = vst [vmem:[%s14839_s5 + $0x1a0] sm:$0xff] %v8355_v18  ;;  %v8358_v55 = vadd.f32 %v14555_v27, %v8357_v43 }
 0x450   :  { %8456 = vst [vmem:[%s14839_s5 + $0x1b8] sm:$0xff] %v8366_v51 }
 0x451   :  { %8454 = vst [vmem:[%s14839_s5 + $0x1a8] sm:$0xff] %v8358_v55 }
 0x45b   :  { %v9681_v40 = vpop.f32.mrb[248].mxu1 }
 0x45c   :  { %v8379_v49 = vadd.f32 %v9681_v40, %v14555_v27  ;;  %v8370_v19 = vpop.f32.mrb[249].mxu1 }
 0x45d   :  { %v8371_v35 = vadd.f32 %v14555_v27, %v8370_v19  ;;  %v9682_v9 = vpop.f32.mrb[250].mxu1 }
 0x45e   :  { %8459 = vst [vmem:[%s14839_s5 + $0x1d0] sm:$0xff] %v8379_v49  ;;  %v8382_v3 = vadd.f32 %v9682_v9, %v14555_v27  ;;  %v8373_v6 = vpop.f32.mrb[251].mxu1 }
 0x45f   :  { %8457 = vst [vmem:[%s14839_s5 + $0x1c0] sm:$0xff] %v8371_v35  ;;  %v8374_v2 = vadd.f32 %v14555_v27, %v8373_v6 }
 0x460   :  { %8460 = vst [vmem:[%s14839_s5 + $0x1d8] sm:$0xff] %v8382_v3 }
 0x461   :  { %8458 = vst [vmem:[%s14839_s5 + $0x1c8] sm:$0xff] %v8374_v2 }
 0x46b   :  { %v9685_v46 = vpop.f32.mrb[252].mxu1 }
 0x46c   :  { %v8395_v13 = vadd.f32 %v9685_v46, %v14555_v27  ;;  %v8386_v53 = vpop.f32.mrb[253].mxu1 }
 0x46d   :  { %v8387_v23 = vadd.f32 %v14555_v27, %v8386_v53  ;;  %v9686_v59 = vpop.f32.mrb[254].mxu1 }
 0x46e   :  { %8463 = vst [vmem:[%s14839_s5 + $0x1f0] sm:$0xff] %v8395_v13  ;;  %v8398_v63 = vadd.f32 %v9686_v59, %v14555_v27  ;;  %v8389_v48 = vpop.f32.mrb[255].mxu1 }
 0x46f   :  { %8461 = vst [vmem:[%s14839_s5 + $0x1e0] sm:$0xff] %v8387_v23  ;;  %v8390_v28 = vadd.f32 %v14555_v27, %v8389_v48 }
 0x470   :  { %8464 = vst [vmem:[%s14839_s5 + $0x1f8] sm:$0xff] %v8398_v63 }
 0x471   :  { %8462 = vst [vmem:[%s14839_s5 + $0x1e8] sm:$0xff] %v8390_v28 }

</bundles_post_ra>
